<compile_context>
chip_gen: v7x
topology: tpu7x:2x2x1
jax: 0.10.0
libtpu: 0.0.40
codegen_flags: <defaults>
</compile_context>

<pallas_src>
import functools

import jax
import jax.numpy as jnp
from jax.experimental import pallas as pl
from jax.experimental.pallas import tpu as pltpu

BN_EPS = 1e-5


def _pick_tile(m, row_bytes=None, vmem_budget=4 << 20):
    """Largest multiple-of-8 tile dividing m that gives a grid of >= 2 steps
    (so both v7x TensorCores get work) and fits the VMEM budget."""
    t = min(m, 1024)
    t -= t % 8
    while t >= 8:
        if (m % t == 0 and m // t >= 2
                and (row_bytes is None or t * row_bytes <= vmem_budget)):
            return t
        t -= 8
    return m


# ----------------------------- Pallas kernels ------------------------------

def _conv_kernel(x0_ref, x1_ref, x2_ref, w_ref, b_ref, o_ref):
    # x{kd}_ref: (1, 1, TM, 9*Cin) depth-shifted im2col rows (bf16)
    # w_ref    : (3, 9*Cin, Cout) BN-folded weights (bf16)
    # b_ref    : (1, Cout) folded bias (f32);  o_ref: (1, 1, TM, Cout) bf16
    acc = jnp.dot(x0_ref[0, 0], w_ref[0], preferred_element_type=jnp.float32)
    acc += jnp.dot(x1_ref[0, 0], w_ref[1], preferred_element_type=jnp.float32)
    acc += jnp.dot(x2_ref[0, 0], w_ref[2], preferred_element_type=jnp.float32)
    y = acc + b_ref[...]
    o_ref[0, 0] = jnp.maximum(y, 0.0).astype(o_ref.dtype)


def _matmul_bias_kernel(x_ref, w_ref, b_ref, o_ref):
    # o = x @ w + b  (single MXU dot, f32 accumulation, bias loaded once)
    y = jnp.dot(x_ref[...], w_ref[...], preferred_element_type=jnp.float32)
    o_ref[...] = (y + b_ref[...]).astype(o_ref.dtype)


def _left_matmul_kernel(m_ref, x_ref, o_ref):
    # o[b] = M @ x[b]   (batched small interpolation matmul, no transposes)
    y = jnp.dot(m_ref[...], x_ref[0], preferred_element_type=jnp.float32)
    o_ref[0] = y.astype(o_ref.dtype)


def _maxpool_kernel(x_ref, o_ref):
    # x_ref: (8, TM, C) -> elementwise max over the 8 voxels of each 2x2x2 cell
    o_ref[...] = jnp.max(x_ref[...], axis=0)


# ---------------------------- pallas_call wrappers --------------------------

def _conv_call(x9p, w3, bias):
    # x9p: (N, D+2, M_hw, 9*Cin) bf16 (depth zero-padded); w3: (3, 9*Cin, Cout)
    n, dpad, m_hw, k9 = x9p.shape
    cout = w3.shape[-1]
    d = dpad - 2
    # double-buffered: 3 bf16 input rows + 1 bf16 output row per spatial row
    row_bytes = 2 * (3 * k9 * 2 + cout * 2)
    tm = _pick_tile(m_hw, row_bytes=row_bytes)
    grid = (n, d, m_hw // tm)

    def mk_in(kd):
        return pl.BlockSpec((1, 1, tm, k9), lambda b, i, j, kd=kd: (b, i + kd, j, 0))

    flops = 2 * n * d * m_hw * 3 * k9 * cout
    bytes_acc = (3 * n * d * m_hw * k9 + 3 * k9 * cout + n * d * m_hw * cout) * 2
    return pl.pallas_call(
        _conv_kernel,
        out_shape=jax.ShapeDtypeStruct((n, d, m_hw, cout), jnp.bfloat16),
        grid=grid,
        in_specs=[
            mk_in(0), mk_in(1), mk_in(2),
            pl.BlockSpec((3, k9, cout), lambda b, i, j: (0, 0, 0)),
            pl.BlockSpec((1, cout), lambda b, i, j: (0, 0)),
        ],
        out_specs=pl.BlockSpec((1, 1, tm, cout), lambda b, i, j: (b, i, j, 0)),
        compiler_params=pltpu.CompilerParams(
            dimension_semantics=("parallel", "parallel", "parallel")),
        cost_estimate=pl.CostEstimate(flops=int(flops), transcendentals=0,
                                      bytes_accessed=int(bytes_acc)),
    )(x9p, x9p, x9p, w3, bias.reshape(1, cout).astype(jnp.float32))


def _matmul_bias_call(x2d, w2d, bias, out_dtype):
    m, k = x2d.shape
    nout = w2d.shape[1]
    tm = _pick_tile(m)
    flops = 2 * m * k * nout
    bytes_acc = (m * k + k * nout) * x2d.dtype.itemsize + m * nout * jnp.dtype(out_dtype).itemsize
    return pl.pallas_call(
        _matmul_bias_kernel,
        out_shape=jax.ShapeDtypeStruct((m, nout), out_dtype),
        grid=(m // tm,),
        in_specs=[
            pl.BlockSpec((tm, k), lambda i: (i, 0)),
            pl.BlockSpec((k, nout), lambda i: (0, 0)),
            pl.BlockSpec((1, nout), lambda i: (0, 0)),
        ],
        out_specs=pl.BlockSpec((tm, nout), lambda i: (i, 0)),
        compiler_params=pltpu.CompilerParams(dimension_semantics=("parallel",)),
        cost_estimate=pl.CostEstimate(flops=int(flops), transcendentals=0,
                                      bytes_accessed=int(bytes_acc)),
    )(x2d, w2d, bias.reshape(1, nout).astype(jnp.float32))


def _left_matmul_call(mat, x3):
    # x3: (B, K, Ncols); mat: (Kout, K) -> (B, Kout, Ncols)
    b, k, ncols = x3.shape
    kout = mat.shape[0]
    return pl.pallas_call(
        _left_matmul_kernel,
        out_shape=jax.ShapeDtypeStruct((b, kout, ncols), x3.dtype),
        grid=(b,),
        in_specs=[
            pl.BlockSpec((kout, k), lambda i: (0, 0)),
            pl.BlockSpec((1, k, ncols), lambda i: (i, 0, 0)),
        ],
        out_specs=pl.BlockSpec((1, kout, ncols), lambda i: (i, 0, 0)),
        compiler_params=pltpu.CompilerParams(dimension_semantics=("parallel",)),
    )(mat, x3)


def _maxpool_call(x8):
    _, m, c = x8.shape
    tm = _pick_tile(m)
    return pl.pallas_call(
        _maxpool_kernel,
        out_shape=jax.ShapeDtypeStruct((m, c), x8.dtype),
        grid=(m // tm,),
        in_specs=[pl.BlockSpec((8, tm, c), lambda i: (0, i, 0))],
        out_specs=pl.BlockSpec((tm, c), lambda i: (i, 0)),
        compiler_params=pltpu.CompilerParams(dimension_semantics=("parallel",)),
    )(x8)


# ------------------------------- layer ops ----------------------------------

def _im2col_hw9(x):
    # x: (N, D, H, W, C) -> (N, D, H*W, 9*C); taps ordered (kh, kw, c), c fastest.
    n, d, h, w, c = x.shape
    xp = jnp.pad(x, ((0, 0), (0, 0), (1, 1), (1, 1), (0, 0)))
    taps = [xp[:, :, kh:kh + h, kw:kw + w, :] for kh in range(3) for kw in range(3)]
    x9 = jnp.concatenate(taps, axis=-1)
    return x9.reshape(n, d, h * w, 9 * c)


def conv3x3x3_bn_relu(x, w3, bias):
    # Conv3d(k=3, padding=1) fused with eval-mode BatchNorm3d (folded) and ReLU.
    n, d, h, w, _ = x.shape
    x9 = _im2col_hw9(x.astype(jnp.bfloat16))
    x9p = jnp.pad(x9, ((0, 0), (1, 1), (0, 0), (0, 0)))     # depth padding=1
    out = _conv_call(x9p, w3, bias)                          # (N, D, H*W, Cout)
    return out.reshape(n, d, h, w, -1)


def block3d(x, p):
    # Block3D: (Conv3d+BN+ReLU) x 2; Dropout is identity at inference.
    x = conv3x3x3_bn_relu(x, p["w1"], p["b1"])
    x = conv3x3x3_bn_relu(x, p["w2"], p["b2"])
    return x


def maxpool3d_2x2x2(x):
    n, d, h, w, c = x.shape
    do, ho, wo = d // 2, h // 2, w // 2
    xr = x.reshape(n, do, 2, ho, 2, wo, 2, c)
    xr = xr.transpose(2, 4, 6, 0, 1, 3, 5, 7).reshape(8, n * do * ho * wo, c)
    out = _maxpool_call(xr)
    return out.reshape(n, do, ho, wo, c)


def conv_transpose3d_2x2x2(x, w8, b8):
    # ConvTranspose3d(kernel=2, stride=2): one matmul with N = 8*Cout, then a
    # single XLA interleave into (N, 2D, 2H, 2W, Cout).
    n, d, h, w, cin = x.shape
    cout = w8.shape[1] // 8
    y = _matmul_bias_call(x.reshape(-1, cin), w8, b8, out_dtype=jnp.bfloat16)
    y = y.reshape(n, d, h, w, 2, 2, 2, cout)
    y = y.transpose(0, 1, 4, 2, 5, 3, 6, 7).reshape(n, 2 * d, 2 * h, 2 * w, cout)
    return y


def conv1x1x1(x, w, bias):
    n, d, h, w_, cin = x.shape
    y = _matmul_bias_call(x.reshape(-1, cin), w, bias, out_dtype=jnp.float32)
    return y.reshape(n, d, h, w_, -1)


def _interp_matrix(out_size, in_size):
    # F.interpolate(mode='trilinear', align_corners=False) weights for one axis.
    i = jnp.arange(out_size, dtype=jnp.float32)
    src = (i + 0.5) * (in_size / out_size) - 0.5
    src = jnp.clip(src, 0.0, float(in_size - 1))
    lo = jnp.floor(src).astype(jnp.int32)
    hi = jnp.minimum(lo + 1, in_size - 1)
    t = src - lo.astype(jnp.float32)
    rows = jnp.arange(out_size)
    mat = jnp.zeros((out_size, in_size), jnp.float32)
    mat = mat.at[rows, lo].add(1.0 - t)
    mat = mat.at[rows, hi].add(t)
    return mat


def resize_trilinear(x, size):
    # Separable trilinear resize: three small matmuls, all reached through
    # bitcast-only reshapes (no XLA transposes).  Same-size resize is an exact
    # identity for align_corners=False, so short-circuit it.
    n, d, h, w, c = x.shape
    do, ho, wo = size
    if (do, ho, wo) == (d, h, w):
        return x
    xf = x.astype(jnp.float32)
    if do != d:                                              # D axis
        xf = _left_matmul_call(_interp_matrix(do, d),
                               xf.reshape(n, d, h * w * c)).reshape(n, do, h, w, c)
    if ho != h:                                              # H axis
        xf = _left_matmul_call(_interp_matrix(ho, h),
                               xf.reshape(n * do, h, w * c)).reshape(n, do, ho, w, c)
    if wo != w:                                              # W axis
        mw = _interp_matrix(wo, w)                           # (wo, w)
        mwc = jnp.kron(mw, jnp.eye(c, dtype=jnp.float32))    # (wo*c, w*c)
        y = _matmul_bias_call(xf.reshape(n * do * ho, w * c), mwc.T,
                              jnp.zeros((wo * c,), jnp.float32),
                              out_dtype=jnp.float32)
        xf = y.reshape(n, do, ho, wo, c)
    return xf.astype(x.dtype)


# ------------------------------ parameters ----------------------------------

def _fold_bn_into_conv(w, conv_b, gamma, beta, rmean, rvar):
    # eval-mode BN folded into the conv: w' = w*s (per out channel), b' = beta + (b - mu)*s
    scale = gamma / jnp.sqrt(rvar + BN_EPS)
    w_eff = w * scale[:, None, None, None, None]
    b_eff = beta + (conv_b - rmean) * scale
    return w_eff, b_eff


def _prep_conv_weight(w_eff, cin, cout):
    # (Cout, Cin, kD, kH, kW) -> (3, 9*Cin, Cout), tap order (kd; kh, kw, cin)
    return jnp.transpose(w_eff, (2, 3, 4, 1, 0)).reshape(3, 9 * cin, cout).astype(jnp.bfloat16)


def _init_block(key, cin, cout):
    k = jax.random.split(key, 8)
    w1 = jax.random.normal(k[0], (cout, cin, 3, 3, 3), jnp.float32) * 0.15
    b1 = jax.random.normal(k[1], (cout,), jnp.float32) * 0.05
    g1 = 1.0 + 0.1 * jax.random.normal(k[2], (cout,), jnp.float32)
    be1 = 0.05 * jax.random.normal(k[3], (cout,), jnp.float32)
    w2 = jax.random.normal(k[4], (cout, cout, 3, 3, 3), jnp.float32) * 0.15
    b2 = jax.random.normal(k[5], (cout,), jnp.float32) * 0.05
    g2 = 1.0 + 0.1 * jax.random.normal(k[6], (cout,), jnp.float32)
    be2 = 0.05 * jax.random.normal(k[7], (cout,), jnp.float32)
    rm = jnp.zeros((cout,), jnp.float32)   # BatchNorm running stats at init
    rv = jnp.ones((cout,), jnp.float32)
    w1e, b1e = _fold_bn_into_conv(w1, b1, g1, be1, rm, rv)
    w2e, b2e = _fold_bn_into_conv(w2, b2, g2, be2, rm, rv)
    return {"w1": _prep_conv_weight(w1e, cin, cout), "b1": b1e,
            "w2": _prep_conv_weight(w2e, cout, cout), "b2": b2e}


def init_params(key, enc_channels=(1, 4, 8, 16), dec_channels=(16, 8, 4), nb_classes=1):
    keys = iter(jax.random.split(key, 16))
    enc_blocks = [_init_block(next(keys), enc_channels[i], enc_channels[i + 1])
                  for i in range(len(enc_channels) - 1)]
    upconvs, dec_blocks = [], []
    for i in range(len(dec_channels) - 1):
        cin, cout = dec_channels[i], dec_channels[i + 1]
        kw, kb = jax.random.split(next(keys))
        w = jax.random.normal(kw, (cin, cout, 2, 2, 2), jnp.float32) * 0.15
        b = jax.random.normal(kb, (cout,), jnp.float32) * 0.05
        # (Cin, Cout, kd, kh, kw) -> (Cin, 8*Cout), column order (kd, kh, kw, cout)
        w8 = jnp.transpose(w, (0, 2, 3, 4, 1)).reshape(cin, 8 * cout).astype(jnp.bfloat16)
        upconvs.append({"w": w8, "b": jnp.tile(b, 8)})
        dec_blocks.append(_init_block(next(keys), cin, cout))
    kw, kb = jax.random.split(next(keys))
    head_w = jax.random.normal(kw, (nb_classes, dec_channels[-1]), jnp.float32) * 0.15
    head_b = jax.random.normal(kb, (nb_classes,), jnp.float32) * 0.05
    return {"enc_blocks": enc_blocks, "upconvs": upconvs, "dec_blocks": dec_blocks,
            "head_w": jnp.transpose(head_w, (1, 0)).astype(jnp.bfloat16),
            "head_b": head_b}


# -------------------------------- forward -----------------------------------

def unet3d_forward(params, x, out_size, retain_dim=True):
    # x: (N, C, D, H, W) like PyTorch NCDHW
    x = jnp.transpose(x, (0, 2, 3, 4, 1)).astype(jnp.bfloat16)   # -> NDHWC
    enc_feats = []
    for bp in params["enc_blocks"]:                              # Encoder3D
        x = block3d(x, bp)
        enc_feats.append(x)
        x = maxpool3d_2x2x2(x)
    x = enc_feats[-1]                                            # Decoder3D
    skips = enc_feats[::-1][1:]
    for up, blk, skip in zip(params["upconvs"], params["dec_blocks"], skips):
        x = conv_transpose3d_2x2x2(x, up["w"], up["b"])
        enc = resize_trilinear(skip, x.shape[1:4])               # crop (trilinear)
        x = jnp.concatenate([x, enc], axis=-1)                   # cat([x, encFeat], dim=1)
        x = block3d(x, blk)
    y = conv1x1x1(x, params["head_w"], params["head_b"])         # head (f32)
    if retain_dim:
        y = resize_trilinear(y, out_size)                        # retainDim interp
    return jnp.transpose(y, (0, 4, 1, 2, 3)).astype(jnp.float32) # -> NCDHW


if __name__ == "__main__":
    key = jax.random.PRNGKey(0)
    pkey, xkey = jax.random.split(key)
    params = init_params(pkey, enc_channels=(1, 4, 8, 16), dec_channels=(16, 8, 4),
                         nb_classes=1)
    x = jax.random.normal(xkey, (2, 1, 8, 16, 16), jnp.float32)   # NCDHW
    out_size = (6, 20, 20)                                        # small outSize
    fwd = jax.jit(functools.partial(unet3d_forward, out_size=out_size, retain_dim=True))
    y = jax.block_until_ready(fwd(params, x))
    assert y.shape == (2, 1, 6, 20, 20), y.shape
    assert bool(jnp.all(jnp.isfinite(y)))
    print("KERNEL_OK")
</pallas_src>

<mosaic_0001>
module attributes {stable_mosaic.version = 11 : i64} {
  func.func @_conv_kernel(%arg0: i32, %arg1: i32, %arg2: i32, %arg3: memref<1x1x128x9xbf16, #tpu.memory_space<vmem>>, %arg4: memref<1x1x128x9xbf16, #tpu.memory_space<vmem>>, %arg5: memref<1x1x128x9xbf16, #tpu.memory_space<vmem>>, %arg6: memref<3x9x4xbf16, #tpu.memory_space<vmem>>, %arg7: memref<1x4xf32, #tpu.memory_space<vmem>>, %arg8: memref<1x1x128x4xbf16, #tpu.memory_space<vmem>>) attributes {dimension_semantics = [#tpu.dimension_semantics<parallel>, #tpu.dimension_semantics<parallel>, #tpu.dimension_semantics<parallel>], iteration_bounds = array<i64: 2, 8, 2>, scalar_prefetch = 0 : i64, scratch_operands = 0 : i64, tpu.core_type = #tpu.core_type<tc>, window_params = [{transform_indices = @transform_0, window_bounds = array<i64: 1, 1, 128, 9>}, {transform_indices = @transform_1, window_bounds = array<i64: 1, 1, 128, 9>}, {transform_indices = @transform_2, window_bounds = array<i64: 1, 1, 128, 9>}, {pipeline_mode = #tpu.pipeline_mode<synchronous>, transform_indices = @transform_3, window_bounds = array<i64: 3, 9, 4>}, {pipeline_mode = #tpu.pipeline_mode<synchronous>, transform_indices = @transform_4, window_bounds = array<i64: 1, 4>}, {transform_indices = @transform_5, window_bounds = array<i64: 1, 1, 128, 4>}]} {
    %c0 = arith.constant 0 : index
    %c0_0 = arith.constant 0 : index
    %c0_1 = arith.constant 0 : index
    %c0_2 = arith.constant 0 : index
    %0 = vector.load %arg3[%c0, %c0_0, %c0_1, %c0_2] : memref<1x1x128x9xbf16, #tpu.memory_space<vmem>>, vector<1x1x128x9xbf16>
    %1 = vector.shape_cast %0 : vector<1x1x128x9xbf16> to vector<128x9xbf16>
    %c0_3 = arith.constant 0 : index
    %c0_4 = arith.constant 0 : index
    %c0_5 = arith.constant 0 : index
    %2 = vector.load %arg6[%c0_3, %c0_4, %c0_5] : memref<3x9x4xbf16, #tpu.memory_space<vmem>>, vector<1x9x4xbf16>
    %3 = vector.shape_cast %2 : vector<1x9x4xbf16> to vector<9x4xbf16>
    %cst = arith.constant dense<0.000000e+00> : vector<128x4xf32>
    %4 = tpu.matmul %1, %3, %cst {dimension_numbers = #tpu.dot_dimension_numbers<[1], [0], [0], [1], [0, 0, 1, 1], [], []>} : vector<128x9xbf16>, vector<9x4xbf16>, vector<128x4xf32> -> vector<128x4xf32>
    %c0_6 = arith.constant 0 : index
    %c0_7 = arith.constant 0 : index
    %c0_8 = arith.constant 0 : index
    %c0_9 = arith.constant 0 : index
    %5 = vector.load %arg4[%c0_6, %c0_7, %c0_8, %c0_9] : memref<1x1x128x9xbf16, #tpu.memory_space<vmem>>, vector<1x1x128x9xbf16>
    %6 = vector.shape_cast %5 : vector<1x1x128x9xbf16> to vector<128x9xbf16>
    %c1 = arith.constant 1 : index
    %c0_10 = arith.constant 0 : index
    %c0_11 = arith.constant 0 : index
    %7 = vector.load %arg6[%c1, %c0_10, %c0_11] : memref<3x9x4xbf16, #tpu.memory_space<vmem>>, vector<1x9x4xbf16>
    %8 = vector.shape_cast %7 : vector<1x9x4xbf16> to vector<9x4xbf16>
    %cst_12 = arith.constant dense<0.000000e+00> : vector<128x4xf32>
    %9 = tpu.matmul %6, %8, %cst_12 {dimension_numbers = #tpu.dot_dimension_numbers<[1], [0], [0], [1], [0, 0, 1, 1], [], []>} : vector<128x9xbf16>, vector<9x4xbf16>, vector<128x4xf32> -> vector<128x4xf32>
    %10 = arith.addf %4, %9 : vector<128x4xf32>
    %c0_13 = arith.constant 0 : index
    %c0_14 = arith.constant 0 : index
    %c0_15 = arith.constant 0 : index
    %c0_16 = arith.constant 0 : index
    %11 = vector.load %arg5[%c0_13, %c0_14, %c0_15, %c0_16] : memref<1x1x128x9xbf16, #tpu.memory_space<vmem>>, vector<1x1x128x9xbf16>
    %12 = vector.shape_cast %11 : vector<1x1x128x9xbf16> to vector<128x9xbf16>
    %c2 = arith.constant 2 : index
    %c0_17 = arith.constant 0 : index
    %c0_18 = arith.constant 0 : index
    %13 = vector.load %arg6[%c2, %c0_17, %c0_18] : memref<3x9x4xbf16, #tpu.memory_space<vmem>>, vector<1x9x4xbf16>
    %14 = vector.shape_cast %13 : vector<1x9x4xbf16> to vector<9x4xbf16>
    %cst_19 = arith.constant dense<0.000000e+00> : vector<128x4xf32>
    %15 = tpu.matmul %12, %14, %cst_19 {dimension_numbers = #tpu.dot_dimension_numbers<[1], [0], [0], [1], [0, 0, 1, 1], [], []>} : vector<128x9xbf16>, vector<9x4xbf16>, vector<128x4xf32> -> vector<128x4xf32>
    %16 = arith.addf %10, %15 : vector<128x4xf32>
    %c0_20 = arith.constant 0 : index
    %c0_21 = arith.constant 0 : index
    %17 = vector.load %arg7[%c0_20, %c0_21] : memref<1x4xf32, #tpu.memory_space<vmem>>, vector<1x4xf32>
    %18 = vector.broadcast %17 : vector<1x4xf32> to vector<128x4xf32>
    %19 = arith.addf %16, %18 : vector<128x4xf32>
    %cst_22 = arith.constant 0.000000e+00 : f32
    %20 = vector.broadcast %cst_22 : f32 to vector<128x4xf32>
    %21 = arith.maximumf %19, %20 : vector<128x4xf32>
    %22 = arith.truncf %21 : vector<128x4xf32> to vector<128x4xbf16>
    %c0_23 = arith.constant 0 : index
    %c0_24 = arith.constant 0 : index
    %c0_25 = arith.constant 0 : index
    %c0_26 = arith.constant 0 : index
    %23 = vector.load %arg8[%c0_23, %c0_24, %c0_25, %c0_26] : memref<1x1x128x4xbf16, #tpu.memory_space<vmem>>, vector<1x1x128x4xbf16>
    %24 = vector.shape_cast %23 : vector<1x1x128x4xbf16> to vector<128x4xbf16>
    %25 = vector.shape_cast %22 : vector<128x4xbf16> to vector<1x1x128x4xbf16>
    tpu.vector_store %arg8[%c0_23, %c0_24, %c0_25, %c0_26], %25 {strides = array<i32>} : memref<1x1x128x4xbf16, #tpu.memory_space<vmem>>, vector<1x1x128x4xbf16>,
    return
  }
  func.func @transform_0(%arg0: i32, %arg1: i32, %arg2: i32) -> (i32, i32, i32, i32) {
    %c0_i32 = arith.constant 0 : i32
    %0 = arith.addi %arg1, %c0_i32 : i32
    %c0_i32_0 = arith.constant 0 : i32
    %c0_i32_1 = arith.constant 0 : i32
    return %arg0, %0, %arg2, %c0_i32_0 : i32, i32, i32, i32
  }
  func.func @transform_1(%arg0: i32, %arg1: i32, %arg2: i32) -> (i32, i32, i32, i32) {
    %c1_i32 = arith.constant 1 : i32
    %0 = arith.addi %arg1, %c1_i32 : i32
    %c0_i32 = arith.constant 0 : i32
    %c0_i32_0 = arith.constant 0 : i32
    return %arg0, %0, %arg2, %c0_i32 : i32, i32, i32, i32
  }
  func.func @transform_2(%arg0: i32, %arg1: i32, %arg2: i32) -> (i32, i32, i32, i32) {
    %c2_i32 = arith.constant 2 : i32
    %0 = arith.addi %arg1, %c2_i32 : i32
    %c0_i32 = arith.constant 0 : i32
    %c0_i32_0 = arith.constant 0 : i32
    return %arg0, %0, %arg2, %c0_i32 : i32, i32, i32, i32
  }
  func.func @transform_3(%arg0: i32, %arg1: i32, %arg2: i32) -> (i32, i32, i32) {
    %c0_i32 = arith.constant 0 : i32
    %c0_i32_0 = arith.constant 0 : i32
    %c0_i32_1 = arith.constant 0 : i32
    %c0_i32_2 = arith.constant 0 : i32
    return %c0_i32, %c0_i32_0, %c0_i32_1 : i32, i32, i32
  }
  func.func @transform_4(%arg0: i32, %arg1: i32, %arg2: i32) -> (i32, i32) {
    %c0_i32 = arith.constant 0 : i32
    %c0_i32_0 = arith.constant 0 : i32
    %c0_i32_1 = arith.constant 0 : i32
    return %c0_i32, %c0_i32_0 : i32, i32
  }
  func.func @transform_5(%arg0: i32, %arg1: i32, %arg2: i32) -> (i32, i32, i32, i32) {
    %c0_i32 = arith.constant 0 : i32
    %c0_i32_0 = arith.constant 0 : i32
    return %arg0, %arg1, %arg2, %c0_i32 : i32, i32, i32, i32
  }
}

module attributes {stable_mosaic.version = 11 : i64} {
  func.func @_conv_kernel(%arg0: i32, %arg1: i32, %arg2: i32, %arg3: memref<1x1x128x36xbf16, #tpu.memory_space<vmem>>, %arg4: memref<1x1x128x36xbf16, #tpu.memory_space<vmem>>, %arg5: memref<1x1x128x36xbf16, #tpu.memory_space<vmem>>, %arg6: memref<3x36x4xbf16, #tpu.memory_space<vmem>>, %arg7: memref<1x4xf32, #tpu.memory_space<vmem>>, %arg8: memref<1x1x128x4xbf16, #tpu.memory_space<vmem>>) attributes {dimension_semantics = [#tpu.dimension_semantics<parallel>, #tpu.dimension_semantics<parallel>, #tpu.dimension_semantics<parallel>], iteration_bounds = array<i64: 2, 8, 2>, scalar_prefetch = 0 : i64, scratch_operands = 0 : i64, tpu.core_type = #tpu.core_type<tc>, window_params = [{transform_indices = @transform_0, window_bounds = array<i64: 1, 1, 128, 36>}, {transform_indices = @transform_1, window_bounds = array<i64: 1, 1, 128, 36>}, {transform_indices = @transform_2, window_bounds = array<i64: 1, 1, 128, 36>}, {pipeline_mode = #tpu.pipeline_mode<synchronous>, transform_indices = @transform_3, window_bounds = array<i64: 3, 36, 4>}, {pipeline_mode = #tpu.pipeline_mode<synchronous>, transform_indices = @transform_4, window_bounds = array<i64: 1, 4>}, {transform_indices = @transform_5, window_bounds = array<i64: 1, 1, 128, 4>}]} {
    %c0 = arith.constant 0 : index
    %c0_0 = arith.constant 0 : index
    %c0_1 = arith.constant 0 : index
    %c0_2 = arith.constant 0 : index
    %0 = vector.load %arg3[%c0, %c0_0, %c0_1, %c0_2] : memref<1x1x128x36xbf16, #tpu.memory_space<vmem>>, vector<1x1x128x36xbf16>
    %1 = vector.shape_cast %0 : vector<1x1x128x36xbf16> to vector<128x36xbf16>
    %c0_3 = arith.constant 0 : index
    %c0_4 = arith.constant 0 : index
    %c0_5 = arith.constant 0 : index
    %2 = vector.load %arg6[%c0_3, %c0_4, %c0_5] : memref<3x36x4xbf16, #tpu.memory_space<vmem>>, vector<1x36x4xbf16>
    %3 = vector.shape_cast %2 : vector<1x36x4xbf16> to vector<36x4xbf16>
    %cst = arith.constant dense<0.000000e+00> : vector<128x4xf32>
    %4 = tpu.matmul %1, %3, %cst {dimension_numbers = #tpu.dot_dimension_numbers<[1], [0], [0], [1], [0, 0, 1, 1], [], []>} : vector<128x36xbf16>, vector<36x4xbf16>, vector<128x4xf32> -> vector<128x4xf32>
    %c0_6 = arith.constant 0 : index
    %c0_7 = arith.constant 0 : index
    %c0_8 = arith.constant 0 : index
    %c0_9 = arith.constant 0 : index
    %5 = vector.load %arg4[%c0_6, %c0_7, %c0_8, %c0_9] : memref<1x1x128x36xbf16, #tpu.memory_space<vmem>>, vector<1x1x128x36xbf16>
    %6 = vector.shape_cast %5 : vector<1x1x128x36xbf16> to vector<128x36xbf16>
    %c1 = arith.constant 1 : index
    %c0_10 = arith.constant 0 : index
    %c0_11 = arith.constant 0 : index
    %7 = vector.load %arg6[%c1, %c0_10, %c0_11] : memref<3x36x4xbf16, #tpu.memory_space<vmem>>, vector<1x36x4xbf16>
    %8 = vector.shape_cast %7 : vector<1x36x4xbf16> to vector<36x4xbf16>
    %cst_12 = arith.constant dense<0.000000e+00> : vector<128x4xf32>
    %9 = tpu.matmul %6, %8, %cst_12 {dimension_numbers = #tpu.dot_dimension_numbers<[1], [0], [0], [1], [0, 0, 1, 1], [], []>} : vector<128x36xbf16>, vector<36x4xbf16>, vector<128x4xf32> -> vector<128x4xf32>
    %10 = arith.addf %4, %9 : vector<128x4xf32>
    %c0_13 = arith.constant 0 : index
    %c0_14 = arith.constant 0 : index
    %c0_15 = arith.constant 0 : index
    %c0_16 = arith.constant 0 : index
    %11 = vector.load %arg5[%c0_13, %c0_14, %c0_15, %c0_16] : memref<1x1x128x36xbf16, #tpu.memory_space<vmem>>, vector<1x1x128x36xbf16>
    %12 = vector.shape_cast %11 : vector<1x1x128x36xbf16> to vector<128x36xbf16>
    %c2 = arith.constant 2 : index
    %c0_17 = arith.constant 0 : index
    %c0_18 = arith.constant 0 : index
    %13 = vector.load %arg6[%c2, %c0_17, %c0_18] : memref<3x36x4xbf16, #tpu.memory_space<vmem>>, vector<1x36x4xbf16>
    %14 = vector.shape_cast %13 : vector<1x36x4xbf16> to vector<36x4xbf16>
    %cst_19 = arith.constant dense<0.000000e+00> : vector<128x4xf32>
    %15 = tpu.matmul %12, %14, %cst_19 {dimension_numbers = #tpu.dot_dimension_numbers<[1], [0], [0], [1], [0, 0, 1, 1], [], []>} : vector<128x36xbf16>, vector<36x4xbf16>, vector<128x4xf32> -> vector<128x4xf32>
    %16 = arith.addf %10, %15 : vector<128x4xf32>
    %c0_20 = arith.constant 0 : index
    %c0_21 = arith.constant 0 : index
    %17 = vector.load %arg7[%c0_20, %c0_21] : memref<1x4xf32, #tpu.memory_space<vmem>>, vector<1x4xf32>
    %18 = vector.broadcast %17 : vector<1x4xf32> to vector<128x4xf32>
    %19 = arith.addf %16, %18 : vector<128x4xf32>
    %cst_22 = arith.constant 0.000000e+00 : f32
    %20 = vector.broadcast %cst_22 : f32 to vector<128x4xf32>
    %21 = arith.maximumf %19, %20 : vector<128x4xf32>
    %22 = arith.truncf %21 : vector<128x4xf32> to vector<128x4xbf16>
    %c0_23 = arith.constant 0 : index
    %c0_24 = arith.constant 0 : index
    %c0_25 = arith.constant 0 : index
    %c0_26 = arith.constant 0 : index
    %23 = vector.load %arg8[%c0_23, %c0_24, %c0_25, %c0_26] : memref<1x1x128x4xbf16, #tpu.memory_space<vmem>>, vector<1x1x128x4xbf16>
    %24 = vector.shape_cast %23 : vector<1x1x128x4xbf16> to vector<128x4xbf16>
    %25 = vector.shape_cast %22 : vector<128x4xbf16> to vector<1x1x128x4xbf16>
    tpu.vector_store %arg8[%c0_23, %c0_24, %c0_25, %c0_26], %25 {strides = array<i32>} : memref<1x1x128x4xbf16, #tpu.memory_space<vmem>>, vector<1x1x128x4xbf16>,
    return
  }
  func.func @transform_0(%arg0: i32, %arg1: i32, %arg2: i32) -> (i32, i32, i32, i32) {
    %c0_i32 = arith.constant 0 : i32
    %0 = arith.addi %arg1, %c0_i32 : i32
    %c0_i32_0 = arith.constant 0 : i32
    %c0_i32_1 = arith.constant 0 : i32
    return %arg0, %0, %arg2, %c0_i32_0 : i32, i32, i32, i32
  }
  func.func @transform_1(%arg0: i32, %arg1: i32, %arg2: i32) -> (i32, i32, i32, i32) {
    %c1_i32 = arith.constant 1 : i32
    %0 = arith.addi %arg1, %c1_i32 : i32
    %c0_i32 = arith.constant 0 : i32
    %c0_i32_0 = arith.constant 0 : i32
    return %arg0, %0, %arg2, %c0_i32 : i32, i32, i32, i32
  }
  func.func @transform_2(%arg0: i32, %arg1: i32, %arg2: i32) -> (i32, i32, i32, i32) {
    %c2_i32 = arith.constant 2 : i32
    %0 = arith.addi %arg1, %c2_i32 : i32
    %c0_i32 = arith.constant 0 : i32
    %c0_i32_0 = arith.constant 0 : i32
    return %arg0, %0, %arg2, %c0_i32 : i32, i32, i32, i32
  }
  func.func @transform_3(%arg0: i32, %arg1: i32, %arg2: i32) -> (i32, i32, i32) {
    %c0_i32 = arith.constant 0 : i32
    %c0_i32_0 = arith.constant 0 : i32
    %c0_i32_1 = arith.constant 0 : i32
    %c0_i32_2 = arith.constant 0 : i32
    return %c0_i32, %c0_i32_0, %c0_i32_1 : i32, i32, i32
  }
  func.func @transform_4(%arg0: i32, %arg1: i32, %arg2: i32) -> (i32, i32) {
    %c0_i32 = arith.constant 0 : i32
    %c0_i32_0 = arith.constant 0 : i32
    %c0_i32_1 = arith.constant 0 : i32
    return %c0_i32, %c0_i32_0 : i32, i32
  }
  func.func @transform_5(%arg0: i32, %arg1: i32, %arg2: i32) -> (i32, i32, i32, i32) {
    %c0_i32 = arith.constant 0 : i32
    %c0_i32_0 = arith.constant 0 : i32
    return %arg0, %arg1, %arg2, %c0_i32 : i32, i32, i32, i32
  }
}

module attributes {stable_mosaic.version = 11 : i64} {
  func.func @_maxpool_kernel(%arg0: i32, %arg1: memref<8x256x4xbf16, #tpu.memory_space<vmem>>, %arg2: memref<256x4xbf16, #tpu.memory_space<vmem>>) attributes {dimension_semantics = [#tpu.dimension_semantics<parallel>], iteration_bounds = array<i64: 2>, scalar_prefetch = 0 : i64, scratch_operands = 0 : i64, tpu.core_type = #tpu.core_type<tc>, window_params = [{transform_indices = @transform_0, window_bounds = array<i64: 8, 256, 4>}, {transform_indices = @transform_1, window_bounds = array<i64: 256, 4>}]} {
    %c0 = arith.constant 0 : index
    %c0_0 = arith.constant 0 : index
    %c0_1 = arith.constant 0 : index
    %0 = vector.load %arg1[%c0, %c0_0, %c0_1] : memref<8x256x4xbf16, #tpu.memory_space<vmem>>, vector<8x256x4xbf16>
    %cst = arith.constant dense<0xFF80> : vector<256x4xbf16>
    %1 = vector.multi_reduction <maximumf>, %0, %cst [0] : vector<8x256x4xbf16> to vector<256x4xbf16>
    %c0_2 = arith.constant 0 : index
    %c0_3 = arith.constant 0 : index
    %2 = vector.load %arg2[%c0_2, %c0_3] : memref<256x4xbf16, #tpu.memory_space<vmem>>, vector<256x4xbf16>
    tpu.vector_store %arg2[%c0_2, %c0_3], %1 {strides = array<i32>} : memref<256x4xbf16, #tpu.memory_space<vmem>>, vector<256x4xbf16>,
    return
  }
  func.func @transform_0(%arg0: i32) -> (i32, i32, i32) {
    %c0_i32 = arith.constant 0 : i32
    %c0_i32_0 = arith.constant 0 : i32
    %c0_i32_1 = arith.constant 0 : i32
    return %c0_i32, %arg0, %c0_i32_0 : i32, i32, i32
  }
  func.func @transform_1(%arg0: i32) -> (i32, i32) {
    %c0_i32 = arith.constant 0 : i32
    %c0_i32_0 = arith.constant 0 : i32
    return %arg0, %c0_i32 : i32, i32
  }
}

module attributes {stable_mosaic.version = 11 : i64} {
  func.func @_conv_kernel(%arg0: i32, %arg1: i32, %arg2: i32, %arg3: memref<1x1x32x36xbf16, #tpu.memory_space<vmem>>, %arg4: memref<1x1x32x36xbf16, #tpu.memory_space<vmem>>, %arg5: memref<1x1x32x36xbf16, #tpu.memory_space<vmem>>, %arg6: memref<3x36x8xbf16, #tpu.memory_space<vmem>>, %arg7: memref<1x8xf32, #tpu.memory_space<vmem>>, %arg8: memref<1x1x32x8xbf16, #tpu.memory_space<vmem>>) attributes {dimension_semantics = [#tpu.dimension_semantics<parallel>, #tpu.dimension_semantics<parallel>, #tpu.dimension_semantics<parallel>], iteration_bounds = array<i64: 2, 4, 2>, scalar_prefetch = 0 : i64, scratch_operands = 0 : i64, tpu.core_type = #tpu.core_type<tc>, window_params = [{transform_indices = @transform_0, window_bounds = array<i64: 1, 1, 32, 36>}, {transform_indices = @transform_1, window_bounds = array<i64: 1, 1, 32, 36>}, {transform_indices = @transform_2, window_bounds = array<i64: 1, 1, 32, 36>}, {pipeline_mode = #tpu.pipeline_mode<synchronous>, transform_indices = @transform_3, window_bounds = array<i64: 3, 36, 8>}, {pipeline_mode = #tpu.pipeline_mode<synchronous>, transform_indices = @transform_4, window_bounds = array<i64: 1, 8>}, {transform_indices = @transform_5, window_bounds = array<i64: 1, 1, 32, 8>}]} {
    %c0 = arith.constant 0 : index
    %c0_0 = arith.constant 0 : index
    %c0_1 = arith.constant 0 : index
    %c0_2 = arith.constant 0 : index
    %0 = vector.load %arg3[%c0, %c0_0, %c0_1, %c0_2] : memref<1x1x32x36xbf16, #tpu.memory_space<vmem>>, vector<1x1x32x36xbf16>
    %1 = vector.shape_cast %0 : vector<1x1x32x36xbf16> to vector<32x36xbf16>
    %c0_3 = arith.constant 0 : index
    %c0_4 = arith.constant 0 : index
    %c0_5 = arith.constant 0 : index
    %2 = vector.load %arg6[%c0_3, %c0_4, %c0_5] : memref<3x36x8xbf16, #tpu.memory_space<vmem>>, vector<1x36x8xbf16>
    %3 = vector.shape_cast %2 : vector<1x36x8xbf16> to vector<36x8xbf16>
    %cst = arith.constant dense<0.000000e+00> : vector<32x8xf32>
    %4 = tpu.matmul %1, %3, %cst {dimension_numbers = #tpu.dot_dimension_numbers<[1], [0], [0], [1], [0, 0, 1, 1], [], []>} : vector<32x36xbf16>, vector<36x8xbf16>, vector<32x8xf32> -> vector<32x8xf32>
    %c0_6 = arith.constant 0 : index
    %c0_7 = arith.constant 0 : index
    %c0_8 = arith.constant 0 : index
    %c0_9 = arith.constant 0 : index
    %5 = vector.load %arg4[%c0_6, %c0_7, %c0_8, %c0_9] : memref<1x1x32x36xbf16, #tpu.memory_space<vmem>>, vector<1x1x32x36xbf16>
    %6 = vector.shape_cast %5 : vector<1x1x32x36xbf16> to vector<32x36xbf16>
    %c1 = arith.constant 1 : index
    %c0_10 = arith.constant 0 : index
    %c0_11 = arith.constant 0 : index
    %7 = vector.load %arg6[%c1, %c0_10, %c0_11] : memref<3x36x8xbf16, #tpu.memory_space<vmem>>, vector<1x36x8xbf16>
    %8 = vector.shape_cast %7 : vector<1x36x8xbf16> to vector<36x8xbf16>
    %cst_12 = arith.constant dense<0.000000e+00> : vector<32x8xf32>
    %9 = tpu.matmul %6, %8, %cst_12 {dimension_numbers = #tpu.dot_dimension_numbers<[1], [0], [0], [1], [0, 0, 1, 1], [], []>} : vector<32x36xbf16>, vector<36x8xbf16>, vector<32x8xf32> -> vector<32x8xf32>
    %10 = arith.addf %4, %9 : vector<32x8xf32>
    %c0_13 = arith.constant 0 : index
    %c0_14 = arith.constant 0 : index
    %c0_15 = arith.constant 0 : index
    %c0_16 = arith.constant 0 : index
    %11 = vector.load %arg5[%c0_13, %c0_14, %c0_15, %c0_16] : memref<1x1x32x36xbf16, #tpu.memory_space<vmem>>, vector<1x1x32x36xbf16>
    %12 = vector.shape_cast %11 : vector<1x1x32x36xbf16> to vector<32x36xbf16>
    %c2 = arith.constant 2 : index
    %c0_17 = arith.constant 0 : index
    %c0_18 = arith.constant 0 : index
    %13 = vector.load %arg6[%c2, %c0_17, %c0_18] : memref<3x36x8xbf16, #tpu.memory_space<vmem>>, vector<1x36x8xbf16>
    %14 = vector.shape_cast %13 : vector<1x36x8xbf16> to vector<36x8xbf16>
    %cst_19 = arith.constant dense<0.000000e+00> : vector<32x8xf32>
    %15 = tpu.matmul %12, %14, %cst_19 {dimension_numbers = #tpu.dot_dimension_numbers<[1], [0], [0], [1], [0, 0, 1, 1], [], []>} : vector<32x36xbf16>, vector<36x8xbf16>, vector<32x8xf32> -> vector<32x8xf32>
    %16 = arith.addf %10, %15 : vector<32x8xf32>
    %c0_20 = arith.constant 0 : index
    %c0_21 = arith.constant 0 : index
    %17 = vector.load %arg7[%c0_20, %c0_21] : memref<1x8xf32, #tpu.memory_space<vmem>>, vector<1x8xf32>
    %18 = vector.broadcast %17 : vector<1x8xf32> to vector<32x8xf32>
    %19 = arith.addf %16, %18 : vector<32x8xf32>
    %cst_22 = arith.constant 0.000000e+00 : f32
    %20 = vector.broadcast %cst_22 : f32 to vector<32x8xf32>
    %21 = arith.maximumf %19, %20 : vector<32x8xf32>
    %22 = arith.truncf %21 : vector<32x8xf32> to vector<32x8xbf16>
    %c0_23 = arith.constant 0 : index
    %c0_24 = arith.constant 0 : index
    %c0_25 = arith.constant 0 : index
    %c0_26 = arith.constant 0 : index
    %23 = vector.load %arg8[%c0_23, %c0_24, %c0_25, %c0_26] : memref<1x1x32x8xbf16, #tpu.memory_space<vmem>>, vector<1x1x32x8xbf16>
    %24 = vector.shape_cast %23 : vector<1x1x32x8xbf16> to vector<32x8xbf16>
    %25 = vector.shape_cast %22 : vector<32x8xbf16> to vector<1x1x32x8xbf16>
    tpu.vector_store %arg8[%c0_23, %c0_24, %c0_25, %c0_26], %25 {strides = array<i32>} : memref<1x1x32x8xbf16, #tpu.memory_space<vmem>>, vector<1x1x32x8xbf16>,
    return
  }
  func.func @transform_0(%arg0: i32, %arg1: i32, %arg2: i32) -> (i32, i32, i32, i32) {
    %c0_i32 = arith.constant 0 : i32
    %0 = arith.addi %arg1, %c0_i32 : i32
    %c0_i32_0 = arith.constant 0 : i32
    %c0_i32_1 = arith.constant 0 : i32
    return %arg0, %0, %arg2, %c0_i32_0 : i32, i32, i32, i32
  }
  func.func @transform_1(%arg0: i32, %arg1: i32, %arg2: i32) -> (i32, i32, i32, i32) {
    %c1_i32 = arith.constant 1 : i32
    %0 = arith.addi %arg1, %c1_i32 : i32
    %c0_i32 = arith.constant 0 : i32
    %c0_i32_0 = arith.constant 0 : i32
    return %arg0, %0, %arg2, %c0_i32 : i32, i32, i32, i32
  }
  func.func @transform_2(%arg0: i32, %arg1: i32, %arg2: i32) -> (i32, i32, i32, i32) {
    %c2_i32 = arith.constant 2 : i32
    %0 = arith.addi %arg1, %c2_i32 : i32
    %c0_i32 = arith.constant 0 : i32
    %c0_i32_0 = arith.constant 0 : i32
    return %arg0, %0, %arg2, %c0_i32 : i32, i32, i32, i32
  }
  func.func @transform_3(%arg0: i32, %arg1: i32, %arg2: i32) -> (i32, i32, i32) {
    %c0_i32 = arith.constant 0 : i32
    %c0_i32_0 = arith.constant 0 : i32
    %c0_i32_1 = arith.constant 0 : i32
    %c0_i32_2 = arith.constant 0 : i32
    return %c0_i32, %c0_i32_0, %c0_i32_1 : i32, i32, i32
  }
  func.func @transform_4(%arg0: i32, %arg1: i32, %arg2: i32) -> (i32, i32) {
    %c0_i32 = arith.constant 0 : i32
    %c0_i32_0 = arith.constant 0 : i32
    %c0_i32_1 = arith.constant 0 : i32
    return %c0_i32, %c0_i32_0 : i32, i32
  }
  func.func @transform_5(%arg0: i32, %arg1: i32, %arg2: i32) -> (i32, i32, i32, i32) {
    %c0_i32 = arith.constant 0 : i32
    %c0_i32_0 = arith.constant 0 : i32
    return %arg0, %arg1, %arg2, %c0_i32 : i32, i32, i32, i32
  }
}

module attributes {stable_mosaic.version = 11 : i64} {
  func.func @_conv_kernel(%arg0: i32, %arg1: i32, %arg2: i32, %arg3: memref<1x1x32x72xbf16, #tpu.memory_space<vmem>>, %arg4: memref<1x1x32x72xbf16, #tpu.memory_space<vmem>>, %arg5: memref<1x1x32x72xbf16, #tpu.memory_space<vmem>>, %arg6: memref<3x72x8xbf16, #tpu.memory_space<vmem>>, %arg7: memref<1x8xf32, #tpu.memory_space<vmem>>, %arg8: memref<1x1x32x8xbf16, #tpu.memory_space<vmem>>) attributes {dimension_semantics = [#tpu.dimension_semantics<parallel>, #tpu.dimension_semantics<parallel>, #tpu.dimension_semantics<parallel>], iteration_bounds = array<i64: 2, 4, 2>, scalar_prefetch = 0 : i64, scratch_operands = 0 : i64, tpu.core_type = #tpu.core_type<tc>, window_params = [{transform_indices = @transform_0, window_bounds = array<i64: 1, 1, 32, 72>}, {transform_indices = @transform_1, window_bounds = array<i64: 1, 1, 32, 72>}, {transform_indices = @transform_2, window_bounds = array<i64: 1, 1, 32, 72>}, {pipeline_mode = #tpu.pipeline_mode<synchronous>, transform_indices = @transform_3, window_bounds = array<i64: 3, 72, 8>}, {pipeline_mode = #tpu.pipeline_mode<synchronous>, transform_indices = @transform_4, window_bounds = array<i64: 1, 8>}, {transform_indices = @transform_5, window_bounds = array<i64: 1, 1, 32, 8>}]} {
    %c0 = arith.constant 0 : index
    %c0_0 = arith.constant 0 : index
    %c0_1 = arith.constant 0 : index
    %c0_2 = arith.constant 0 : index
    %0 = vector.load %arg3[%c0, %c0_0, %c0_1, %c0_2] : memref<1x1x32x72xbf16, #tpu.memory_space<vmem>>, vector<1x1x32x72xbf16>
    %1 = vector.shape_cast %0 : vector<1x1x32x72xbf16> to vector<32x72xbf16>
    %c0_3 = arith.constant 0 : index
    %c0_4 = arith.constant 0 : index
    %c0_5 = arith.constant 0 : index
    %2 = vector.load %arg6[%c0_3, %c0_4, %c0_5] : memref<3x72x8xbf16, #tpu.memory_space<vmem>>, vector<1x72x8xbf16>
    %3 = vector.shape_cast %2 : vector<1x72x8xbf16> to vector<72x8xbf16>
    %cst = arith.constant dense<0.000000e+00> : vector<32x8xf32>
    %4 = tpu.matmul %1, %3, %cst {dimension_numbers = #tpu.dot_dimension_numbers<[1], [0], [0], [1], [0, 0, 1, 1], [], []>} : vector<32x72xbf16>, vector<72x8xbf16>, vector<32x8xf32> -> vector<32x8xf32>
    %c0_6 = arith.constant 0 : index
    %c0_7 = arith.constant 0 : index
    %c0_8 = arith.constant 0 : index
    %c0_9 = arith.constant 0 : index
    %5 = vector.load %arg4[%c0_6, %c0_7, %c0_8, %c0_9] : memref<1x1x32x72xbf16, #tpu.memory_space<vmem>>, vector<1x1x32x72xbf16>
    %6 = vector.shape_cast %5 : vector<1x1x32x72xbf16> to vector<32x72xbf16>
    %c1 = arith.constant 1 : index
    %c0_10 = arith.constant 0 : index
    %c0_11 = arith.constant 0 : index
    %7 = vector.load %arg6[%c1, %c0_10, %c0_11] : memref<3x72x8xbf16, #tpu.memory_space<vmem>>, vector<1x72x8xbf16>
    %8 = vector.shape_cast %7 : vector<1x72x8xbf16> to vector<72x8xbf16>
    %cst_12 = arith.constant dense<0.000000e+00> : vector<32x8xf32>
    %9 = tpu.matmul %6, %8, %cst_12 {dimension_numbers = #tpu.dot_dimension_numbers<[1], [0], [0], [1], [0, 0, 1, 1], [], []>} : vector<32x72xbf16>, vector<72x8xbf16>, vector<32x8xf32> -> vector<32x8xf32>
    %10 = arith.addf %4, %9 : vector<32x8xf32>
    %c0_13 = arith.constant 0 : index
    %c0_14 = arith.constant 0 : index
    %c0_15 = arith.constant 0 : index
    %c0_16 = arith.constant 0 : index
    %11 = vector.load %arg5[%c0_13, %c0_14, %c0_15, %c0_16] : memref<1x1x32x72xbf16, #tpu.memory_space<vmem>>, vector<1x1x32x72xbf16>
    %12 = vector.shape_cast %11 : vector<1x1x32x72xbf16> to vector<32x72xbf16>
    %c2 = arith.constant 2 : index
    %c0_17 = arith.constant 0 : index
    %c0_18 = arith.constant 0 : index
    %13 = vector.load %arg6[%c2, %c0_17, %c0_18] : memref<3x72x8xbf16, #tpu.memory_space<vmem>>, vector<1x72x8xbf16>
    %14 = vector.shape_cast %13 : vector<1x72x8xbf16> to vector<72x8xbf16>
    %cst_19 = arith.constant dense<0.000000e+00> : vector<32x8xf32>
    %15 = tpu.matmul %12, %14, %cst_19 {dimension_numbers = #tpu.dot_dimension_numbers<[1], [0], [0], [1], [0, 0, 1, 1], [], []>} : vector<32x72xbf16>, vector<72x8xbf16>, vector<32x8xf32> -> vector<32x8xf32>
    %16 = arith.addf %10, %15 : vector<32x8xf32>
    %c0_20 = arith.constant 0 : index
    %c0_21 = arith.constant 0 : index
    %17 = vector.load %arg7[%c0_20, %c0_21] : memref<1x8xf32, #tpu.memory_space<vmem>>, vector<1x8xf32>
    %18 = vector.broadcast %17 : vector<1x8xf32> to vector<32x8xf32>
    %19 = arith.addf %16, %18 : vector<32x8xf32>
    %cst_22 = arith.constant 0.000000e+00 : f32
    %20 = vector.broadcast %cst_22 : f32 to vector<32x8xf32>
    %21 = arith.maximumf %19, %20 : vector<32x8xf32>
    %22 = arith.truncf %21 : vector<32x8xf32> to vector<32x8xbf16>
    %c0_23 = arith.constant 0 : index
    %c0_24 = arith.constant 0 : index
    %c0_25 = arith.constant 0 : index
    %c0_26 = arith.constant 0 : index
    %23 = vector.load %arg8[%c0_23, %c0_24, %c0_25, %c0_26] : memref<1x1x32x8xbf16, #tpu.memory_space<vmem>>, vector<1x1x32x8xbf16>
    %24 = vector.shape_cast %23 : vector<1x1x32x8xbf16> to vector<32x8xbf16>
    %25 = vector.shape_cast %22 : vector<32x8xbf16> to vector<1x1x32x8xbf16>
    tpu.vector_store %arg8[%c0_23, %c0_24, %c0_25, %c0_26], %25 {strides = array<i32>} : memref<1x1x32x8xbf16, #tpu.memory_space<vmem>>, vector<1x1x32x8xbf16>,
    return
  }
  func.func @transform_0(%arg0: i32, %arg1: i32, %arg2: i32) -> (i32, i32, i32, i32) {
    %c0_i32 = arith.constant 0 : i32
    %0 = arith.addi %arg1, %c0_i32 : i32
    %c0_i32_0 = arith.constant 0 : i32
    %c0_i32_1 = arith.constant 0 : i32
    return %arg0, %0, %arg2, %c0_i32_0 : i32, i32, i32, i32
  }
  func.func @transform_1(%arg0: i32, %arg1: i32, %arg2: i32) -> (i32, i32, i32, i32) {
    %c1_i32 = arith.constant 1 : i32
    %0 = arith.addi %arg1, %c1_i32 : i32
    %c0_i32 = arith.constant 0 : i32
    %c0_i32_0 = arith.constant 0 : i32
    return %arg0, %0, %arg2, %c0_i32 : i32, i32, i32, i32
  }
  func.func @transform_2(%arg0: i32, %arg1: i32, %arg2: i32) -> (i32, i32, i32, i32) {
    %c2_i32 = arith.constant 2 : i32
    %0 = arith.addi %arg1, %c2_i32 : i32
    %c0_i32 = arith.constant 0 : i32
    %c0_i32_0 = arith.constant 0 : i32
    return %arg0, %0, %arg2, %c0_i32 : i32, i32, i32, i32
  }
  func.func @transform_3(%arg0: i32, %arg1: i32, %arg2: i32) -> (i32, i32, i32) {
    %c0_i32 = arith.constant 0 : i32
    %c0_i32_0 = arith.constant 0 : i32
    %c0_i32_1 = arith.constant 0 : i32
    %c0_i32_2 = arith.constant 0 : i32
    return %c0_i32, %c0_i32_0, %c0_i32_1 : i32, i32, i32
  }
  func.func @transform_4(%arg0: i32, %arg1: i32, %arg2: i32) -> (i32, i32) {
    %c0_i32 = arith.constant 0 : i32
    %c0_i32_0 = arith.constant 0 : i32
    %c0_i32_1 = arith.constant 0 : i32
    return %c0_i32, %c0_i32_0 : i32, i32
  }
  func.func @transform_5(%arg0: i32, %arg1: i32, %arg2: i32) -> (i32, i32, i32, i32) {
    %c0_i32 = arith.constant 0 : i32
    %c0_i32_0 = arith.constant 0 : i32
    return %arg0, %arg1, %arg2, %c0_i32 : i32, i32, i32, i32
  }
}

module attributes {stable_mosaic.version = 11 : i64} {
  func.func @_maxpool_kernel(%arg0: i32, %arg1: memref<8x32x8xbf16, #tpu.memory_space<vmem>>, %arg2: memref<32x8xbf16, #tpu.memory_space<vmem>>) attributes {dimension_semantics = [#tpu.dimension_semantics<parallel>], iteration_bounds = array<i64: 2>, scalar_prefetch = 0 : i64, scratch_operands = 0 : i64, tpu.core_type = #tpu.core_type<tc>, window_params = [{transform_indices = @transform_0, window_bounds = array<i64: 8, 32, 8>}, {transform_indices = @transform_1, window_bounds = array<i64: 32, 8>}]} {
    %c0 = arith.constant 0 : index
    %c0_0 = arith.constant 0 : index
    %c0_1 = arith.constant 0 : index
    %0 = vector.load %arg1[%c0, %c0_0, %c0_1] : memref<8x32x8xbf16, #tpu.memory_space<vmem>>, vector<8x32x8xbf16>
    %cst = arith.constant dense<0xFF80> : vector<32x8xbf16>
    %1 = vector.multi_reduction <maximumf>, %0, %cst [0] : vector<8x32x8xbf16> to vector<32x8xbf16>
    %c0_2 = arith.constant 0 : index
    %c0_3 = arith.constant 0 : index
    %2 = vector.load %arg2[%c0_2, %c0_3] : memref<32x8xbf16, #tpu.memory_space<vmem>>, vector<32x8xbf16>
    tpu.vector_store %arg2[%c0_2, %c0_3], %1 {strides = array<i32>} : memref<32x8xbf16, #tpu.memory_space<vmem>>, vector<32x8xbf16>,
    return
  }
  func.func @transform_0(%arg0: i32) -> (i32, i32, i32) {
    %c0_i32 = arith.constant 0 : i32
    %c0_i32_0 = arith.constant 0 : i32
    %c0_i32_1 = arith.constant 0 : i32
    return %c0_i32, %arg0, %c0_i32_0 : i32, i32, i32
  }
  func.func @transform_1(%arg0: i32) -> (i32, i32) {
    %c0_i32 = arith.constant 0 : i32
    %c0_i32_0 = arith.constant 0 : i32
    return %arg0, %c0_i32 : i32, i32
  }
}

module attributes {stable_mosaic.version = 11 : i64} {
  func.func @_conv_kernel(%arg0: i32, %arg1: i32, %arg2: i32, %arg3: memref<1x1x8x72xbf16, #tpu.memory_space<vmem>>, %arg4: memref<1x1x8x72xbf16, #tpu.memory_space<vmem>>, %arg5: memref<1x1x8x72xbf16, #tpu.memory_space<vmem>>, %arg6: memref<3x72x16xbf16, #tpu.memory_space<vmem>>, %arg7: memref<1x16xf32, #tpu.memory_space<vmem>>, %arg8: memref<1x1x8x16xbf16, #tpu.memory_space<vmem>>) attributes {dimension_semantics = [#tpu.dimension_semantics<parallel>, #tpu.dimension_semantics<parallel>, #tpu.dimension_semantics<parallel>], iteration_bounds = array<i64: 2, 2, 2>, scalar_prefetch = 0 : i64, scratch_operands = 0 : i64, tpu.core_type = #tpu.core_type<tc>, window_params = [{transform_indices = @transform_0, window_bounds = array<i64: 1, 1, 8, 72>}, {transform_indices = @transform_1, window_bounds = array<i64: 1, 1, 8, 72>}, {transform_indices = @transform_2, window_bounds = array<i64: 1, 1, 8, 72>}, {pipeline_mode = #tpu.pipeline_mode<synchronous>, transform_indices = @transform_3, window_bounds = array<i64: 3, 72, 16>}, {pipeline_mode = #tpu.pipeline_mode<synchronous>, transform_indices = @transform_4, window_bounds = array<i64: 1, 16>}, {transform_indices = @transform_5, window_bounds = array<i64: 1, 1, 8, 16>}]} {
    %c0 = arith.constant 0 : index
    %c0_0 = arith.constant 0 : index
    %c0_1 = arith.constant 0 : index
    %c0_2 = arith.constant 0 : index
    %0 = vector.load %arg3[%c0, %c0_0, %c0_1, %c0_2] : memref<1x1x8x72xbf16, #tpu.memory_space<vmem>>, vector<1x1x8x72xbf16>
    %1 = vector.shape_cast %0 : vector<1x1x8x72xbf16> to vector<8x72xbf16>
    %c0_3 = arith.constant 0 : index
    %c0_4 = arith.constant 0 : index
    %c0_5 = arith.constant 0 : index
    %2 = vector.load %arg6[%c0_3, %c0_4, %c0_5] : memref<3x72x16xbf16, #tpu.memory_space<vmem>>, vector<1x72x16xbf16>
    %3 = vector.shape_cast %2 : vector<1x72x16xbf16> to vector<72x16xbf16>
    %cst = arith.constant dense<0.000000e+00> : vector<8x16xf32>
    %4 = tpu.matmul %1, %3, %cst {dimension_numbers = #tpu.dot_dimension_numbers<[1], [0], [0], [1], [0, 0, 1, 1], [], []>} : vector<8x72xbf16>, vector<72x16xbf16>, vector<8x16xf32> -> vector<8x16xf32>
    %c0_6 = arith.constant 0 : index
    %c0_7 = arith.constant 0 : index
    %c0_8 = arith.constant 0 : index
    %c0_9 = arith.constant 0 : index
    %5 = vector.load %arg4[%c0_6, %c0_7, %c0_8, %c0_9] : memref<1x1x8x72xbf16, #tpu.memory_space<vmem>>, vector<1x1x8x72xbf16>
    %6 = vector.shape_cast %5 : vector<1x1x8x72xbf16> to vector<8x72xbf16>
    %c1 = arith.constant 1 : index
    %c0_10 = arith.constant 0 : index
    %c0_11 = arith.constant 0 : index
    %7 = vector.load %arg6[%c1, %c0_10, %c0_11] : memref<3x72x16xbf16, #tpu.memory_space<vmem>>, vector<1x72x16xbf16>
    %8 = vector.shape_cast %7 : vector<1x72x16xbf16> to vector<72x16xbf16>
    %cst_12 = arith.constant dense<0.000000e+00> : vector<8x16xf32>
    %9 = tpu.matmul %6, %8, %cst_12 {dimension_numbers = #tpu.dot_dimension_numbers<[1], [0], [0], [1], [0, 0, 1, 1], [], []>} : vector<8x72xbf16>, vector<72x16xbf16>, vector<8x16xf32> -> vector<8x16xf32>
    %10 = arith.addf %4, %9 : vector<8x16xf32>
    %c0_13 = arith.constant 0 : index
    %c0_14 = arith.constant 0 : index
    %c0_15 = arith.constant 0 : index
    %c0_16 = arith.constant 0 : index
    %11 = vector.load %arg5[%c0_13, %c0_14, %c0_15, %c0_16] : memref<1x1x8x72xbf16, #tpu.memory_space<vmem>>, vector<1x1x8x72xbf16>
    %12 = vector.shape_cast %11 : vector<1x1x8x72xbf16> to vector<8x72xbf16>
    %c2 = arith.constant 2 : index
    %c0_17 = arith.constant 0 : index
    %c0_18 = arith.constant 0 : index
    %13 = vector.load %arg6[%c2, %c0_17, %c0_18] : memref<3x72x16xbf16, #tpu.memory_space<vmem>>, vector<1x72x16xbf16>
    %14 = vector.shape_cast %13 : vector<1x72x16xbf16> to vector<72x16xbf16>
    %cst_19 = arith.constant dense<0.000000e+00> : vector<8x16xf32>
    %15 = tpu.matmul %12, %14, %cst_19 {dimension_numbers = #tpu.dot_dimension_numbers<[1], [0], [0], [1], [0, 0, 1, 1], [], []>} : vector<8x72xbf16>, vector<72x16xbf16>, vector<8x16xf32> -> vector<8x16xf32>
    %16 = arith.addf %10, %15 : vector<8x16xf32>
    %c0_20 = arith.constant 0 : index
    %c0_21 = arith.constant 0 : index
    %17 = vector.load %arg7[%c0_20, %c0_21] : memref<1x16xf32, #tpu.memory_space<vmem>>, vector<1x16xf32>
    %18 = vector.broadcast %17 : vector<1x16xf32> to vector<8x16xf32>
    %19 = arith.addf %16, %18 : vector<8x16xf32>
    %cst_22 = arith.constant 0.000000e+00 : f32
    %20 = vector.broadcast %cst_22 : f32 to vector<8x16xf32>
    %21 = arith.maximumf %19, %20 : vector<8x16xf32>
    %22 = arith.truncf %21 : vector<8x16xf32> to vector<8x16xbf16>
    %c0_23 = arith.constant 0 : index
    %c0_24 = arith.constant 0 : index
    %c0_25 = arith.constant 0 : index
    %c0_26 = arith.constant 0 : index
    %23 = vector.load %arg8[%c0_23, %c0_24, %c0_25, %c0_26] : memref<1x1x8x16xbf16, #tpu.memory_space<vmem>>, vector<1x1x8x16xbf16>
    %24 = vector.shape_cast %23 : vector<1x1x8x16xbf16> to vector<8x16xbf16>
    %25 = vector.shape_cast %22 : vector<8x16xbf16> to vector<1x1x8x16xbf16>
    tpu.vector_store %arg8[%c0_23, %c0_24, %c0_25, %c0_26], %25 {strides = array<i32>} : memref<1x1x8x16xbf16, #tpu.memory_space<vmem>>, vector<1x1x8x16xbf16>,
    return
  }
  func.func @transform_0(%arg0: i32, %arg1: i32, %arg2: i32) -> (i32, i32, i32, i32) {
    %c0_i32 = arith.constant 0 : i32
    %0 = arith.addi %arg1, %c0_i32 : i32
    %c0_i32_0 = arith.constant 0 : i32
    %c0_i32_1 = arith.constant 0 : i32
    return %arg0, %0, %arg2, %c0_i32_0 : i32, i32, i32, i32
  }
  func.func @transform_1(%arg0: i32, %arg1: i32, %arg2: i32) -> (i32, i32, i32, i32) {
    %c1_i32 = arith.constant 1 : i32
    %0 = arith.addi %arg1, %c1_i32 : i32
    %c0_i32 = arith.constant 0 : i32
    %c0_i32_0 = arith.constant 0 : i32
    return %arg0, %0, %arg2, %c0_i32 : i32, i32, i32, i32
  }
  func.func @transform_2(%arg0: i32, %arg1: i32, %arg2: i32) -> (i32, i32, i32, i32) {
    %c2_i32 = arith.constant 2 : i32
    %0 = arith.addi %arg1, %c2_i32 : i32
    %c0_i32 = arith.constant 0 : i32
    %c0_i32_0 = arith.constant 0 : i32
    return %arg0, %0, %arg2, %c0_i32 : i32, i32, i32, i32
  }
  func.func @transform_3(%arg0: i32, %arg1: i32, %arg2: i32) -> (i32, i32, i32) {
    %c0_i32 = arith.constant 0 : i32
    %c0_i32_0 = arith.constant 0 : i32
    %c0_i32_1 = arith.constant 0 : i32
    %c0_i32_2 = arith.constant 0 : i32
    return %c0_i32, %c0_i32_0, %c0_i32_1 : i32, i32, i32
  }
  func.func @transform_4(%arg0: i32, %arg1: i32, %arg2: i32) -> (i32, i32) {
    %c0_i32 = arith.constant 0 : i32
    %c0_i32_0 = arith.constant 0 : i32
    %c0_i32_1 = arith.constant 0 : i32
    return %c0_i32, %c0_i32_0 : i32, i32
  }
  func.func @transform_5(%arg0: i32, %arg1: i32, %arg2: i32) -> (i32, i32, i32, i32) {
    %c0_i32 = arith.constant 0 : i32
    %c0_i32_0 = arith.constant 0 : i32
    return %arg0, %arg1, %arg2, %c0_i32 : i32, i32, i32, i32
  }
}

module attributes {stable_mosaic.version = 11 : i64} {
  func.func @_matmul_bias_kernel(%arg0: i32, %arg1: memref<32x16xbf16, #tpu.memory_space<vmem>>, %arg2: memref<16x64xbf16, #tpu.memory_space<vmem>>, %arg3: memref<1x64xf32, #tpu.memory_space<vmem>>, %arg4: memref<32x64xbf16, #tpu.memory_space<vmem>>) attributes {dimension_semantics = [#tpu.dimension_semantics<parallel>], iteration_bounds = array<i64: 2>, scalar_prefetch = 0 : i64, scratch_operands = 0 : i64, tpu.core_type = #tpu.core_type<tc>, window_params = [{transform_indices = @transform_0, window_bounds = array<i64: 32, 16>}, {pipeline_mode = #tpu.pipeline_mode<synchronous>, transform_indices = @transform_1, window_bounds = array<i64: 16, 64>}, {pipeline_mode = #tpu.pipeline_mode<synchronous>, transform_indices = @transform_2, window_bounds = array<i64: 1, 64>}, {transform_indices = @transform_3, window_bounds = array<i64: 32, 64>}]} {
    %c0 = arith.constant 0 : index
    %c0_0 = arith.constant 0 : index
    %0 = vector.load %arg1[%c0, %c0_0] : memref<32x16xbf16, #tpu.memory_space<vmem>>, vector<32x16xbf16>
    %c0_1 = arith.constant 0 : index
    %c0_2 = arith.constant 0 : index
    %1 = vector.load %arg2[%c0_1, %c0_2] : memref<16x64xbf16, #tpu.memory_space<vmem>>, vector<16x64xbf16>
    %cst = arith.constant dense<0.000000e+00> : vector<32x64xf32>
    %2 = tpu.matmul %0, %1, %cst {dimension_numbers = #tpu.dot_dimension_numbers<[1], [0], [0], [1], [0, 0, 1, 1], [], []>} : vector<32x16xbf16>, vector<16x64xbf16>, vector<32x64xf32> -> vector<32x64xf32>
    %c0_3 = arith.constant 0 : index
    %c0_4 = arith.constant 0 : index
    %3 = vector.load %arg3[%c0_3, %c0_4] : memref<1x64xf32, #tpu.memory_space<vmem>>, vector<1x64xf32>
    %4 = vector.broadcast %3 : vector<1x64xf32> to vector<32x64xf32>
    %5 = arith.addf %2, %4 : vector<32x64xf32>
    %6 = arith.truncf %5 : vector<32x64xf32> to vector<32x64xbf16>
    %c0_5 = arith.constant 0 : index
    %c0_6 = arith.constant 0 : index
    %7 = vector.load %arg4[%c0_5, %c0_6] : memref<32x64xbf16, #tpu.memory_space<vmem>>, vector<32x64xbf16>
    tpu.vector_store %arg4[%c0_5, %c0_6], %6 {strides = array<i32>} : memref<32x64xbf16, #tpu.memory_space<vmem>>, vector<32x64xbf16>,
    return
  }
  func.func @transform_0(%arg0: i32) -> (i32, i32) {
    %c0_i32 = arith.constant 0 : i32
    %c0_i32_0 = arith.constant 0 : i32
    return %arg0, %c0_i32 : i32, i32
  }
  func.func @transform_1(%arg0: i32) -> (i32, i32) {
    %c0_i32 = arith.constant 0 : i32
    %c0_i32_0 = arith.constant 0 : i32
    %c0_i32_1 = arith.constant 0 : i32
    return %c0_i32, %c0_i32_0 : i32, i32
  }
  func.func @transform_2(%arg0: i32) -> (i32, i32) {
    %c0_i32 = arith.constant 0 : i32
    %c0_i32_0 = arith.constant 0 : i32
    %c0_i32_1 = arith.constant 0 : i32
    return %c0_i32, %c0_i32_0 : i32, i32
  }
  func.func @transform_3(%arg0: i32) -> (i32, i32) {
    %c0_i32 = arith.constant 0 : i32
    %c0_i32_0 = arith.constant 0 : i32
    return %arg0, %c0_i32 : i32, i32
  }
}

module attributes {stable_mosaic.version = 11 : i64} {
  func.func @_conv_kernel(%arg0: i32, %arg1: i32, %arg2: i32, %arg3: memref<1x1x8x144xbf16, #tpu.memory_space<vmem>>, %arg4: memref<1x1x8x144xbf16, #tpu.memory_space<vmem>>, %arg5: memref<1x1x8x144xbf16, #tpu.memory_space<vmem>>, %arg6: memref<3x144x16xbf16, #tpu.memory_space<vmem>>, %arg7: memref<1x16xf32, #tpu.memory_space<vmem>>, %arg8: memref<1x1x8x16xbf16, #tpu.memory_space<vmem>>) attributes {dimension_semantics = [#tpu.dimension_semantics<parallel>, #tpu.dimension_semantics<parallel>, #tpu.dimension_semantics<parallel>], iteration_bounds = array<i64: 2, 2, 2>, scalar_prefetch = 0 : i64, scratch_operands = 0 : i64, tpu.core_type = #tpu.core_type<tc>, window_params = [{transform_indices = @transform_0, window_bounds = array<i64: 1, 1, 8, 144>}, {transform_indices = @transform_1, window_bounds = array<i64: 1, 1, 8, 144>}, {transform_indices = @transform_2, window_bounds = array<i64: 1, 1, 8, 144>}, {pipeline_mode = #tpu.pipeline_mode<synchronous>, transform_indices = @transform_3, window_bounds = array<i64: 3, 144, 16>}, {pipeline_mode = #tpu.pipeline_mode<synchronous>, transform_indices = @transform_4, window_bounds = array<i64: 1, 16>}, {transform_indices = @transform_5, window_bounds = array<i64: 1, 1, 8, 16>}]} {
    %c0 = arith.constant 0 : index
    %c0_0 = arith.constant 0 : index
    %c0_1 = arith.constant 0 : index
    %c0_2 = arith.constant 0 : index
    %0 = vector.load %arg3[%c0, %c0_0, %c0_1, %c0_2] : memref<1x1x8x144xbf16, #tpu.memory_space<vmem>>, vector<1x1x8x144xbf16>
    %1 = vector.shape_cast %0 : vector<1x1x8x144xbf16> to vector<8x144xbf16>
    %c0_3 = arith.constant 0 : index
    %c0_4 = arith.constant 0 : index
    %c0_5 = arith.constant 0 : index
    %2 = vector.load %arg6[%c0_3, %c0_4, %c0_5] : memref<3x144x16xbf16, #tpu.memory_space<vmem>>, vector<1x144x16xbf16>
    %3 = vector.shape_cast %2 : vector<1x144x16xbf16> to vector<144x16xbf16>
    %cst = arith.constant dense<0.000000e+00> : vector<8x16xf32>
    %4 = tpu.matmul %1, %3, %cst {dimension_numbers = #tpu.dot_dimension_numbers<[1], [0], [0], [1], [0, 0, 1, 1], [], []>} : vector<8x144xbf16>, vector<144x16xbf16>, vector<8x16xf32> -> vector<8x16xf32>
    %c0_6 = arith.constant 0 : index
    %c0_7 = arith.constant 0 : index
    %c0_8 = arith.constant 0 : index
    %c0_9 = arith.constant 0 : index
    %5 = vector.load %arg4[%c0_6, %c0_7, %c0_8, %c0_9] : memref<1x1x8x144xbf16, #tpu.memory_space<vmem>>, vector<1x1x8x144xbf16>
    %6 = vector.shape_cast %5 : vector<1x1x8x144xbf16> to vector<8x144xbf16>
    %c1 = arith.constant 1 : index
    %c0_10 = arith.constant 0 : index
    %c0_11 = arith.constant 0 : index
    %7 = vector.load %arg6[%c1, %c0_10, %c0_11] : memref<3x144x16xbf16, #tpu.memory_space<vmem>>, vector<1x144x16xbf16>
    %8 = vector.shape_cast %7 : vector<1x144x16xbf16> to vector<144x16xbf16>
    %cst_12 = arith.constant dense<0.000000e+00> : vector<8x16xf32>
    %9 = tpu.matmul %6, %8, %cst_12 {dimension_numbers = #tpu.dot_dimension_numbers<[1], [0], [0], [1], [0, 0, 1, 1], [], []>} : vector<8x144xbf16>, vector<144x16xbf16>, vector<8x16xf32> -> vector<8x16xf32>
    %10 = arith.addf %4, %9 : vector<8x16xf32>
    %c0_13 = arith.constant 0 : index
    %c0_14 = arith.constant 0 : index
    %c0_15 = arith.constant 0 : index
    %c0_16 = arith.constant 0 : index
    %11 = vector.load %arg5[%c0_13, %c0_14, %c0_15, %c0_16] : memref<1x1x8x144xbf16, #tpu.memory_space<vmem>>, vector<1x1x8x144xbf16>
    %12 = vector.shape_cast %11 : vector<1x1x8x144xbf16> to vector<8x144xbf16>
    %c2 = arith.constant 2 : index
    %c0_17 = arith.constant 0 : index
    %c0_18 = arith.constant 0 : index
    %13 = vector.load %arg6[%c2, %c0_17, %c0_18] : memref<3x144x16xbf16, #tpu.memory_space<vmem>>, vector<1x144x16xbf16>
    %14 = vector.shape_cast %13 : vector<1x144x16xbf16> to vector<144x16xbf16>
    %cst_19 = arith.constant dense<0.000000e+00> : vector<8x16xf32>
    %15 = tpu.matmul %12, %14, %cst_19 {dimension_numbers = #tpu.dot_dimension_numbers<[1], [0], [0], [1], [0, 0, 1, 1], [], []>} : vector<8x144xbf16>, vector<144x16xbf16>, vector<8x16xf32> -> vector<8x16xf32>
    %16 = arith.addf %10, %15 : vector<8x16xf32>
    %c0_20 = arith.constant 0 : index
    %c0_21 = arith.constant 0 : index
    %17 = vector.load %arg7[%c0_20, %c0_21] : memref<1x16xf32, #tpu.memory_space<vmem>>, vector<1x16xf32>
    %18 = vector.broadcast %17 : vector<1x16xf32> to vector<8x16xf32>
    %19 = arith.addf %16, %18 : vector<8x16xf32>
    %cst_22 = arith.constant 0.000000e+00 : f32
    %20 = vector.broadcast %cst_22 : f32 to vector<8x16xf32>
    %21 = arith.maximumf %19, %20 : vector<8x16xf32>
    %22 = arith.truncf %21 : vector<8x16xf32> to vector<8x16xbf16>
    %c0_23 = arith.constant 0 : index
    %c0_24 = arith.constant 0 : index
    %c0_25 = arith.constant 0 : index
    %c0_26 = arith.constant 0 : index
    %23 = vector.load %arg8[%c0_23, %c0_24, %c0_25, %c0_26] : memref<1x1x8x16xbf16, #tpu.memory_space<vmem>>, vector<1x1x8x16xbf16>
    %24 = vector.shape_cast %23 : vector<1x1x8x16xbf16> to vector<8x16xbf16>
    %25 = vector.shape_cast %22 : vector<8x16xbf16> to vector<1x1x8x16xbf16>
    tpu.vector_store %arg8[%c0_23, %c0_24, %c0_25, %c0_26], %25 {strides = array<i32>} : memref<1x1x8x16xbf16, #tpu.memory_space<vmem>>, vector<1x1x8x16xbf16>,
    return
  }
  func.func @transform_0(%arg0: i32, %arg1: i32, %arg2: i32) -> (i32, i32, i32, i32) {
    %c0_i32 = arith.constant 0 : i32
    %0 = arith.addi %arg1, %c0_i32 : i32
    %c0_i32_0 = arith.constant 0 : i32
    %c0_i32_1 = arith.constant 0 : i32
    return %arg0, %0, %arg2, %c0_i32_0 : i32, i32, i32, i32
  }
  func.func @transform_1(%arg0: i32, %arg1: i32, %arg2: i32) -> (i32, i32, i32, i32) {
    %c1_i32 = arith.constant 1 : i32
    %0 = arith.addi %arg1, %c1_i32 : i32
    %c0_i32 = arith.constant 0 : i32
    %c0_i32_0 = arith.constant 0 : i32
    return %arg0, %0, %arg2, %c0_i32 : i32, i32, i32, i32
  }
  func.func @transform_2(%arg0: i32, %arg1: i32, %arg2: i32) -> (i32, i32, i32, i32) {
    %c2_i32 = arith.constant 2 : i32
    %0 = arith.addi %arg1, %c2_i32 : i32
    %c0_i32 = arith.constant 0 : i32
    %c0_i32_0 = arith.constant 0 : i32
    return %arg0, %0, %arg2, %c0_i32 : i32, i32, i32, i32
  }
  func.func @transform_3(%arg0: i32, %arg1: i32, %arg2: i32) -> (i32, i32, i32) {
    %c0_i32 = arith.constant 0 : i32
    %c0_i32_0 = arith.constant 0 : i32
    %c0_i32_1 = arith.constant 0 : i32
    %c0_i32_2 = arith.constant 0 : i32
    return %c0_i32, %c0_i32_0, %c0_i32_1 : i32, i32, i32
  }
  func.func @transform_4(%arg0: i32, %arg1: i32, %arg2: i32) -> (i32, i32) {
    %c0_i32 = arith.constant 0 : i32
    %c0_i32_0 = arith.constant 0 : i32
    %c0_i32_1 = arith.constant 0 : i32
    return %c0_i32, %c0_i32_0 : i32, i32
  }
  func.func @transform_5(%arg0: i32, %arg1: i32, %arg2: i32) -> (i32, i32, i32, i32) {
    %c0_i32 = arith.constant 0 : i32
    %c0_i32_0 = arith.constant 0 : i32
    return %arg0, %arg1, %arg2, %c0_i32 : i32, i32, i32, i32
  }
}

module attributes {stable_mosaic.version = 11 : i64} {
  func.func @_conv_kernel(%arg0: i32, %arg1: i32, %arg2: i32, %arg3: memref<1x1x32x144xbf16, #tpu.memory_space<vmem>>, %arg4: memref<1x1x32x144xbf16, #tpu.memory_space<vmem>>, %arg5: memref<1x1x32x144xbf16, #tpu.memory_space<vmem>>, %arg6: memref<3x144x8xbf16, #tpu.memory_space<vmem>>, %arg7: memref<1x8xf32, #tpu.memory_space<vmem>>, %arg8: memref<1x1x32x8xbf16, #tpu.memory_space<vmem>>) attributes {dimension_semantics = [#tpu.dimension_semantics<parallel>, #tpu.dimension_semantics<parallel>, #tpu.dimension_semantics<parallel>], iteration_bounds = array<i64: 2, 4, 2>, scalar_prefetch = 0 : i64, scratch_operands = 0 : i64, tpu.core_type = #tpu.core_type<tc>, window_params = [{transform_indices = @transform_0, window_bounds = array<i64: 1, 1, 32, 144>}, {transform_indices = @transform_1, window_bounds = array<i64: 1, 1, 32, 144>}, {transform_indices = @transform_2, window_bounds = array<i64: 1, 1, 32, 144>}, {pipeline_mode = #tpu.pipeline_mode<synchronous>, transform_indices = @transform_3, window_bounds = array<i64: 3, 144, 8>}, {pipeline_mode = #tpu.pipeline_mode<synchronous>, transform_indices = @transform_4, window_bounds = array<i64: 1, 8>}, {transform_indices = @transform_5, window_bounds = array<i64: 1, 1, 32, 8>}]} {
    %c0 = arith.constant 0 : index
    %c0_0 = arith.constant 0 : index
    %c0_1 = arith.constant 0 : index
    %c0_2 = arith.constant 0 : index
    %0 = vector.load %arg3[%c0, %c0_0, %c0_1, %c0_2] : memref<1x1x32x144xbf16, #tpu.memory_space<vmem>>, vector<1x1x32x144xbf16>
    %1 = vector.shape_cast %0 : vector<1x1x32x144xbf16> to vector<32x144xbf16>
    %c0_3 = arith.constant 0 : index
    %c0_4 = arith.constant 0 : index
    %c0_5 = arith.constant 0 : index
    %2 = vector.load %arg6[%c0_3, %c0_4, %c0_5] : memref<3x144x8xbf16, #tpu.memory_space<vmem>>, vector<1x144x8xbf16>
    %3 = vector.shape_cast %2 : vector<1x144x8xbf16> to vector<144x8xbf16>
    %cst = arith.constant dense<0.000000e+00> : vector<32x8xf32>
    %4 = tpu.matmul %1, %3, %cst {dimension_numbers = #tpu.dot_dimension_numbers<[1], [0], [0], [1], [0, 0, 1, 1], [], []>} : vector<32x144xbf16>, vector<144x8xbf16>, vector<32x8xf32> -> vector<32x8xf32>
    %c0_6 = arith.constant 0 : index
    %c0_7 = arith.constant 0 : index
    %c0_8 = arith.constant 0 : index
    %c0_9 = arith.constant 0 : index
    %5 = vector.load %arg4[%c0_6, %c0_7, %c0_8, %c0_9] : memref<1x1x32x144xbf16, #tpu.memory_space<vmem>>, vector<1x1x32x144xbf16>
    %6 = vector.shape_cast %5 : vector<1x1x32x144xbf16> to vector<32x144xbf16>
    %c1 = arith.constant 1 : index
    %c0_10 = arith.constant 0 : index
    %c0_11 = arith.constant 0 : index
    %7 = vector.load %arg6[%c1, %c0_10, %c0_11] : memref<3x144x8xbf16, #tpu.memory_space<vmem>>, vector<1x144x8xbf16>
    %8 = vector.shape_cast %7 : vector<1x144x8xbf16> to vector<144x8xbf16>
    %cst_12 = arith.constant dense<0.000000e+00> : vector<32x8xf32>
    %9 = tpu.matmul %6, %8, %cst_12 {dimension_numbers = #tpu.dot_dimension_numbers<[1], [0], [0], [1], [0, 0, 1, 1], [], []>} : vector<32x144xbf16>, vector<144x8xbf16>, vector<32x8xf32> -> vector<32x8xf32>
    %10 = arith.addf %4, %9 : vector<32x8xf32>
    %c0_13 = arith.constant 0 : index
    %c0_14 = arith.constant 0 : index
    %c0_15 = arith.constant 0 : index
    %c0_16 = arith.constant 0 : index
    %11 = vector.load %arg5[%c0_13, %c0_14, %c0_15, %c0_16] : memref<1x1x32x144xbf16, #tpu.memory_space<vmem>>, vector<1x1x32x144xbf16>
    %12 = vector.shape_cast %11 : vector<1x1x32x144xbf16> to vector<32x144xbf16>
    %c2 = arith.constant 2 : index
    %c0_17 = arith.constant 0 : index
    %c0_18 = arith.constant 0 : index
    %13 = vector.load %arg6[%c2, %c0_17, %c0_18] : memref<3x144x8xbf16, #tpu.memory_space<vmem>>, vector<1x144x8xbf16>
    %14 = vector.shape_cast %13 : vector<1x144x8xbf16> to vector<144x8xbf16>
    %cst_19 = arith.constant dense<0.000000e+00> : vector<32x8xf32>
    %15 = tpu.matmul %12, %14, %cst_19 {dimension_numbers = #tpu.dot_dimension_numbers<[1], [0], [0], [1], [0, 0, 1, 1], [], []>} : vector<32x144xbf16>, vector<144x8xbf16>, vector<32x8xf32> -> vector<32x8xf32>
    %16 = arith.addf %10, %15 : vector<32x8xf32>
    %c0_20 = arith.constant 0 : index
    %c0_21 = arith.constant 0 : index
    %17 = vector.load %arg7[%c0_20, %c0_21] : memref<1x8xf32, #tpu.memory_space<vmem>>, vector<1x8xf32>
    %18 = vector.broadcast %17 : vector<1x8xf32> to vector<32x8xf32>
    %19 = arith.addf %16, %18 : vector<32x8xf32>
    %cst_22 = arith.constant 0.000000e+00 : f32
    %20 = vector.broadcast %cst_22 : f32 to vector<32x8xf32>
    %21 = arith.maximumf %19, %20 : vector<32x8xf32>
    %22 = arith.truncf %21 : vector<32x8xf32> to vector<32x8xbf16>
    %c0_23 = arith.constant 0 : index
    %c0_24 = arith.constant 0 : index
    %c0_25 = arith.constant 0 : index
    %c0_26 = arith.constant 0 : index
    %23 = vector.load %arg8[%c0_23, %c0_24, %c0_25, %c0_26] : memref<1x1x32x8xbf16, #tpu.memory_space<vmem>>, vector<1x1x32x8xbf16>
    %24 = vector.shape_cast %23 : vector<1x1x32x8xbf16> to vector<32x8xbf16>
    %25 = vector.shape_cast %22 : vector<32x8xbf16> to vector<1x1x32x8xbf16>
    tpu.vector_store %arg8[%c0_23, %c0_24, %c0_25, %c0_26], %25 {strides = array<i32>} : memref<1x1x32x8xbf16, #tpu.memory_space<vmem>>, vector<1x1x32x8xbf16>,
    return
  }
  func.func @transform_0(%arg0: i32, %arg1: i32, %arg2: i32) -> (i32, i32, i32, i32) {
    %c0_i32 = arith.constant 0 : i32
    %0 = arith.addi %arg1, %c0_i32 : i32
    %c0_i32_0 = arith.constant 0 : i32
    %c0_i32_1 = arith.constant 0 : i32
    return %arg0, %0, %arg2, %c0_i32_0 : i32, i32, i32, i32
  }
  func.func @transform_1(%arg0: i32, %arg1: i32, %arg2: i32) -> (i32, i32, i32, i32) {
    %c1_i32 = arith.constant 1 : i32
    %0 = arith.addi %arg1, %c1_i32 : i32
    %c0_i32 = arith.constant 0 : i32
    %c0_i32_0 = arith.constant 0 : i32
    return %arg0, %0, %arg2, %c0_i32 : i32, i32, i32, i32
  }
  func.func @transform_2(%arg0: i32, %arg1: i32, %arg2: i32) -> (i32, i32, i32, i32) {
    %c2_i32 = arith.constant 2 : i32
    %0 = arith.addi %arg1, %c2_i32 : i32
    %c0_i32 = arith.constant 0 : i32
    %c0_i32_0 = arith.constant 0 : i32
    return %arg0, %0, %arg2, %c0_i32 : i32, i32, i32, i32
  }
  func.func @transform_3(%arg0: i32, %arg1: i32, %arg2: i32) -> (i32, i32, i32) {
    %c0_i32 = arith.constant 0 : i32
    %c0_i32_0 = arith.constant 0 : i32
    %c0_i32_1 = arith.constant 0 : i32
    %c0_i32_2 = arith.constant 0 : i32
    return %c0_i32, %c0_i32_0, %c0_i32_1 : i32, i32, i32
  }
  func.func @transform_4(%arg0: i32, %arg1: i32, %arg2: i32) -> (i32, i32) {
    %c0_i32 = arith.constant 0 : i32
    %c0_i32_0 = arith.constant 0 : i32
    %c0_i32_1 = arith.constant 0 : i32
    return %c0_i32, %c0_i32_0 : i32, i32
  }
  func.func @transform_5(%arg0: i32, %arg1: i32, %arg2: i32) -> (i32, i32, i32, i32) {
    %c0_i32 = arith.constant 0 : i32
    %c0_i32_0 = arith.constant 0 : i32
    return %arg0, %arg1, %arg2, %c0_i32 : i32, i32, i32, i32
  }
}

module attributes {stable_mosaic.version = 11 : i64} {
  func.func @_matmul_bias_kernel(%arg0: i32, %arg1: memref<256x8xbf16, #tpu.memory_space<vmem>>, %arg2: memref<8x32xbf16, #tpu.memory_space<vmem>>, %arg3: memref<1x32xf32, #tpu.memory_space<vmem>>, %arg4: memref<256x32xbf16, #tpu.memory_space<vmem>>) attributes {dimension_semantics = [#tpu.dimension_semantics<parallel>], iteration_bounds = array<i64: 2>, scalar_prefetch = 0 : i64, scratch_operands = 0 : i64, tpu.core_type = #tpu.core_type<tc>, window_params = [{transform_indices = @transform_0, window_bounds = array<i64: 256, 8>}, {pipeline_mode = #tpu.pipeline_mode<synchronous>, transform_indices = @transform_1, window_bounds = array<i64: 8, 32>}, {pipeline_mode = #tpu.pipeline_mode<synchronous>, transform_indices = @transform_2, window_bounds = array<i64: 1, 32>}, {transform_indices = @transform_3, window_bounds = array<i64: 256, 32>}]} {
    %c0 = arith.constant 0 : index
    %c0_0 = arith.constant 0 : index
    %0 = vector.load %arg1[%c0, %c0_0] : memref<256x8xbf16, #tpu.memory_space<vmem>>, vector<256x8xbf16>
    %c0_1 = arith.constant 0 : index
    %c0_2 = arith.constant 0 : index
    %1 = vector.load %arg2[%c0_1, %c0_2] : memref<8x32xbf16, #tpu.memory_space<vmem>>, vector<8x32xbf16>
    %cst = arith.constant dense<0.000000e+00> : vector<256x32xf32>
    %2 = tpu.matmul %0, %1, %cst {dimension_numbers = #tpu.dot_dimension_numbers<[1], [0], [0], [1], [0, 0, 1, 1], [], []>} : vector<256x8xbf16>, vector<8x32xbf16>, vector<256x32xf32> -> vector<256x32xf32>
    %c0_3 = arith.constant 0 : index
    %c0_4 = arith.constant 0 : index
    %3 = vector.load %arg3[%c0_3, %c0_4] : memref<1x32xf32, #tpu.memory_space<vmem>>, vector<1x32xf32>
    %4 = vector.broadcast %3 : vector<1x32xf32> to vector<256x32xf32>
    %5 = arith.addf %2, %4 : vector<256x32xf32>
    %6 = arith.truncf %5 : vector<256x32xf32> to vector<256x32xbf16>
    %c0_5 = arith.constant 0 : index
    %c0_6 = arith.constant 0 : index
    %7 = vector.load %arg4[%c0_5, %c0_6] : memref<256x32xbf16, #tpu.memory_space<vmem>>, vector<256x32xbf16>
    tpu.vector_store %arg4[%c0_5, %c0_6], %6 {strides = array<i32>} : memref<256x32xbf16, #tpu.memory_space<vmem>>, vector<256x32xbf16>,
    return
  }
  func.func @transform_0(%arg0: i32) -> (i32, i32) {
    %c0_i32 = arith.constant 0 : i32
    %c0_i32_0 = arith.constant 0 : i32
    return %arg0, %c0_i32 : i32, i32
  }
  func.func @transform_1(%arg0: i32) -> (i32, i32) {
    %c0_i32 = arith.constant 0 : i32
    %c0_i32_0 = arith.constant 0 : i32
    %c0_i32_1 = arith.constant 0 : i32
    return %c0_i32, %c0_i32_0 : i32, i32
  }
  func.func @transform_2(%arg0: i32) -> (i32, i32) {
    %c0_i32 = arith.constant 0 : i32
    %c0_i32_0 = arith.constant 0 : i32
    %c0_i32_1 = arith.constant 0 : i32
    return %c0_i32, %c0_i32_0 : i32, i32
  }
  func.func @transform_3(%arg0: i32) -> (i32, i32) {
    %c0_i32 = arith.constant 0 : i32
    %c0_i32_0 = arith.constant 0 : i32
    return %arg0, %c0_i32 : i32, i32
  }
}

module attributes {stable_mosaic.version = 11 : i64} {
  func.func @_conv_kernel(%arg0: i32, %arg1: i32, %arg2: i32, %arg3: memref<1x1x128x72xbf16, #tpu.memory_space<vmem>>, %arg4: memref<1x1x128x72xbf16, #tpu.memory_space<vmem>>, %arg5: memref<1x1x128x72xbf16, #tpu.memory_space<vmem>>, %arg6: memref<3x72x4xbf16, #tpu.memory_space<vmem>>, %arg7: memref<1x4xf32, #tpu.memory_space<vmem>>, %arg8: memref<1x1x128x4xbf16, #tpu.memory_space<vmem>>) attributes {dimension_semantics = [#tpu.dimension_semantics<parallel>, #tpu.dimension_semantics<parallel>, #tpu.dimension_semantics<parallel>], iteration_bounds = array<i64: 2, 8, 2>, scalar_prefetch = 0 : i64, scratch_operands = 0 : i64, tpu.core_type = #tpu.core_type<tc>, window_params = [{transform_indices = @transform_0, window_bounds = array<i64: 1, 1, 128, 72>}, {transform_indices = @transform_1, window_bounds = array<i64: 1, 1, 128, 72>}, {transform_indices = @transform_2, window_bounds = array<i64: 1, 1, 128, 72>}, {pipeline_mode = #tpu.pipeline_mode<synchronous>, transform_indices = @transform_3, window_bounds = array<i64: 3, 72, 4>}, {pipeline_mode = #tpu.pipeline_mode<synchronous>, transform_indices = @transform_4, window_bounds = array<i64: 1, 4>}, {transform_indices = @transform_5, window_bounds = array<i64: 1, 1, 128, 4>}]} {
    %c0 = arith.constant 0 : index
    %c0_0 = arith.constant 0 : index
    %c0_1 = arith.constant 0 : index
    %c0_2 = arith.constant 0 : index
    %0 = vector.load %arg3[%c0, %c0_0, %c0_1, %c0_2] : memref<1x1x128x72xbf16, #tpu.memory_space<vmem>>, vector<1x1x128x72xbf16>
    %1 = vector.shape_cast %0 : vector<1x1x128x72xbf16> to vector<128x72xbf16>
    %c0_3 = arith.constant 0 : index
    %c0_4 = arith.constant 0 : index
    %c0_5 = arith.constant 0 : index
    %2 = vector.load %arg6[%c0_3, %c0_4, %c0_5] : memref<3x72x4xbf16, #tpu.memory_space<vmem>>, vector<1x72x4xbf16>
    %3 = vector.shape_cast %2 : vector<1x72x4xbf16> to vector<72x4xbf16>
    %cst = arith.constant dense<0.000000e+00> : vector<128x4xf32>
    %4 = tpu.matmul %1, %3, %cst {dimension_numbers = #tpu.dot_dimension_numbers<[1], [0], [0], [1], [0, 0, 1, 1], [], []>} : vector<128x72xbf16>, vector<72x4xbf16>, vector<128x4xf32> -> vector<128x4xf32>
    %c0_6 = arith.constant 0 : index
    %c0_7 = arith.constant 0 : index
    %c0_8 = arith.constant 0 : index
    %c0_9 = arith.constant 0 : index
    %5 = vector.load %arg4[%c0_6, %c0_7, %c0_8, %c0_9] : memref<1x1x128x72xbf16, #tpu.memory_space<vmem>>, vector<1x1x128x72xbf16>
    %6 = vector.shape_cast %5 : vector<1x1x128x72xbf16> to vector<128x72xbf16>
    %c1 = arith.constant 1 : index
    %c0_10 = arith.constant 0 : index
    %c0_11 = arith.constant 0 : index
    %7 = vector.load %arg6[%c1, %c0_10, %c0_11] : memref<3x72x4xbf16, #tpu.memory_space<vmem>>, vector<1x72x4xbf16>
    %8 = vector.shape_cast %7 : vector<1x72x4xbf16> to vector<72x4xbf16>
    %cst_12 = arith.constant dense<0.000000e+00> : vector<128x4xf32>
    %9 = tpu.matmul %6, %8, %cst_12 {dimension_numbers = #tpu.dot_dimension_numbers<[1], [0], [0], [1], [0, 0, 1, 1], [], []>} : vector<128x72xbf16>, vector<72x4xbf16>, vector<128x4xf32> -> vector<128x4xf32>
    %10 = arith.addf %4, %9 : vector<128x4xf32>
    %c0_13 = arith.constant 0 : index
    %c0_14 = arith.constant 0 : index
    %c0_15 = arith.constant 0 : index
    %c0_16 = arith.constant 0 : index
    %11 = vector.load %arg5[%c0_13, %c0_14, %c0_15, %c0_16] : memref<1x1x128x72xbf16, #tpu.memory_space<vmem>>, vector<1x1x128x72xbf16>
    %12 = vector.shape_cast %11 : vector<1x1x128x72xbf16> to vector<128x72xbf16>
    %c2 = arith.constant 2 : index
    %c0_17 = arith.constant 0 : index
    %c0_18 = arith.constant 0 : index
    %13 = vector.load %arg6[%c2, %c0_17, %c0_18] : memref<3x72x4xbf16, #tpu.memory_space<vmem>>, vector<1x72x4xbf16>
    %14 = vector.shape_cast %13 : vector<1x72x4xbf16> to vector<72x4xbf16>
    %cst_19 = arith.constant dense<0.000000e+00> : vector<128x4xf32>
    %15 = tpu.matmul %12, %14, %cst_19 {dimension_numbers = #tpu.dot_dimension_numbers<[1], [0], [0], [1], [0, 0, 1, 1], [], []>} : vector<128x72xbf16>, vector<72x4xbf16>, vector<128x4xf32> -> vector<128x4xf32>
    %16 = arith.addf %10, %15 : vector<128x4xf32>
    %c0_20 = arith.constant 0 : index
    %c0_21 = arith.constant 0 : index
    %17 = vector.load %arg7[%c0_20, %c0_21] : memref<1x4xf32, #tpu.memory_space<vmem>>, vector<1x4xf32>
    %18 = vector.broadcast %17 : vector<1x4xf32> to vector<128x4xf32>
    %19 = arith.addf %16, %18 : vector<128x4xf32>
    %cst_22 = arith.constant 0.000000e+00 : f32
    %20 = vector.broadcast %cst_22 : f32 to vector<128x4xf32>
    %21 = arith.maximumf %19, %20 : vector<128x4xf32>
    %22 = arith.truncf %21 : vector<128x4xf32> to vector<128x4xbf16>
    %c0_23 = arith.constant 0 : index
    %c0_24 = arith.constant 0 : index
    %c0_25 = arith.constant 0 : index
    %c0_26 = arith.constant 0 : index
    %23 = vector.load %arg8[%c0_23, %c0_24, %c0_25, %c0_26] : memref<1x1x128x4xbf16, #tpu.memory_space<vmem>>, vector<1x1x128x4xbf16>
    %24 = vector.shape_cast %23 : vector<1x1x128x4xbf16> to vector<128x4xbf16>
    %25 = vector.shape_cast %22 : vector<128x4xbf16> to vector<1x1x128x4xbf16>
    tpu.vector_store %arg8[%c0_23, %c0_24, %c0_25, %c0_26], %25 {strides = array<i32>} : memref<1x1x128x4xbf16, #tpu.memory_space<vmem>>, vector<1x1x128x4xbf16>,
    return
  }
  func.func @transform_0(%arg0: i32, %arg1: i32, %arg2: i32) -> (i32, i32, i32, i32) {
    %c0_i32 = arith.constant 0 : i32
    %0 = arith.addi %arg1, %c0_i32 : i32
    %c0_i32_0 = arith.constant 0 : i32
    %c0_i32_1 = arith.constant 0 : i32
    return %arg0, %0, %arg2, %c0_i32_0 : i32, i32, i32, i32
  }
  func.func @transform_1(%arg0: i32, %arg1: i32, %arg2: i32) -> (i32, i32, i32, i32) {
    %c1_i32 = arith.constant 1 : i32
    %0 = arith.addi %arg1, %c1_i32 : i32
    %c0_i32 = arith.constant 0 : i32
    %c0_i32_0 = arith.constant 0 : i32
    return %arg0, %0, %arg2, %c0_i32 : i32, i32, i32, i32
  }
  func.func @transform_2(%arg0: i32, %arg1: i32, %arg2: i32) -> (i32, i32, i32, i32) {
    %c2_i32 = arith.constant 2 : i32
    %0 = arith.addi %arg1, %c2_i32 : i32
    %c0_i32 = arith.constant 0 : i32
    %c0_i32_0 = arith.constant 0 : i32
    return %arg0, %0, %arg2, %c0_i32 : i32, i32, i32, i32
  }
  func.func @transform_3(%arg0: i32, %arg1: i32, %arg2: i32) -> (i32, i32, i32) {
    %c0_i32 = arith.constant 0 : i32
    %c0_i32_0 = arith.constant 0 : i32
    %c0_i32_1 = arith.constant 0 : i32
    %c0_i32_2 = arith.constant 0 : i32
    return %c0_i32, %c0_i32_0, %c0_i32_1 : i32, i32, i32
  }
  func.func @transform_4(%arg0: i32, %arg1: i32, %arg2: i32) -> (i32, i32) {
    %c0_i32 = arith.constant 0 : i32
    %c0_i32_0 = arith.constant 0 : i32
    %c0_i32_1 = arith.constant 0 : i32
    return %c0_i32, %c0_i32_0 : i32, i32
  }
  func.func @transform_5(%arg0: i32, %arg1: i32, %arg2: i32) -> (i32, i32, i32, i32) {
    %c0_i32 = arith.constant 0 : i32
    %c0_i32_0 = arith.constant 0 : i32
    return %arg0, %arg1, %arg2, %c0_i32 : i32, i32, i32, i32
  }
}

module attributes {stable_mosaic.version = 11 : i64} {
  func.func @_matmul_bias_kernel(%arg0: i32, %arg1: memref<1024x4xbf16, #tpu.memory_space<vmem>>, %arg2: memref<4x1xbf16, #tpu.memory_space<vmem>>, %arg3: memref<1x1xf32, #tpu.memory_space<vmem>>, %arg4: memref<1024x1xf32, #tpu.memory_space<vmem>>) attributes {dimension_semantics = [#tpu.dimension_semantics<parallel>], iteration_bounds = array<i64: 4>, scalar_prefetch = 0 : i64, scratch_operands = 0 : i64, tpu.core_type = #tpu.core_type<tc>, window_params = [{transform_indices = @transform_0, window_bounds = array<i64: 1024, 4>}, {pipeline_mode = #tpu.pipeline_mode<synchronous>, transform_indices = @transform_1, window_bounds = array<i64: 4, 1>}, {pipeline_mode = #tpu.pipeline_mode<synchronous>, transform_indices = @transform_2, window_bounds = array<i64: 1, 1>}, {transform_indices = @transform_3, window_bounds = array<i64: 1024, 1>}]} {
    %c0 = arith.constant 0 : index
    %c0_0 = arith.constant 0 : index
    %0 = vector.load %arg1[%c0, %c0_0] : memref<1024x4xbf16, #tpu.memory_space<vmem>>, vector<1024x4xbf16>
    %c0_1 = arith.constant 0 : index
    %c0_2 = arith.constant 0 : index
    %1 = vector.load %arg2[%c0_1, %c0_2] : memref<4x1xbf16, #tpu.memory_space<vmem>>, vector<4x1xbf16>
    %cst = arith.constant dense<0.000000e+00> : vector<1024x1xf32>
    %2 = tpu.matmul %0, %1, %cst {dimension_numbers = #tpu.dot_dimension_numbers<[1], [0], [0], [1], [0, 0, 1, 1], [], []>} : vector<1024x4xbf16>, vector<4x1xbf16>, vector<1024x1xf32> -> vector<1024x1xf32>
    %c0_3 = arith.constant 0 : index
    %c0_4 = arith.constant 0 : index
    %3 = vector.load %arg3[%c0_3, %c0_4] : memref<1x1xf32, #tpu.memory_space<vmem>>, vector<1x1xf32>
    %4 = vector.broadcast %3 : vector<1x1xf32> to vector<1024x1xf32>
    %5 = arith.addf %2, %4 : vector<1024x1xf32>
    %c0_5 = arith.constant 0 : index
    %c0_6 = arith.constant 0 : index
    %6 = vector.load %arg4[%c0_5, %c0_6] : memref<1024x1xf32, #tpu.memory_space<vmem>>, vector<1024x1xf32>
    tpu.vector_store %arg4[%c0_5, %c0_6], %5 {strides = array<i32>} : memref<1024x1xf32, #tpu.memory_space<vmem>>, vector<1024x1xf32>,
    return
  }
  func.func @transform_0(%arg0: i32) -> (i32, i32) {
    %c0_i32 = arith.constant 0 : i32
    %c0_i32_0 = arith.constant 0 : i32
    return %arg0, %c0_i32 : i32, i32
  }
  func.func @transform_1(%arg0: i32) -> (i32, i32) {
    %c0_i32 = arith.constant 0 : i32
    %c0_i32_0 = arith.constant 0 : i32
    %c0_i32_1 = arith.constant 0 : i32
    return %c0_i32, %c0_i32_0 : i32, i32
  }
  func.func @transform_2(%arg0: i32) -> (i32, i32) {
    %c0_i32 = arith.constant 0 : i32
    %c0_i32_0 = arith.constant 0 : i32
    %c0_i32_1 = arith.constant 0 : i32
    return %c0_i32, %c0_i32_0 : i32, i32
  }
  func.func @transform_3(%arg0: i32) -> (i32, i32) {
    %c0_i32 = arith.constant 0 : i32
    %c0_i32_0 = arith.constant 0 : i32
    return %arg0, %c0_i32 : i32, i32
  }
}

module attributes {stable_mosaic.version = 11 : i64} {
  func.func @_left_matmul_kernel(%arg0: i32, %arg1: memref<6x8xf32, #tpu.memory_space<vmem>>, %arg2: memref<1x8x256xf32, #tpu.memory_space<vmem>>, %arg3: memref<1x6x256xf32, #tpu.memory_space<vmem>>) attributes {dimension_semantics = [#tpu.dimension_semantics<parallel>], iteration_bounds = array<i64: 2>, scalar_prefetch = 0 : i64, scratch_operands = 0 : i64, tpu.core_type = #tpu.core_type<tc>, window_params = [{pipeline_mode = #tpu.pipeline_mode<synchronous>, transform_indices = @transform_0, window_bounds = array<i64: 6, 8>}, {transform_indices = @transform_1, window_bounds = array<i64: 1, 8, 256>}, {transform_indices = @transform_2, window_bounds = array<i64: 1, 6, 256>}]} {
    %c0 = arith.constant 0 : index
    %c0_0 = arith.constant 0 : index
    %0 = vector.load %arg1[%c0, %c0_0] : memref<6x8xf32, #tpu.memory_space<vmem>>, vector<6x8xf32>
    %c0_1 = arith.constant 0 : index
    %c0_2 = arith.constant 0 : index
    %c0_3 = arith.constant 0 : index
    %1 = vector.load %arg2[%c0_1, %c0_2, %c0_3] : memref<1x8x256xf32, #tpu.memory_space<vmem>>, vector<1x8x256xf32>
    %2 = vector.shape_cast %1 : vector<1x8x256xf32> to vector<8x256xf32>
    %cst = arith.constant dense<0.000000e+00> : vector<6x256xf32>
    %3 = tpu.matmul %0, %2, %cst {dimension_numbers = #tpu.dot_dimension_numbers<[1], [0], [0], [1], [0, 0, 1, 1], [], []>} : vector<6x8xf32>, vector<8x256xf32>, vector<6x256xf32> -> vector<6x256xf32>
    %c0_4 = arith.constant 0 : index
    %c0_5 = arith.constant 0 : index
    %c0_6 = arith.constant 0 : index
    %4 = vector.load %arg3[%c0_4, %c0_5, %c0_6] : memref<1x6x256xf32, #tpu.memory_space<vmem>>, vector<1x6x256xf32>
    %5 = vector.shape_cast %4 : vector<1x6x256xf32> to vector<6x256xf32>
    %6 = vector.shape_cast %3 : vector<6x256xf32> to vector<1x6x256xf32>
    tpu.vector_store %arg3[%c0_4, %c0_5, %c0_6], %6 {strides = array<i32>} : memref<1x6x256xf32, #tpu.memory_space<vmem>>, vector<1x6x256xf32>,
    return
  }
  func.func @transform_0(%arg0: i32) -> (i32, i32) {
    %c0_i32 = arith.constant 0 : i32
    %c0_i32_0 = arith.constant 0 : i32
    %c0_i32_1 = arith.constant 0 : i32
    return %c0_i32, %c0_i32_0 : i32, i32
  }
  func.func @transform_1(%arg0: i32) -> (i32, i32, i32) {
    %c0_i32 = arith.constant 0 : i32
    %c0_i32_0 = arith.constant 0 : i32
    %c0_i32_1 = arith.constant 0 : i32
    return %arg0, %c0_i32, %c0_i32_0 : i32, i32, i32
  }
  func.func @transform_2(%arg0: i32) -> (i32, i32, i32) {
    %c0_i32 = arith.constant 0 : i32
    %c0_i32_0 = arith.constant 0 : i32
    %c0_i32_1 = arith.constant 0 : i32
    return %arg0, %c0_i32, %c0_i32_0 : i32, i32, i32
  }
}

module attributes {stable_mosaic.version = 11 : i64} {
  func.func @_left_matmul_kernel(%arg0: i32, %arg1: memref<20x16xf32, #tpu.memory_space<vmem>>, %arg2: memref<1x16x16xf32, #tpu.memory_space<vmem>>, %arg3: memref<1x20x16xf32, #tpu.memory_space<vmem>>) attributes {dimension_semantics = [#tpu.dimension_semantics<parallel>], iteration_bounds = array<i64: 12>, scalar_prefetch = 0 : i64, scratch_operands = 0 : i64, tpu.core_type = #tpu.core_type<tc>, window_params = [{pipeline_mode = #tpu.pipeline_mode<synchronous>, transform_indices = @transform_0, window_bounds = array<i64: 20, 16>}, {transform_indices = @transform_1, window_bounds = array<i64: 1, 16, 16>}, {transform_indices = @transform_2, window_bounds = array<i64: 1, 20, 16>}]} {
    %c0 = arith.constant 0 : index
    %c0_0 = arith.constant 0 : index
    %0 = vector.load %arg1[%c0, %c0_0] : memref<20x16xf32, #tpu.memory_space<vmem>>, vector<20x16xf32>
    %c0_1 = arith.constant 0 : index
    %c0_2 = arith.constant 0 : index
    %c0_3 = arith.constant 0 : index
    %1 = vector.load %arg2[%c0_1, %c0_2, %c0_3] : memref<1x16x16xf32, #tpu.memory_space<vmem>>, vector<1x16x16xf32>
    %2 = vector.shape_cast %1 : vector<1x16x16xf32> to vector<16x16xf32>
    %cst = arith.constant dense<0.000000e+00> : vector<20x16xf32>
    %3 = tpu.matmul %0, %2, %cst {dimension_numbers = #tpu.dot_dimension_numbers<[1], [0], [0], [1], [0, 0, 1, 1], [], []>} : vector<20x16xf32>, vector<16x16xf32>, vector<20x16xf32> -> vector<20x16xf32>
    %c0_4 = arith.constant 0 : index
    %c0_5 = arith.constant 0 : index
    %c0_6 = arith.constant 0 : index
    %4 = vector.load %arg3[%c0_4, %c0_5, %c0_6] : memref<1x20x16xf32, #tpu.memory_space<vmem>>, vector<1x20x16xf32>
    %5 = vector.shape_cast %4 : vector<1x20x16xf32> to vector<20x16xf32>
    %6 = vector.shape_cast %3 : vector<20x16xf32> to vector<1x20x16xf32>
    tpu.vector_store %arg3[%c0_4, %c0_5, %c0_6], %6 {strides = array<i32>} : memref<1x20x16xf32, #tpu.memory_space<vmem>>, vector<1x20x16xf32>,
    return
  }
  func.func @transform_0(%arg0: i32) -> (i32, i32) {
    %c0_i32 = arith.constant 0 : i32
    %c0_i32_0 = arith.constant 0 : i32
    %c0_i32_1 = arith.constant 0 : i32
    return %c0_i32, %c0_i32_0 : i32, i32
  }
  func.func @transform_1(%arg0: i32) -> (i32, i32, i32) {
    %c0_i32 = arith.constant 0 : i32
    %c0_i32_0 = arith.constant 0 : i32
    %c0_i32_1 = arith.constant 0 : i32
    return %arg0, %c0_i32, %c0_i32_0 : i32, i32, i32
  }
  func.func @transform_2(%arg0: i32) -> (i32, i32, i32) {
    %c0_i32 = arith.constant 0 : i32
    %c0_i32_0 = arith.constant 0 : i32
    %c0_i32_1 = arith.constant 0 : i32
    return %arg0, %c0_i32, %c0_i32_0 : i32, i32, i32
  }
}

module attributes {stable_mosaic.version = 11 : i64} {
  func.func @_matmul_bias_kernel(%arg0: i32, %arg1: memref<120x16xf32, #tpu.memory_space<vmem>>, %arg2: memref<16x20xf32, #tpu.memory_space<vmem>>, %arg3: memref<1x20xf32, #tpu.memory_space<vmem>>, %arg4: memref<120x20xf32, #tpu.memory_space<vmem>>) attributes {dimension_semantics = [#tpu.dimension_semantics<parallel>], iteration_bounds = array<i64: 2>, scalar_prefetch = 0 : i64, scratch_operands = 0 : i64, tpu.core_type = #tpu.core_type<tc>, window_params = [{transform_indices = @transform_0, window_bounds = array<i64: 120, 16>}, {pipeline_mode = #tpu.pipeline_mode<synchronous>, transform_indices = @transform_1, window_bounds = array<i64: 16, 20>}, {pipeline_mode = #tpu.pipeline_mode<synchronous>, transform_indices = @transform_2, window_bounds = array<i64: 1, 20>}, {transform_indices = @transform_3, window_bounds = array<i64: 120, 20>}]} {
    %c0 = arith.constant 0 : index
    %c0_0 = arith.constant 0 : index
    %0 = vector.load %arg1[%c0, %c0_0] : memref<120x16xf32, #tpu.memory_space<vmem>>, vector<120x16xf32>
    %c0_1 = arith.constant 0 : index
    %c0_2 = arith.constant 0 : index
    %1 = vector.load %arg2[%c0_1, %c0_2] : memref<16x20xf32, #tpu.memory_space<vmem>>, vector<16x20xf32>
    %cst = arith.constant dense<0.000000e+00> : vector<120x20xf32>
    %2 = tpu.matmul %0, %1, %cst {dimension_numbers = #tpu.dot_dimension_numbers<[1], [0], [0], [1], [0, 0, 1, 1], [], []>} : vector<120x16xf32>, vector<16x20xf32>, vector<120x20xf32> -> vector<120x20xf32>
    %c0_3 = arith.constant 0 : index
    %c0_4 = arith.constant 0 : index
    %3 = vector.load %arg3[%c0_3, %c0_4] : memref<1x20xf32, #tpu.memory_space<vmem>>, vector<1x20xf32>
    %4 = vector.broadcast %3 : vector<1x20xf32> to vector<120x20xf32>
    %5 = arith.addf %2, %4 : vector<120x20xf32>
    %c0_5 = arith.constant 0 : index
    %c0_6 = arith.constant 0 : index
    %6 = vector.load %arg4[%c0_5, %c0_6] : memref<120x20xf32, #tpu.memory_space<vmem>>, vector<120x20xf32>
    tpu.vector_store %arg4[%c0_5, %c0_6], %5 {strides = array<i32>} : memref<120x20xf32, #tpu.memory_space<vmem>>, vector<120x20xf32>,
    return
  }
  func.func @transform_0(%arg0: i32) -> (i32, i32) {
    %c0_i32 = arith.constant 0 : i32
    %c0_i32_0 = arith.constant 0 : i32
    return %arg0, %c0_i32 : i32, i32
  }
  func.func @transform_1(%arg0: i32) -> (i32, i32) {
    %c0_i32 = arith.constant 0 : i32
    %c0_i32_0 = arith.constant 0 : i32
    %c0_i32_1 = arith.constant 0 : i32
    return %c0_i32, %c0_i32_0 : i32, i32
  }
  func.func @transform_2(%arg0: i32) -> (i32, i32) {
    %c0_i32 = arith.constant 0 : i32
    %c0_i32_0 = arith.constant 0 : i32
    %c0_i32_1 = arith.constant 0 : i32
    return %c0_i32, %c0_i32_0 : i32, i32
  }
  func.func @transform_3(%arg0: i32) -> (i32, i32) {
    %c0_i32 = arith.constant 0 : i32
    %c0_i32_0 = arith.constant 0 : i32
    return %arg0, %c0_i32 : i32, i32
  }
}

</mosaic_0001>

<bundles_post_ra>
// kernel: unet3d_forward.18
= control target key start
LH: loop header
LB: loop body
LE: loop exit
PB: predicated region body
PF: predicated region fallthrough
CT: control target
= control target key end

     0   :  { %s1675_s18 = smov 0   ;;  %s1677_s19 = smov 0   ;;  %s1888_s0 = inlined_call_operand.vmem [shape: bf16[2,10,256,9], index: 0, kind: input, shape index: {}, may-alias: {0,1,2}]   ;;  %s1889_s1 = inlined_call_operand.vmem [shape: bf16[2,10,256,9], index: 1, kind: input, shape index: {}, may-alias: {0,1,2}]   ;;  %s1890_s2 = inlined_call_operand.vmem [shape: bf16[2,10,256,9], index: 2, kind: input, shape index: {}, may-alias: {0,1,2}]   ;;  %s1891_s3 = inlined_call_operand.vmem [shape: bf16[3,9,4], index: 3, kind: input, shape index: {}]   ;;  %s1892_s4 = inlined_call_operand.vmem [shape: f32[1,4], index: 4, kind: input, shape index: {}]   ;;  %s1893_s5 = inlined_call_operand.vmem [shape: bf16[2,8,256,4], index: 5, kind: output, shape index: {}]  }
   0x1   :  { %1894 = sst [smem:[#allocation2_spill]] %s1888_s0  ;;  %s1679_s20 = smov 0  }
   0x2   :  { %s1681_s21 = smov 0   ;;  %s1683_s22 = smov 0  }
   0x3   :  { %s1685_s23 = smov 0   ;;  %s1687_s24 = smov 0  }
   0x4 LB: > { %s27_s25 = sadd.s32 1, %s1630_s21  ;;  %s30_s26 = sadd.s32 1, %s1634_s22  ;;  %s1642_s24 = sphi %s1687_s24, %s15_s24   ;;  %s1638_s23 = sphi %s1685_s23, %s1901_s23   ;;  %s1634_s22 = sphi %s1683_s22, %s1900_s22   ;;  %s1630_s21 = sphi %s1681_s21, %s1899_s21   ;;  %s1626_s20 = sphi %s1679_s20, %s1898_s20   ;;  %s1622_s19 = sphi %s1677_s19, %s1897_s19   ;;  %s1618_s18 = sphi %s1675_s18, %s1896_s18  }
   0x5   : > { %p28_p0 = scmp.ge.s32.totalorder %s27_s25, 2  ;;  %p1284_p1 = scmp.ge.s32.totalorder %s1642_s24, 1 }
   0x6   : > { %p277_p2 = scmp.lt.s32.totalorder %s1642_s24, 33  ;;  %s34_s27 = sadd.s32 1, %s1638_s23 }
   0x7   : > { %s1903_s25 = smov (%p28_p0, %s27_s25), 0  ;;  %s1905_s26 = smov (!%p28_p0, %s30_s26), %s1634_s22 }
   0x8   : > { %p278_p3 = pnand %p1284_p1, %p277_p2  ;;  %p32_p4 = scmp.ge.s32.totalorder %s1905_s26, 8 }
   0x9   : > { %v1561_v0 = vld [vmem:[%s1891_s3 + $0x8] sm:$0x1f] (!%p278_p3)   ;;  %vm517_vm0 = vcmask (!%p278_p3), 1043456   ;;  %vm518_vm1 = vcmask (!%p278_p3), 1044480   ;;  %v1562_v1 = vld [vmem:[%s1891_s3] sm:$0x1f] (!%p278_p3)  }
   0xa   : > { %s1907_s26 = smov (%p32_p4, %s1905_s26), 0  ;;  %s1909_s27 = smov (!%p32_p4, %s34_s27), %s1638_s23 }
   0xb   : > { %p36_p5 = scmp.ge.s32.totalorder %s1909_s27, 2  ;;  %281 = sbr.rel (%p278_p3) target bundleno = 295 (0x127), region = 40  ;;  %v1644_v2 = vmov (!%p278_p3), 65535   ;;  %v1566_v5 = vld [vmem:[%s1891_s3 + $0x10] sm:$0x1f] (!%p278_p3)   ;;  %vm492_vm2 = vcmask (!%p278_p3), 72704  }
   0xc   : > { %s1285_s7 = sshll.u32 (!%p278_p3), %s1618_s18, 4  ;;  %p350_p6 = scmp.lt.s32.totalorder (!%p278_p3), %s1626_s20, 1  ;;  %v519_v3 = vsel (!%p278_p3), %vm517_vm0, 4294967295, %v1644_v2  ;;  %v1812_v41 = vld [vmem:[%s1892_s4] ss:$0 sm:$0xff] (!%p278_p3)  ;;  %vm1097_vm3 = vcmask (!%p278_p3), 27648  }
   0xd   : > { %s1911_s27 = smov (%p36_p5, %s1909_s27), 0  ;;  %p352_p7 = scmp.lt.s32.totalorder (!%p278_p3), %s1622_s19, 9  ;;  %v520_v4 = vsel (!%p278_p3), %vm518_vm1, %v519_v3, 0 }
   0xe   : > { %p354_p8 = scmp.lt.s32.totalorder (!%p278_p3), %s1285_s7, 31  ;;  %v522_v6 = vand.u32 (!%p278_p3), %v1561_v0, %v520_v4  ;;  %v691_v7 = vand.u32 (!%p278_p3), %v1562_v1, %v520_v4  ;;  %v879_v8 = vand.u32 (!%p278_p3), %v1566_v5, %v520_v4  ;;  %s363_s14 = sadd.s32 (!%p278_p3), 1, %s1622_s19 }
   0xf   : > { %p367_p9 = scmp.lt.s32.totalorder (!%p278_p3), %s363_s14, 9  ;;  %s379_s17 = sadd.s32 (!%p278_p3), 2, %s1622_s19 }
  0x10   : > { %1415 = vmatprep.subr.bf16.mxu1 (!%p278_p3), %v522_v6  ;;  %1433 = vmatprep.subr.bf16.mxu0 (!%p278_p3), %v691_v7  ;;  %s1895_s0 = sld [smem:[#allocation2_spill]] (!%p278_p3)  ;;  %p383_p10 = scmp.lt.s32.totalorder (!%p278_p3), %s379_s17, 9 }
  0x11   : > { %1416 = vmatpush3.bf16.msra.mxu1 (!%p278_p3), %v522_v6  ;;  %1434 = vmatpush3.bf16.msra.mxu0 (!%p278_p3), %v691_v7  ;;  %p398_p11 = scmp.lt.s32.totalorder (!%p278_p3), %s1622_s19, 7 }
  0x12   : > { %s1913_s20 = smov (!%p350_p6, %s1626_s20), 1  ;;  %s1915_s7 = smov (!%p354_p8, %s1285_s7), 31  ;;  %1469 = vmatprep.subr.bf16.mxu1 %v691_v7  ;;  %1451 = vmatprep.subr.bf16.mxu0 %v879_v8 }
  0x13   : > { %s353_s10 = scalar_select %p352_p7, %s1622_s19, 9 }
  0x14   : > { %s1742_s12 = smul.u32 320, %s1913_s20  ;;  %s1917_s14 = smov (!%p367_p9, %s363_s14), 9 }
  0x15   : > { %s1286_s11 = sshll.u32 %s353_s10, 5  ;;  %s1919_s17 = smov (!%p383_p10, %s379_s17), 9 }
  0x16   : > { %s357_s13 = sadd.s32 %s1286_s11, %s1915_s7  ;;  %s1289_s30 = sshll.u32 %s1917_s14, 5 }
  0x17   : > { %s359_s15 = sadd.s32 %s1742_s12, %s357_s13  ;;  %s372_s6 = sadd.s32 %s1289_s30, %s1915_s7 }
  0x18   : > { %s1287_s16 = sshll.u32 %s359_s15, 2  ;;  %s1292_s8 = sshll.u32 %s1919_s17, 5 }
  0x19   : > { %s1751_s29 = scalar_lea.vmem %s1895_s0, %s1287_s16  ;;  %s374_s9 = sadd.s32 %s1742_s12, %s372_s6 }
  0x1a   : > { %v1563_v9 = vld [vmem:[%s1751_s29] sm:$0xff]   ;;  %v1565_v10 = vld [vmem:[%s1751_s29 + $0x8] sm:$0xff]   ;;  %v1568_v11 = vld [vmem:[%s1751_s29 + $0x10] sm:$0xff]   ;;  %s388_s10 = sadd.s32 %s1292_s8, %s1915_s7  ;;  %s1290_s11 = sshll.u32 %s374_s9, 2 }
  0x1b   : > { %1435 = vmatprep.mubr.msk.bf16.mxu0 %vm492_vm2, %v1563_v9  ;;  %s390_s13 = sadd.s32 %s1742_s12, %s388_s10  ;;  %s376_s18 = scalar_lea.vmem %s1889_s1, %s1290_s11  ;;  %v1570_v12 = vld [vmem:[%s1751_s29 + $0x18] sm:$0xff]   ;;  %v1581_v26 = vld [vmem:[%s1751_s29 + $0x20] sm:$0xff]   ;;  %v1583_v29 = vld [vmem:[%s1751_s29 + $0x28] sm:$0xff]  }
  0x1c   : > { %1436 = vmatmul.mubr.msk.bf16.vlgmr.msra.gmra.mrb[0].mxu0 %vm492_vm2, %v1565_v10  ;;  %s1293_s28 = sshll.u32 %s390_s13, 2  ;;  %v1564_v13 = vld [vmem:[%s376_s18] sm:$0xff]   ;;  %v1567_v14 = vld [vmem:[%s376_s18 + $0x8] sm:$0xff]   ;;  %v1569_v15 = vld [vmem:[%s376_s18 + $0x10] sm:$0xff]   ;;  %s1921_s19 = smov (!%p398_p11, %s1622_s19), 7 }
  0x1d   : > { %1452 = vmatpush3.bf16.msra.mxu0 %v879_v8  ;;  %1439 = vmatprep.mubr.msk.bf16.mxu0 %vm492_vm2, %v1568_v11  ;;  %s1770_s0 = scalar_lea.vmem %s1890_s2, %s1293_s28  ;;  %v1571_v17 = vld [vmem:[%s376_s18 + $0x18] sm:$0xff]   ;;  %v1573_v18 = vld [vmem:[%s376_s18 + $0x20] sm:$0xff]   ;;  %v1575_v21 = vld [vmem:[%s376_s18 + $0x28] sm:$0xff]   ;;  %s1295_s12 = sshll.u32 %s1921_s19, 5 }
  0x1e   : > { %1417 = vmatprep.mubr.msk.bf16.mxu1 %vm492_vm2, %v1564_v13  ;;  %v1572_v16 = vld [vmem:[%s1770_s0] sm:$0xff]   ;;  %v1574_v19 = vld [vmem:[%s1770_s0 + $0x8] sm:$0xff]   ;;  %v1576_v20 = vld [vmem:[%s1770_s0 + $0x10] sm:$0xff]   ;;  %s403_s17 = sadd.s32 %s1295_s12, %s1915_s7  ;;  %s1296_s6 = sshll.u32 %s1913_s20, 8 }
  0x1f   : > { %1418 = vmatmul.mubr.msk.bf16.vlgmr.msra.gmra.mrb[0].mxu1 %vm492_vm2, %v1567_v14  ;;  %v1577_v22 = vld [vmem:[%s376_s18 + $0x30] sm:$0xff]   ;;  %v1578_v23 = vld [vmem:[%s1770_s0 + $0x18] sm:$0xff]   ;;  %v1580_v24 = vld [vmem:[%s1770_s0 + $0x20] sm:$0xff]  }
  0x20   : > { %1470 = vmatpush3.bf16.msra.mxu1 %v691_v7  ;;  %1421 = vmatprep.mubr.msk.bf16.mxu1 %vm492_vm2, %v1569_v15  ;;  %v1579_v25 = vld [vmem:[%s376_s18 + $0x38] sm:$0xff]   ;;  %v1582_v27 = vld [vmem:[%s1770_s0 + $0x28] sm:$0xff]   ;;  %v1584_v28 = vld [vmem:[%s1770_s0 + $0x30] sm:$0xff]  }
  0x21   : > { %v1585_v30 = vld [vmem:[%s1751_s29 + $0x30] sm:$0xff]   ;;  %v1586_v31 = vld [vmem:[%s1770_s0 + $0x38] sm:$0xff]   ;;  %s405_s0 = sadd.s32 %s1296_s6, %s403_s17 }
  0x22   : > { %v1587_v32 = vld [vmem:[%s1751_s29 + $0x38] sm:$0xff]   ;;  %s1297_s29 = sshll.u32 %s405_s0, 2 }
  0x23   : > { %s1820_s7 = scalar_lea.vmem %s1893_s5, %s1297_s29 }
  0x24   : > { %1440 = vmatmul.mubr.msk.bf16.gmra.mrb[4].mxu0 %vm492_vm2, %v1570_v12 }
  0x25   : > { %1453 = vmatprep.mubr.msk.bf16.mxu0 %vm492_vm2, %v1572_v16 }
  0x27   : > { %1422 = vmatmul.mubr.msk.bf16.gmra.mrb[4].mxu1 %vm492_vm2, %v1571_v17 }
  0x28   : > { %1425 = vmatprep.mubr.msk.bf16.mxu1 %vm492_vm2, %v1573_v18 }
  0x2c   : > { %1454 = vmatmul.mubr.msk.bf16.vlgmr.msra.gmra.mrb[0].mxu0 %vm492_vm2, %v1574_v19 }
  0x2d   : > { %1457 = vmatprep.mubr.msk.bf16.mxu0 %vm492_vm2, %v1576_v20 }
  0x2f   : > { %1426 = vmatmul.mubr.msk.bf16.gmra.mrb[8].mxu1 %vm492_vm2, %v1575_v21 }
  0x30   : > { %1429 = vmatprep.mubr.msk.bf16.mxu1 %vm492_vm2, %v1577_v22 }
  0x34   : > { %1458 = vmatmul.mubr.msk.bf16.gmra.mrb[4].mxu0 %vm492_vm2, %v1578_v23 }
  0x35   : > { %1461 = vmatprep.mubr.msk.bf16.mxu0 %vm492_vm2, %v1580_v24 }
  0x37   : > { %1430 = vmatmul.mubr.msk.bf16.gmra.mrb[12].mxu1 %vm492_vm2, %v1579_v25 }
  0x38   : > { %1443 = vmatprep.mubr.msk.bf16.mxu1 %vm492_vm2, %v1581_v26 }
  0x3c   : > { %1462 = vmatmul.mubr.msk.bf16.gmra.mrb[8].mxu0 %vm492_vm2, %v1582_v27 }
  0x3d   : > { %1465 = vmatprep.mubr.msk.bf16.mxu0 %vm492_vm2, %v1584_v28 }
  0x3f   : > { %1444 = vmatmul.mubr.msk.bf16.vlgmr.msra.gmra.mrb[8].mxu1 %vm492_vm2, %v1583_v29 }
  0x40   : > { %1447 = vmatprep.mubr.msk.bf16.mxu1 %vm492_vm2, %v1585_v30 }
  0x44   : > { %1466 = vmatmul.mubr.msk.bf16.gmra.mrb[12].mxu0 %vm492_vm2, %v1586_v31 }
  0x47   : > { %1448 = vmatmul.mubr.msk.bf16.gmra.mrb[12].mxu1 %vm492_vm2, %v1587_v32 }
  0xf2   : > { %v1419_v33 = vpop.f32.mrb[0].mxu1 }
  0xf3   : > { %v558_v34 = vpop.f32.mrb[1].mxu1 }
  0xf4   : > { %v1420_v35 = vpop.f32.mrb[2].mxu1 }
  0xf5   : > { %v561_v36 = vpop.f32.mrb[3].mxu1 }
  0xfa   : > { %v1423_v37 = vpop.f32.mrb[4].mxu1 }
  0xfb   : > { %v574_v38 = vpop.f32.mrb[5].mxu1 }
  0xfc   : > { %v1424_v39 = vpop.f32.mrb[6].mxu1 }
  0xfd   : > { %v577_v42 = vpop.f32.mrb[7].mxu1 }
  0xff   : > { %v1455_v40 = vpop.f32.mrb[0].mxu0 }
 0x100   : > { %v1471_v43 = vadd.f32 %v1455_v40, %v1419_v33  ;;  %v915_v44 = vpop.f32.mrb[1].mxu0 }
 0x101   : > { %v1472_v45 = vadd.f32 %v915_v44, %v558_v34  ;;  %v1456_v46 = vpop.f32.mrb[2].mxu0 }
 0x102   : > { %v1003_v47 = vadd.f32 %v1471_v43, %v1812_v41  ;;  %v1473_v48 = vadd.f32 %v1456_v46, %v1420_v35  ;;  %v918_v49 = vpop.f32.mrb[3].mxu0 }
 0x103   : > { %v1001_v50 = vadd.f32 %v1472_v45, %v1812_v41  ;;  %v1474_v51 = vadd.f32 %v918_v49, %v561_v36 }
 0x104   : > { %v1019_v52 = vmax.f32 %v1003_v47, 0.0  ;;  %v1004_v53 = vadd.f32 %v1473_v48, %v1812_v41 }
 0x105   : > { %v1017_v54 = vmax.f32 %v1001_v50, 0.0  ;;  %v1002_v55 = vadd.f32 %v1474_v51, %v1812_v41 }
 0x106   : > { %v1374_v56 = vpack.c.bf16 %v1019_v52, %v1019_v52  ;;  %v1020_v57 = vmax.f32 %v1004_v53, 0.0 }
 0x107   : > { %v1372_v58 = vpack.c.bf16 %v1017_v54, %v1017_v54  ;;  %v1018_v59 = vmax.f32 %v1002_v55, 0.0  ;;  %v1459_v60 = vpop.f32.mrb[4].mxu0 }
 0x108   : > { %1100 = vst.msk [vmem:[%s1820_s7 + $0x8] sm:$0xf] %vm1097_vm3, %v1374_v56  ;;  %v1375_v61 = vpack.c.bf16 %v1020_v57, %v1020_v57  ;;  %v1475_v62 = vadd.f32 %v1459_v60, %v1423_v37  ;;  %v931_v63 = vpop.f32.mrb[5].mxu0 }
 0x109   : > { %1098 = vst.msk [vmem:[%s1820_s7] sm:$0xf] %vm1097_vm3, %v1372_v58  ;;  %v1373_v0 = vpack.c.bf16 %v1018_v59, %v1018_v59  ;;  %v1476_v1 = vadd.f32 %v931_v63, %v574_v38  ;;  %v1460_v2 = vpop.f32.mrb[6].mxu0 }
 0x10a   : > { %1101 = vst.msk [vmem:[%s1820_s7 + $0xc] sm:$0xf] %vm1097_vm3, %v1375_v61  ;;  %v1007_v3 = vadd.f32 %v1475_v62, %v1812_v41  ;;  %v1477_v4 = vadd.f32 %v1460_v2, %v1424_v39  ;;  %v934_v5 = vpop.f32.mrb[7].mxu0 }
 0x10b   : > { %1099 = vst.msk [vmem:[%s1820_s7 + $0x4] sm:$0xf] %vm1097_vm3, %v1373_v0  ;;  %v1005_v6 = vadd.f32 %v1476_v1, %v1812_v41  ;;  %v1478_v7 = vadd.f32 %v934_v5, %v577_v42 }
 0x10c   : > { %v1023_v8 = vmax.f32 %v1007_v3, 0.0  ;;  %v1008_v9 = vadd.f32 %v1477_v4, %v1812_v41 }
 0x10d   : > { %v1021_v10 = vmax.f32 %v1005_v6, 0.0  ;;  %v1006_v11 = vadd.f32 %v1478_v7, %v1812_v41 }
 0x10e   : > { %v1378_v12 = vpack.c.bf16 %v1023_v8, %v1023_v8  ;;  %v1024_v13 = vmax.f32 %v1008_v9, 0.0 }
 0x10f   : > { %v1376_v14 = vpack.c.bf16 %v1021_v10, %v1021_v10  ;;  %v1022_v15 = vmax.f32 %v1006_v11, 0.0  ;;  %v1463_v16 = vpop.f32.mrb[8].mxu0 }
 0x110   : > { %1104 = vst.msk [vmem:[%s1820_s7 + $0x18] sm:$0xf] %vm1097_vm3, %v1378_v12  ;;  %v1379_v17 = vpack.c.bf16 %v1024_v13, %v1024_v13  ;;  %v947_v18 = vpop.f32.mrb[9].mxu0 }
 0x111   : > { %1102 = vst.msk [vmem:[%s1820_s7 + $0x10] sm:$0xf] %vm1097_vm3, %v1376_v14  ;;  %v1377_v19 = vpack.c.bf16 %v1022_v15, %v1022_v15  ;;  %v1464_v20 = vpop.f32.mrb[10].mxu0 }
 0x112   : > { %1105 = vst.msk [vmem:[%s1820_s7 + $0x1c] sm:$0xf] %vm1097_vm3, %v1379_v17  ;;  %v950_v21 = vpop.f32.mrb[11].mxu0  ;;  %v1445_v22 = vpop.f32.mrb[8].mxu1 }
 0x113   : > { %1103 = vst.msk [vmem:[%s1820_s7 + $0x14] sm:$0xf] %vm1097_vm3, %v1377_v19  ;;  %v1479_v23 = vadd.f32 %v1463_v16, %v1445_v22  ;;  %v759_v24 = vpop.f32.mrb[9].mxu1 }
 0x114   : > { %v1480_v25 = vadd.f32 %v947_v18, %v759_v24  ;;  %v1446_v26 = vpop.f32.mrb[10].mxu1 }
 0x115   : > { %v1011_v28 = vadd.f32 %v1479_v23, %v1812_v41  ;;  %v1481_v29 = vadd.f32 %v1464_v20, %v1446_v26  ;;  %v762_v30 = vpop.f32.mrb[11].mxu1 }
 0x116   : > { %v1009_v32 = vadd.f32 %v1480_v25, %v1812_v41  ;;  %v1482_v33 = vadd.f32 %v950_v21, %v762_v30 }
 0x117   : > { %v1467_v27 = vpop.f32.mrb[12].mxu0  ;;  %v1027_v35 = vmax.f32 %v1011_v28, 0.0  ;;  %v1012_v36 = vadd.f32 %v1481_v29, %v1812_v41 }
 0x118   : > { %v963_v31 = vpop.f32.mrb[13].mxu0  ;;  %v1025_v38 = vmax.f32 %v1009_v32, 0.0  ;;  %v1010_v39 = vadd.f32 %v1482_v33, %v1812_v41 }
 0x119   : > { %v1468_v34 = vpop.f32.mrb[14].mxu0  ;;  %v1382_v40 = vpack.c.bf16 %v1027_v35, %v1027_v35  ;;  %v1028_v42 = vmax.f32 %v1012_v36, 0.0 }
 0x11a   : > { %v966_v37 = vpop.f32.mrb[15].mxu0  ;;  %v1380_v43 = vpack.c.bf16 %v1025_v38, %v1025_v38  ;;  %v1026_v44 = vmax.f32 %v1010_v39, 0.0  ;;  %v1449_v45 = vpop.f32.mrb[12].mxu1 }
 0x11b   : > { %1108 = vst.msk [vmem:[%s1820_s7 + $0x28] sm:$0xf] %vm1097_vm3, %v1382_v40  ;;  %v1383_v46 = vpack.c.bf16 %v1028_v42, %v1028_v42  ;;  %v1483_v47 = vadd.f32 %v1467_v27, %v1449_v45  ;;  %v775_v48 = vpop.f32.mrb[13].mxu1 }
 0x11c   : > { %1106 = vst.msk [vmem:[%s1820_s7 + $0x20] sm:$0xf] %vm1097_vm3, %v1380_v43  ;;  %v1381_v49 = vpack.c.bf16 %v1026_v44, %v1026_v44  ;;  %v1484_v50 = vadd.f32 %v963_v31, %v775_v48  ;;  %v1450_v51 = vpop.f32.mrb[14].mxu1 }
 0x11d   : > { %1109 = vst.msk [vmem:[%s1820_s7 + $0x2c] sm:$0xf] %vm1097_vm3, %v1383_v46  ;;  %v1015_v52 = vadd.f32 %v1483_v47, %v1812_v41  ;;  %v1485_v53 = vadd.f32 %v1468_v34, %v1450_v51  ;;  %v778_v54 = vpop.f32.mrb[15].mxu1 }
 0x11e   : > { %1107 = vst.msk [vmem:[%s1820_s7 + $0x24] sm:$0xf] %vm1097_vm3, %v1381_v49  ;;  %v1013_v55 = vadd.f32 %v1484_v50, %v1812_v41  ;;  %v1486_v56 = vadd.f32 %v966_v37, %v778_v54 }
 0x11f   : > { %v1031_v57 = vmax.f32 %v1015_v52, 0.0  ;;  %v1016_v58 = vadd.f32 %v1485_v53, %v1812_v41 }
 0x120   : > { %v1029_v59 = vmax.f32 %v1013_v55, 0.0  ;;  %v1014_v60 = vadd.f32 %v1486_v56, %v1812_v41 }
 0x121   : > { %v1386_v61 = vpack.c.bf16 %v1031_v57, %v1031_v57  ;;  %v1032_v62 = vmax.f32 %v1016_v58, 0.0 }
 0x122   : > { %v1384_v63 = vpack.c.bf16 %v1029_v59, %v1029_v59  ;;  %v1030_v0 = vmax.f32 %v1014_v60, 0.0 }
 0x123   : > { %1112 = vst.msk [vmem:[%s1820_s7 + $0x38] sm:$0xf] %vm1097_vm3, %v1386_v61  ;;  %v1387_v1 = vpack.c.bf16 %v1032_v62, %v1032_v62 }
 0x124   : > { %1110 = vst.msk [vmem:[%s1820_s7 + $0x30] sm:$0xf] %vm1097_vm3, %v1384_v63  ;;  %v1385_v2 = vpack.c.bf16 %v1030_v0, %v1030_v0 }
 0x125   : > { %1113 = vst.msk [vmem:[%s1820_s7 + $0x3c] sm:$0xf] %vm1097_vm3, %v1387_v1 }
 0x126   : > { %1111 = vst.msk [vmem:[%s1820_s7 + $0x34] sm:$0xf] %vm1097_vm3, %v1385_v2 }
 0x127 PF: > { %s15_s24 = sadd.s32 1, %s1642_s24   ;;  %s1896_s18 = smov %s1630_s21 }
 0x128   : > { %p12_p12 = scmp.ge.s32.totalorder %s15_s24, 34   ;;  %s1897_s19 = smov %s1634_s22 }
 0x129   : > { %s1898_s20 = smov %s1638_s23  ;;  %s1899_s21 = smov %s1903_s25 }
 0x12a   : > { %s1900_s22 = smov %s1907_s26  ;;  %s1901_s23 = smov %s1911_s27 }
 0x12b   :  { %14 = sbr.rel (!%p12_p12) target bundleno = 4 (0x4), region = 78 }

// kernel: unet3d_forward.19
= control target key start
LH: loop header
LB: loop body
LE: loop exit
PB: predicated region body
PF: predicated region fallthrough
CT: control target
= control target key end

     0   :  { %s1753_s18 = smov 0   ;;  %s1755_s19 = smov 0   ;;  %s2013_s0 = inlined_call_operand.vmem [shape: bf16[2,10,256,36], index: 0, kind: input, shape index: {}, may-alias: {0,1,2}]   ;;  %s2014_s1 = inlined_call_operand.vmem [shape: bf16[2,10,256,36], index: 1, kind: input, shape index: {}, may-alias: {0,1,2}]   ;;  %s2015_s2 = inlined_call_operand.vmem [shape: bf16[2,10,256,36], index: 2, kind: input, shape index: {}, may-alias: {0,1,2}]   ;;  %s2016_s3 = inlined_call_operand.vmem [shape: bf16[3,36,4], index: 3, kind: input, shape index: {}]   ;;  %s2017_s4 = inlined_call_operand.vmem [shape: f32[1,4], index: 4, kind: input, shape index: {}]   ;;  %s2018_s5 = inlined_call_operand.vmem [shape: bf16[2,8,256,4], index: 5, kind: output, shape index: {}]  }
   0x1   :  { %s1757_s20 = smov 0   ;;  %s1759_s21 = smov 0  }
   0x2   :  { %s1761_s22 = smov 0   ;;  %s1763_s23 = smov 0  }
   0x3   :  { %s1765_s24 = smov 0  }
   0x4 LB: > { %s27_s25 = sadd.s32 1, %s1709_s21  ;;  %s30_s26 = sadd.s32 1, %s1713_s22  ;;  %s1721_s24 = sphi %s1765_s24, %s15_s24   ;;  %s1717_s23 = sphi %s1763_s23, %s2025_s23   ;;  %s1713_s22 = sphi %s1761_s22, %s2024_s22   ;;  %s1709_s21 = sphi %s1759_s21, %s2023_s21   ;;  %s1705_s20 = sphi %s1757_s20, %s2022_s20   ;;  %s1701_s19 = sphi %s1755_s19, %s2021_s19   ;;  %s1697_s18 = sphi %s1753_s18, %s2020_s18  }
   0x5   : > { %p28_p0 = scmp.ge.s32.totalorder %s27_s25, 2  ;;  %p1320_p1 = scmp.ge.s32.totalorder %s1721_s24, 1 }
   0x6   : > { %p277_p2 = scmp.lt.s32.totalorder %s1721_s24, 33  ;;  %s34_s27 = sadd.s32 1, %s1717_s23 }
   0x7   : > { %s2027_s25 = smov (%p28_p0, %s27_s25), 0  ;;  %s2029_s26 = smov (!%p28_p0, %s30_s26), %s1713_s22 }
   0x8   : > { %p278_p3 = pnand %p1320_p1, %p277_p2  ;;  %p32_p4 = scmp.ge.s32.totalorder %s2029_s26, 8 }
   0x9   : > { %v1634_v0 = vld [vmem:[%s2016_s3 + $0x14] sm:$0xff] (!%p278_p3)   ;;  %vm533_vm0 = vcmask (!%p278_p3), 1041408   ;;  %v1635_v1 = vld [vmem:[%s2016_s3] sm:$0xff] (!%p278_p3)   ;;  %s1321_s7 = sshll.u32 (!%p278_p3), %s1697_s18, 4  ;;  %p350_p6 = scmp.lt.s32.totalorder (!%p278_p3), %s1705_s20, 1  ;;  %v1815_v3 = vld [vmem:[%s2016_s3 + $0x8] sm:$0xff] (!%p278_p3)  }
   0xa   : > { %s2031_s26 = smov (%p32_p4, %s2029_s26), 0  ;;  %s2033_s27 = smov (!%p32_p4, %s34_s27), %s1717_s23 }
   0xb   : > { %p36_p5 = scmp.ge.s32.totalorder %s2033_s27, 2  ;;  %281 = sbr.rel (%p278_p3) target bundleno = 293 (0x125), region = 40  ;;  %1469 = vmatprep.subr.bf16.mxu1 (!%p278_p3), %v1634_v0  ;;  %v1636_v2 = vld [vmem:[%s2016_s3 + $0x1c] sm:$0xff] (!%p278_p3)   ;;  %1491 = vmatprep.subr.bf16.mxu0 (!%p278_p3), %v1635_v1  ;;  %v1638_v4 = vld [vmem:[%s2016_s3 + $0x24] ss:$0 sps:$4 sm:$0x33] (!%p278_p3)  }
   0xc   : > { %1470 = vmatpush3.bf16.msra.mxu1 (!%p278_p3), %v1634_v0  ;;  %p354_p7 = scmp.lt.s32.totalorder (!%p278_p3), %s1321_s7, 31  ;;  %1492 = vmatpush3.bf16.msra.mxu0 (!%p278_p3), %v1635_v1  ;;  %v1639_v5 = vld [vmem:[%s2016_s3 + $0x10] ss:$0 sps:$4 sm:$0x33] (!%p278_p3)   ;;  %s363_s16 = sadd.s32 (!%p278_p3), 1, %s1701_s19  ;;  %v535_v6 = vsel (!%p278_p3), %vm533_vm0, %v1638_v4, 0 }
   0xd   : > { %s2035_s27 = smov (%p36_p5, %s2033_s27), 0  ;;  %1471 = vmatprep.subr.bf16.mxu1 (!%p278_p3), %v1636_v2  ;;  %1493 = vmatprep.subr.bf16.mxu0 (!%p278_p3), %v1815_v3  ;;  %p367_p8 = scmp.lt.s32.totalorder (!%p278_p3), %s363_s16, 9  ;;  %v714_v7 = vsel (!%p278_p3), %vm533_vm0, %v1639_v5, 0  ;;  %v1644_v8 = vld [vmem:[%s2016_s3 + $0x28] sm:$0xff] (!%p278_p3)   ;;  %vm508_vm1 = vcmask (!%p278_p3), 293888   ;;  %v1645_v11 = vld [vmem:[%s2016_s3 + $0x30] sm:$0xff] (!%p278_p3)  }
   0xe   : > { %p352_p9 = scmp.lt.s32.totalorder (!%p278_p3), %s1701_s19, 9  ;;  %s379_s18 = sadd.s32 (!%p278_p3), 2, %s1701_s19  ;;  %v1650_v16 = vld [vmem:[%s2016_s3 + $0x38] ss:$0 sps:$4 sm:$0x33] (!%p278_p3)   ;;  %vm1133_vm2 = vcmask (!%p278_p3), 27648  }
   0xf   : > { %p1844_p10 = scmp.lt.s32.totalorder (!%p278_p3), %s379_s18, 9  ;;  %v915_v21 = vsel (!%p278_p3), %vm533_vm0, %v1650_v16, 0  ;;  %p398_p11 = scmp.lt.s32.totalorder (!%p278_p3), %s1701_s19, 7  ;;  %v1937_v45 = vld [vmem:[%s2017_s4] ss:$0 sm:$0xff] (!%p278_p3) }
  0x10   : > { %1472 = vmatpush3.bf16.msra.mxu1 (!%p278_p3), %v1636_v2  ;;  %1494 = vmatpush3.bf16.msra.mxu0 (!%p278_p3), %v1815_v3 }
  0x11   : > { %1573 = vmatprep.subr.msk.bf16.mxu1 (!%p278_p3), %vm533_vm0, %v1638_v4  ;;  %1574 = vmatprep.subr.msk.bf16.mxu0 (!%p278_p3), %vm533_vm0, %v1639_v5 }
  0x12   : > { %s2037_s20 = smov (!%p350_p6, %s1705_s20), 1  ;;  %s2039_s7 = smov (!%p354_p7, %s1321_s7), 31 }
  0x13   : > { %s1835_s17 = smul.u32 320, %s2037_s20  ;;  %s2041_s16 = smov (!%p367_p8, %s363_s16), 9 }
  0x14   : > { %s353_s30 = scalar_select %p352_p9, %s1701_s19, 9  ;;  %1474 = vmatpush3.bf16.msra.mxu1 %v535_v6  ;;  %1496 = vmatpush3.bf16.msra.mxu0 %v714_v7 }
  0x15   : > { %s1325_s6 = sshll.u32 %s2041_s16, 5  ;;  %1535 = vmatprep.subr.bf16.mxu1 %v1635_v1  ;;  %1513 = vmatprep.subr.bf16.mxu0 %v1644_v8  ;;  %s2043_s18 = smov (!%p1844_p10, %s379_s18), 9 }
  0x16   : > { %s372_s9 = sadd.s32 %s1325_s6, %s2039_s7  ;;  %s1322_s10 = sshll.u32 %s353_s30, 5 }
  0x17   : > { %s374_s11 = sadd.s32 %s1835_s17, %s372_s9  ;;  %s357_s12 = sadd.s32 %s1322_s10, %s2039_s7 }
  0x18   : > { %s1326_s13 = sshll.u32 %s374_s11, 2  ;;  %s359_s14 = sadd.s32 %s1835_s17, %s357_s12 }
  0x19   : > { %s1855_s29 = scalar_lea.vmem %s2014_s1, %s1326_s13  ;;  %s1323_s16 = sshll.u32 %s359_s14, 2 }
  0x1a   : > { %v1640_v9 = vld [vmem:[%s1855_s29] sm:$0xff]   ;;  %s1861_s9 = scalar_lea.vmem %s2013_s0, %s1323_s16  ;;  %v1642_v12 = vld [vmem:[%s1855_s29 + $0x8] sm:$0xff]   ;;  %s1328_s12 = sshll.u32 %s2043_s18, 5  ;;  %v1646_v14 = vld [vmem:[%s1855_s29 + $0x10] sm:$0xff]  }
  0x1b   : > { %v1641_v10 = vld [vmem:[%s1861_s9] sm:$0xff]   ;;  %1475 = vmatprep.mubr.msk.bf16.mxu1 %vm508_vm1, %v1640_v9  ;;  %v1643_v13 = vld [vmem:[%s1861_s9 + $0x8] sm:$0xff]   ;;  %s388_s13 = sadd.s32 %s1328_s12, %s2039_s7  ;;  %v1647_v15 = vld [vmem:[%s1861_s9 + $0x10] sm:$0xff]   ;;  %s2045_s19 = smov (!%p398_p11, %s1701_s19), 7 }
  0x1c   : > { %1497 = vmatprep.mubr.msk.bf16.mxu0 %vm508_vm1, %v1641_v10  ;;  %1476 = vmatmul.mubr.msk.bf16.vlgmr.msra.gmra.mrb[0].mxu1 %vm508_vm1, %v1642_v12  ;;  %s390_s15 = sadd.s32 %s1835_s17, %s388_s13  ;;  %v1648_v17 = vld [vmem:[%s1855_s29 + $0x18] sm:$0xff]   ;;  %v1651_v19 = vld [vmem:[%s1855_s29 + $0x20] sm:$0xff]   ;;  %v1653_v22 = vld [vmem:[%s1855_s29 + $0x28] sm:$0xff]   ;;  %s1331_s17 = sshll.u32 %s2045_s19, 5 }
  0x1d   : > { %1498 = vmatmul.mubr.msk.bf16.vlgmr.msra.gmra.mrb[0].mxu0 %vm508_vm1, %v1643_v13  ;;  %1538 = vmatpush3.bf16.msra.mxu1 %v1635_v1  ;;  %s1329_s28 = sshll.u32 %s390_s15, 2  ;;  %v1649_v18 = vld [vmem:[%s1861_s9 + $0x18] sm:$0xff]   ;;  %v1655_v24 = vld [vmem:[%s1855_s29 + $0x30] sm:$0xff]   ;;  %v1659_v28 = vld [vmem:[%s1861_s9 + $0x20] sm:$0xff]   ;;  %s1332_s30 = sshll.u32 %s2037_s20, 8 }
  0x1e   : > { %1514 = vmatpush3.bf16.msra.mxu0 %v1644_v8  ;;  %1479 = vmatprep.mubr.msk.bf16.mxu1 %vm508_vm1, %v1646_v14  ;;  %s1888_s6 = scalar_lea.vmem %s2015_s2, %s1329_s28  ;;  %v1657_v26 = vld [vmem:[%s1855_s29 + $0x38] sm:$0xff]   ;;  %v1661_v30 = vld [vmem:[%s1861_s9 + $0x28] sm:$0xff]   ;;  %v1663_v32 = vld [vmem:[%s1861_s9 + $0x30] sm:$0xff]   ;;  %s403_s29 = sadd.s32 %s1331_s17, %s2039_s7 }
  0x1f   : > { %1515 = vmatprep.subr.bf16.mxu0 %v1645_v11  ;;  %1501 = vmatprep.mubr.msk.bf16.mxu0 %vm508_vm1, %v1647_v15  ;;  %v1652_v20 = vld [vmem:[%s1888_s6] sm:$0xff]   ;;  %v1654_v23 = vld [vmem:[%s1888_s6 + $0x8] sm:$0xff]   ;;  %v1656_v25 = vld [vmem:[%s1888_s6 + $0x10] sm:$0xff]  }
  0x20   : > { %1536 = vmatprep.subr.bf16.mxu1 %v1815_v3  ;;  %v1658_v27 = vld [vmem:[%s1888_s6 + $0x18] sm:$0xff]   ;;  %v1660_v29 = vld [vmem:[%s1888_s6 + $0x20] sm:$0xff]   ;;  %v1662_v31 = vld [vmem:[%s1888_s6 + $0x28] sm:$0xff]  }
  0x21   : > { %1539 = vmatpush3.bf16.msra.mxu1 %v1815_v3  ;;  %v1664_v33 = vld [vmem:[%s1888_s6 + $0x30] sm:$0xff]   ;;  %v1665_v34 = vld [vmem:[%s1861_s9 + $0x38] sm:$0xff]   ;;  %s405_s9 = sadd.s32 %s1332_s30, %s403_s29 }
  0x22   : > { %1516 = vmatpush3.bf16.msra.mxu0 %v1645_v11  ;;  %1575 = vmatprep.subr.msk.bf16.mxu1 %vm533_vm0, %v1639_v5  ;;  %v1666_v35 = vld [vmem:[%s1888_s6 + $0x38] sm:$0xff]   ;;  %s1333_s12 = sshll.u32 %s405_s9, 2 }
  0x23   : > { %1576 = vmatprep.subr.msk.bf16.mxu0 %vm533_vm0, %v1650_v16  ;;  %s1945_s7 = scalar_lea.vmem %s2018_s5, %s1333_s12 }
  0x24   : > { %1480 = vmatmul.mubr.msk.bf16.gmra.mrb[4].mxu1 %vm508_vm1, %v1648_v17 }
  0x25   : > { %1502 = vmatmul.mubr.msk.bf16.gmra.mrb[4].mxu0 %vm508_vm1, %v1649_v18  ;;  %1483 = vmatprep.mubr.msk.bf16.mxu1 %vm508_vm1, %v1651_v19 }
  0x26   : > { %1518 = vmatpush3.bf16.msra.mxu0 %v915_v21  ;;  %1519 = vmatprep.mubr.msk.bf16.mxu0 %vm508_vm1, %v1652_v20 }
  0x27   : > { %1540 = vmatpush3.bf16.msra.mxu1 %v714_v7 }
  0x2c   : > { %1484 = vmatmul.mubr.msk.bf16.gmra.mrb[8].mxu1 %vm508_vm1, %v1653_v22 }
  0x2d   : > { %1520 = vmatmul.mubr.msk.bf16.vlgmr.msra.gmra.mrb[0].mxu0 %vm508_vm1, %v1654_v23  ;;  %1487 = vmatprep.mubr.msk.bf16.mxu1 %vm508_vm1, %v1655_v24 }
  0x2e   : > { %1523 = vmatprep.mubr.msk.bf16.mxu0 %vm508_vm1, %v1656_v25 }
  0x34   : > { %1488 = vmatmul.mubr.msk.bf16.gmra.mrb[12].mxu1 %vm508_vm1, %v1657_v26 }
  0x35   : > { %1524 = vmatmul.mubr.msk.bf16.gmra.mrb[4].mxu0 %vm508_vm1, %v1658_v27  ;;  %1505 = vmatprep.mubr.msk.bf16.mxu1 %vm508_vm1, %v1659_v28 }
  0x36   : > { %1527 = vmatprep.mubr.msk.bf16.mxu0 %vm508_vm1, %v1660_v29 }
  0x3c   : > { %1506 = vmatmul.mubr.msk.bf16.vlgmr.msra.gmra.mrb[8].mxu1 %vm508_vm1, %v1661_v30 }
  0x3d   : > { %1528 = vmatmul.mubr.msk.bf16.gmra.mrb[8].mxu0 %vm508_vm1, %v1662_v31  ;;  %1509 = vmatprep.mubr.msk.bf16.mxu1 %vm508_vm1, %v1663_v32 }
  0x3e   : > { %1531 = vmatprep.mubr.msk.bf16.mxu0 %vm508_vm1, %v1664_v33 }
  0x44   : > { %1510 = vmatmul.mubr.msk.bf16.gmra.mrb[12].mxu1 %vm508_vm1, %v1665_v34 }
  0x45   : > { %1532 = vmatmul.mubr.msk.bf16.gmra.mrb[12].mxu0 %vm508_vm1, %v1666_v35 }
  0xef   : > { %v1477_v36 = vpop.f32.mrb[0].mxu1 }
  0xf0   : > { %v571_v37 = vpop.f32.mrb[1].mxu1 }
  0xf1   : > { %v1478_v38 = vpop.f32.mrb[2].mxu1 }
  0xf2   : > { %v574_v39 = vpop.f32.mrb[3].mxu1 }
  0xf7   : > { %v1481_v40 = vpop.f32.mrb[4].mxu1 }
  0xf8   : > { %v587_v41 = vpop.f32.mrb[5].mxu1 }
  0xf9   : > { %v1482_v42 = vpop.f32.mrb[6].mxu1 }
  0xfa   : > { %v590_v43 = vpop.f32.mrb[7].mxu1 }
 0x100   : > { %v1521_v44 = vpop.f32.mrb[0].mxu0 }
 0x101   : > { %v1541_v46 = vadd.f32 %v1521_v44, %v1477_v36  ;;  %v951_v47 = vpop.f32.mrb[1].mxu0 }
 0x102   : > { %v1542_v48 = vadd.f32 %v951_v47, %v571_v37  ;;  %v1522_v49 = vpop.f32.mrb[2].mxu0 }
 0x103   : > { %v1039_v50 = vadd.f32 %v1541_v46, %v1937_v45  ;;  %v1543_v51 = vadd.f32 %v1522_v49, %v1478_v38  ;;  %v954_v52 = vpop.f32.mrb[3].mxu0 }
 0x104   : > { %v1037_v53 = vadd.f32 %v1542_v48, %v1937_v45  ;;  %v1544_v54 = vadd.f32 %v954_v52, %v574_v39 }
 0x105   : > { %v1055_v55 = vmax.f32 %v1039_v50, 0.0  ;;  %v1040_v56 = vadd.f32 %v1543_v51, %v1937_v45 }
 0x106   : > { %v1053_v57 = vmax.f32 %v1037_v53, 0.0  ;;  %v1038_v58 = vadd.f32 %v1544_v54, %v1937_v45 }
 0x107   : > { %v1422_v59 = vpack.c.bf16 %v1055_v55, %v1055_v55  ;;  %v1056_v60 = vmax.f32 %v1040_v56, 0.0 }
 0x108   : > { %v1420_v61 = vpack.c.bf16 %v1053_v57, %v1053_v57  ;;  %v1054_v62 = vmax.f32 %v1038_v58, 0.0  ;;  %v1525_v63 = vpop.f32.mrb[4].mxu0 }
 0x109   : > { %1136 = vst.msk [vmem:[%s1945_s7 + $0x8] sm:$0xf] %vm1133_vm2, %v1422_v59  ;;  %v1423_v0 = vpack.c.bf16 %v1056_v60, %v1056_v60  ;;  %v1545_v1 = vadd.f32 %v1525_v63, %v1481_v40  ;;  %v967_v2 = vpop.f32.mrb[5].mxu0 }
 0x10a   : > { %1134 = vst.msk [vmem:[%s1945_s7] sm:$0xf] %vm1133_vm2, %v1420_v61  ;;  %v1421_v3 = vpack.c.bf16 %v1054_v62, %v1054_v62  ;;  %v1546_v4 = vadd.f32 %v967_v2, %v587_v41  ;;  %v1526_v5 = vpop.f32.mrb[6].mxu0 }
 0x10b   : > { %1137 = vst.msk [vmem:[%s1945_s7 + $0xc] sm:$0xf] %vm1133_vm2, %v1423_v0  ;;  %v1043_v6 = vadd.f32 %v1545_v1, %v1937_v45  ;;  %v1547_v7 = vadd.f32 %v1526_v5, %v1482_v42  ;;  %v970_v8 = vpop.f32.mrb[7].mxu0 }
 0x10c   : > { %1135 = vst.msk [vmem:[%s1945_s7 + $0x4] sm:$0xf] %vm1133_vm2, %v1421_v3  ;;  %v1041_v9 = vadd.f32 %v1546_v4, %v1937_v45  ;;  %v1548_v10 = vadd.f32 %v970_v8, %v590_v43 }
 0x10d   : > { %v1059_v11 = vmax.f32 %v1043_v6, 0.0  ;;  %v1044_v12 = vadd.f32 %v1547_v7, %v1937_v45 }
 0x10e   : > { %v1057_v13 = vmax.f32 %v1041_v9, 0.0  ;;  %v1042_v14 = vadd.f32 %v1548_v10, %v1937_v45 }
 0x10f   : > { %v1426_v15 = vpack.c.bf16 %v1059_v11, %v1059_v11  ;;  %v1060_v16 = vmax.f32 %v1044_v12, 0.0  ;;  %v1507_v17 = vpop.f32.mrb[8].mxu1 }
 0x110   : > { %v1424_v18 = vpack.c.bf16 %v1057_v13, %v1057_v13  ;;  %v1058_v19 = vmax.f32 %v1042_v14, 0.0  ;;  %v1529_v20 = vpop.f32.mrb[8].mxu0  ;;  %v782_v21 = vpop.f32.mrb[9].mxu1 }
 0x111   : > { %1140 = vst.msk [vmem:[%s1945_s7 + $0x18] sm:$0xf] %vm1133_vm2, %v1426_v15  ;;  %v1427_v22 = vpack.c.bf16 %v1060_v16, %v1060_v16  ;;  %v1549_v23 = vadd.f32 %v1529_v20, %v1507_v17  ;;  %v983_v24 = vpop.f32.mrb[9].mxu0  ;;  %v1508_v25 = vpop.f32.mrb[10].mxu1 }
 0x112   : > { %1138 = vst.msk [vmem:[%s1945_s7 + $0x10] sm:$0xf] %vm1133_vm2, %v1424_v18  ;;  %v1425_v26 = vpack.c.bf16 %v1058_v19, %v1058_v19  ;;  %v1550_v27 = vadd.f32 %v983_v24, %v782_v21  ;;  %v1530_v28 = vpop.f32.mrb[10].mxu0  ;;  %v785_v29 = vpop.f32.mrb[11].mxu1 }
 0x113   : > { %1141 = vst.msk [vmem:[%s1945_s7 + $0x1c] sm:$0xf] %vm1133_vm2, %v1427_v22  ;;  %v1047_v30 = vadd.f32 %v1549_v23, %v1937_v45  ;;  %v1551_v31 = vadd.f32 %v1530_v28, %v1508_v25  ;;  %v986_v32 = vpop.f32.mrb[11].mxu0 }
 0x114   : > { %1139 = vst.msk [vmem:[%s1945_s7 + $0x14] sm:$0xf] %vm1133_vm2, %v1425_v26  ;;  %v1045_v33 = vadd.f32 %v1550_v27, %v1937_v45  ;;  %v1552_v34 = vadd.f32 %v986_v32, %v785_v29 }
 0x115   : > { %v1063_v35 = vmax.f32 %v1047_v30, 0.0  ;;  %v1048_v36 = vadd.f32 %v1551_v31, %v1937_v45 }
 0x116   : > { %v1061_v37 = vmax.f32 %v1045_v33, 0.0  ;;  %v1046_v38 = vadd.f32 %v1552_v34, %v1937_v45 }
 0x117   : > { %v1430_v39 = vpack.c.bf16 %v1063_v35, %v1063_v35  ;;  %v1064_v40 = vmax.f32 %v1048_v36, 0.0  ;;  %v1511_v41 = vpop.f32.mrb[12].mxu1 }
 0x118   : > { %v1428_v42 = vpack.c.bf16 %v1061_v37, %v1061_v37  ;;  %v1062_v43 = vmax.f32 %v1046_v38, 0.0  ;;  %v1533_v44 = vpop.f32.mrb[12].mxu0  ;;  %v798_v46 = vpop.f32.mrb[13].mxu1 }
 0x119   : > { %1144 = vst.msk [vmem:[%s1945_s7 + $0x28] sm:$0xf] %vm1133_vm2, %v1430_v39  ;;  %v1431_v47 = vpack.c.bf16 %v1064_v40, %v1064_v40  ;;  %v1553_v48 = vadd.f32 %v1533_v44, %v1511_v41  ;;  %v999_v49 = vpop.f32.mrb[13].mxu0  ;;  %v1512_v50 = vpop.f32.mrb[14].mxu1 }
 0x11a   : > { %1142 = vst.msk [vmem:[%s1945_s7 + $0x20] sm:$0xf] %vm1133_vm2, %v1428_v42  ;;  %v1429_v51 = vpack.c.bf16 %v1062_v43, %v1062_v43  ;;  %v1554_v52 = vadd.f32 %v999_v49, %v798_v46  ;;  %v1534_v53 = vpop.f32.mrb[14].mxu0  ;;  %v801_v54 = vpop.f32.mrb[15].mxu1 }
 0x11b   : > { %1145 = vst.msk [vmem:[%s1945_s7 + $0x2c] sm:$0xf] %vm1133_vm2, %v1431_v47  ;;  %v1051_v55 = vadd.f32 %v1553_v48, %v1937_v45  ;;  %v1555_v56 = vadd.f32 %v1534_v53, %v1512_v50  ;;  %v1002_v57 = vpop.f32.mrb[15].mxu0 }
 0x11c   : > { %1143 = vst.msk [vmem:[%s1945_s7 + $0x24] sm:$0xf] %vm1133_vm2, %v1429_v51  ;;  %v1049_v58 = vadd.f32 %v1554_v52, %v1937_v45  ;;  %v1556_v59 = vadd.f32 %v1002_v57, %v801_v54 }
 0x11d   : > { %v1067_v60 = vmax.f32 %v1051_v55, 0.0  ;;  %v1052_v61 = vadd.f32 %v1555_v56, %v1937_v45 }
 0x11e   : > { %v1065_v62 = vmax.f32 %v1049_v58, 0.0  ;;  %v1050_v63 = vadd.f32 %v1556_v59, %v1937_v45 }
 0x11f   : > { %v1434_v0 = vpack.c.bf16 %v1067_v60, %v1067_v60  ;;  %v1068_v1 = vmax.f32 %v1052_v61, 0.0 }
 0x120   : > { %v1432_v2 = vpack.c.bf16 %v1065_v62, %v1065_v62  ;;  %v1066_v3 = vmax.f32 %v1050_v63, 0.0 }
 0x121   : > { %1148 = vst.msk [vmem:[%s1945_s7 + $0x38] sm:$0xf] %vm1133_vm2, %v1434_v0  ;;  %v1435_v4 = vpack.c.bf16 %v1068_v1, %v1068_v1 }
 0x122   : > { %1146 = vst.msk [vmem:[%s1945_s7 + $0x30] sm:$0xf] %vm1133_vm2, %v1432_v2  ;;  %v1433_v5 = vpack.c.bf16 %v1066_v3, %v1066_v3 }
 0x123   : > { %1149 = vst.msk [vmem:[%s1945_s7 + $0x3c] sm:$0xf] %vm1133_vm2, %v1435_v4 }
 0x124   : > { %1147 = vst.msk [vmem:[%s1945_s7 + $0x34] sm:$0xf] %vm1133_vm2, %v1433_v5 }
 0x125 PF: > { %s15_s24 = sadd.s32 1, %s1721_s24   ;;  %s2020_s18 = smov %s1709_s21 }
 0x126   : > { %p12_p12 = scmp.ge.s32.totalorder %s15_s24, 34   ;;  %s2021_s19 = smov %s1713_s22 }
 0x127   : > { %s2022_s20 = smov %s1717_s23  ;;  %s2023_s21 = smov %s2027_s25 }
 0x128   : > { %s2024_s22 = smov %s2031_s26  ;;  %s2025_s23 = smov %s2035_s27 }
 0x129   :  { %14 = sbr.rel (!%p12_p12) target bundleno = 4 (0x4), region = 78 }

// kernel: unet3d_forward.20
= control target key start
LH: loop header
LB: loop body
LE: loop exit
PB: predicated region body
PF: predicated region fallthrough
CT: control target
= control target key end

     0   :  { %s2598_s6 = smov 0   ;;  %s2600_s7 = smov 0   ;;  %s3495_s0 = inlined_call_operand.vmem [shape: bf16[8,512,4], index: 0, kind: input, shape index: {}]   ;;  %s3496_s1 = inlined_call_operand.vmem [shape: bf16[512,4], index: 1, kind: output, shape index: {}]  }
   0x1   :  { %s2602_s8 = smov 0  }
   0x2 LB: > { %s2526_s9 = sadd.s32 4294967295, %s2586_s8   ;;  %s2615_s10 = sadd.s32 1, %s2586_s8   ;;  %s2586_s8 = sphi %s2602_s8, %s3499_s8   ;;  %s2582_s7 = sphi %s2600_s7, %s3498_s7   ;;  %s2578_s6 = sphi %s2598_s6, %s3497_s6  }
   0x3   : > { %s15_s11 = ssub.s32 %s2586_s8, %s2615_s10  ;;  %s18_s12 = sadd.s32 1, %s2582_s7 }
   0x4   : > { %p16_p0 = scmp.eq.s32.totalorder %s15_s11, 0  ;;  %p25_p1 = scmp.ne.s32.totalorder %s2582_s7, %s2578_s6 }
   0x5   : > { %p26_p2 = scmp.eq.s32.totalorder %s2586_s8, 0  ;;  %p2529_p4 = scmp.ge.s32.totalorder %s2586_s8, 2 }
   0x6   : > { %s2624_s13 = scalar_select %p16_p0, %s2582_s7, %s18_s12  }
   0x7   : > { %p27_p3 = por %p26_p2, %p25_p1  ;;  %77 = sbr.rel (%p2529_p4) target bundleno = 82 (0x52), region = 16 }
   0xe   : > { %80 = sbr.rel (!%p27_p3) target bundleno = 82 (0x52), region = 20  ;;  %s82_s14 = sand.u32 (%p27_p3), 1, %s2582_s7  }
   0xf   : > { %s2539_s15 = sshll.u32 (%p27_p3), %s2586_s8, 7  ;;  %s2530_s16 = sshll.u32 (%p27_p3), %s82_s14, 10 }
  0x10   : > { %s2632_s19 = scalar_lea.vmem (%p27_p3), %s3495_s0, %s2539_s15  ;;  %s2637_s20 = scalar_lea.vmem (%p27_p3), [#allocation2], %s2530_s16 }
  0x11   : > { %v103_v0 = vld [vmem:[%s2632_s19] sm:$0xff] (%p27_p3)   ;;  %v107_v1 = vld [vmem:[%s2632_s19 + $0x8] sm:$0xff] (%p27_p3)   ;;  %v111_v2 = vld [vmem:[%s2632_s19 + $0x10] sm:$0xff] (%p27_p3)  }
  0x12   : > { %104 = vst [vmem:[%s2637_s20] sm:$0xff] (%p27_p3), %v103_v0   ;;  %108 = vst [vmem:[%s2637_s20 + $0x8] sm:$0xff] (%p27_p3), %v107_v1   ;;  %v115_v3 = vld [vmem:[%s2632_s19 + $0x18] sm:$0xff] (%p27_p3)   ;;  %v119_v4 = vld [vmem:[%s2632_s19 + $0x20] sm:$0xff] (%p27_p3)  }
  0x13   : > { %112 = vst [vmem:[%s2637_s20 + $0x10] sm:$0xff] (%p27_p3), %v111_v2   ;;  %v123_v5 = vld [vmem:[%s2632_s19 + $0x28] sm:$0xff] (%p27_p3)   ;;  %116 = vst [vmem:[%s2637_s20 + $0x18] sm:$0xff] (%p27_p3), %v115_v3   ;;  %v127_v6 = vld [vmem:[%s2632_s19 + $0x30] sm:$0xff] (%p27_p3)  }
  0x14   : > { %120 = vst [vmem:[%s2637_s20 + $0x20] sm:$0xff] (%p27_p3), %v119_v4   ;;  %124 = vst [vmem:[%s2637_s20 + $0x28] sm:$0xff] (%p27_p3), %v123_v5   ;;  %v131_v7 = vld [vmem:[%s2632_s19 + $0x38] sm:$0xff] (%p27_p3)   ;;  %v135_v8 = vld [vmem:[%s2632_s19 + $0x40] sm:$0xff] (%p27_p3)  }
  0x15   : > { %128 = vst [vmem:[%s2637_s20 + $0x30] sm:$0xff] %v127_v6   ;;  %132 = vst [vmem:[%s2637_s20 + $0x38] sm:$0xff] %v131_v7   ;;  %v139_v9 = vld [vmem:[%s2632_s19 + $0x48] sm:$0xff]   ;;  %v143_v10 = vld [vmem:[%s2632_s19 + $0x50] sm:$0xff]  }
  0x16   : > { %136 = vst [vmem:[%s2637_s20 + $0x40] sm:$0xff] %v135_v8   ;;  %v147_v11 = vld [vmem:[%s2632_s19 + $0x58] sm:$0xff]   ;;  %140 = vst [vmem:[%s2637_s20 + $0x48] sm:$0xff] %v139_v9   ;;  %v151_v12 = vld [vmem:[%s2632_s19 + $0x60] sm:$0xff]  }
  0x17   : > { %144 = vst [vmem:[%s2637_s20 + $0x50] sm:$0xff] %v143_v10   ;;  %148 = vst [vmem:[%s2637_s20 + $0x58] sm:$0xff] %v147_v11   ;;  %v155_v13 = vld [vmem:[%s2632_s19 + $0x68] sm:$0xff]   ;;  %v159_v14 = vld [vmem:[%s2632_s19 + $0x70] sm:$0xff]  }
  0x18   : > { %152 = vst [vmem:[%s2637_s20 + $0x60] sm:$0xff] %v151_v12   ;;  %156 = vst [vmem:[%s2637_s20 + $0x68] sm:$0xff] %v155_v13   ;;  %v163_v15 = vld [vmem:[%s2632_s19 + $0x78] sm:$0xff]   ;;  %v167_v16 = vld [vmem:[%s2632_s19 + $0x100] sm:$0xff]  }
  0x19   : > { %160 = vst [vmem:[%s2637_s20 + $0x70] sm:$0xff] %v159_v14   ;;  %v171_v17 = vld [vmem:[%s2632_s19 + $0x108] sm:$0xff]   ;;  %164 = vst [vmem:[%s2637_s20 + $0x78] sm:$0xff] %v163_v15   ;;  %v175_v18 = vld [vmem:[%s2632_s19 + $0x110] sm:$0xff]  }
  0x1a   : > { %168 = vst [vmem:[%s2637_s20 + $0x80] sm:$0xff] %v167_v16   ;;  %172 = vst [vmem:[%s2637_s20 + $0x88] sm:$0xff] %v171_v17   ;;  %v179_v19 = vld [vmem:[%s2632_s19 + $0x118] sm:$0xff]   ;;  %v183_v20 = vld [vmem:[%s2632_s19 + $0x120] sm:$0xff]  }
  0x1b   : > { %176 = vst [vmem:[%s2637_s20 + $0x90] sm:$0xff] %v175_v18   ;;  %180 = vst [vmem:[%s2637_s20 + $0x98] sm:$0xff] %v179_v19   ;;  %v187_v21 = vld [vmem:[%s2632_s19 + $0x128] sm:$0xff]   ;;  %v191_v22 = vld [vmem:[%s2632_s19 + $0x130] sm:$0xff]  }
  0x1c   : > { %184 = vst [vmem:[%s2637_s20 + $0xa0] sm:$0xff] %v183_v20   ;;  %v195_v23 = vld [vmem:[%s2632_s19 + $0x138] sm:$0xff]   ;;  %188 = vst [vmem:[%s2637_s20 + $0xa8] sm:$0xff] %v187_v21   ;;  %v199_v24 = vld [vmem:[%s2632_s19 + $0x140] sm:$0xff]  }
  0x1d   : > { %192 = vst [vmem:[%s2637_s20 + $0xb0] sm:$0xff] %v191_v22   ;;  %196 = vst [vmem:[%s2637_s20 + $0xb8] sm:$0xff] %v195_v23   ;;  %v203_v25 = vld [vmem:[%s2632_s19 + $0x148] sm:$0xff]   ;;  %v207_v26 = vld [vmem:[%s2632_s19 + $0x150] sm:$0xff]  }
  0x1e   : > { %200 = vst [vmem:[%s2637_s20 + $0xc0] sm:$0xff] %v199_v24   ;;  %204 = vst [vmem:[%s2637_s20 + $0xc8] sm:$0xff] %v203_v25   ;;  %v211_v27 = vld [vmem:[%s2632_s19 + $0x158] sm:$0xff]   ;;  %v215_v28 = vld [vmem:[%s2632_s19 + $0x160] sm:$0xff]  }
  0x1f   : > { %208 = vst [vmem:[%s2637_s20 + $0xd0] sm:$0xff] %v207_v26   ;;  %v219_v29 = vld [vmem:[%s2632_s19 + $0x168] sm:$0xff]   ;;  %212 = vst [vmem:[%s2637_s20 + $0xd8] sm:$0xff] %v211_v27   ;;  %v223_v30 = vld [vmem:[%s2632_s19 + $0x170] sm:$0xff]  }
  0x20   : > { %216 = vst [vmem:[%s2637_s20 + $0xe0] sm:$0xff] %v215_v28   ;;  %220 = vst [vmem:[%s2637_s20 + $0xe8] sm:$0xff] %v219_v29   ;;  %v227_v31 = vld [vmem:[%s2632_s19 + $0x178] sm:$0xff]   ;;  %v231_v32 = vld [vmem:[%s2632_s19 + $0x200] sm:$0xff]  }
  0x21   : > { %224 = vst [vmem:[%s2637_s20 + $0xf0] sm:$0xff] %v223_v30   ;;  %228 = vst [vmem:[%s2637_s20 + $0xf8] sm:$0xff] %v227_v31   ;;  %v235_v33 = vld [vmem:[%s2632_s19 + $0x208] sm:$0xff]   ;;  %v239_v34 = vld [vmem:[%s2632_s19 + $0x210] sm:$0xff]  }
  0x22   : > { %232 = vst [vmem:[%s2637_s20 + $0x100] sm:$0xff] %v231_v32   ;;  %v243_v35 = vld [vmem:[%s2632_s19 + $0x218] sm:$0xff]   ;;  %236 = vst [vmem:[%s2637_s20 + $0x108] sm:$0xff] %v235_v33   ;;  %v247_v36 = vld [vmem:[%s2632_s19 + $0x220] sm:$0xff]  }
  0x23   : > { %240 = vst [vmem:[%s2637_s20 + $0x110] sm:$0xff] %v239_v34   ;;  %244 = vst [vmem:[%s2637_s20 + $0x118] sm:$0xff] %v243_v35   ;;  %v251_v37 = vld [vmem:[%s2632_s19 + $0x228] sm:$0xff]   ;;  %v255_v38 = vld [vmem:[%s2632_s19 + $0x230] sm:$0xff]  }
  0x24   : > { %248 = vst [vmem:[%s2637_s20 + $0x120] sm:$0xff] %v247_v36   ;;  %252 = vst [vmem:[%s2637_s20 + $0x128] sm:$0xff] %v251_v37   ;;  %v259_v39 = vld [vmem:[%s2632_s19 + $0x238] sm:$0xff]   ;;  %v263_v40 = vld [vmem:[%s2632_s19 + $0x240] sm:$0xff]  }
  0x25   : > { %256 = vst [vmem:[%s2637_s20 + $0x130] sm:$0xff] %v255_v38   ;;  %v267_v41 = vld [vmem:[%s2632_s19 + $0x248] sm:$0xff]   ;;  %260 = vst [vmem:[%s2637_s20 + $0x138] sm:$0xff] %v259_v39   ;;  %v271_v42 = vld [vmem:[%s2632_s19 + $0x250] sm:$0xff]  }
  0x26   : > { %264 = vst [vmem:[%s2637_s20 + $0x140] sm:$0xff] %v263_v40   ;;  %268 = vst [vmem:[%s2637_s20 + $0x148] sm:$0xff] %v267_v41   ;;  %v275_v43 = vld [vmem:[%s2632_s19 + $0x258] sm:$0xff]   ;;  %v279_v44 = vld [vmem:[%s2632_s19 + $0x260] sm:$0xff]  }
  0x27   : > { %272 = vst [vmem:[%s2637_s20 + $0x150] sm:$0xff] %v271_v42   ;;  %276 = vst [vmem:[%s2637_s20 + $0x158] sm:$0xff] %v275_v43   ;;  %v283_v45 = vld [vmem:[%s2632_s19 + $0x268] sm:$0xff]   ;;  %v287_v46 = vld [vmem:[%s2632_s19 + $0x270] sm:$0xff]  }
  0x28   : > { %280 = vst [vmem:[%s2637_s20 + $0x160] sm:$0xff] %v279_v44   ;;  %v291_v47 = vld [vmem:[%s2632_s19 + $0x278] sm:$0xff]   ;;  %284 = vst [vmem:[%s2637_s20 + $0x168] sm:$0xff] %v283_v45   ;;  %v295_v48 = vld [vmem:[%s2632_s19 + $0x300] sm:$0xff]  }
  0x29   : > { %288 = vst [vmem:[%s2637_s20 + $0x170] sm:$0xff] %v287_v46   ;;  %292 = vst [vmem:[%s2637_s20 + $0x178] sm:$0xff] %v291_v47   ;;  %v299_v49 = vld [vmem:[%s2632_s19 + $0x308] sm:$0xff]   ;;  %v303_v50 = vld [vmem:[%s2632_s19 + $0x310] sm:$0xff]  }
  0x2a   : > { %296 = vst [vmem:[%s2637_s20 + $0x180] sm:$0xff] %v295_v48   ;;  %300 = vst [vmem:[%s2637_s20 + $0x188] sm:$0xff] %v299_v49   ;;  %v307_v51 = vld [vmem:[%s2632_s19 + $0x318] sm:$0xff]   ;;  %v311_v52 = vld [vmem:[%s2632_s19 + $0x320] sm:$0xff]  }
  0x2b   : > { %304 = vst [vmem:[%s2637_s20 + $0x190] sm:$0xff] %v303_v50   ;;  %v315_v53 = vld [vmem:[%s2632_s19 + $0x328] sm:$0xff]   ;;  %308 = vst [vmem:[%s2637_s20 + $0x198] sm:$0xff] %v307_v51   ;;  %v319_v54 = vld [vmem:[%s2632_s19 + $0x330] sm:$0xff]  }
  0x2c   : > { %312 = vst [vmem:[%s2637_s20 + $0x1a0] sm:$0xff] %v311_v52   ;;  %316 = vst [vmem:[%s2637_s20 + $0x1a8] sm:$0xff] %v315_v53   ;;  %v323_v55 = vld [vmem:[%s2632_s19 + $0x338] sm:$0xff]   ;;  %v327_v56 = vld [vmem:[%s2632_s19 + $0x340] sm:$0xff]  }
  0x2d   : > { %320 = vst [vmem:[%s2637_s20 + $0x1b0] sm:$0xff] %v319_v54   ;;  %324 = vst [vmem:[%s2637_s20 + $0x1b8] sm:$0xff] %v323_v55   ;;  %v331_v57 = vld [vmem:[%s2632_s19 + $0x348] sm:$0xff]   ;;  %v335_v58 = vld [vmem:[%s2632_s19 + $0x350] sm:$0xff]  }
  0x2e   : > { %328 = vst [vmem:[%s2637_s20 + $0x1c0] sm:$0xff] %v327_v56   ;;  %v339_v59 = vld [vmem:[%s2632_s19 + $0x358] sm:$0xff]   ;;  %332 = vst [vmem:[%s2637_s20 + $0x1c8] sm:$0xff] %v331_v57   ;;  %v343_v60 = vld [vmem:[%s2632_s19 + $0x360] sm:$0xff]  }
  0x2f   : > { %336 = vst [vmem:[%s2637_s20 + $0x1d0] sm:$0xff] %v335_v58   ;;  %340 = vst [vmem:[%s2637_s20 + $0x1d8] sm:$0xff] %v339_v59   ;;  %v347_v61 = vld [vmem:[%s2632_s19 + $0x368] sm:$0xff]   ;;  %v351_v62 = vld [vmem:[%s2632_s19 + $0x370] sm:$0xff]  }
  0x30   : > { %344 = vst [vmem:[%s2637_s20 + $0x1e0] sm:$0xff] %v343_v60   ;;  %348 = vst [vmem:[%s2637_s20 + $0x1e8] sm:$0xff] %v347_v61   ;;  %v355_v63 = vld [vmem:[%s2632_s19 + $0x378] sm:$0xff]   ;;  %v359_v0 = vld [vmem:[%s2632_s19 + $0x400] sm:$0xff]  }
  0x31   : > { %352 = vst [vmem:[%s2637_s20 + $0x1f0] sm:$0xff] %v351_v62   ;;  %v363_v1 = vld [vmem:[%s2632_s19 + $0x408] sm:$0xff]   ;;  %356 = vst [vmem:[%s2637_s20 + $0x1f8] sm:$0xff] %v355_v63   ;;  %v367_v2 = vld [vmem:[%s2632_s19 + $0x410] sm:$0xff]  }
  0x32   : > { %360 = vst [vmem:[%s2637_s20 + $0x200] sm:$0xff] %v359_v0   ;;  %364 = vst [vmem:[%s2637_s20 + $0x208] sm:$0xff] %v363_v1   ;;  %v371_v3 = vld [vmem:[%s2632_s19 + $0x418] sm:$0xff]   ;;  %v375_v4 = vld [vmem:[%s2632_s19 + $0x420] sm:$0xff]  }
  0x33   : > { %368 = vst [vmem:[%s2637_s20 + $0x210] sm:$0xff] %v367_v2   ;;  %372 = vst [vmem:[%s2637_s20 + $0x218] sm:$0xff] %v371_v3   ;;  %v379_v5 = vld [vmem:[%s2632_s19 + $0x428] sm:$0xff]   ;;  %v383_v6 = vld [vmem:[%s2632_s19 + $0x430] sm:$0xff]  }
  0x34   : > { %376 = vst [vmem:[%s2637_s20 + $0x220] sm:$0xff] %v375_v4   ;;  %v387_v7 = vld [vmem:[%s2632_s19 + $0x438] sm:$0xff]   ;;  %380 = vst [vmem:[%s2637_s20 + $0x228] sm:$0xff] %v379_v5   ;;  %v391_v8 = vld [vmem:[%s2632_s19 + $0x440] sm:$0xff]  }
  0x35   : > { %384 = vst [vmem:[%s2637_s20 + $0x230] sm:$0xff] %v383_v6   ;;  %388 = vst [vmem:[%s2637_s20 + $0x238] sm:$0xff] %v387_v7   ;;  %v395_v9 = vld [vmem:[%s2632_s19 + $0x448] sm:$0xff]   ;;  %v399_v10 = vld [vmem:[%s2632_s19 + $0x450] sm:$0xff]  }
  0x36   : > { %392 = vst [vmem:[%s2637_s20 + $0x240] sm:$0xff] %v391_v8   ;;  %396 = vst [vmem:[%s2637_s20 + $0x248] sm:$0xff] %v395_v9   ;;  %v403_v11 = vld [vmem:[%s2632_s19 + $0x458] sm:$0xff]   ;;  %v407_v12 = vld [vmem:[%s2632_s19 + $0x460] sm:$0xff]  }
  0x37   : > { %400 = vst [vmem:[%s2637_s20 + $0x250] sm:$0xff] %v399_v10   ;;  %v411_v13 = vld [vmem:[%s2632_s19 + $0x468] sm:$0xff]   ;;  %404 = vst [vmem:[%s2637_s20 + $0x258] sm:$0xff] %v403_v11   ;;  %v415_v14 = vld [vmem:[%s2632_s19 + $0x470] sm:$0xff]  }
  0x38   : > { %408 = vst [vmem:[%s2637_s20 + $0x260] sm:$0xff] %v407_v12   ;;  %412 = vst [vmem:[%s2637_s20 + $0x268] sm:$0xff] %v411_v13   ;;  %v419_v15 = vld [vmem:[%s2632_s19 + $0x478] sm:$0xff]   ;;  %v423_v16 = vld [vmem:[%s2632_s19 + $0x500] sm:$0xff]  }
  0x39   : > { %416 = vst [vmem:[%s2637_s20 + $0x270] sm:$0xff] %v415_v14   ;;  %420 = vst [vmem:[%s2637_s20 + $0x278] sm:$0xff] %v419_v15   ;;  %v427_v17 = vld [vmem:[%s2632_s19 + $0x508] sm:$0xff]   ;;  %v431_v18 = vld [vmem:[%s2632_s19 + $0x510] sm:$0xff]  }
  0x3a   : > { %424 = vst [vmem:[%s2637_s20 + $0x280] sm:$0xff] %v423_v16   ;;  %v435_v19 = vld [vmem:[%s2632_s19 + $0x518] sm:$0xff]   ;;  %428 = vst [vmem:[%s2637_s20 + $0x288] sm:$0xff] %v427_v17   ;;  %v439_v20 = vld [vmem:[%s2632_s19 + $0x520] sm:$0xff]  }
  0x3b   : > { %432 = vst [vmem:[%s2637_s20 + $0x290] sm:$0xff] %v431_v18   ;;  %436 = vst [vmem:[%s2637_s20 + $0x298] sm:$0xff] %v435_v19   ;;  %v443_v21 = vld [vmem:[%s2632_s19 + $0x528] sm:$0xff]   ;;  %v447_v22 = vld [vmem:[%s2632_s19 + $0x530] sm:$0xff]  }
  0x3c   : > { %440 = vst [vmem:[%s2637_s20 + $0x2a0] sm:$0xff] %v439_v20   ;;  %444 = vst [vmem:[%s2637_s20 + $0x2a8] sm:$0xff] %v443_v21   ;;  %v451_v23 = vld [vmem:[%s2632_s19 + $0x538] sm:$0xff]   ;;  %v455_v24 = vld [vmem:[%s2632_s19 + $0x540] sm:$0xff]  }
  0x3d   : > { %448 = vst [vmem:[%s2637_s20 + $0x2b0] sm:$0xff] %v447_v22   ;;  %v459_v25 = vld [vmem:[%s2632_s19 + $0x548] sm:$0xff]   ;;  %452 = vst [vmem:[%s2637_s20 + $0x2b8] sm:$0xff] %v451_v23   ;;  %v463_v26 = vld [vmem:[%s2632_s19 + $0x550] sm:$0xff]  }
  0x3e   : > { %456 = vst [vmem:[%s2637_s20 + $0x2c0] sm:$0xff] %v455_v24   ;;  %460 = vst [vmem:[%s2637_s20 + $0x2c8] sm:$0xff] %v459_v25   ;;  %v467_v27 = vld [vmem:[%s2632_s19 + $0x558] sm:$0xff]   ;;  %v471_v28 = vld [vmem:[%s2632_s19 + $0x560] sm:$0xff]  }
  0x3f   : > { %464 = vst [vmem:[%s2637_s20 + $0x2d0] sm:$0xff] %v463_v26   ;;  %468 = vst [vmem:[%s2637_s20 + $0x2d8] sm:$0xff] %v467_v27   ;;  %v475_v29 = vld [vmem:[%s2632_s19 + $0x568] sm:$0xff]   ;;  %v479_v30 = vld [vmem:[%s2632_s19 + $0x570] sm:$0xff]  }
  0x40   : > { %472 = vst [vmem:[%s2637_s20 + $0x2e0] sm:$0xff] %v471_v28   ;;  %v483_v31 = vld [vmem:[%s2632_s19 + $0x578] sm:$0xff]   ;;  %476 = vst [vmem:[%s2637_s20 + $0x2e8] sm:$0xff] %v475_v29   ;;  %v487_v32 = vld [vmem:[%s2632_s19 + $0x600] sm:$0xff]  }
  0x41   : > { %480 = vst [vmem:[%s2637_s20 + $0x2f0] sm:$0xff] %v479_v30   ;;  %484 = vst [vmem:[%s2637_s20 + $0x2f8] sm:$0xff] %v483_v31   ;;  %v491_v33 = vld [vmem:[%s2632_s19 + $0x608] sm:$0xff]   ;;  %v495_v34 = vld [vmem:[%s2632_s19 + $0x610] sm:$0xff]  }
  0x42   : > { %488 = vst [vmem:[%s2637_s20 + $0x300] sm:$0xff] %v487_v32   ;;  %492 = vst [vmem:[%s2637_s20 + $0x308] sm:$0xff] %v491_v33   ;;  %v499_v35 = vld [vmem:[%s2632_s19 + $0x618] sm:$0xff]   ;;  %v503_v36 = vld [vmem:[%s2632_s19 + $0x620] sm:$0xff]  }
  0x43   : > { %496 = vst [vmem:[%s2637_s20 + $0x310] sm:$0xff] %v495_v34   ;;  %v507_v37 = vld [vmem:[%s2632_s19 + $0x628] sm:$0xff]   ;;  %500 = vst [vmem:[%s2637_s20 + $0x318] sm:$0xff] %v499_v35   ;;  %v511_v38 = vld [vmem:[%s2632_s19 + $0x630] sm:$0xff]  }
  0x44   : > { %504 = vst [vmem:[%s2637_s20 + $0x320] sm:$0xff] %v503_v36   ;;  %508 = vst [vmem:[%s2637_s20 + $0x328] sm:$0xff] %v507_v37   ;;  %v515_v39 = vld [vmem:[%s2632_s19 + $0x638] sm:$0xff]   ;;  %v519_v40 = vld [vmem:[%s2632_s19 + $0x640] sm:$0xff]  }
  0x45   : > { %512 = vst [vmem:[%s2637_s20 + $0x330] sm:$0xff] %v511_v38   ;;  %516 = vst [vmem:[%s2637_s20 + $0x338] sm:$0xff] %v515_v39   ;;  %v523_v41 = vld [vmem:[%s2632_s19 + $0x648] sm:$0xff]   ;;  %v527_v42 = vld [vmem:[%s2632_s19 + $0x650] sm:$0xff]  }
  0x46   : > { %520 = vst [vmem:[%s2637_s20 + $0x340] sm:$0xff] %v519_v40   ;;  %v531_v43 = vld [vmem:[%s2632_s19 + $0x658] sm:$0xff]   ;;  %524 = vst [vmem:[%s2637_s20 + $0x348] sm:$0xff] %v523_v41   ;;  %v535_v44 = vld [vmem:[%s2632_s19 + $0x660] sm:$0xff]  }
  0x47   : > { %528 = vst [vmem:[%s2637_s20 + $0x350] sm:$0xff] %v527_v42   ;;  %532 = vst [vmem:[%s2637_s20 + $0x358] sm:$0xff] %v531_v43   ;;  %v539_v45 = vld [vmem:[%s2632_s19 + $0x668] sm:$0xff]   ;;  %v543_v46 = vld [vmem:[%s2632_s19 + $0x670] sm:$0xff]  }
  0x48   : > { %536 = vst [vmem:[%s2637_s20 + $0x360] sm:$0xff] %v535_v44   ;;  %540 = vst [vmem:[%s2637_s20 + $0x368] sm:$0xff] %v539_v45   ;;  %v547_v47 = vld [vmem:[%s2632_s19 + $0x678] sm:$0xff]   ;;  %v551_v48 = vld [vmem:[%s2632_s19 + $0x700] sm:$0xff]  }
  0x49   : > { %544 = vst [vmem:[%s2637_s20 + $0x370] sm:$0xff] %v543_v46   ;;  %v555_v49 = vld [vmem:[%s2632_s19 + $0x708] sm:$0xff]   ;;  %548 = vst [vmem:[%s2637_s20 + $0x378] sm:$0xff] %v547_v47   ;;  %v559_v50 = vld [vmem:[%s2632_s19 + $0x710] sm:$0xff]  }
  0x4a   : > { %552 = vst [vmem:[%s2637_s20 + $0x380] sm:$0xff] %v551_v48   ;;  %556 = vst [vmem:[%s2637_s20 + $0x388] sm:$0xff] %v555_v49   ;;  %v563_v51 = vld [vmem:[%s2632_s19 + $0x718] sm:$0xff]   ;;  %v567_v52 = vld [vmem:[%s2632_s19 + $0x720] sm:$0xff]  }
  0x4b   : > { %560 = vst [vmem:[%s2637_s20 + $0x390] sm:$0xff] %v559_v50   ;;  %564 = vst [vmem:[%s2637_s20 + $0x398] sm:$0xff] %v563_v51   ;;  %v571_v53 = vld [vmem:[%s2632_s19 + $0x728] sm:$0xff]   ;;  %v575_v54 = vld [vmem:[%s2632_s19 + $0x730] sm:$0xff]  }
  0x4c   : > { %568 = vst [vmem:[%s2637_s20 + $0x3a0] sm:$0xff] %v567_v52   ;;  %v579_v55 = vld [vmem:[%s2632_s19 + $0x738] sm:$0xff]   ;;  %572 = vst [vmem:[%s2637_s20 + $0x3a8] sm:$0xff] %v571_v53   ;;  %v583_v56 = vld [vmem:[%s2632_s19 + $0x740] sm:$0xff]  }
  0x4d   : > { %576 = vst [vmem:[%s2637_s20 + $0x3b0] sm:$0xff] %v575_v54   ;;  %580 = vst [vmem:[%s2637_s20 + $0x3b8] sm:$0xff] %v579_v55   ;;  %v587_v57 = vld [vmem:[%s2632_s19 + $0x748] sm:$0xff]   ;;  %v591_v58 = vld [vmem:[%s2632_s19 + $0x750] sm:$0xff]  }
  0x4e   : > { %584 = vst [vmem:[%s2637_s20 + $0x3c0] sm:$0xff] %v583_v56   ;;  %588 = vst [vmem:[%s2637_s20 + $0x3c8] sm:$0xff] %v587_v57   ;;  %v595_v59 = vld [vmem:[%s2632_s19 + $0x758] sm:$0xff]   ;;  %v599_v60 = vld [vmem:[%s2632_s19 + $0x760] sm:$0xff]  }
  0x4f   : > { %592 = vst [vmem:[%s2637_s20 + $0x3d0] sm:$0xff] %v591_v58   ;;  %v603_v61 = vld [vmem:[%s2632_s19 + $0x768] sm:$0xff]   ;;  %596 = vst [vmem:[%s2637_s20 + $0x3d8] sm:$0xff] %v595_v59   ;;  %v607_v62 = vld [vmem:[%s2632_s19 + $0x770] sm:$0xff]  }
  0x50   : > { %600 = vst [vmem:[%s2637_s20 + $0x3e0] sm:$0xff] %v599_v60   ;;  %604 = vst [vmem:[%s2637_s20 + $0x3e8] sm:$0xff] %v603_v61   ;;  %v611_v63 = vld [vmem:[%s2632_s19 + $0x778] sm:$0xff]  }
  0x51   : > { %608 = vst [vmem:[%s2637_s20 + $0x3f0] sm:$0xff] %v607_v62   ;;  %612 = vst [vmem:[%s2637_s20 + $0x3f8] sm:$0xff] %v611_v63  }
  0x52 PF: > { %p2533_p5 = scmp.ge.s32.totalorder %s2586_s8, 1  ;;  %p1148_p6 = scmp.lt.s32.totalorder %s2586_s8, 3 }
  0x54   : > { %p1149_p7 = pnand %p2533_p5, %p1148_p6 }
  0x55   : > { %s1155_s21 = sand.u32 (!%p1149_p7), 1, %s2578_s6   ;;  %s2535_s22 = sshll.u32 (!%p1149_p7), %s2526_s9, 5  ;;  %vm1438_vm0 = vcmask (!%p1149_p7), 27648  }
  0x56   : > { %1152 = sbr.rel (%p1149_p7) target bundleno = 280 (0x118), region = 61  ;;  %s2534_s23 = sshll.u32 (!%p1149_p7), %s1155_s21, 10 }
  0x57   : > { %p1176_p8 = scmp.lt.s32.totalorder (!%p1149_p7), %s2535_s22, 63  ;;  %s2897_s24 = scalar_lea.vmem (!%p1149_p7), [#allocation2], %s2534_s23 }
  0x58   : > { %v1182_v0 = vld [vmem:[%s2897_s24] sm:$0xf] (!%p1149_p7)  ;;  %v1183_v12 = vld [vmem:[%s2897_s24 + $0x4] sm:$0xf] (!%p1149_p7)  ;;  %v1184_v30 = vld [vmem:[%s2897_s24 + $0x8] sm:$0xf] (!%p1149_p7) }
  0x59   : > { %v1214_v1 = vld [vmem:[%s2897_s24 + $0x80] sm:$0xf] (!%p1149_p7)  ;;  %v1441_v4 = vsel (!%p1149_p7), %vm1438_vm0, %v1182_v0, 4286644096  ;;  %v1215_v13 = vld [vmem:[%s2897_s24 + $0x84] sm:$0xf] (!%p1149_p7) }
  0x5a   : > { %v1246_v2 = vld [vmem:[%s2897_s24 + $0x100] sm:$0xf] (!%p1149_p7)  ;;  %v1444_v5 = vsel (!%p1149_p7), %vm1438_vm0, %v1214_v1, 4286644096  ;;  %v1247_v14 = vld [vmem:[%s2897_s24 + $0x104] sm:$0xf] (!%p1149_p7) }
  0x5b   : > { %v1278_v3 = vld [vmem:[%s2897_s24 + $0x180] sm:$0xf] (!%p1149_p7)  ;;  %v1446_v7 = vmax.bf16 (!%p1149_p7), %v1444_v5, %v1441_v4  ;;  %v1448_v8 = vsel (!%p1149_p7), %vm1438_vm0, %v1246_v2, 4286644096  ;;  %v1279_v19 = vld [vmem:[%s2897_s24 + $0x184] sm:$0xf] (!%p1149_p7) }
  0x5c   : > { %v1310_v6 = vld [vmem:[%s2897_s24 + $0x200] sm:$0xf] (!%p1149_p7)  ;;  %v1452_v10 = vsel (!%p1149_p7), %vm1438_vm0, %v1278_v3, 4286644096  ;;  %v1472_v20 = vsel (!%p1149_p7), %vm1438_vm0, %v1183_v12, 4286644096 }
  0x5d   : > { %s3501_s22 = smov (!%p1176_p8, %s2535_s22), 63  ;;  %v1342_v9 = vld [vmem:[%s2897_s24 + $0x280] sm:$0xf]  ;;  %v1450_v11 = vmax.bf16 %v1448_v8, %v1446_v7  ;;  %v1456_v16 = vsel %vm1438_vm0, %v1310_v6, 4286644096 }
  0x5e   : > { %s2536_s25 = sshll.u32 %s3501_s22, 2  ;;  %v1374_v15 = vld [vmem:[%s2897_s24 + $0x300] sm:$0xf]  ;;  %v1460_v21 = vsel %vm1438_vm0, %v1342_v9, 4286644096 }
  0x5f   : > { %v1406_v17 = vld [vmem:[%s2897_s24 + $0x380] sm:$0xf]  ;;  %v1454_v18 = vmax.bf16 %v1452_v10, %v1450_v11  ;;  %v1475_v22 = vsel %vm1438_vm0, %v1215_v13, 4286644096  ;;  %v1479_v23 = vsel %vm1438_vm0, %v1247_v14, 4286644096  ;;  %s2943_s28 = scalar_lea.vmem %s3496_s1, %s2536_s25 }
  0x60   : > { %v1464_v25 = vsel %vm1438_vm0, %v1374_v15, 4286644096  ;;  %v1311_v26 = vld [vmem:[%s2897_s24 + $0x204] sm:$0xf]  ;;  %v1477_v28 = vmax.bf16 %v1475_v22, %v1472_v20  ;;  %v1483_v29 = vsel %vm1438_vm0, %v1279_v19, 4286644096 }
  0x61   : > { %v1458_v24 = vmax.bf16 %v1456_v16, %v1454_v18  ;;  %v1343_v27 = vld [vmem:[%s2897_s24 + $0x284] sm:$0xf]  ;;  %v1216_v31 = vld [vmem:[%s2897_s24 + $0x88] sm:$0xf]  ;;  %v1468_v33 = vsel %vm1438_vm0, %v1406_v17, 4286644096 }
  0x62   : > { %v1375_v34 = vld [vmem:[%s2897_s24 + $0x304] sm:$0xf]  ;;  %v1481_v35 = vmax.bf16 %v1479_v23, %v1477_v28  ;;  %v1248_v36 = vld [vmem:[%s2897_s24 + $0x108] sm:$0xf]  ;;  %v1487_v37 = vsel %vm1438_vm0, %v1311_v26, 4286644096 }
  0x63   : > { %v1462_v32 = vmax.bf16 %v1460_v21, %v1458_v24  ;;  %v1491_v38 = vsel %vm1438_vm0, %v1343_v27, 4286644096  ;;  %v1280_v39 = vld [vmem:[%s2897_s24 + $0x188] sm:$0xf]  ;;  %v1407_v41 = vld [vmem:[%s2897_s24 + $0x384] sm:$0xf] }
  0x64   : > { %v1485_v42 = vmax.bf16 %v1483_v29, %v1481_v35  ;;  %v1503_v43 = vsel %vm1438_vm0, %v1184_v30, 4286644096  ;;  %v1506_v44 = vsel %vm1438_vm0, %v1216_v31, 4286644096  ;;  %v1495_v45 = vsel %vm1438_vm0, %v1375_v34, 4286644096 }
  0x65   : > { %v1466_v40 = vmax.bf16 %v1464_v25, %v1462_v32  ;;  %v1312_v46 = vld [vmem:[%s2897_s24 + $0x208] sm:$0xf]  ;;  %v1508_v47 = vmax.bf16 %v1506_v44, %v1503_v43  ;;  %v1510_v48 = vsel %vm1438_vm0, %v1248_v36, 4286644096  ;;  %v1514_v51 = vsel %vm1438_vm0, %v1280_v39, 4286644096 }
  0x66   : > { %v1489_v50 = vmax.bf16 %v1487_v37, %v1485_v42  ;;  %v1185_v52 = vld [vmem:[%s2897_s24 + $0xc] sm:$0xf]  ;;  %v1499_v54 = vsel %vm1438_vm0, %v1407_v41, 4286644096  ;;  %v1344_v55 = vld [vmem:[%s2897_s24 + $0x288] sm:$0xf] }
  0x67   : > { %v1470_v49 = vmax.bf16 %v1468_v33, %v1466_v40  ;;  %v1217_v53 = vld [vmem:[%s2897_s24 + $0x8c] sm:$0xf]  ;;  %v1512_v56 = vmax.bf16 %v1510_v48, %v1508_v47  ;;  %v1376_v59 = vld [vmem:[%s2897_s24 + $0x308] sm:$0xf]  ;;  %v1518_v60 = vsel %vm1438_vm0, %v1312_v46, 4286644096 }
  0x68   : > { %v1249_v57 = vld [vmem:[%s2897_s24 + $0x10c] sm:$0xf]  ;;  %v1493_v58 = vmax.bf16 %v1491_v38, %v1489_v50  ;;  %v1408_v62 = vld [vmem:[%s2897_s24 + $0x388] sm:$0xf]  ;;  %v1534_v0 = vsel %vm1438_vm0, %v1185_v52, 4286644096 }
  0x69   : > { %2432 = vst.msk [vmem:[%s2943_s28] sm:$0xf] %vm1438_vm0, %v1470_v49  ;;  %v1281_v61 = vld [vmem:[%s2897_s24 + $0x18c] sm:$0xf]  ;;  %v1516_v63 = vmax.bf16 %v1514_v51, %v1512_v56  ;;  %v1537_v1 = vsel %vm1438_vm0, %v1217_v53, 4286644096 }
  0x6a   : > { %v1497_v2 = vmax.bf16 %v1495_v45, %v1493_v58  ;;  %v1522_v3 = vsel %vm1438_vm0, %v1344_v55, 4286644096  ;;  %v1313_v4 = vld [vmem:[%s2897_s24 + $0x20c] sm:$0xf]  ;;  %v1539_v5 = vmax.bf16 %v1537_v1, %v1534_v0  ;;  %v1541_v6 = vsel %vm1438_vm0, %v1249_v57, 4286644096 }
  0x6b   : > { %v1520_v7 = vmax.bf16 %v1518_v60, %v1516_v63  ;;  %v1526_v8 = vsel %vm1438_vm0, %v1376_v59, 4286644096  ;;  %v1545_v9 = vsel %vm1438_vm0, %v1281_v61, 4286644096  ;;  %v1186_v10 = vld [vmem:[%s2897_s24 + $0x10] sm:$0xf] }
  0x6c   : > { %v1501_v11 = vmax.bf16 %v1499_v54, %v1497_v2  ;;  %v1345_v12 = vld [vmem:[%s2897_s24 + $0x28c] sm:$0xf]  ;;  %v1543_v13 = vmax.bf16 %v1541_v6, %v1539_v5  ;;  %v1218_v14 = vld [vmem:[%s2897_s24 + $0x90] sm:$0xf]  ;;  %v1530_v17 = vsel %vm1438_vm0, %v1408_v62, 4286644096 }
  0x6d   : > { %v1250_v15 = vld [vmem:[%s2897_s24 + $0x110] sm:$0xf]  ;;  %v1524_v16 = vmax.bf16 %v1522_v3, %v1520_v7  ;;  %v1377_v18 = vld [vmem:[%s2897_s24 + $0x30c] sm:$0xf]  ;;  %v1549_v19 = vsel %vm1438_vm0, %v1313_v4, 4286644096 }
  0x6e   : > { %2433 = vst.msk [vmem:[%s2943_s28 + $0x4] sm:$0xf] %vm1438_vm0, %v1501_v11  ;;  %v1409_v20 = vld [vmem:[%s2897_s24 + $0x38c] sm:$0xf]  ;;  %v1547_v21 = vmax.bf16 %v1545_v9, %v1543_v13  ;;  %v1282_v22 = vld [vmem:[%s2897_s24 + $0x190] sm:$0xf] }
  0x6f   : > { %v1565_v23 = vsel %vm1438_vm0, %v1186_v10, 4286644096  ;;  %v1528_v24 = vmax.bf16 %v1526_v8, %v1524_v16  ;;  %v1553_v25 = vsel %vm1438_vm0, %v1345_v12, 4286644096  ;;  %v1568_v26 = vsel %vm1438_vm0, %v1218_v14, 4286644096 }
  0x70   : > { %v1572_v27 = vsel %vm1438_vm0, %v1250_v15, 4286644096  ;;  %v1551_v28 = vmax.bf16 %v1549_v19, %v1547_v21  ;;  %v1557_v29 = vsel %vm1438_vm0, %v1377_v18, 4286644096  ;;  %v1314_v30 = vld [vmem:[%s2897_s24 + $0x210] sm:$0xf]  ;;  %v1570_v32 = vmax.bf16 %v1568_v26, %v1565_v23 }
  0x71   : > { %v1346_v31 = vld [vmem:[%s2897_s24 + $0x290] sm:$0xf]  ;;  %v1532_v33 = vmax.bf16 %v1530_v17, %v1528_v24  ;;  %v1576_v34 = vsel %vm1438_vm0, %v1282_v22, 4286644096  ;;  %v1187_v35 = vld [vmem:[%s2897_s24 + $0x14] sm:$0xf] }
  0x72   : > { %v1219_v36 = vld [vmem:[%s2897_s24 + $0x94] sm:$0xf]  ;;  %v1555_v37 = vmax.bf16 %v1553_v25, %v1551_v28  ;;  %v1561_v38 = vsel %vm1438_vm0, %v1409_v20, 4286644096  ;;  %v1378_v39 = vld [vmem:[%s2897_s24 + $0x310] sm:$0xf]  ;;  %v1574_v40 = vmax.bf16 %v1572_v27, %v1570_v32 }
  0x73   : > { %v1251_v41 = vld [vmem:[%s2897_s24 + $0x114] sm:$0xf]  ;;  %2434 = vst.msk [vmem:[%s2943_s28 + $0x8] sm:$0xf] %vm1438_vm0, %v1532_v33  ;;  %v1580_v42 = vsel %vm1438_vm0, %v1314_v30, 4286644096 }
  0x74   : > { %v1584_v43 = vsel %vm1438_vm0, %v1346_v31, 4286644096  ;;  %v1283_v44 = vld [vmem:[%s2897_s24 + $0x194] sm:$0xf]  ;;  %v1559_v45 = vmax.bf16 %v1557_v29, %v1555_v37  ;;  %v1410_v46 = vld [vmem:[%s2897_s24 + $0x390] sm:$0xf]  ;;  %v1578_v47 = vmax.bf16 %v1576_v34, %v1574_v40 }
  0x75   : > { %v1596_v48 = vsel %vm1438_vm0, %v1187_v35, 4286644096  ;;  %v1599_v49 = vsel %vm1438_vm0, %v1219_v36, 4286644096  ;;  %v1588_v50 = vsel %vm1438_vm0, %v1378_v39, 4286644096 }
  0x76   : > { %v1315_v51 = vld [vmem:[%s2897_s24 + $0x214] sm:$0xf]  ;;  %v1601_v52 = vmax.bf16 %v1599_v49, %v1596_v48  ;;  %v1603_v53 = vsel %vm1438_vm0, %v1251_v41, 4286644096  ;;  %v1563_v54 = vmax.bf16 %v1561_v38, %v1559_v45  ;;  %v1582_v55 = vmax.bf16 %v1580_v42, %v1578_v47  ;;  %v1188_v57 = vld [vmem:[%s2897_s24 + $0x18] sm:$0xf] }
  0x77   : > { %v1607_v56 = vsel %vm1438_vm0, %v1283_v44, 4286644096  ;;  %v1220_v58 = vld [vmem:[%s2897_s24 + $0x98] sm:$0xf]  ;;  %v1592_v59 = vsel %vm1438_vm0, %v1410_v46, 4286644096 }
  0x78   : > { %v1347_v60 = vld [vmem:[%s2897_s24 + $0x294] sm:$0xf]  ;;  %v1605_v61 = vmax.bf16 %v1603_v53, %v1601_v52  ;;  %v1252_v62 = vld [vmem:[%s2897_s24 + $0x118] sm:$0xf]  ;;  %2435 = vst.msk [vmem:[%s2943_s28 + $0xc] sm:$0xf] %vm1438_vm0, %v1563_v54  ;;  %v1586_v63 = vmax.bf16 %v1584_v43, %v1582_v55 }
  0x79   : > { %v1379_v0 = vld [vmem:[%s2897_s24 + $0x314] sm:$0xf]  ;;  %v1611_v1 = vsel %vm1438_vm0, %v1315_v51, 4286644096  ;;  %v1284_v2 = vld [vmem:[%s2897_s24 + $0x198] sm:$0xf] }
  0x7a   : > { %v1411_v3 = vld [vmem:[%s2897_s24 + $0x394] sm:$0xf]  ;;  %v1609_v4 = vmax.bf16 %v1607_v56, %v1605_v61  ;;  %v1627_v5 = vsel %vm1438_vm0, %v1188_v57, 4286644096  ;;  %v1630_v6 = vsel %vm1438_vm0, %v1220_v58, 4286644096  ;;  %v1590_v7 = vmax.bf16 %v1588_v50, %v1586_v63 }
  0x7b   : > { %v1615_v8 = vsel %vm1438_vm0, %v1347_v60, 4286644096  ;;  %v1316_v9 = vld [vmem:[%s2897_s24 + $0x218] sm:$0xf]  ;;  %v1632_v10 = vmax.bf16 %v1630_v6, %v1627_v5  ;;  %v1634_v11 = vsel %vm1438_vm0, %v1252_v62, 4286644096 }
  0x7c   : > { %v1613_v12 = vmax.bf16 %v1611_v1, %v1609_v4  ;;  %v1619_v13 = vsel %vm1438_vm0, %v1379_v0, 4286644096  ;;  %v1638_v14 = vsel %vm1438_vm0, %v1284_v2, 4286644096  ;;  %v1189_v15 = vld [vmem:[%s2897_s24 + $0x1c] sm:$0xf]  ;;  %v1594_v16 = vmax.bf16 %v1592_v59, %v1590_v7 }
  0x7d   : > { %v1348_v17 = vld [vmem:[%s2897_s24 + $0x298] sm:$0xf]  ;;  %v1636_v18 = vmax.bf16 %v1634_v11, %v1632_v10  ;;  %v1221_v19 = vld [vmem:[%s2897_s24 + $0x9c] sm:$0xf]  ;;  %v1623_v22 = vsel %vm1438_vm0, %v1411_v3, 4286644096 }
  0x7e   : > { %v1253_v20 = vld [vmem:[%s2897_s24 + $0x11c] sm:$0xf]  ;;  %v1617_v21 = vmax.bf16 %v1615_v8, %v1613_v12  ;;  %v1380_v23 = vld [vmem:[%s2897_s24 + $0x318] sm:$0xf]  ;;  %v1642_v24 = vsel %vm1438_vm0, %v1316_v9, 4286644096 }
  0x7f   : > { %2436 = vst.msk [vmem:[%s2943_s28 + $0x10] sm:$0xf] %vm1438_vm0, %v1594_v16  ;;  %v1412_v25 = vld [vmem:[%s2897_s24 + $0x398] sm:$0xf]  ;;  %v1640_v26 = vmax.bf16 %v1638_v14, %v1636_v18  ;;  %v1285_v27 = vld [vmem:[%s2897_s24 + $0x19c] sm:$0xf] }
  0x80   : > { %v1658_v28 = vsel %vm1438_vm0, %v1189_v15, 4286644096  ;;  %v1621_v29 = vmax.bf16 %v1619_v13, %v1617_v21  ;;  %v1646_v30 = vsel %vm1438_vm0, %v1348_v17, 4286644096  ;;  %v1661_v31 = vsel %vm1438_vm0, %v1221_v19, 4286644096 }
  0x81   : > { %v1665_v32 = vsel %vm1438_vm0, %v1253_v20, 4286644096  ;;  %v1644_v33 = vmax.bf16 %v1642_v24, %v1640_v26  ;;  %v1650_v34 = vsel %vm1438_vm0, %v1380_v23, 4286644096  ;;  %v1317_v35 = vld [vmem:[%s2897_s24 + $0x21c] sm:$0xf]  ;;  %v1663_v37 = vmax.bf16 %v1661_v31, %v1658_v28 }
  0x82   : > { %v1349_v36 = vld [vmem:[%s2897_s24 + $0x29c] sm:$0xf]  ;;  %v1625_v38 = vmax.bf16 %v1623_v22, %v1621_v29  ;;  %v1669_v39 = vsel %vm1438_vm0, %v1285_v27, 4286644096  ;;  %v1190_v40 = vld [vmem:[%s2897_s24 + $0x20] sm:$0xf] }
  0x83   : > { %v1222_v41 = vld [vmem:[%s2897_s24 + $0xa0] sm:$0xf]  ;;  %v1648_v42 = vmax.bf16 %v1646_v30, %v1644_v33  ;;  %v1654_v43 = vsel %vm1438_vm0, %v1412_v25, 4286644096  ;;  %v1381_v44 = vld [vmem:[%s2897_s24 + $0x31c] sm:$0xf]  ;;  %v1667_v45 = vmax.bf16 %v1665_v32, %v1663_v37 }
  0x84   : > { %v1254_v46 = vld [vmem:[%s2897_s24 + $0x120] sm:$0xf]  ;;  %2437 = vst.msk [vmem:[%s2943_s28 + $0x14] sm:$0xf] %vm1438_vm0, %v1625_v38  ;;  %v1673_v47 = vsel %vm1438_vm0, %v1317_v35, 4286644096 }
  0x85   : > { %v1677_v48 = vsel %vm1438_vm0, %v1349_v36, 4286644096  ;;  %v1286_v49 = vld [vmem:[%s2897_s24 + $0x1a0] sm:$0xf]  ;;  %v1652_v50 = vmax.bf16 %v1650_v34, %v1648_v42  ;;  %v1413_v51 = vld [vmem:[%s2897_s24 + $0x39c] sm:$0xf]  ;;  %v1671_v52 = vmax.bf16 %v1669_v39, %v1667_v45 }
  0x86   : > { %v1689_v53 = vsel %vm1438_vm0, %v1190_v40, 4286644096  ;;  %v1692_v54 = vsel %vm1438_vm0, %v1222_v41, 4286644096  ;;  %v1681_v55 = vsel %vm1438_vm0, %v1381_v44, 4286644096 }
  0x87   : > { %v1318_v56 = vld [vmem:[%s2897_s24 + $0x220] sm:$0xf]  ;;  %v1694_v57 = vmax.bf16 %v1692_v54, %v1689_v53  ;;  %v1696_v58 = vsel %vm1438_vm0, %v1254_v46, 4286644096  ;;  %v1656_v59 = vmax.bf16 %v1654_v43, %v1652_v50  ;;  %v1675_v60 = vmax.bf16 %v1673_v47, %v1671_v52  ;;  %v1191_v62 = vld [vmem:[%s2897_s24 + $0x24] sm:$0xf] }
  0x88   : > { %v1700_v61 = vsel %vm1438_vm0, %v1286_v49, 4286644096  ;;  %v1223_v63 = vld [vmem:[%s2897_s24 + $0xa4] sm:$0xf]  ;;  %v1685_v0 = vsel %vm1438_vm0, %v1413_v51, 4286644096 }
  0x89   : > { %v1350_v1 = vld [vmem:[%s2897_s24 + $0x2a0] sm:$0xf]  ;;  %v1698_v2 = vmax.bf16 %v1696_v58, %v1694_v57  ;;  %v1255_v3 = vld [vmem:[%s2897_s24 + $0x124] sm:$0xf]  ;;  %2438 = vst.msk [vmem:[%s2943_s28 + $0x18] sm:$0xf] %vm1438_vm0, %v1656_v59  ;;  %v1679_v4 = vmax.bf16 %v1677_v48, %v1675_v60 }
  0x8a   : > { %v1382_v5 = vld [vmem:[%s2897_s24 + $0x320] sm:$0xf]  ;;  %v1704_v6 = vsel %vm1438_vm0, %v1318_v56, 4286644096  ;;  %v1287_v7 = vld [vmem:[%s2897_s24 + $0x1a4] sm:$0xf] }
  0x8b   : > { %v1414_v8 = vld [vmem:[%s2897_s24 + $0x3a0] sm:$0xf]  ;;  %v1702_v9 = vmax.bf16 %v1700_v61, %v1698_v2  ;;  %v1720_v10 = vsel %vm1438_vm0, %v1191_v62, 4286644096  ;;  %v1723_v11 = vsel %vm1438_vm0, %v1223_v63, 4286644096  ;;  %v1683_v12 = vmax.bf16 %v1681_v55, %v1679_v4 }
  0x8c   : > { %v1708_v13 = vsel %vm1438_vm0, %v1350_v1, 4286644096  ;;  %v1319_v14 = vld [vmem:[%s2897_s24 + $0x224] sm:$0xf]  ;;  %v1725_v15 = vmax.bf16 %v1723_v11, %v1720_v10  ;;  %v1727_v16 = vsel %vm1438_vm0, %v1255_v3, 4286644096 }
  0x8d   : > { %v1706_v17 = vmax.bf16 %v1704_v6, %v1702_v9  ;;  %v1712_v18 = vsel %vm1438_vm0, %v1382_v5, 4286644096  ;;  %v1731_v19 = vsel %vm1438_vm0, %v1287_v7, 4286644096  ;;  %v1192_v20 = vld [vmem:[%s2897_s24 + $0x28] sm:$0xf]  ;;  %v1687_v21 = vmax.bf16 %v1685_v0, %v1683_v12 }
  0x8e   : > { %v1351_v22 = vld [vmem:[%s2897_s24 + $0x2a4] sm:$0xf]  ;;  %v1729_v23 = vmax.bf16 %v1727_v16, %v1725_v15  ;;  %v1224_v24 = vld [vmem:[%s2897_s24 + $0xa8] sm:$0xf]  ;;  %v1716_v27 = vsel %vm1438_vm0, %v1414_v8, 4286644096 }
  0x8f   : > { %v1256_v25 = vld [vmem:[%s2897_s24 + $0x128] sm:$0xf]  ;;  %v1710_v26 = vmax.bf16 %v1708_v13, %v1706_v17  ;;  %v1383_v28 = vld [vmem:[%s2897_s24 + $0x324] sm:$0xf]  ;;  %v1735_v29 = vsel %vm1438_vm0, %v1319_v14, 4286644096 }
  0x90   : > { %2439 = vst.msk [vmem:[%s2943_s28 + $0x1c] sm:$0xf] %vm1438_vm0, %v1687_v21  ;;  %v1415_v30 = vld [vmem:[%s2897_s24 + $0x3a4] sm:$0xf]  ;;  %v1733_v31 = vmax.bf16 %v1731_v19, %v1729_v23  ;;  %v1288_v32 = vld [vmem:[%s2897_s24 + $0x1a8] sm:$0xf] }
  0x91   : > { %v1751_v33 = vsel %vm1438_vm0, %v1192_v20, 4286644096  ;;  %v1714_v34 = vmax.bf16 %v1712_v18, %v1710_v26  ;;  %v1739_v35 = vsel %vm1438_vm0, %v1351_v22, 4286644096  ;;  %v1754_v36 = vsel %vm1438_vm0, %v1224_v24, 4286644096 }
  0x92   : > { %v1758_v37 = vsel %vm1438_vm0, %v1256_v25, 4286644096  ;;  %v1737_v38 = vmax.bf16 %v1735_v29, %v1733_v31  ;;  %v1743_v39 = vsel %vm1438_vm0, %v1383_v28, 4286644096  ;;  %v1320_v40 = vld [vmem:[%s2897_s24 + $0x228] sm:$0xf]  ;;  %v1756_v42 = vmax.bf16 %v1754_v36, %v1751_v33 }
  0x93   : > { %v1352_v41 = vld [vmem:[%s2897_s24 + $0x2a8] sm:$0xf]  ;;  %v1718_v43 = vmax.bf16 %v1716_v27, %v1714_v34  ;;  %v1762_v44 = vsel %vm1438_vm0, %v1288_v32, 4286644096  ;;  %v1193_v45 = vld [vmem:[%s2897_s24 + $0x2c] sm:$0xf] }
  0x94   : > { %v1225_v46 = vld [vmem:[%s2897_s24 + $0xac] sm:$0xf]  ;;  %v1741_v47 = vmax.bf16 %v1739_v35, %v1737_v38  ;;  %v1747_v48 = vsel %vm1438_vm0, %v1415_v30, 4286644096  ;;  %v1384_v49 = vld [vmem:[%s2897_s24 + $0x328] sm:$0xf]  ;;  %v1760_v50 = vmax.bf16 %v1758_v37, %v1756_v42 }
  0x95   : > { %v1257_v51 = vld [vmem:[%s2897_s24 + $0x12c] sm:$0xf]  ;;  %2440 = vst.msk [vmem:[%s2943_s28 + $0x20] sm:$0xf] %vm1438_vm0, %v1718_v43  ;;  %v1766_v52 = vsel %vm1438_vm0, %v1320_v40, 4286644096 }
  0x96   : > { %v1770_v53 = vsel %vm1438_vm0, %v1352_v41, 4286644096  ;;  %v1289_v54 = vld [vmem:[%s2897_s24 + $0x1ac] sm:$0xf]  ;;  %v1745_v55 = vmax.bf16 %v1743_v39, %v1741_v47  ;;  %v1416_v56 = vld [vmem:[%s2897_s24 + $0x3a8] sm:$0xf]  ;;  %v1764_v57 = vmax.bf16 %v1762_v44, %v1760_v50 }
  0x97   : > { %v1782_v58 = vsel %vm1438_vm0, %v1193_v45, 4286644096  ;;  %v1785_v59 = vsel %vm1438_vm0, %v1225_v46, 4286644096  ;;  %v1774_v60 = vsel %vm1438_vm0, %v1384_v49, 4286644096 }
  0x98   : > { %v1321_v61 = vld [vmem:[%s2897_s24 + $0x22c] sm:$0xf]  ;;  %v1787_v62 = vmax.bf16 %v1785_v59, %v1782_v58  ;;  %v1789_v63 = vsel %vm1438_vm0, %v1257_v51, 4286644096  ;;  %v1749_v0 = vmax.bf16 %v1747_v48, %v1745_v55  ;;  %v1768_v1 = vmax.bf16 %v1766_v52, %v1764_v57  ;;  %v1194_v3 = vld [vmem:[%s2897_s24 + $0x30] sm:$0xf] }
  0x99   : > { %v1793_v2 = vsel %vm1438_vm0, %v1289_v54, 4286644096  ;;  %v1226_v4 = vld [vmem:[%s2897_s24 + $0xb0] sm:$0xf]  ;;  %v1778_v5 = vsel %vm1438_vm0, %v1416_v56, 4286644096 }
  0x9a   : > { %v1353_v6 = vld [vmem:[%s2897_s24 + $0x2ac] sm:$0xf]  ;;  %v1791_v7 = vmax.bf16 %v1789_v63, %v1787_v62  ;;  %v1258_v8 = vld [vmem:[%s2897_s24 + $0x130] sm:$0xf]  ;;  %2441 = vst.msk [vmem:[%s2943_s28 + $0x24] sm:$0xf] %vm1438_vm0, %v1749_v0  ;;  %v1772_v9 = vmax.bf16 %v1770_v53, %v1768_v1 }
  0x9b   : > { %v1385_v10 = vld [vmem:[%s2897_s24 + $0x32c] sm:$0xf]  ;;  %v1797_v11 = vsel %vm1438_vm0, %v1321_v61, 4286644096  ;;  %v1290_v12 = vld [vmem:[%s2897_s24 + $0x1b0] sm:$0xf] }
  0x9c   : > { %v1417_v13 = vld [vmem:[%s2897_s24 + $0x3ac] sm:$0xf]  ;;  %v1795_v14 = vmax.bf16 %v1793_v2, %v1791_v7  ;;  %v1813_v15 = vsel %vm1438_vm0, %v1194_v3, 4286644096  ;;  %v1816_v16 = vsel %vm1438_vm0, %v1226_v4, 4286644096  ;;  %v1776_v17 = vmax.bf16 %v1774_v60, %v1772_v9 }
  0x9d   : > { %v1801_v18 = vsel %vm1438_vm0, %v1353_v6, 4286644096  ;;  %v1322_v19 = vld [vmem:[%s2897_s24 + $0x230] sm:$0xf]  ;;  %v1818_v20 = vmax.bf16 %v1816_v16, %v1813_v15  ;;  %v1820_v21 = vsel %vm1438_vm0, %v1258_v8, 4286644096 }
  0x9e   : > { %v1799_v22 = vmax.bf16 %v1797_v11, %v1795_v14  ;;  %v1805_v23 = vsel %vm1438_vm0, %v1385_v10, 4286644096  ;;  %v1824_v24 = vsel %vm1438_vm0, %v1290_v12, 4286644096  ;;  %v1195_v25 = vld [vmem:[%s2897_s24 + $0x34] sm:$0xf]  ;;  %v1780_v26 = vmax.bf16 %v1778_v5, %v1776_v17 }
  0x9f   : > { %v1354_v27 = vld [vmem:[%s2897_s24 + $0x2b0] sm:$0xf]  ;;  %v1822_v28 = vmax.bf16 %v1820_v21, %v1818_v20  ;;  %v1227_v29 = vld [vmem:[%s2897_s24 + $0xb4] sm:$0xf]  ;;  %v1809_v32 = vsel %vm1438_vm0, %v1417_v13, 4286644096 }
  0xa0   : > { %v1259_v30 = vld [vmem:[%s2897_s24 + $0x134] sm:$0xf]  ;;  %v1803_v31 = vmax.bf16 %v1801_v18, %v1799_v22  ;;  %v1386_v33 = vld [vmem:[%s2897_s24 + $0x330] sm:$0xf]  ;;  %v1828_v34 = vsel %vm1438_vm0, %v1322_v19, 4286644096 }
  0xa1   : > { %2442 = vst.msk [vmem:[%s2943_s28 + $0x28] sm:$0xf] %vm1438_vm0, %v1780_v26  ;;  %v1418_v35 = vld [vmem:[%s2897_s24 + $0x3b0] sm:$0xf]  ;;  %v1826_v36 = vmax.bf16 %v1824_v24, %v1822_v28  ;;  %v1291_v37 = vld [vmem:[%s2897_s24 + $0x1b4] sm:$0xf] }
  0xa2   : > { %v1844_v38 = vsel %vm1438_vm0, %v1195_v25, 4286644096  ;;  %v1807_v39 = vmax.bf16 %v1805_v23, %v1803_v31  ;;  %v1832_v40 = vsel %vm1438_vm0, %v1354_v27, 4286644096  ;;  %v1847_v41 = vsel %vm1438_vm0, %v1227_v29, 4286644096 }
  0xa3   : > { %v1851_v42 = vsel %vm1438_vm0, %v1259_v30, 4286644096  ;;  %v1830_v43 = vmax.bf16 %v1828_v34, %v1826_v36  ;;  %v1836_v44 = vsel %vm1438_vm0, %v1386_v33, 4286644096  ;;  %v1323_v45 = vld [vmem:[%s2897_s24 + $0x234] sm:$0xf]  ;;  %v1849_v47 = vmax.bf16 %v1847_v41, %v1844_v38 }
  0xa4   : > { %v1355_v46 = vld [vmem:[%s2897_s24 + $0x2b4] sm:$0xf]  ;;  %v1811_v48 = vmax.bf16 %v1809_v32, %v1807_v39  ;;  %v1855_v49 = vsel %vm1438_vm0, %v1291_v37, 4286644096  ;;  %v1196_v50 = vld [vmem:[%s2897_s24 + $0x38] sm:$0xf] }
  0xa5   : > { %v1228_v51 = vld [vmem:[%s2897_s24 + $0xb8] sm:$0xf]  ;;  %v1834_v52 = vmax.bf16 %v1832_v40, %v1830_v43  ;;  %v1840_v53 = vsel %vm1438_vm0, %v1418_v35, 4286644096  ;;  %v1387_v54 = vld [vmem:[%s2897_s24 + $0x334] sm:$0xf]  ;;  %v1853_v55 = vmax.bf16 %v1851_v42, %v1849_v47 }
  0xa6   : > { %v1260_v56 = vld [vmem:[%s2897_s24 + $0x138] sm:$0xf]  ;;  %2443 = vst.msk [vmem:[%s2943_s28 + $0x2c] sm:$0xf] %vm1438_vm0, %v1811_v48  ;;  %v1859_v57 = vsel %vm1438_vm0, %v1323_v45, 4286644096 }
  0xa7   : > { %v1863_v58 = vsel %vm1438_vm0, %v1355_v46, 4286644096  ;;  %v1292_v59 = vld [vmem:[%s2897_s24 + $0x1b8] sm:$0xf]  ;;  %v1838_v60 = vmax.bf16 %v1836_v44, %v1834_v52  ;;  %v1419_v61 = vld [vmem:[%s2897_s24 + $0x3b4] sm:$0xf]  ;;  %v1857_v62 = vmax.bf16 %v1855_v49, %v1853_v55 }
  0xa8   : > { %v1875_v63 = vsel %vm1438_vm0, %v1196_v50, 4286644096  ;;  %v1878_v0 = vsel %vm1438_vm0, %v1228_v51, 4286644096  ;;  %v1867_v1 = vsel %vm1438_vm0, %v1387_v54, 4286644096 }
  0xa9   : > { %v1324_v2 = vld [vmem:[%s2897_s24 + $0x238] sm:$0xf]  ;;  %v1880_v3 = vmax.bf16 %v1878_v0, %v1875_v63  ;;  %v1882_v4 = vsel %vm1438_vm0, %v1260_v56, 4286644096  ;;  %v1842_v5 = vmax.bf16 %v1840_v53, %v1838_v60  ;;  %v1861_v6 = vmax.bf16 %v1859_v57, %v1857_v62  ;;  %v1197_v8 = vld [vmem:[%s2897_s24 + $0x3c] sm:$0xf] }
  0xaa   : > { %v1886_v7 = vsel %vm1438_vm0, %v1292_v59, 4286644096  ;;  %v1229_v9 = vld [vmem:[%s2897_s24 + $0xbc] sm:$0xf]  ;;  %v1871_v10 = vsel %vm1438_vm0, %v1419_v61, 4286644096 }
  0xab   : > { %v1356_v11 = vld [vmem:[%s2897_s24 + $0x2b8] sm:$0xf]  ;;  %v1884_v12 = vmax.bf16 %v1882_v4, %v1880_v3  ;;  %v1261_v13 = vld [vmem:[%s2897_s24 + $0x13c] sm:$0xf]  ;;  %2444 = vst.msk [vmem:[%s2943_s28 + $0x30] sm:$0xf] %vm1438_vm0, %v1842_v5  ;;  %v1865_v14 = vmax.bf16 %v1863_v58, %v1861_v6 }
  0xac   : > { %v1388_v15 = vld [vmem:[%s2897_s24 + $0x338] sm:$0xf]  ;;  %v1890_v16 = vsel %vm1438_vm0, %v1324_v2, 4286644096  ;;  %v1293_v17 = vld [vmem:[%s2897_s24 + $0x1bc] sm:$0xf] }
  0xad   : > { %v1420_v18 = vld [vmem:[%s2897_s24 + $0x3b8] sm:$0xf]  ;;  %v1888_v19 = vmax.bf16 %v1886_v7, %v1884_v12  ;;  %v1906_v20 = vsel %vm1438_vm0, %v1197_v8, 4286644096  ;;  %v1909_v21 = vsel %vm1438_vm0, %v1229_v9, 4286644096  ;;  %v1869_v22 = vmax.bf16 %v1867_v1, %v1865_v14 }
  0xae   : > { %v1894_v23 = vsel %vm1438_vm0, %v1356_v11, 4286644096  ;;  %v1325_v24 = vld [vmem:[%s2897_s24 + $0x23c] sm:$0xf]  ;;  %v1911_v25 = vmax.bf16 %v1909_v21, %v1906_v20  ;;  %v1913_v26 = vsel %vm1438_vm0, %v1261_v13, 4286644096 }
  0xaf   : > { %v1892_v27 = vmax.bf16 %v1890_v16, %v1888_v19  ;;  %v1898_v28 = vsel %vm1438_vm0, %v1388_v15, 4286644096  ;;  %v1917_v29 = vsel %vm1438_vm0, %v1293_v17, 4286644096  ;;  %v1198_v30 = vld [vmem:[%s2897_s24 + $0x40] sm:$0xf]  ;;  %v1873_v31 = vmax.bf16 %v1871_v10, %v1869_v22 }
  0xb0   : > { %v1357_v32 = vld [vmem:[%s2897_s24 + $0x2bc] sm:$0xf]  ;;  %v1915_v33 = vmax.bf16 %v1913_v26, %v1911_v25  ;;  %v1230_v34 = vld [vmem:[%s2897_s24 + $0xc0] sm:$0xf]  ;;  %v1902_v37 = vsel %vm1438_vm0, %v1420_v18, 4286644096 }
  0xb1   : > { %v1262_v35 = vld [vmem:[%s2897_s24 + $0x140] sm:$0xf]  ;;  %v1896_v36 = vmax.bf16 %v1894_v23, %v1892_v27  ;;  %v1389_v38 = vld [vmem:[%s2897_s24 + $0x33c] sm:$0xf]  ;;  %v1921_v39 = vsel %vm1438_vm0, %v1325_v24, 4286644096 }
  0xb2   : > { %2445 = vst.msk [vmem:[%s2943_s28 + $0x34] sm:$0xf] %vm1438_vm0, %v1873_v31  ;;  %v1421_v40 = vld [vmem:[%s2897_s24 + $0x3bc] sm:$0xf]  ;;  %v1919_v41 = vmax.bf16 %v1917_v29, %v1915_v33  ;;  %v1294_v42 = vld [vmem:[%s2897_s24 + $0x1c0] sm:$0xf] }
  0xb3   : > { %v1937_v43 = vsel %vm1438_vm0, %v1198_v30, 4286644096  ;;  %v1900_v44 = vmax.bf16 %v1898_v28, %v1896_v36  ;;  %v1925_v45 = vsel %vm1438_vm0, %v1357_v32, 4286644096  ;;  %v1940_v46 = vsel %vm1438_vm0, %v1230_v34, 4286644096 }
  0xb4   : > { %v1944_v47 = vsel %vm1438_vm0, %v1262_v35, 4286644096  ;;  %v1923_v48 = vmax.bf16 %v1921_v39, %v1919_v41  ;;  %v1929_v49 = vsel %vm1438_vm0, %v1389_v38, 4286644096  ;;  %v1326_v50 = vld [vmem:[%s2897_s24 + $0x240] sm:$0xf]  ;;  %v1942_v52 = vmax.bf16 %v1940_v46, %v1937_v43 }
  0xb5   : > { %v1358_v51 = vld [vmem:[%s2897_s24 + $0x2c0] sm:$0xf]  ;;  %v1904_v53 = vmax.bf16 %v1902_v37, %v1900_v44  ;;  %v1948_v54 = vsel %vm1438_vm0, %v1294_v42, 4286644096  ;;  %v1199_v55 = vld [vmem:[%s2897_s24 + $0x44] sm:$0xf] }
  0xb6   : > { %v1231_v56 = vld [vmem:[%s2897_s24 + $0xc4] sm:$0xf]  ;;  %v1927_v57 = vmax.bf16 %v1925_v45, %v1923_v48  ;;  %v1933_v58 = vsel %vm1438_vm0, %v1421_v40, 4286644096  ;;  %v1390_v59 = vld [vmem:[%s2897_s24 + $0x340] sm:$0xf]  ;;  %v1946_v60 = vmax.bf16 %v1944_v47, %v1942_v52 }
  0xb7   : > { %v1263_v61 = vld [vmem:[%s2897_s24 + $0x144] sm:$0xf]  ;;  %2446 = vst.msk [vmem:[%s2943_s28 + $0x38] sm:$0xf] %vm1438_vm0, %v1904_v53  ;;  %v1952_v62 = vsel %vm1438_vm0, %v1326_v50, 4286644096 }
  0xb8   : > { %v1956_v63 = vsel %vm1438_vm0, %v1358_v51, 4286644096  ;;  %v1295_v0 = vld [vmem:[%s2897_s24 + $0x1c4] sm:$0xf]  ;;  %v1931_v1 = vmax.bf16 %v1929_v49, %v1927_v57  ;;  %v1422_v2 = vld [vmem:[%s2897_s24 + $0x3c0] sm:$0xf]  ;;  %v1950_v3 = vmax.bf16 %v1948_v54, %v1946_v60 }
  0xb9   : > { %v1968_v4 = vsel %vm1438_vm0, %v1199_v55, 4286644096  ;;  %v1971_v5 = vsel %vm1438_vm0, %v1231_v56, 4286644096  ;;  %v1960_v6 = vsel %vm1438_vm0, %v1390_v59, 4286644096 }
  0xba   : > { %v1327_v7 = vld [vmem:[%s2897_s24 + $0x244] sm:$0xf]  ;;  %v1973_v8 = vmax.bf16 %v1971_v5, %v1968_v4  ;;  %v1975_v9 = vsel %vm1438_vm0, %v1263_v61, 4286644096  ;;  %v1935_v10 = vmax.bf16 %v1933_v58, %v1931_v1  ;;  %v1954_v11 = vmax.bf16 %v1952_v62, %v1950_v3  ;;  %v1200_v13 = vld [vmem:[%s2897_s24 + $0x48] sm:$0xf] }
  0xbb   : > { %v1979_v12 = vsel %vm1438_vm0, %v1295_v0, 4286644096  ;;  %v1232_v14 = vld [vmem:[%s2897_s24 + $0xc8] sm:$0xf]  ;;  %v1964_v15 = vsel %vm1438_vm0, %v1422_v2, 4286644096 }
  0xbc   : > { %v1359_v16 = vld [vmem:[%s2897_s24 + $0x2c4] sm:$0xf]  ;;  %v1977_v17 = vmax.bf16 %v1975_v9, %v1973_v8  ;;  %v1264_v18 = vld [vmem:[%s2897_s24 + $0x148] sm:$0xf]  ;;  %2447 = vst.msk [vmem:[%s2943_s28 + $0x3c] sm:$0xf] %vm1438_vm0, %v1935_v10  ;;  %v1958_v19 = vmax.bf16 %v1956_v63, %v1954_v11 }
  0xbd   : > { %v1391_v20 = vld [vmem:[%s2897_s24 + $0x344] sm:$0xf]  ;;  %v1983_v21 = vsel %vm1438_vm0, %v1327_v7, 4286644096  ;;  %v1296_v22 = vld [vmem:[%s2897_s24 + $0x1c8] sm:$0xf] }
  0xbe   : > { %v1423_v23 = vld [vmem:[%s2897_s24 + $0x3c4] sm:$0xf]  ;;  %v1981_v24 = vmax.bf16 %v1979_v12, %v1977_v17  ;;  %v1999_v25 = vsel %vm1438_vm0, %v1200_v13, 4286644096  ;;  %v2002_v26 = vsel %vm1438_vm0, %v1232_v14, 4286644096  ;;  %v1962_v27 = vmax.bf16 %v1960_v6, %v1958_v19 }
  0xbf   : > { %v1987_v28 = vsel %vm1438_vm0, %v1359_v16, 4286644096  ;;  %v1328_v29 = vld [vmem:[%s2897_s24 + $0x248] sm:$0xf]  ;;  %v2004_v30 = vmax.bf16 %v2002_v26, %v1999_v25  ;;  %v2006_v31 = vsel %vm1438_vm0, %v1264_v18, 4286644096 }
  0xc0   : > { %v1985_v32 = vmax.bf16 %v1983_v21, %v1981_v24  ;;  %v1991_v33 = vsel %vm1438_vm0, %v1391_v20, 4286644096  ;;  %v2010_v34 = vsel %vm1438_vm0, %v1296_v22, 4286644096  ;;  %v1201_v35 = vld [vmem:[%s2897_s24 + $0x4c] sm:$0xf]  ;;  %v1966_v36 = vmax.bf16 %v1964_v15, %v1962_v27 }
  0xc1   : > { %v1360_v37 = vld [vmem:[%s2897_s24 + $0x2c8] sm:$0xf]  ;;  %v2008_v38 = vmax.bf16 %v2006_v31, %v2004_v30  ;;  %v1233_v39 = vld [vmem:[%s2897_s24 + $0xcc] sm:$0xf]  ;;  %v1995_v42 = vsel %vm1438_vm0, %v1423_v23, 4286644096 }
  0xc2   : > { %v1265_v40 = vld [vmem:[%s2897_s24 + $0x14c] sm:$0xf]  ;;  %v1989_v41 = vmax.bf16 %v1987_v28, %v1985_v32  ;;  %v1392_v43 = vld [vmem:[%s2897_s24 + $0x348] sm:$0xf]  ;;  %v2014_v44 = vsel %vm1438_vm0, %v1328_v29, 4286644096 }
  0xc3   : > { %2448 = vst.msk [vmem:[%s2943_s28 + $0x40] sm:$0xf] %vm1438_vm0, %v1966_v36  ;;  %v1424_v45 = vld [vmem:[%s2897_s24 + $0x3c8] sm:$0xf]  ;;  %v2012_v46 = vmax.bf16 %v2010_v34, %v2008_v38  ;;  %v1297_v47 = vld [vmem:[%s2897_s24 + $0x1cc] sm:$0xf] }
  0xc4   : > { %v2030_v48 = vsel %vm1438_vm0, %v1201_v35, 4286644096  ;;  %v1993_v49 = vmax.bf16 %v1991_v33, %v1989_v41  ;;  %v2018_v50 = vsel %vm1438_vm0, %v1360_v37, 4286644096  ;;  %v2033_v51 = vsel %vm1438_vm0, %v1233_v39, 4286644096 }
  0xc5   : > { %v2037_v52 = vsel %vm1438_vm0, %v1265_v40, 4286644096  ;;  %v2016_v53 = vmax.bf16 %v2014_v44, %v2012_v46  ;;  %v2022_v54 = vsel %vm1438_vm0, %v1392_v43, 4286644096  ;;  %v1329_v55 = vld [vmem:[%s2897_s24 + $0x24c] sm:$0xf]  ;;  %v2035_v57 = vmax.bf16 %v2033_v51, %v2030_v48 }
  0xc6   : > { %v1361_v56 = vld [vmem:[%s2897_s24 + $0x2cc] sm:$0xf]  ;;  %v1997_v58 = vmax.bf16 %v1995_v42, %v1993_v49  ;;  %v2041_v59 = vsel %vm1438_vm0, %v1297_v47, 4286644096  ;;  %v1202_v60 = vld [vmem:[%s2897_s24 + $0x50] sm:$0xf] }
  0xc7   : > { %v1234_v61 = vld [vmem:[%s2897_s24 + $0xd0] sm:$0xf]  ;;  %v2020_v62 = vmax.bf16 %v2018_v50, %v2016_v53  ;;  %v2026_v63 = vsel %vm1438_vm0, %v1424_v45, 4286644096  ;;  %v1393_v0 = vld [vmem:[%s2897_s24 + $0x34c] sm:$0xf]  ;;  %v2039_v1 = vmax.bf16 %v2037_v52, %v2035_v57 }
  0xc8   : > { %v1266_v2 = vld [vmem:[%s2897_s24 + $0x150] sm:$0xf]  ;;  %2449 = vst.msk [vmem:[%s2943_s28 + $0x44] sm:$0xf] %vm1438_vm0, %v1997_v58  ;;  %v2045_v3 = vsel %vm1438_vm0, %v1329_v55, 4286644096 }
  0xc9   : > { %v2049_v4 = vsel %vm1438_vm0, %v1361_v56, 4286644096  ;;  %v1298_v5 = vld [vmem:[%s2897_s24 + $0x1d0] sm:$0xf]  ;;  %v2024_v6 = vmax.bf16 %v2022_v54, %v2020_v62  ;;  %v1425_v7 = vld [vmem:[%s2897_s24 + $0x3cc] sm:$0xf]  ;;  %v2043_v8 = vmax.bf16 %v2041_v59, %v2039_v1 }
  0xca   : > { %v2061_v9 = vsel %vm1438_vm0, %v1202_v60, 4286644096  ;;  %v2064_v10 = vsel %vm1438_vm0, %v1234_v61, 4286644096  ;;  %v2053_v11 = vsel %vm1438_vm0, %v1393_v0, 4286644096 }
  0xcb   : > { %v1330_v12 = vld [vmem:[%s2897_s24 + $0x250] sm:$0xf]  ;;  %v2066_v13 = vmax.bf16 %v2064_v10, %v2061_v9  ;;  %v2068_v14 = vsel %vm1438_vm0, %v1266_v2, 4286644096  ;;  %v2028_v15 = vmax.bf16 %v2026_v63, %v2024_v6  ;;  %v2047_v16 = vmax.bf16 %v2045_v3, %v2043_v8  ;;  %v1203_v18 = vld [vmem:[%s2897_s24 + $0x54] sm:$0xf] }
  0xcc   : > { %v2072_v17 = vsel %vm1438_vm0, %v1298_v5, 4286644096  ;;  %v1235_v19 = vld [vmem:[%s2897_s24 + $0xd4] sm:$0xf]  ;;  %v2057_v20 = vsel %vm1438_vm0, %v1425_v7, 4286644096 }
  0xcd   : > { %v1362_v21 = vld [vmem:[%s2897_s24 + $0x2d0] sm:$0xf]  ;;  %v2070_v22 = vmax.bf16 %v2068_v14, %v2066_v13  ;;  %v1267_v23 = vld [vmem:[%s2897_s24 + $0x154] sm:$0xf]  ;;  %2450 = vst.msk [vmem:[%s2943_s28 + $0x48] sm:$0xf] %vm1438_vm0, %v2028_v15  ;;  %v2051_v24 = vmax.bf16 %v2049_v4, %v2047_v16 }
  0xce   : > { %v1394_v25 = vld [vmem:[%s2897_s24 + $0x350] sm:$0xf]  ;;  %v2076_v26 = vsel %vm1438_vm0, %v1330_v12, 4286644096  ;;  %v1299_v27 = vld [vmem:[%s2897_s24 + $0x1d4] sm:$0xf] }
  0xcf   : > { %v1426_v28 = vld [vmem:[%s2897_s24 + $0x3d0] sm:$0xf]  ;;  %v2074_v29 = vmax.bf16 %v2072_v17, %v2070_v22  ;;  %v2092_v30 = vsel %vm1438_vm0, %v1203_v18, 4286644096  ;;  %v2095_v31 = vsel %vm1438_vm0, %v1235_v19, 4286644096  ;;  %v2055_v32 = vmax.bf16 %v2053_v11, %v2051_v24 }
  0xd0   : > { %v2080_v33 = vsel %vm1438_vm0, %v1362_v21, 4286644096  ;;  %v1331_v34 = vld [vmem:[%s2897_s24 + $0x254] sm:$0xf]  ;;  %v2097_v35 = vmax.bf16 %v2095_v31, %v2092_v30  ;;  %v2099_v36 = vsel %vm1438_vm0, %v1267_v23, 4286644096 }
  0xd1   : > { %v2078_v37 = vmax.bf16 %v2076_v26, %v2074_v29  ;;  %v2084_v38 = vsel %vm1438_vm0, %v1394_v25, 4286644096  ;;  %v2103_v39 = vsel %vm1438_vm0, %v1299_v27, 4286644096  ;;  %v1204_v40 = vld [vmem:[%s2897_s24 + $0x58] sm:$0xf]  ;;  %v2059_v41 = vmax.bf16 %v2057_v20, %v2055_v32 }
  0xd2   : > { %v1363_v42 = vld [vmem:[%s2897_s24 + $0x2d4] sm:$0xf]  ;;  %v2101_v43 = vmax.bf16 %v2099_v36, %v2097_v35  ;;  %v1236_v44 = vld [vmem:[%s2897_s24 + $0xd8] sm:$0xf]  ;;  %v2088_v47 = vsel %vm1438_vm0, %v1426_v28, 4286644096 }
  0xd3   : > { %v1268_v45 = vld [vmem:[%s2897_s24 + $0x158] sm:$0xf]  ;;  %v2082_v46 = vmax.bf16 %v2080_v33, %v2078_v37  ;;  %v1395_v48 = vld [vmem:[%s2897_s24 + $0x354] sm:$0xf]  ;;  %v2107_v49 = vsel %vm1438_vm0, %v1331_v34, 4286644096 }
  0xd4   : > { %2451 = vst.msk [vmem:[%s2943_s28 + $0x4c] sm:$0xf] %vm1438_vm0, %v2059_v41  ;;  %v1427_v50 = vld [vmem:[%s2897_s24 + $0x3d4] sm:$0xf]  ;;  %v2105_v51 = vmax.bf16 %v2103_v39, %v2101_v43  ;;  %v1300_v52 = vld [vmem:[%s2897_s24 + $0x1d8] sm:$0xf] }
  0xd5   : > { %v2123_v53 = vsel %vm1438_vm0, %v1204_v40, 4286644096  ;;  %v2086_v54 = vmax.bf16 %v2084_v38, %v2082_v46  ;;  %v2111_v55 = vsel %vm1438_vm0, %v1363_v42, 4286644096  ;;  %v2126_v56 = vsel %vm1438_vm0, %v1236_v44, 4286644096 }
  0xd6   : > { %v2130_v57 = vsel %vm1438_vm0, %v1268_v45, 4286644096  ;;  %v2109_v58 = vmax.bf16 %v2107_v49, %v2105_v51  ;;  %v2115_v59 = vsel %vm1438_vm0, %v1395_v48, 4286644096  ;;  %v1332_v60 = vld [vmem:[%s2897_s24 + $0x258] sm:$0xf]  ;;  %v2128_v62 = vmax.bf16 %v2126_v56, %v2123_v53 }
  0xd7   : > { %v1364_v61 = vld [vmem:[%s2897_s24 + $0x2d8] sm:$0xf]  ;;  %v2090_v63 = vmax.bf16 %v2088_v47, %v2086_v54  ;;  %v2134_v0 = vsel %vm1438_vm0, %v1300_v52, 4286644096  ;;  %v1205_v1 = vld [vmem:[%s2897_s24 + $0x5c] sm:$0xf] }
  0xd8   : > { %v1237_v2 = vld [vmem:[%s2897_s24 + $0xdc] sm:$0xf]  ;;  %v2113_v3 = vmax.bf16 %v2111_v55, %v2109_v58  ;;  %v2119_v4 = vsel %vm1438_vm0, %v1427_v50, 4286644096  ;;  %v1396_v5 = vld [vmem:[%s2897_s24 + $0x358] sm:$0xf]  ;;  %v2132_v6 = vmax.bf16 %v2130_v57, %v2128_v62 }
  0xd9   : > { %v1269_v7 = vld [vmem:[%s2897_s24 + $0x15c] sm:$0xf]  ;;  %2452 = vst.msk [vmem:[%s2943_s28 + $0x50] sm:$0xf] %vm1438_vm0, %v2090_v63  ;;  %v2138_v8 = vsel %vm1438_vm0, %v1332_v60, 4286644096 }
  0xda   : > { %v2142_v9 = vsel %vm1438_vm0, %v1364_v61, 4286644096  ;;  %v1301_v10 = vld [vmem:[%s2897_s24 + $0x1dc] sm:$0xf]  ;;  %v2117_v11 = vmax.bf16 %v2115_v59, %v2113_v3  ;;  %v1428_v12 = vld [vmem:[%s2897_s24 + $0x3d8] sm:$0xf]  ;;  %v2136_v13 = vmax.bf16 %v2134_v0, %v2132_v6 }
  0xdb   : > { %v2154_v14 = vsel %vm1438_vm0, %v1205_v1, 4286644096  ;;  %v2157_v15 = vsel %vm1438_vm0, %v1237_v2, 4286644096  ;;  %v2146_v16 = vsel %vm1438_vm0, %v1396_v5, 4286644096 }
  0xdc   : > { %v1333_v17 = vld [vmem:[%s2897_s24 + $0x25c] sm:$0xf]  ;;  %v2159_v18 = vmax.bf16 %v2157_v15, %v2154_v14  ;;  %v2161_v19 = vsel %vm1438_vm0, %v1269_v7, 4286644096  ;;  %v2121_v20 = vmax.bf16 %v2119_v4, %v2117_v11  ;;  %v2140_v21 = vmax.bf16 %v2138_v8, %v2136_v13  ;;  %v1206_v23 = vld [vmem:[%s2897_s24 + $0x60] sm:$0xf] }
  0xdd   : > { %v2165_v22 = vsel %vm1438_vm0, %v1301_v10, 4286644096  ;;  %v1238_v24 = vld [vmem:[%s2897_s24 + $0xe0] sm:$0xf]  ;;  %v2150_v25 = vsel %vm1438_vm0, %v1428_v12, 4286644096 }
  0xde   : > { %v1365_v26 = vld [vmem:[%s2897_s24 + $0x2dc] sm:$0xf]  ;;  %v2163_v27 = vmax.bf16 %v2161_v19, %v2159_v18  ;;  %v1270_v28 = vld [vmem:[%s2897_s24 + $0x160] sm:$0xf]  ;;  %2453 = vst.msk [vmem:[%s2943_s28 + $0x54] sm:$0xf] %vm1438_vm0, %v2121_v20  ;;  %v2144_v29 = vmax.bf16 %v2142_v9, %v2140_v21 }
  0xdf   : > { %v1397_v30 = vld [vmem:[%s2897_s24 + $0x35c] sm:$0xf]  ;;  %v2169_v31 = vsel %vm1438_vm0, %v1333_v17, 4286644096  ;;  %v1302_v32 = vld [vmem:[%s2897_s24 + $0x1e0] sm:$0xf] }
  0xe0   : > { %v1429_v33 = vld [vmem:[%s2897_s24 + $0x3dc] sm:$0xf]  ;;  %v2167_v34 = vmax.bf16 %v2165_v22, %v2163_v27  ;;  %v2185_v35 = vsel %vm1438_vm0, %v1206_v23, 4286644096  ;;  %v2188_v36 = vsel %vm1438_vm0, %v1238_v24, 4286644096  ;;  %v2148_v37 = vmax.bf16 %v2146_v16, %v2144_v29 }
  0xe1   : > { %v2173_v38 = vsel %vm1438_vm0, %v1365_v26, 4286644096  ;;  %v1334_v39 = vld [vmem:[%s2897_s24 + $0x260] sm:$0xf]  ;;  %v2190_v40 = vmax.bf16 %v2188_v36, %v2185_v35  ;;  %v2192_v41 = vsel %vm1438_vm0, %v1270_v28, 4286644096 }
  0xe2   : > { %v2171_v42 = vmax.bf16 %v2169_v31, %v2167_v34  ;;  %v2177_v43 = vsel %vm1438_vm0, %v1397_v30, 4286644096  ;;  %v2196_v44 = vsel %vm1438_vm0, %v1302_v32, 4286644096  ;;  %v1207_v45 = vld [vmem:[%s2897_s24 + $0x64] sm:$0xf]  ;;  %v2152_v46 = vmax.bf16 %v2150_v25, %v2148_v37 }
  0xe3   : > { %v1366_v47 = vld [vmem:[%s2897_s24 + $0x2e0] sm:$0xf]  ;;  %v2194_v48 = vmax.bf16 %v2192_v41, %v2190_v40  ;;  %v1239_v49 = vld [vmem:[%s2897_s24 + $0xe4] sm:$0xf]  ;;  %v2181_v52 = vsel %vm1438_vm0, %v1429_v33, 4286644096 }
  0xe4   : > { %v1271_v50 = vld [vmem:[%s2897_s24 + $0x164] sm:$0xf]  ;;  %v2175_v51 = vmax.bf16 %v2173_v38, %v2171_v42  ;;  %v1398_v53 = vld [vmem:[%s2897_s24 + $0x360] sm:$0xf]  ;;  %v2200_v54 = vsel %vm1438_vm0, %v1334_v39, 4286644096 }
  0xe5   : > { %2454 = vst.msk [vmem:[%s2943_s28 + $0x58] sm:$0xf] %vm1438_vm0, %v2152_v46  ;;  %v1430_v55 = vld [vmem:[%s2897_s24 + $0x3e0] sm:$0xf]  ;;  %v2198_v56 = vmax.bf16 %v2196_v44, %v2194_v48  ;;  %v1303_v57 = vld [vmem:[%s2897_s24 + $0x1e4] sm:$0xf] }
  0xe6   : > { %v2216_v58 = vsel %vm1438_vm0, %v1207_v45, 4286644096  ;;  %v2179_v59 = vmax.bf16 %v2177_v43, %v2175_v51  ;;  %v2204_v60 = vsel %vm1438_vm0, %v1366_v47, 4286644096  ;;  %v2219_v61 = vsel %vm1438_vm0, %v1239_v49, 4286644096 }
  0xe7   : > { %v2223_v62 = vsel %vm1438_vm0, %v1271_v50, 4286644096  ;;  %v2202_v63 = vmax.bf16 %v2200_v54, %v2198_v56  ;;  %v2208_v0 = vsel %vm1438_vm0, %v1398_v53, 4286644096  ;;  %v1335_v1 = vld [vmem:[%s2897_s24 + $0x264] sm:$0xf]  ;;  %v2221_v3 = vmax.bf16 %v2219_v61, %v2216_v58 }
  0xe8   : > { %v1367_v2 = vld [vmem:[%s2897_s24 + $0x2e4] sm:$0xf]  ;;  %v2183_v4 = vmax.bf16 %v2181_v52, %v2179_v59  ;;  %v2227_v5 = vsel %vm1438_vm0, %v1303_v57, 4286644096  ;;  %v1208_v6 = vld [vmem:[%s2897_s24 + $0x68] sm:$0xf] }
  0xe9   : > { %v1240_v7 = vld [vmem:[%s2897_s24 + $0xe8] sm:$0xf]  ;;  %v2206_v8 = vmax.bf16 %v2204_v60, %v2202_v63  ;;  %v2212_v9 = vsel %vm1438_vm0, %v1430_v55, 4286644096  ;;  %v1399_v10 = vld [vmem:[%s2897_s24 + $0x364] sm:$0xf]  ;;  %v2225_v11 = vmax.bf16 %v2223_v62, %v2221_v3 }
  0xea   : > { %v1272_v12 = vld [vmem:[%s2897_s24 + $0x168] sm:$0xf]  ;;  %2455 = vst.msk [vmem:[%s2943_s28 + $0x5c] sm:$0xf] %vm1438_vm0, %v2183_v4  ;;  %v2231_v13 = vsel %vm1438_vm0, %v1335_v1, 4286644096 }
  0xeb   : > { %v2235_v14 = vsel %vm1438_vm0, %v1367_v2, 4286644096  ;;  %v1304_v15 = vld [vmem:[%s2897_s24 + $0x1e8] sm:$0xf]  ;;  %v2210_v16 = vmax.bf16 %v2208_v0, %v2206_v8  ;;  %v1431_v17 = vld [vmem:[%s2897_s24 + $0x3e4] sm:$0xf]  ;;  %v2229_v18 = vmax.bf16 %v2227_v5, %v2225_v11 }
  0xec   : > { %v2247_v19 = vsel %vm1438_vm0, %v1208_v6, 4286644096  ;;  %v2250_v20 = vsel %vm1438_vm0, %v1240_v7, 4286644096  ;;  %v2239_v21 = vsel %vm1438_vm0, %v1399_v10, 4286644096 }
  0xed   : > { %v1336_v22 = vld [vmem:[%s2897_s24 + $0x268] sm:$0xf]  ;;  %v2252_v23 = vmax.bf16 %v2250_v20, %v2247_v19  ;;  %v2254_v24 = vsel %vm1438_vm0, %v1272_v12, 4286644096  ;;  %v2214_v25 = vmax.bf16 %v2212_v9, %v2210_v16  ;;  %v2233_v26 = vmax.bf16 %v2231_v13, %v2229_v18  ;;  %v1209_v28 = vld [vmem:[%s2897_s24 + $0x6c] sm:$0xf] }
  0xee   : > { %v2258_v27 = vsel %vm1438_vm0, %v1304_v15, 4286644096  ;;  %v1241_v29 = vld [vmem:[%s2897_s24 + $0xec] sm:$0xf]  ;;  %v2243_v30 = vsel %vm1438_vm0, %v1431_v17, 4286644096 }
  0xef   : > { %v1368_v31 = vld [vmem:[%s2897_s24 + $0x2e8] sm:$0xf]  ;;  %v2256_v32 = vmax.bf16 %v2254_v24, %v2252_v23  ;;  %v1273_v33 = vld [vmem:[%s2897_s24 + $0x16c] sm:$0xf]  ;;  %2456 = vst.msk [vmem:[%s2943_s28 + $0x60] sm:$0xf] %vm1438_vm0, %v2214_v25  ;;  %v2237_v34 = vmax.bf16 %v2235_v14, %v2233_v26 }
  0xf0   : > { %v1400_v35 = vld [vmem:[%s2897_s24 + $0x368] sm:$0xf]  ;;  %v2262_v36 = vsel %vm1438_vm0, %v1336_v22, 4286644096  ;;  %v1305_v37 = vld [vmem:[%s2897_s24 + $0x1ec] sm:$0xf] }
  0xf1   : > { %v1432_v38 = vld [vmem:[%s2897_s24 + $0x3e8] sm:$0xf]  ;;  %v2260_v39 = vmax.bf16 %v2258_v27, %v2256_v32  ;;  %v2278_v40 = vsel %vm1438_vm0, %v1209_v28, 4286644096  ;;  %v2281_v41 = vsel %vm1438_vm0, %v1241_v29, 4286644096  ;;  %v2241_v42 = vmax.bf16 %v2239_v21, %v2237_v34 }
  0xf2   : > { %v2266_v43 = vsel %vm1438_vm0, %v1368_v31, 4286644096  ;;  %v1337_v44 = vld [vmem:[%s2897_s24 + $0x26c] sm:$0xf]  ;;  %v2283_v45 = vmax.bf16 %v2281_v41, %v2278_v40  ;;  %v2285_v46 = vsel %vm1438_vm0, %v1273_v33, 4286644096 }
  0xf3   : > { %v2264_v47 = vmax.bf16 %v2262_v36, %v2260_v39  ;;  %v2270_v48 = vsel %vm1438_vm0, %v1400_v35, 4286644096  ;;  %v2289_v49 = vsel %vm1438_vm0, %v1305_v37, 4286644096  ;;  %v1210_v50 = vld [vmem:[%s2897_s24 + $0x70] sm:$0xf]  ;;  %v2245_v51 = vmax.bf16 %v2243_v30, %v2241_v42 }
  0xf4   : > { %v1369_v52 = vld [vmem:[%s2897_s24 + $0x2ec] sm:$0xf]  ;;  %v2287_v53 = vmax.bf16 %v2285_v46, %v2283_v45  ;;  %v1242_v54 = vld [vmem:[%s2897_s24 + $0xf0] sm:$0xf]  ;;  %v2274_v57 = vsel %vm1438_vm0, %v1432_v38, 4286644096 }
  0xf5   : > { %v1274_v55 = vld [vmem:[%s2897_s24 + $0x170] sm:$0xf]  ;;  %v2268_v56 = vmax.bf16 %v2266_v43, %v2264_v47  ;;  %v1401_v58 = vld [vmem:[%s2897_s24 + $0x36c] sm:$0xf]  ;;  %v2293_v59 = vsel %vm1438_vm0, %v1337_v44, 4286644096 }
  0xf6   : > { %2457 = vst.msk [vmem:[%s2943_s28 + $0x64] sm:$0xf] %vm1438_vm0, %v2245_v51  ;;  %v1433_v60 = vld [vmem:[%s2897_s24 + $0x3ec] sm:$0xf]  ;;  %v2291_v61 = vmax.bf16 %v2289_v49, %v2287_v53  ;;  %v1306_v62 = vld [vmem:[%s2897_s24 + $0x1f0] sm:$0xf] }
  0xf7   : > { %v2309_v63 = vsel %vm1438_vm0, %v1210_v50, 4286644096  ;;  %v2272_v0 = vmax.bf16 %v2270_v48, %v2268_v56  ;;  %v2297_v1 = vsel %vm1438_vm0, %v1369_v52, 4286644096  ;;  %v2312_v2 = vsel %vm1438_vm0, %v1242_v54, 4286644096 }
  0xf8   : > { %v2316_v3 = vsel %vm1438_vm0, %v1274_v55, 4286644096  ;;  %v2295_v4 = vmax.bf16 %v2293_v59, %v2291_v61  ;;  %v2301_v5 = vsel %vm1438_vm0, %v1401_v58, 4286644096  ;;  %v1338_v6 = vld [vmem:[%s2897_s24 + $0x270] sm:$0xf]  ;;  %v2314_v8 = vmax.bf16 %v2312_v2, %v2309_v63 }
  0xf9   : > { %v1370_v7 = vld [vmem:[%s2897_s24 + $0x2f0] sm:$0xf]  ;;  %v2276_v9 = vmax.bf16 %v2274_v57, %v2272_v0  ;;  %v2320_v10 = vsel %vm1438_vm0, %v1306_v62, 4286644096  ;;  %v1211_v11 = vld [vmem:[%s2897_s24 + $0x74] sm:$0xf] }
  0xfa   : > { %v1243_v12 = vld [vmem:[%s2897_s24 + $0xf4] sm:$0xf]  ;;  %v2299_v13 = vmax.bf16 %v2297_v1, %v2295_v4  ;;  %v2305_v14 = vsel %vm1438_vm0, %v1433_v60, 4286644096  ;;  %v1402_v15 = vld [vmem:[%s2897_s24 + $0x370] sm:$0xf]  ;;  %v2318_v16 = vmax.bf16 %v2316_v3, %v2314_v8 }
  0xfb   : > { %v1275_v17 = vld [vmem:[%s2897_s24 + $0x174] sm:$0xf]  ;;  %2458 = vst.msk [vmem:[%s2943_s28 + $0x68] sm:$0xf] %vm1438_vm0, %v2276_v9  ;;  %v2324_v18 = vsel %vm1438_vm0, %v1338_v6, 4286644096 }
  0xfc   : > { %v2328_v19 = vsel %vm1438_vm0, %v1370_v7, 4286644096  ;;  %v1307_v20 = vld [vmem:[%s2897_s24 + $0x1f4] sm:$0xf]  ;;  %v2303_v21 = vmax.bf16 %v2301_v5, %v2299_v13  ;;  %v1434_v22 = vld [vmem:[%s2897_s24 + $0x3f0] sm:$0xf]  ;;  %v2322_v23 = vmax.bf16 %v2320_v10, %v2318_v16 }
  0xfd   : > { %v2340_v24 = vsel %vm1438_vm0, %v1211_v11, 4286644096  ;;  %v2343_v25 = vsel %vm1438_vm0, %v1243_v12, 4286644096  ;;  %v2332_v26 = vsel %vm1438_vm0, %v1402_v15, 4286644096 }
  0xfe   : > { %v1339_v27 = vld [vmem:[%s2897_s24 + $0x274] sm:$0xf]  ;;  %v2345_v28 = vmax.bf16 %v2343_v25, %v2340_v24  ;;  %v2347_v29 = vsel %vm1438_vm0, %v1275_v17, 4286644096  ;;  %v2307_v30 = vmax.bf16 %v2305_v14, %v2303_v21  ;;  %v2326_v31 = vmax.bf16 %v2324_v18, %v2322_v23  ;;  %v1212_v33 = vld [vmem:[%s2897_s24 + $0x78] sm:$0xf] }
  0xff   : > { %v2351_v32 = vsel %vm1438_vm0, %v1307_v20, 4286644096  ;;  %v1244_v34 = vld [vmem:[%s2897_s24 + $0xf8] sm:$0xf]  ;;  %v2336_v35 = vsel %vm1438_vm0, %v1434_v22, 4286644096 }
 0x100   : > { %v1371_v36 = vld [vmem:[%s2897_s24 + $0x2f4] sm:$0xf]  ;;  %v2349_v37 = vmax.bf16 %v2347_v29, %v2345_v28  ;;  %v1276_v38 = vld [vmem:[%s2897_s24 + $0x178] sm:$0xf]  ;;  %2459 = vst.msk [vmem:[%s2943_s28 + $0x6c] sm:$0xf] %vm1438_vm0, %v2307_v30  ;;  %v2330_v39 = vmax.bf16 %v2328_v19, %v2326_v31 }
 0x101   : > { %v1403_v40 = vld [vmem:[%s2897_s24 + $0x374] sm:$0xf]  ;;  %v2355_v41 = vsel %vm1438_vm0, %v1339_v27, 4286644096  ;;  %v1308_v42 = vld [vmem:[%s2897_s24 + $0x1f8] sm:$0xf] }
 0x102   : > { %v1435_v43 = vld [vmem:[%s2897_s24 + $0x3f4] sm:$0xf]  ;;  %v2353_v44 = vmax.bf16 %v2351_v32, %v2349_v37  ;;  %v2371_v45 = vsel %vm1438_vm0, %v1212_v33, 4286644096  ;;  %v2374_v46 = vsel %vm1438_vm0, %v1244_v34, 4286644096  ;;  %v2334_v47 = vmax.bf16 %v2332_v26, %v2330_v39 }
 0x103   : > { %v2359_v48 = vsel %vm1438_vm0, %v1371_v36, 4286644096  ;;  %v1340_v49 = vld [vmem:[%s2897_s24 + $0x278] sm:$0xf]  ;;  %v2376_v50 = vmax.bf16 %v2374_v46, %v2371_v45  ;;  %v2378_v51 = vsel %vm1438_vm0, %v1276_v38, 4286644096 }
 0x104   : > { %v2357_v52 = vmax.bf16 %v2355_v41, %v2353_v44  ;;  %v2363_v53 = vsel %vm1438_vm0, %v1403_v40, 4286644096  ;;  %v2382_v54 = vsel %vm1438_vm0, %v1308_v42, 4286644096  ;;  %v1213_v55 = vld [vmem:[%s2897_s24 + $0x7c] sm:$0xf]  ;;  %v2338_v56 = vmax.bf16 %v2336_v35, %v2334_v47 }
 0x105   : > { %v1372_v57 = vld [vmem:[%s2897_s24 + $0x2f8] sm:$0xf]  ;;  %v2380_v58 = vmax.bf16 %v2378_v51, %v2376_v50  ;;  %v1245_v59 = vld [vmem:[%s2897_s24 + $0xfc] sm:$0xf]  ;;  %v2367_v62 = vsel %vm1438_vm0, %v1435_v43, 4286644096 }
 0x106   : > { %v1277_v60 = vld [vmem:[%s2897_s24 + $0x17c] sm:$0xf]  ;;  %v2361_v61 = vmax.bf16 %v2359_v48, %v2357_v52  ;;  %v2386_v63 = vsel %vm1438_vm0, %v1340_v49, 4286644096  ;;  %2460 = vst.msk [vmem:[%s2943_s28 + $0x70] sm:$0xf] %vm1438_vm0, %v2338_v56 }
 0x107   : > { %v1404_v0 = vld [vmem:[%s2897_s24 + $0x378] sm:$0xf]  ;;  %v2384_v1 = vmax.bf16 %v2382_v54, %v2380_v58  ;;  %v1309_v2 = vld [vmem:[%s2897_s24 + $0x1fc] sm:$0xf]  ;;  %v2402_v3 = vsel %vm1438_vm0, %v1213_v55, 4286644096 }
 0x108   : > { %v2365_v4 = vmax.bf16 %v2363_v53, %v2361_v61  ;;  %v2390_v5 = vsel %vm1438_vm0, %v1372_v57, 4286644096  ;;  %v2405_v6 = vsel %vm1438_vm0, %v1245_v59, 4286644096  ;;  %v2409_v7 = vsel %vm1438_vm0, %v1277_v60, 4286644096 }
 0x109   : > { %v1436_v8 = vld [vmem:[%s2897_s24 + $0x3f8] sm:$0xf]  ;;  %v2388_v9 = vmax.bf16 %v2386_v63, %v2384_v1  ;;  %v1341_v10 = vld [vmem:[%s2897_s24 + $0x27c] sm:$0xf]  ;;  %v2407_v11 = vmax.bf16 %v2405_v6, %v2402_v3  ;;  %v2394_v13 = vsel %vm1438_vm0, %v1404_v0, 4286644096 }
 0x10a   : > { %v2369_v12 = vmax.bf16 %v2367_v62, %v2365_v4  ;;  %v2413_v14 = vsel %vm1438_vm0, %v1309_v2, 4286644096  ;;  %v1373_v16 = vld [vmem:[%s2897_s24 + $0x2fc] sm:$0xf]  ;;  %v2398_v18 = vsel %vm1438_vm0, %v1436_v8, 4286644096 }
 0x10b   : > { %v2392_v15 = vmax.bf16 %v2390_v5, %v2388_v9  ;;  %v2411_v17 = vmax.bf16 %v2409_v7, %v2407_v11  ;;  %v2417_v19 = vsel %vm1438_vm0, %v1341_v10, 4286644096  ;;  %v1405_v21 = vld [vmem:[%s2897_s24 + $0x37c] sm:$0xf]  ;;  %v2421_v23 = vsel %vm1438_vm0, %v1373_v16, 4286644096 }
 0x10c   : > { %2461 = vst.msk [vmem:[%s2943_s28 + $0x74] sm:$0xf] %vm1438_vm0, %v2369_v12  ;;  %v1437_v25 = vld [vmem:[%s2897_s24 + $0x3fc] sm:$0xf]  ;;  %v2425_v27 = vsel %vm1438_vm0, %v1405_v21, 4286644096 }
 0x10d   : > { %v2396_v20 = vmax.bf16 %v2394_v13, %v2392_v15  ;;  %v2415_v22 = vmax.bf16 %v2413_v14, %v2411_v17  ;;  %v2429_v29 = vsel %vm1438_vm0, %v1437_v25, 4286644096 }
 0x10f   : > { %v2400_v24 = vmax.bf16 %v2398_v18, %v2396_v20  ;;  %v2419_v26 = vmax.bf16 %v2417_v19, %v2415_v22 }
 0x111   : > { %2462 = vst.msk [vmem:[%s2943_s28 + $0x78] sm:$0xf] %vm1438_vm0, %v2400_v24  ;;  %v2423_v28 = vmax.bf16 %v2421_v23, %v2419_v26 }
 0x113   : > { %v2427_v30 = vmax.bf16 %v2425_v27, %v2423_v28 }
 0x115   : > { %v2431_v31 = vmax.bf16 %v2429_v29, %v2427_v30 }
 0x117   : > { %2463 = vst.msk [vmem:[%s2943_s28 + $0x7c] sm:$0xf] %vm1438_vm0, %v2431_v31 }
 0x118 PF: > { %p8_p9 = scmp.ge.s32.totalorder %s2615_s10, 4   ;;  %s3497_s6 = smov %s2582_s7 }
 0x119   : > { %s3498_s7 = smov %s2624_s13  ;;  %s3499_s8 = smov %s2615_s10 }
 0x11a   :  { %10 = sbr.rel (!%p8_p9) target bundleno = 2 (0x2), region = 100 }

// kernel: unet3d_forward.21
= control target key start
LH: loop header
LB: loop body
LE: loop exit
PB: predicated region body
PF: predicated region fallthrough
CT: control target
= control target key end

     0   :  { %s1170_s18 = smov 0   ;;  %s1172_s19 = smov 0   ;;  %s1317_s0 = inlined_call_operand.vmem [shape: bf16[2,6,64,36], index: 0, kind: input, shape index: {}, may-alias: {0,1,2}]   ;;  %s1318_s1 = inlined_call_operand.vmem [shape: bf16[2,6,64,36], index: 1, kind: input, shape index: {}, may-alias: {0,1,2}]   ;;  %s1319_s2 = inlined_call_operand.vmem [shape: bf16[2,6,64,36], index: 2, kind: input, shape index: {}, may-alias: {0,1,2}]   ;;  %s1320_s3 = inlined_call_operand.vmem [shape: bf16[3,36,8], index: 3, kind: input, shape index: {}]   ;;  %s1321_s4 = inlined_call_operand.vmem [shape: f32[1,8], index: 4, kind: input, shape index: {}]   ;;  %s1322_s5 = inlined_call_operand.vmem [shape: bf16[2,4,64,8], index: 5, kind: output, shape index: {}]  }
   0x1   :  { %s1174_s20 = smov 0   ;;  %s1176_s21 = smov 0  }
   0x2   :  { %s1178_s22 = smov 0   ;;  %s1180_s23 = smov 0  }
   0x3   :  { %s1182_s24 = smov 0  }
   0x4 LB: > { %s27_s25 = sadd.s32 1, %s1126_s21  ;;  %s30_s26 = sadd.s32 1, %s1130_s22  ;;  %s1138_s24 = sphi %s1182_s24, %s15_s24   ;;  %s1134_s23 = sphi %s1180_s23, %s1328_s23   ;;  %s1130_s22 = sphi %s1178_s22, %s1327_s22   ;;  %s1126_s21 = sphi %s1176_s21, %s1326_s21   ;;  %s1122_s20 = sphi %s1174_s20, %s1325_s20   ;;  %s1118_s19 = sphi %s1172_s19, %s1324_s19   ;;  %s1114_s18 = sphi %s1170_s18, %s1323_s18  }
   0x5   : > { %p28_p0 = scmp.ge.s32.totalorder %s27_s25, 2  ;;  %p900_p1 = scmp.ge.s32.totalorder %s1138_s24, 1 }
   0x6   : > { %p277_p2 = scmp.lt.s32.totalorder %s1138_s24, 17  ;;  %s34_s27 = sadd.s32 1, %s1134_s23 }
   0x7   : > { %s1330_s25 = smov (%p28_p0, %s27_s25), 0  ;;  %s1332_s26 = smov (!%p28_p0, %s30_s26), %s1130_s22 }
   0x8   : > { %p278_p3 = pnand %p900_p1, %p277_p2  ;;  %p32_p4 = scmp.ge.s32.totalorder %s1332_s26, 4 }
   0x9   : > { %v1069_v0 = vld [vmem:[%s1320_s3] sm:$0xff] (!%p278_p3)   ;;  %v1070_v1 = vld [vmem:[%s1320_s3 + $0x8] sm:$0xff] (!%p278_p3)   ;;  %s901_s7 = sshll.u32 (!%p278_p3), %s1114_s18, 2  ;;  %v1071_v2 = vld [vmem:[%s1320_s3 + $0x10] ss:$0 sps:$4 sm:$0x33] (!%p278_p3)  }
   0xa   : > { %s1334_s26 = smov (%p32_p4, %s1332_s26), 0  ;;  %s1336_s27 = smov (!%p32_p4, %s34_s27), %s1134_s23 }
   0xb   : > { %p36_p5 = scmp.ge.s32.totalorder %s1336_s27, 2  ;;  %281 = sbr.rel (%p278_p3) target bundleno = 264 (0x108), region = 40  ;;  %981 = vmatprep.subr.bf16.mxu0 (!%p278_p3), %v1069_v0  ;;  %v1072_v3 = vld [vmem:[%s1320_s3 + $0x14] sm:$0xff] (!%p278_p3)   ;;  %vm461_vm0 = vcmask (!%p278_p3), 1041408   ;;  %v1076_v4 = vld [vmem:[%s1320_s3 + $0x1c] sm:$0xff] (!%p278_p3)   ;;  %v1075_v6 = vld [vmem:[%s1320_s3 + $0x28] sm:$0xff] (!%p278_p3)  }
   0xc   : > { %982 = vmatpush3.bf16.msra.mxu0 (!%p278_p3), %v1069_v0  ;;  %p350_p6 = scmp.lt.s32.totalorder (!%p278_p3), %s1122_s20, 1  ;;  %p352_p7 = scmp.lt.s32.totalorder (!%p278_p3), %s1118_s19, 5  ;;  %971 = vmatprep.subr.bf16.mxu1 (!%p278_p3), %v1072_v3  ;;  %v546_v5 = vsel (!%p278_p3), %vm461_vm0, %v1071_v2, 0  ;;  %v1078_v7 = vld [vmem:[%s1320_s3 + $0x24] ss:$0 sps:$4 sm:$0x33] (!%p278_p3)  }
   0xd   : > { %s1338_s27 = smov (%p36_p5, %s1336_s27), 0  ;;  %983 = vmatprep.subr.bf16.mxu0 (!%p278_p3), %v1070_v1  ;;  %p354_p8 = scmp.lt.s32.totalorder (!%p278_p3), %s901_s7, 7  ;;  %972 = vmatpush3.bf16.msra.mxu1 (!%p278_p3), %v1072_v3  ;;  %v463_v8 = vsel (!%p278_p3), %vm461_vm0, %v1078_v7, 0  ;;  %vm454_vm1 = vcmask (!%p278_p3), 293888   ;;  %v1077_v9 = vld [vmem:[%s1320_s3 + $0x30] sm:$0xff] (!%p278_p3)   ;;  %vm725_vm2 = vcmask (!%p278_p3), 60416  }
   0xe   : > { %973 = vmatprep.subr.bf16.mxu1 (!%p278_p3), %v1076_v4  ;;  %s363_s6 = sadd.s32 (!%p278_p3), 1, %s1118_s19  ;;  %s379_s10 = sadd.s32 (!%p278_p3), 2, %s1118_s19  ;;  %v1079_v12 = vld [vmem:[%s1320_s3 + $0x38] ss:$0 sps:$4 sm:$0x33] (!%p278_p3)  }
   0xf   : > { %p367_p9 = scmp.lt.s32.totalorder (!%p278_p3), %s363_s6, 5  ;;  %p383_p10 = scmp.lt.s32.totalorder (!%p278_p3), %s379_s10, 5  ;;  %v639_v15 = vsel (!%p278_p3), %vm461_vm0, %v1079_v12, 0  ;;  %v945_v23 = vld [vmem:[%s1321_s4] ss:$0 sm:$0xff] (!%p278_p3) }
  0x10   : > { %984 = vmatpush3.bf16.msra.mxu0 (!%p278_p3), %v1070_v1  ;;  %p398_p11 = scmp.lt.s32.totalorder (!%p278_p3), %s1118_s19, 3 }
  0x11   : > { %1010 = vmatprep.subr.msk.bf16.mxu0 (!%p278_p3), %vm461_vm0, %v1071_v2  ;;  %974 = vmatpush3.bf16.msra.mxu1 (!%p278_p3), %v1076_v4 }
  0x12   : > { %s1340_s20 = smov (!%p350_p6, %s1122_s20), 1  ;;  %s1342_s7 = smov (!%p354_p8, %s901_s7), 7  ;;  %1009 = vmatprep.subr.msk.bf16.mxu1 %vm461_vm0, %v1078_v7 }
  0x13   : > { %s353_s14 = scalar_select %p352_p7, %s1118_s19, 5 }
  0x14   : > { %s1245_s16 = smul.u32 48, %s1340_s20  ;;  %986 = vmatpush3.bf16.msra.mxu0 %v546_v5  ;;  %s1344_s6 = smov (!%p367_p9, %s363_s6), 5 }
  0x15   : > { %s902_s15 = sshll.u32 %s353_s14, 3  ;;  %991 = vmatprep.subr.bf16.mxu0 %v1075_v6  ;;  %976 = vmatpush3.bf16.msra.mxu1 %v463_v8  ;;  %s1346_s10 = smov (!%p383_p10, %s379_s10), 5 }
  0x16   : > { %s357_s30 = sadd.s32 %s902_s15, %s1342_s7  ;;  %s905_s17 = sshll.u32 %s1344_s6, 3 }
  0x17   : > { %s359_s8 = sadd.s32 %s1245_s16, %s357_s30  ;;  %s372_s18 = sadd.s32 %s905_s17, %s1342_s7 }
  0x18   : > { %s903_s9 = sshll.u32 %s359_s8, 2  ;;  %s908_s28 = sshll.u32 %s1346_s10, 3 }
  0x19   : > { %s361_s13 = scalar_lea.vmem %s1317_s0, %s903_s9  ;;  %s374_s29 = sadd.s32 %s1245_s16, %s372_s18 }
  0x1a   : > { %v1073_v10 = vld [vmem:[%s361_s13] sm:$0xff]   ;;  %v1074_v11 = vld [vmem:[%s361_s13 + $0x8] sm:$0xff]   ;;  %s388_s30 = sadd.s32 %s908_s28, %s1342_s7  ;;  %s906_s11 = sshll.u32 %s374_s29, 2 }
  0x1b   : > { %987 = vmatprep.mubr.msk.bf16.mxu0 %vm454_vm1, %v1073_v10  ;;  %s390_s12 = sadd.s32 %s1245_s16, %s388_s30  ;;  %s376_s15 = scalar_lea.vmem %s1318_s1, %s906_s11 }
  0x1c   : > { %988 = vmatmul.mubr.msk.bf16.vlgmr.msra.gmra.mrb[0].mxu0 %vm454_vm1, %v1074_v11  ;;  %s909_s6 = sshll.u32 %s390_s12, 2  ;;  %v1080_v13 = vld [vmem:[%s376_s15] sm:$0xff]   ;;  %v1081_v14 = vld [vmem:[%s376_s15 + $0x8] sm:$0xff]   ;;  %s1348_s19 = smov (!%p398_p11, %s1118_s19), 3 }
  0x1d   : > { %992 = vmatpush3.bf16.msra.mxu0 %v1075_v6  ;;  %s392_s18 = scalar_lea.vmem %s1319_s2, %s909_s6  ;;  %977 = vmatprep.mubr.msk.bf16.mxu1 %vm454_vm1, %v1080_v13  ;;  %s911_s16 = sshll.u32 %s1348_s19, 3 }
  0x1e   : > { %993 = vmatprep.subr.bf16.mxu0 %v1077_v9  ;;  %v1082_v16 = vld [vmem:[%s392_s18] sm:$0xff]   ;;  %978 = vmatmul.mubr.msk.bf16.vlgmr.msra.gmra.mrb[0].mxu1 %vm454_vm1, %v1081_v14  ;;  %v1083_v17 = vld [vmem:[%s392_s18 + $0x8] sm:$0xff]   ;;  %s403_s28 = sadd.s32 %s911_s16, %s1342_s7  ;;  %s912_s29 = sshll.u32 %s1340_s20, 5 }
  0x1f   : > { %997 = vmatprep.mubr.msk.bf16.mxu0 %vm454_vm1, %v1082_v16  ;;  %s405_s30 = sadd.s32 %s912_s29, %s403_s28 }
  0x20   : > { %s913_s11 = sshll.u32 %s405_s30, 2 }
  0x21   : > { %994 = vmatpush3.bf16.msra.mxu0 %v1077_v9  ;;  %s407_s7 = scalar_lea.vmem %s1322_s5, %s913_s11 }
  0x22   : > { %1011 = vmatprep.subr.msk.bf16.mxu0 %vm461_vm0, %v1079_v12 }
  0x25   : > { %996 = vmatpush3.bf16.msra.mxu0 %v639_v15 }
  0x28   : > { %998 = vmatmul.mubr.msk.bf16.vlgmr.msra.gmra.mrb[0].mxu0 %vm454_vm1, %v1083_v17 }
  0xf1   : > { %v979_v18 = vpop.f32.mrb[0].mxu1 }
  0xf2   : > { %v499_v19 = vpop.f32.mrb[1].mxu1 }
  0xf3   : > { %v980_v20 = vpop.f32.mrb[2].mxu1 }
  0xf4   : > { %v502_v21 = vpop.f32.mrb[3].mxu1 }
  0xfb   : > { %v999_v22 = vpop.f32.mrb[0].mxu0 }
  0xfc   : > { %v1001_v24 = vadd.f32 %v999_v22, %v979_v18  ;;  %v675_v25 = vpop.f32.mrb[1].mxu0 }
  0xfd   : > { %v1002_v26 = vadd.f32 %v675_v25, %v499_v19  ;;  %v1000_v27 = vpop.f32.mrb[2].mxu0 }
  0xfe   : > { %v703_v28 = vadd.f32 %v1001_v24, %v945_v23  ;;  %v1003_v29 = vadd.f32 %v1000_v27, %v980_v20  ;;  %v678_v30 = vpop.f32.mrb[3].mxu0 }
  0xff   : > { %v701_v31 = vadd.f32 %v1002_v26, %v945_v23  ;;  %v1004_v32 = vadd.f32 %v678_v30, %v502_v21 }
 0x100   : > { %v707_v33 = vmax.f32 %v703_v28, 0.0  ;;  %v704_v34 = vadd.f32 %v1003_v29, %v945_v23 }
 0x101   : > { %v705_v35 = vmax.f32 %v701_v31, 0.0  ;;  %v702_v36 = vadd.f32 %v1004_v32, %v945_v23 }
 0x102   : > { %v954_v37 = vpack.c.bf16 %v707_v33, %v707_v33  ;;  %v708_v38 = vmax.f32 %v704_v34, 0.0 }
 0x103   : > { %v952_v39 = vpack.c.bf16 %v705_v35, %v705_v35  ;;  %v706_v40 = vmax.f32 %v702_v36, 0.0 }
 0x104   : > { %728 = vst.msk [vmem:[%s407_s7 + $0x8] sm:$0xf] %vm725_vm2, %v954_v37  ;;  %v955_v41 = vpack.c.bf16 %v708_v38, %v708_v38 }
 0x105   : > { %726 = vst.msk [vmem:[%s407_s7] sm:$0xf] %vm725_vm2, %v952_v39  ;;  %v953_v42 = vpack.c.bf16 %v706_v40, %v706_v40 }
 0x106   : > { %729 = vst.msk [vmem:[%s407_s7 + $0xc] sm:$0xf] %vm725_vm2, %v955_v41 }
 0x107   : > { %727 = vst.msk [vmem:[%s407_s7 + $0x4] sm:$0xf] %vm725_vm2, %v953_v42 }
 0x108 PF: > { %s15_s24 = sadd.s32 1, %s1138_s24   ;;  %s1323_s18 = smov %s1126_s21 }
 0x109   : > { %p12_p12 = scmp.ge.s32.totalorder %s15_s24, 18   ;;  %s1324_s19 = smov %s1130_s22 }
 0x10a   : > { %s1325_s20 = smov %s1134_s23  ;;  %s1326_s21 = smov %s1330_s25 }
 0x10b   : > { %s1327_s22 = smov %s1334_s26  ;;  %s1328_s23 = smov %s1338_s27 }
 0x10c   :  { %14 = sbr.rel (!%p12_p12) target bundleno = 4 (0x4), region = 78 }

// kernel: unet3d_forward.22
= control target key start
LH: loop header
LB: loop body
LE: loop exit
PB: predicated region body
PF: predicated region fallthrough
CT: control target
= control target key end

     0   :  { %s1256_s18 = smov 0   ;;  %s1258_s19 = smov 0   ;;  %s1427_s0 = inlined_call_operand.vmem [shape: bf16[2,6,64,72], index: 0, kind: input, shape index: {}, may-alias: {0,1,2}]   ;;  %s1428_s1 = inlined_call_operand.vmem [shape: bf16[2,6,64,72], index: 1, kind: input, shape index: {}, may-alias: {0,1,2}]   ;;  %s1429_s2 = inlined_call_operand.vmem [shape: bf16[2,6,64,72], index: 2, kind: input, shape index: {}, may-alias: {0,1,2}]   ;;  %s1430_s3 = inlined_call_operand.vmem [shape: bf16[3,72,8], index: 3, kind: input, shape index: {}]   ;;  %s1431_s4 = inlined_call_operand.vmem [shape: f32[1,8], index: 4, kind: input, shape index: {}]   ;;  %s1432_s5 = inlined_call_operand.vmem [shape: bf16[2,4,64,8], index: 5, kind: output, shape index: {}]  }
   0x1   :  { %s1260_s20 = smov 0   ;;  %s1262_s21 = smov 0  }
   0x2   :  { %s1264_s22 = smov 0   ;;  %s1266_s23 = smov 0  }
   0x3   :  { %s1268_s24 = smov 0  }
   0x4 LB: > { %s27_s25 = sadd.s32 1, %s1212_s21  ;;  %s30_s26 = sadd.s32 1, %s1216_s22  ;;  %s1224_s24 = sphi %s1268_s24, %s15_s24   ;;  %s1220_s23 = sphi %s1266_s23, %s1439_s23   ;;  %s1216_s22 = sphi %s1264_s22, %s1438_s22   ;;  %s1212_s21 = sphi %s1262_s21, %s1437_s21   ;;  %s1208_s20 = sphi %s1260_s20, %s1436_s20   ;;  %s1204_s19 = sphi %s1258_s19, %s1435_s19   ;;  %s1200_s18 = sphi %s1256_s18, %s1434_s18  }
   0x5   : > { %p28_p0 = scmp.ge.s32.totalorder %s27_s25, 2  ;;  %p948_p1 = scmp.ge.s32.totalorder %s1224_s24, 1 }
   0x6   : > { %p277_p2 = scmp.lt.s32.totalorder %s1224_s24, 17  ;;  %s34_s27 = sadd.s32 1, %s1220_s23 }
   0x7   : > { %s1441_s25 = smov (%p28_p0, %s27_s25), 0  ;;  %s1443_s26 = smov (!%p28_p0, %s30_s26), %s1216_s22 }
   0x8   : > { %p278_p3 = pnand %p948_p1, %p277_p2  ;;  %p32_p4 = scmp.ge.s32.totalorder %s1443_s26, 4 }
   0x9   : > { %v1149_v0 = vld [vmem:[%s1430_s3] sm:$0xff] (!%p278_p3)   ;;  %v1150_v1 = vld [vmem:[%s1430_s3 + $0x8] sm:$0xff] (!%p278_p3)   ;;  %p350_p6 = scmp.lt.s32.totalorder (!%p278_p3), %s1208_s20, 1  ;;  %p352_p7 = scmp.lt.s32.totalorder (!%p278_p3), %s1204_s19, 5  ;;  %v1151_v2 = vld [vmem:[%s1430_s3 + $0x10] sm:$0xff] (!%p278_p3)   ;;  %vm481_vm0 = vcmask (!%p278_p3), 1043456  }
   0xa   : > { %s1445_s26 = smov (%p32_p4, %s1443_s26), 0  ;;  %s1447_s27 = smov (!%p32_p4, %s34_s27), %s1220_s23 }
   0xb   : > { %p36_p5 = scmp.ge.s32.totalorder %s1447_s27, 2  ;;  %281 = sbr.rel (%p278_p3) target bundleno = 275 (0x113), region = 40  ;;  %1053 = vmatprep.subr.bf16.mxu0 (!%p278_p3), %v1149_v0  ;;  %v1154_v3 = vld [vmem:[%s1430_s3 + $0x24] sm:$0xff] (!%p278_p3)   ;;  %v1152_v4 = vld [vmem:[%s1430_s3 + $0x18] sm:$0xff] (!%p278_p3)   ;;  %v1157_v5 = vld [vmem:[%s1430_s3 + $0x2c] sm:$0xff] (!%p278_p3)   ;;  %vm474_vm1 = vcmask (!%p278_p3), 588800  }
   0xc   : > { %1054 = vmatpush3.bf16.msra.mxu0 (!%p278_p3), %v1149_v0  ;;  %s949_s9 = sshll.u32 (!%p278_p3), %s1200_s18, 2  ;;  %1039 = vmatprep.subr.bf16.mxu1 (!%p278_p3), %v1154_v3  ;;  %v1153_v6 = vld [vmem:[%s1430_s3 + $0x20] ss:$0 sps:$4 sm:$0xff] (!%p278_p3)   ;;  %v1160_v7 = vld [vmem:[%s1430_s3 + $0x34] sm:$0xff] (!%p278_p3)   ;;  %s363_s7 = sadd.s32 (!%p278_p3), 1, %s1204_s19  ;;  %v1156_v9 = vld [vmem:[%s1430_s3 + $0x48] sm:$0xff] (!%p278_p3)  }
   0xd   : > { %s1449_s27 = smov (%p36_p5, %s1447_s27), 0  ;;  %1055 = vmatprep.subr.bf16.mxu0 (!%p278_p3), %v1150_v1  ;;  %p354_p8 = scmp.lt.s32.totalorder (!%p278_p3), %s949_s9, 7  ;;  %1040 = vmatpush3.bf16.msra.mxu1 (!%p278_p3), %v1154_v3  ;;  %v1162_v8 = vld [vmem:[%s1430_s3 + $0x3c] sm:$0xff] (!%p278_p3)   ;;  %v578_v11 = vsel (!%p278_p3), %vm481_vm0, %v1153_v6, 0  ;;  %v1164_v12 = vld [vmem:[%s1430_s3 + $0x44] ss:$0 sps:$4 sm:$0xff] (!%p278_p3)  }
   0xe   : > { %1041 = vmatprep.subr.bf16.mxu1 (!%p278_p3), %v1157_v5  ;;  %p1342_p9 = scmp.lt.s32.totalorder (!%p278_p3), %s363_s7, 5  ;;  %s379_s12 = sadd.s32 (!%p278_p3), 2, %s1204_s19  ;;  %v1159_v14 = vld [vmem:[%s1430_s3 + $0x50] sm:$0xff] (!%p278_p3)   ;;  %v483_v15 = vsel (!%p278_p3), %vm481_vm0, %v1164_v12, 0  ;;  %v1161_v16 = vld [vmem:[%s1430_s3 + $0x58] sm:$0xff] (!%p278_p3)   ;;  %v1163_v20 = vld [vmem:[%s1430_s3 + $0x60] sm:$0xff] (!%p278_p3)  }
   0xf   : > { %p383_p10 = scmp.lt.s32.totalorder (!%p278_p3), %s379_s12, 5  ;;  %v1166_v21 = vld [vmem:[%s1430_s3 + $0x68] ss:$0 sps:$4 sm:$0xff] (!%p278_p3)   ;;  %p398_p11 = scmp.lt.s32.totalorder (!%p278_p3), %s1204_s19, 3  ;;  %v1007_v29 = vld [vmem:[%s1431_s4] ss:$0 sm:$0xff] (!%p278_p3) }
  0x10   : > { %1056 = vmatpush3.bf16.msra.mxu0 (!%p278_p3), %v1150_v1  ;;  %v687_v22 = vsel (!%p278_p3), %vm481_vm0, %v1166_v21, 0  ;;  %vm773_vm2 = vcmask (!%p278_p3), 60416  }
  0x11   : > { %1057 = vmatprep.subr.bf16.mxu0 (!%p278_p3), %v1151_v2  ;;  %1042 = vmatpush3.bf16.msra.mxu1 (!%p278_p3), %v1157_v5 }
  0x12   : > { %s1451_s20 = smov (!%p350_p6, %s1208_s20), 1  ;;  %s1453_s9 = smov (!%p354_p8, %s949_s9), 7  ;;  %1043 = vmatprep.subr.bf16.mxu1 %v1160_v7 }
  0x13   : > { %s353_s14 = scalar_select %p352_p7, %s1204_s19, 5 }
  0x14   : > { %s1327_s15 = smul.u32 48, %s1451_s20  ;;  %1058 = vmatpush3.bf16.msra.mxu0 %v1151_v2  ;;  %s1455_s7 = smov (!%p1342_p9, %s363_s7), 5 }
  0x15   : > { %s950_s16 = sshll.u32 %s353_s14, 3  ;;  %1059 = vmatprep.subr.bf16.mxu0 %v1152_v4  ;;  %1044 = vmatpush3.bf16.msra.mxu1 %v1160_v7  ;;  %s1457_s12 = smov (!%p383_p10, %s379_s12), 5 }
  0x16   : > { %s357_s8 = sadd.s32 %s950_s16, %s1453_s9  ;;  %1045 = vmatprep.subr.bf16.mxu1 %v1162_v8  ;;  %s956_s14 = sshll.u32 %s1457_s12, 3 }
  0x17   : > { %s359_s11 = sadd.s32 %s1327_s15, %s357_s8  ;;  %s388_s28 = sadd.s32 %s956_s14, %s1453_s9 }
  0x18   : > { %s951_s13 = sshll.u32 %s359_s11, 2  ;;  %1060 = vmatpush3.bf16.msra.mxu0 %v1152_v4  ;;  %s953_s11 = sshll.u32 %s1455_s7, 3 }
  0x19   : > { %s361_s16 = scalar_lea.vmem %s1427_s0, %s951_s13  ;;  %1090 = vmatprep.subr.msk.bf16.mxu0 %vm481_vm0, %v1153_v6  ;;  %s372_s13 = sadd.s32 %s953_s11, %s1453_s9  ;;  %1046 = vmatpush3.bf16.msra.mxu1 %v1162_v8 }
  0x1a   : > { %v1155_v10 = vld [vmem:[%s361_s16] sm:$0xff]   ;;  %v1158_v13 = vld [vmem:[%s361_s16 + $0x8] sm:$0xff]   ;;  %s374_s10 = sadd.s32 %s1327_s15, %s372_s13  ;;  %1089 = vmatprep.subr.msk.bf16.mxu1 %vm481_vm0, %v1164_v12  ;;  %s390_s30 = sadd.s32 %s1327_s15, %s388_s28 }
  0x1b   : > { %1063 = vmatprep.mubr.msk.bf16.mxu0 %vm474_vm1, %v1155_v10  ;;  %s954_s29 = sshll.u32 %s374_s10, 2  ;;  %s957_s11 = sshll.u32 %s390_s30, 2 }
  0x1c   : > { %1062 = vmatpush3.bf16.msra.mxu0 %v578_v11  ;;  %s376_s8 = scalar_lea.vmem %s1428_s1, %s954_s29  ;;  %s392_s17 = scalar_lea.vmem %s1429_s2, %s957_s11 }
  0x1d   : > { %1067 = vmatprep.subr.bf16.mxu0 %v1156_v9  ;;  %v1165_v17 = vld [vmem:[%s376_s8] sm:$0xff]   ;;  %1048 = vmatpush3.bf16.msra.mxu1 %v483_v15  ;;  %v1167_v18 = vld [vmem:[%s376_s8 + $0x8] sm:$0xff]   ;;  %s1459_s19 = smov (!%p398_p11, %s1204_s19), 3  ;;  %s960_s7 = sshll.u32 %s1451_s20, 5 }
  0x1e   : > { %1049 = vmatprep.mubr.msk.bf16.mxu1 %vm474_vm1, %v1165_v17  ;;  %v1168_v19 = vld [vmem:[%s392_s17] sm:$0xff]   ;;  %v1169_v23 = vld [vmem:[%s392_s17 + $0x8] sm:$0xff]   ;;  %s959_s29 = sshll.u32 %s1459_s19, 3 }
  0x1f   : > { %1064 = vmatmul.mubr.msk.bf16.vlgmr.msra.gmra.mrb[0].mxu0 %vm474_vm1, %v1158_v13  ;;  %s403_s30 = sadd.s32 %s959_s29, %s1453_s9 }
  0x20   : > { %1068 = vmatpush3.bf16.msra.mxu0 %v1156_v9  ;;  %1050 = vmatmul.mubr.msk.bf16.vlgmr.msra.gmra.mrb[0].mxu1 %vm474_vm1, %v1167_v18  ;;  %s405_s16 = sadd.s32 %s960_s7, %s403_s30 }
  0x21   : > { %1069 = vmatprep.subr.bf16.mxu0 %v1159_v14  ;;  %1077 = vmatprep.mubr.msk.bf16.mxu0 %vm474_vm1, %v1168_v19  ;;  %s961_s8 = sshll.u32 %s405_s16, 2 }
  0x22   : > { %s407_s9 = scalar_lea.vmem %s1432_s5, %s961_s8 }
  0x24   : > { %1070 = vmatpush3.bf16.msra.mxu0 %v1159_v14 }
  0x25   : > { %1071 = vmatprep.subr.bf16.mxu0 %v1161_v16 }
  0x28   : > { %1072 = vmatpush3.bf16.msra.mxu0 %v1161_v16 }
  0x29   : > { %1073 = vmatprep.subr.bf16.mxu0 %v1163_v20 }
  0x2c   : > { %1074 = vmatpush3.bf16.msra.mxu0 %v1163_v20 }
  0x2d   : > { %1091 = vmatprep.subr.msk.bf16.mxu0 %vm481_vm0, %v1166_v21 }
  0x30   : > { %1076 = vmatpush3.bf16.msra.mxu0 %v687_v22 }
  0x33   : > { %1078 = vmatmul.mubr.msk.bf16.vlgmr.msra.gmra.mrb[0].mxu0 %vm474_vm1, %v1169_v23 }
  0xf3   : > { %v1051_v24 = vpop.f32.mrb[0].mxu1 }
  0xf4   : > { %v519_v25 = vpop.f32.mrb[1].mxu1 }
  0xf5   : > { %v1052_v26 = vpop.f32.mrb[2].mxu1 }
  0xf6   : > { %v522_v27 = vpop.f32.mrb[3].mxu1 }
 0x106   : > { %v1079_v28 = vpop.f32.mrb[0].mxu0 }
 0x107   : > { %v1081_v30 = vadd.f32 %v1079_v28, %v1051_v24  ;;  %v723_v31 = vpop.f32.mrb[1].mxu0 }
 0x108   : > { %v1082_v32 = vadd.f32 %v723_v31, %v519_v25  ;;  %v1080_v33 = vpop.f32.mrb[2].mxu0 }
 0x109   : > { %v751_v34 = vadd.f32 %v1081_v30, %v1007_v29  ;;  %v1083_v35 = vadd.f32 %v1080_v33, %v1052_v26  ;;  %v726_v36 = vpop.f32.mrb[3].mxu0 }
 0x10a   : > { %v749_v37 = vadd.f32 %v1082_v32, %v1007_v29  ;;  %v1084_v38 = vadd.f32 %v726_v36, %v522_v27 }
 0x10b   : > { %v755_v39 = vmax.f32 %v751_v34, 0.0  ;;  %v752_v40 = vadd.f32 %v1083_v35, %v1007_v29 }
 0x10c   : > { %v753_v41 = vmax.f32 %v749_v37, 0.0  ;;  %v750_v42 = vadd.f32 %v1084_v38, %v1007_v29 }
 0x10d   : > { %v1016_v43 = vpack.c.bf16 %v755_v39, %v755_v39  ;;  %v756_v44 = vmax.f32 %v752_v40, 0.0 }
 0x10e   : > { %v1014_v45 = vpack.c.bf16 %v753_v41, %v753_v41  ;;  %v754_v46 = vmax.f32 %v750_v42, 0.0 }
 0x10f   : > { %776 = vst.msk [vmem:[%s407_s9 + $0x8] sm:$0xf] %vm773_vm2, %v1016_v43  ;;  %v1017_v47 = vpack.c.bf16 %v756_v44, %v756_v44 }
 0x110   : > { %774 = vst.msk [vmem:[%s407_s9] sm:$0xf] %vm773_vm2, %v1014_v45  ;;  %v1015_v48 = vpack.c.bf16 %v754_v46, %v754_v46 }
 0x111   : > { %777 = vst.msk [vmem:[%s407_s9 + $0xc] sm:$0xf] %vm773_vm2, %v1017_v47 }
 0x112   : > { %775 = vst.msk [vmem:[%s407_s9 + $0x4] sm:$0xf] %vm773_vm2, %v1015_v48 }
 0x113 PF: > { %s15_s24 = sadd.s32 1, %s1224_s24   ;;  %s1434_s18 = smov %s1212_s21 }
 0x114   : > { %p12_p12 = scmp.ge.s32.totalorder %s15_s24, 18   ;;  %s1435_s19 = smov %s1216_s22 }
 0x115   : > { %s1436_s20 = smov %s1220_s23  ;;  %s1437_s21 = smov %s1441_s25 }
 0x116   : > { %s1438_s22 = smov %s1445_s26  ;;  %s1439_s23 = smov %s1449_s27 }
 0x117   :  { %14 = sbr.rel (!%p12_p12) target bundleno = 4 (0x4), region = 78 }

// kernel: unet3d_forward.23
= control target key start
LH: loop header
LB: loop body
LE: loop exit
PB: predicated region body
PF: predicated region fallthrough
CT: control target
= control target key end

     0   :  { %s582_s6 = smov 0   ;;  %s584_s7 = smov 0   ;;  %s731_s0 = inlined_call_operand.vmem [shape: bf16[8,64,8], index: 0, kind: input, shape index: {}]   ;;  %s732_s1 = inlined_call_operand.vmem [shape: bf16[64,8], index: 1, kind: output, shape index: {}]  }
   0x1   :  { %s586_s8 = smov 0  }
   0x2 LB: > { %s510_s9 = sadd.s32 4294967295, %s570_s8   ;;  %s599_s10 = sadd.s32 1, %s570_s8   ;;  %s570_s8 = sphi %s586_s8, %s735_s8   ;;  %s566_s7 = sphi %s584_s7, %s734_s7   ;;  %s562_s6 = sphi %s582_s6, %s733_s6  }
   0x3   : > { %s15_s11 = ssub.s32 %s570_s8, %s599_s10  ;;  %s18_s12 = sadd.s32 1, %s566_s7 }
   0x4   : > { %p16_p0 = scmp.eq.s32.totalorder %s15_s11, 0  ;;  %p25_p1 = scmp.ne.s32.totalorder %s566_s7, %s562_s6 }
   0x5   : > { %p26_p2 = scmp.eq.s32.totalorder %s570_s8, 0  ;;  %p513_p4 = scmp.ge.s32.totalorder %s570_s8, 2 }
   0x6   : > { %s608_s13 = scalar_select %p16_p0, %s566_s7, %s18_s12  }
   0x7   : > { %p27_p3 = por %p26_p2, %p25_p1  ;;  %77 = sbr.rel (%p513_p4) target bundleno = 26 (0x1a), region = 16 }
   0xe   : > { %80 = sbr.rel (!%p27_p3) target bundleno = 26 (0x1a), region = 20  ;;  %s82_s14 = sand.u32 (%p27_p3), 1, %s566_s7  }
   0xf   : > { %s523_s15 = sshll.u32 (%p27_p3), %s570_s8, 4  ;;  %s514_s16 = sshll.u32 (%p27_p3), %s82_s14, 7 }
  0x10   : > { %s616_s19 = scalar_lea.vmem (%p27_p3), %s731_s0, %s523_s15  ;;  %s84_s20 = scalar_lea.vmem (%p27_p3), [#allocation2], %s514_s16 }
  0x11   : > { %v103_v0 = vld [vmem:[%s616_s19] sm:$0xff] (%p27_p3)   ;;  %v107_v1 = vld [vmem:[%s616_s19 + $0x8] sm:$0xff] (%p27_p3)  }
  0x12   : > { %v111_v2 = vld [vmem:[%s616_s19 + $0x20] sm:$0xff] (%p27_p3)   ;;  %104 = vst [vmem:[%s84_s20] sm:$0xff] (%p27_p3), %v103_v0   ;;  %108 = vst [vmem:[%s84_s20 + $0x8] sm:$0xff] (%p27_p3), %v107_v1   ;;  %v115_v3 = vld [vmem:[%s616_s19 + $0x28] sm:$0xff] (%p27_p3)  }
  0x13   : > { %112 = vst [vmem:[%s84_s20 + $0x10] sm:$0xff] (%p27_p3), %v111_v2   ;;  %v119_v4 = vld [vmem:[%s616_s19 + $0x40] sm:$0xff] (%p27_p3)   ;;  %v123_v5 = vld [vmem:[%s616_s19 + $0x48] sm:$0xff] (%p27_p3)   ;;  %116 = vst [vmem:[%s84_s20 + $0x18] sm:$0xff] (%p27_p3), %v115_v3  }
  0x14   : > { %120 = vst [vmem:[%s84_s20 + $0x20] sm:$0xff] (%p27_p3), %v119_v4   ;;  %124 = vst [vmem:[%s84_s20 + $0x28] sm:$0xff] (%p27_p3), %v123_v5   ;;  %v127_v6 = vld [vmem:[%s616_s19 + $0x60] sm:$0xff] (%p27_p3)   ;;  %v131_v7 = vld [vmem:[%s616_s19 + $0x68] sm:$0xff] (%p27_p3)  }
  0x15   : > { %v135_v8 = vld [vmem:[%s616_s19 + $0x80] sm:$0xff]   ;;  %128 = vst [vmem:[%s84_s20 + $0x30] sm:$0xff] %v127_v6   ;;  %132 = vst [vmem:[%s84_s20 + $0x38] sm:$0xff] %v131_v7   ;;  %v139_v9 = vld [vmem:[%s616_s19 + $0x88] sm:$0xff]  }
  0x16   : > { %136 = vst [vmem:[%s84_s20 + $0x40] sm:$0xff] %v135_v8   ;;  %v143_v10 = vld [vmem:[%s616_s19 + $0xa0] sm:$0xff]   ;;  %v147_v11 = vld [vmem:[%s616_s19 + $0xa8] sm:$0xff]   ;;  %140 = vst [vmem:[%s84_s20 + $0x48] sm:$0xff] %v139_v9  }
  0x17   : > { %144 = vst [vmem:[%s84_s20 + $0x50] sm:$0xff] %v143_v10   ;;  %148 = vst [vmem:[%s84_s20 + $0x58] sm:$0xff] %v147_v11   ;;  %v151_v12 = vld [vmem:[%s616_s19 + $0xc0] sm:$0xff]   ;;  %v155_v13 = vld [vmem:[%s616_s19 + $0xc8] sm:$0xff]  }
  0x18   : > { %v159_v14 = vld [vmem:[%s616_s19 + $0xe0] sm:$0xff]   ;;  %152 = vst [vmem:[%s84_s20 + $0x60] sm:$0xff] %v151_v12   ;;  %156 = vst [vmem:[%s84_s20 + $0x68] sm:$0xff] %v155_v13   ;;  %v163_v15 = vld [vmem:[%s616_s19 + $0xe8] sm:$0xff]  }
  0x19   : > { %160 = vst [vmem:[%s84_s20 + $0x70] sm:$0xff] %v159_v14   ;;  %164 = vst [vmem:[%s84_s20 + $0x78] sm:$0xff] %v163_v15  }
  0x1a PF: > { %p517_p5 = scmp.ge.s32.totalorder %s570_s8, 1  ;;  %p252_p6 = scmp.lt.s32.totalorder %s570_s8, 3 }
  0x1c   : > { %p253_p7 = pnand %p517_p5, %p252_p6 }
  0x1d   : > { %s259_s21 = sand.u32 (!%p253_p7), 1, %s562_s6   ;;  %s519_s23 = sshll.u32 (!%p253_p7), %s510_s9, 2  ;;  %vm318_vm0 = vcmask (!%p253_p7), 60416  }
  0x1e   : > { %256 = sbr.rel (%p253_p7) target bundleno = 65 (0x41), region = 61  ;;  %s518_s22 = sshll.u32 (!%p253_p7), %s259_s21, 7 }
  0x1f   : > { %s639_s24 = scalar_lea.vmem (!%p253_p7), [#allocation2], %s518_s22  ;;  %p280_p8 = scmp.lt.s32.totalorder (!%p253_p7), %s519_s23, 7 }
  0x20   : > { %v286_v16 = vld [vmem:[%s639_s24] sm:$0xf] (!%p253_p7)  ;;  %v290_v17 = vld [vmem:[%s639_s24 + $0x10] sm:$0xf] (!%p253_p7)  ;;  %v287_v28 = vld [vmem:[%s639_s24 + $0x4] sm:$0xf] (!%p253_p7) }
  0x21   : > { %v294_v18 = vld [vmem:[%s639_s24 + $0x20] sm:$0xf] (!%p253_p7)  ;;  %v298_v19 = vld [vmem:[%s639_s24 + $0x30] sm:$0xf] (!%p253_p7)  ;;  %v321_v20 = vsel (!%p253_p7), %vm318_vm0, %v286_v16, 4286644096 }
  0x22   : > { %v324_v21 = vsel (!%p253_p7), %vm318_vm0, %v290_v17, 4286644096  ;;  %v302_v22 = vld [vmem:[%s639_s24 + $0x40] sm:$0xf] (!%p253_p7)  ;;  %v328_v24 = vsel (!%p253_p7), %vm318_vm0, %v294_v18, 4286644096 }
  0x23   : > { %v326_v23 = vmax.bf16 (!%p253_p7), %v324_v21, %v321_v20  ;;  %v306_v25 = vld [vmem:[%s639_s24 + $0x50] sm:$0xf] (!%p253_p7)  ;;  %v332_v26 = vsel (!%p253_p7), %vm318_vm0, %v298_v19, 4286644096  ;;  %v291_v29 = vld [vmem:[%s639_s24 + $0x14] sm:$0xf] (!%p253_p7) }
  0x24   : > { %v295_v30 = vld [vmem:[%s639_s24 + $0x24] sm:$0xf] (!%p253_p7)  ;;  %v310_v31 = vld [vmem:[%s639_s24 + $0x60] sm:$0xf] (!%p253_p7)  ;;  %v336_v32 = vsel (!%p253_p7), %vm318_vm0, %v302_v22, 4286644096 }
  0x25   : > { %s737_s23 = smov (!%p280_p8, %s519_s23), 7  ;;  %v330_v27 = vmax.bf16 %v328_v24, %v326_v23  ;;  %v314_v33 = vld [vmem:[%s639_s24 + $0x70] sm:$0xf]  ;;  %v299_v35 = vld [vmem:[%s639_s24 + $0x34] sm:$0xf] }
  0x26   : > { %v352_v36 = vsel %vm318_vm0, %v287_v28, 4286644096  ;;  %v340_v37 = vsel %vm318_vm0, %v306_v25, 4286644096  ;;  %v355_v38 = vsel %vm318_vm0, %v291_v29, 4286644096 }
  0x27   : > { %v334_v34 = vmax.bf16 %v332_v26, %v330_v27  ;;  %v359_v39 = vsel %vm318_vm0, %v295_v30, 4286644096  ;;  %s520_s25 = sshll.u32 %s737_s23, 2  ;;  %v344_v41 = vsel %vm318_vm0, %v310_v31, 4286644096  ;;  %v357_v43 = vmax.bf16 %v355_v38, %v352_v36 }
  0x28   : > { %v303_v42 = vld [vmem:[%s639_s24 + $0x44] sm:$0xf]  ;;  %v363_v44 = vsel %vm318_vm0, %v299_v35, 4286644096  ;;  %v288_v45 = vld [vmem:[%s639_s24 + $0x8] sm:$0xf]  ;;  %s682_s28 = scalar_lea.vmem %s732_s1, %s520_s25 }
  0x29   : > { %v338_v40 = vmax.bf16 %v336_v32, %v334_v34  ;;  %v292_v46 = vld [vmem:[%s639_s24 + $0x18] sm:$0xf]  ;;  %v348_v48 = vsel %vm318_vm0, %v314_v33, 4286644096  ;;  %v307_v49 = vld [vmem:[%s639_s24 + $0x54] sm:$0xf]  ;;  %v361_v50 = vmax.bf16 %v359_v39, %v357_v43 }
  0x2a   : > { %v296_v51 = vld [vmem:[%s639_s24 + $0x28] sm:$0xf]  ;;  %v311_v52 = vld [vmem:[%s639_s24 + $0x64] sm:$0xf]  ;;  %v367_v53 = vsel %vm318_vm0, %v303_v42, 4286644096 }
  0x2b   : > { %v342_v47 = vmax.bf16 %v340_v37, %v338_v40  ;;  %v300_v54 = vld [vmem:[%s639_s24 + $0x38] sm:$0xf]  ;;  %v315_v56 = vld [vmem:[%s639_s24 + $0x74] sm:$0xf]  ;;  %v365_v57 = vmax.bf16 %v363_v44, %v361_v50  ;;  %v383_v58 = vsel %vm318_vm0, %v288_v45, 4286644096 }
  0x2c   : > { %v386_v59 = vsel %vm318_vm0, %v292_v46, 4286644096  ;;  %v371_v60 = vsel %vm318_vm0, %v307_v49, 4286644096  ;;  %v304_v61 = vld [vmem:[%s639_s24 + $0x48] sm:$0xf] }
  0x2d   : > { %v346_v55 = vmax.bf16 %v344_v41, %v342_v47  ;;  %v388_v62 = vmax.bf16 %v386_v59, %v383_v58  ;;  %v390_v63 = vsel %vm318_vm0, %v296_v51, 4286644096  ;;  %v369_v1 = vmax.bf16 %v367_v53, %v365_v57  ;;  %v289_v3 = vld [vmem:[%s639_s24 + $0xc] sm:$0xf]  ;;  %v293_v4 = vld [vmem:[%s639_s24 + $0x1c] sm:$0xf] }
  0x2e   : > { %v394_v2 = vsel %vm318_vm0, %v300_v54, 4286644096  ;;  %v375_v5 = vsel %vm318_vm0, %v311_v52, 4286644096  ;;  %v308_v6 = vld [vmem:[%s639_s24 + $0x58] sm:$0xf] }
  0x2f   : > { %v350_v0 = vmax.bf16 %v348_v48, %v346_v55  ;;  %v392_v7 = vmax.bf16 %v390_v63, %v388_v62  ;;  %v297_v8 = vld [vmem:[%s639_s24 + $0x2c] sm:$0xf]  ;;  %v373_v9 = vmax.bf16 %v371_v60, %v369_v1  ;;  %v379_v10 = vsel %vm318_vm0, %v315_v56, 4286644096  ;;  %v301_v12 = vld [vmem:[%s639_s24 + $0x3c] sm:$0xf] }
  0x30   : > { %v398_v11 = vsel %vm318_vm0, %v304_v61, 4286644096  ;;  %v312_v13 = vld [vmem:[%s639_s24 + $0x68] sm:$0xf]  ;;  %v414_v15 = vsel %vm318_vm0, %v289_v3, 4286644096 }
  0x31   : > { %444 = vst.msk [vmem:[%s682_s28] sm:$0xf] %vm318_vm0, %v350_v0  ;;  %v396_v14 = vmax.bf16 %v394_v2, %v392_v7  ;;  %v417_v16 = vsel %vm318_vm0, %v293_v4, 4286644096  ;;  %v377_v17 = vmax.bf16 %v375_v5, %v373_v9  ;;  %v402_v18 = vsel %vm318_vm0, %v308_v6, 4286644096 }
  0x32   : > { %v305_v19 = vld [vmem:[%s639_s24 + $0x4c] sm:$0xf]  ;;  %v419_v20 = vmax.bf16 %v417_v16, %v414_v15  ;;  %v421_v21 = vsel %vm318_vm0, %v297_v8, 4286644096  ;;  %v316_v22 = vld [vmem:[%s639_s24 + $0x78] sm:$0xf] }
  0x33   : > { %v400_v23 = vmax.bf16 %v398_v11, %v396_v14  ;;  %v425_v24 = vsel %vm318_vm0, %v301_v12, 4286644096  ;;  %v381_v25 = vmax.bf16 %v379_v10, %v377_v17  ;;  %v406_v26 = vsel %vm318_vm0, %v312_v13, 4286644096  ;;  %v309_v27 = vld [vmem:[%s639_s24 + $0x5c] sm:$0xf] }
  0x34   : > { %v423_v28 = vmax.bf16 %v421_v21, %v419_v20  ;;  %v429_v30 = vsel %vm318_vm0, %v305_v19, 4286644096  ;;  %v410_v31 = vsel %vm318_vm0, %v316_v22, 4286644096  ;;  %v313_v32 = vld [vmem:[%s639_s24 + $0x6c] sm:$0xf] }
  0x35   : > { %v404_v29 = vmax.bf16 %v402_v18, %v400_v23  ;;  %445 = vst.msk [vmem:[%s682_s28 + $0x4] sm:$0xf] %vm318_vm0, %v381_v25  ;;  %v433_v35 = vsel %vm318_vm0, %v309_v27, 4286644096  ;;  %v317_v36 = vld [vmem:[%s639_s24 + $0x7c] sm:$0xf] }
  0x36   : > { %v427_v33 = vmax.bf16 %v425_v24, %v423_v28  ;;  %v437_v39 = vsel %vm318_vm0, %v313_v32, 4286644096  ;;  %v441_v41 = vsel %vm318_vm0, %v317_v36, 4286644096 }
  0x37   : > { %v408_v34 = vmax.bf16 %v406_v26, %v404_v29 }
  0x38   : > { %v431_v37 = vmax.bf16 %v429_v30, %v427_v33 }
  0x39   : > { %v412_v38 = vmax.bf16 %v410_v31, %v408_v34 }
  0x3a   : > { %v435_v40 = vmax.bf16 %v433_v35, %v431_v37 }
  0x3b   : > { %446 = vst.msk [vmem:[%s682_s28 + $0x8] sm:$0xf] %vm318_vm0, %v412_v38 }
  0x3c   : > { %v439_v42 = vmax.bf16 %v437_v39, %v435_v40 }
  0x3e   : > { %v443_v43 = vmax.bf16 %v441_v41, %v439_v42 }
  0x40   : > { %447 = vst.msk [vmem:[%s682_s28 + $0xc] sm:$0xf] %vm318_vm0, %v443_v43 }
  0x41 PF: > { %p8_p9 = scmp.ge.s32.totalorder %s599_s10, 4   ;;  %s733_s6 = smov %s566_s7 }
  0x42   : > { %s734_s7 = smov %s608_s13  ;;  %s735_s8 = smov %s599_s10 }
  0x43   :  { %10 = sbr.rel (!%p8_p9) target bundleno = 2 (0x2), region = 100 }

// kernel: unet3d_forward.24
= control target key start
LH: loop header
LB: loop body
LE: loop exit
PB: predicated region body
PF: predicated region fallthrough
CT: control target
= control target key end

     0   :  { %s1097_s18 = smov 0   ;;  %s1099_s19 = smov 0   ;;  %s1278_s0 = inlined_call_operand.vmem [shape: bf16[2,4,16,72], index: 0, kind: input, shape index: {}, may-alias: {0,1,2}]   ;;  %s1279_s1 = inlined_call_operand.vmem [shape: bf16[2,4,16,72], index: 1, kind: input, shape index: {}, may-alias: {0,1,2}]   ;;  %s1280_s2 = inlined_call_operand.vmem [shape: bf16[2,4,16,72], index: 2, kind: input, shape index: {}, may-alias: {0,1,2}]   ;;  %s1281_s3 = inlined_call_operand.vmem [shape: bf16[3,72,16], index: 3, kind: input, shape index: {}]   ;;  %s1282_s4 = inlined_call_operand.vmem [shape: f32[1,16], index: 4, kind: input, shape index: {}]   ;;  %s1283_s5 = inlined_call_operand.vmem [shape: bf16[2,2,16,16], index: 5, kind: output, shape index: {}]  }
   0x1   :  { %s1101_s20 = smov 0   ;;  %s1103_s21 = smov 0  }
   0x2   :  { %s1105_s22 = smov 0   ;;  %s1107_s23 = smov 0  }
   0x3   :  { %s1109_s24 = smov 0  }
   0x4 LB: > { %s27_s25 = sadd.s32 1, %s1051_s21  ;;  %s30_s26 = sadd.s32 1, %s1055_s22  ;;  %s1063_s24 = sphi %s1109_s24, %s15_s24   ;;  %s1059_s23 = sphi %s1107_s23, %s1291_s23   ;;  %s1055_s22 = sphi %s1105_s22, %s1290_s22   ;;  %s1051_s21 = sphi %s1103_s21, %s1289_s21   ;;  %s1047_s20 = sphi %s1101_s20, %s1288_s20   ;;  %s1043_s19 = sphi %s1099_s19, %s1287_s19   ;;  %s1039_s18 = sphi %s1097_s18, %s1286_s18  }
   0x5   : > { %p28_p0 = scmp.ge.s32.totalorder %s27_s25, 2  ;;  %p824_p1 = scmp.ge.s32.totalorder %s1063_s24, 1 }
   0x6   : > { %p271_p2 = scmp.lt.s32.totalorder %s1063_s24, 9  ;;  %s34_s27 = sadd.s32 1, %s1059_s23 }
   0x7   : > { %s1293_s25 = smov (%p28_p0, %s27_s25), 0  ;;  %s1295_s26 = smov (!%p28_p0, %s30_s26), %s1055_s22 }
   0x8   : > { %p272_p3 = pnand %p824_p1, %p271_p2  ;;  %p32_p4 = scmp.ge.s32.totalorder %s1295_s26, 2 }
   0x9   : > { %v994_v0 = vld [vmem:[%s1281_s3 + $0x24] sm:$0xff] (!%p272_p3)   ;;  %v1065_v1 = vmov (!%p272_p3), 0.0   ;;  %v996_v3 = vld [vmem:[%s1281_s3 + $0x2c] sm:$0xff] (!%p272_p3)   ;;  %p339_p6 = scmp.lt.s32.totalorder (!%p272_p3), %s1047_s20, 1  ;;  %vm1066_vm0 = vmmov (!%p272_p3), 0   ;;  %p343_p7 = scmp.lt.s32.totalorder (!%p272_p3), %s1039_s18, 1 }
   0xa   : > { %s1297_s26 = smov (%p32_p4, %s1295_s26), 0  ;;  %s1299_s27 = smov (!%p32_p4, %s34_s27), %s1059_s23 }
   0xb   : > { %p36_p5 = scmp.ge.s32.totalorder %s1299_s27, 2  ;;  %275 = sbr.rel (%p272_p3) target bundleno = 272 (0x110), region = 40  ;;  %894 = vmatprep.subr.bf16.mxu0 (!%p272_p3), %v1065_v1  ;;  %908 = vmatprep.subr.bf16.mxu1 (!%p272_p3), %v1065_v1  ;;  %v995_v2 = vld [vmem:[%s1281_s3] sm:$0xff] (!%p272_p3)   ;;  %v997_v4 = vld [vmem:[%s1281_s3 + $0x8] sm:$0xff] (!%p272_p3)   ;;  %v998_v5 = vld [vmem:[%s1281_s3 + $0x34] sm:$0xff] (!%p272_p3)   ;;  %vm444_vm1 = vcmask (!%p272_p3), 1043456  }
   0xc   : > { %895 = vmatpush3.bf16.msra.mxu0 (!%p272_p3), %v994_v0  ;;  %909 = vmatpush3.bf16.msra.mxu1 (!%p272_p3), %v995_v2  ;;  %v999_v6 = vld [vmem:[%s1281_s3 + $0x10] sm:$0xff] (!%p272_p3)   ;;  %v1000_v7 = vld [vmem:[%s1281_s3 + $0x3c] sm:$0xff] (!%p272_p3)   ;;  %s351_s30 = sadd.s32 (!%p272_p3), 1, %s1043_s19  ;;  %v1002_v9 = vld [vmem:[%s1281_s3 + $0x44] ss:$0 sps:$4 sm:$0xff] (!%p272_p3)   ;;  %p341_p9 = scmp.lt.s32.totalorder (!%p272_p3), %s1043_s19, 3 }
   0xd   : > { %s1301_s27 = smov (%p36_p5, %s1299_s27), 0  ;;  %896 = vmatprep.subr.bf16.mxu0 (!%p272_p3), %v1065_v1  ;;  %910 = vmatprep.subr.bf16.mxu1 (!%p272_p3), %v1065_v1  ;;  %v1001_v8 = vld [vmem:[%s1281_s3 + $0x18] sm:$0xff] (!%p272_p3)   ;;  %p354_p8 = scmp.lt.s32.totalorder (!%p272_p3), %s351_s30, 3  ;;  %v1003_v10 = vld [vmem:[%s1281_s3 + $0x20] ss:$0 sps:$4 sm:$0xff] (!%p272_p3)   ;;  %v446_v11 = vsel (!%p272_p3), %vm444_vm1, %v1002_v9, 0 }
   0xe   : > { %1284 = sst [smem:[#allocation2_spill]] %s1301_s27  ;;  %904 = vmatprep.mubr.msk.bf16.mxu0 (!%p272_p3), %vm1066_vm0, %v1065_v1  ;;  %918 = vmatprep.mubr.msk.bf16.mxu1 (!%p272_p3), %vm1066_vm0, %v1065_v1  ;;  %s365_s12 = sadd.s32 (!%p272_p3), 2, %s1043_s19  ;;  %v519_v12 = vsel (!%p272_p3), %vm444_vm1, %v1003_v10, 0  ;;  %vm440_vm2 = vcmask (!%p272_p3), 588800   ;;  %v1004_v13 = vld [vmem:[%s1281_s3 + $0x48] sm:$0xff] (!%p272_p3)   ;;  %v1005_v16 = vld [vmem:[%s1281_s3 + $0x50] sm:$0xff] (!%p272_p3)  }
   0xf   : > { %p368_p10 = scmp.lt.s32.totalorder (!%p272_p3), %s365_s12, 3  ;;  %v1006_v17 = vld [vmem:[%s1281_s3 + $0x58] sm:$0xff] (!%p272_p3)   ;;  %v1007_v18 = vld [vmem:[%s1281_s3 + $0x60] sm:$0xff] (!%p272_p3)   ;;  %v1008_v19 = vld [vmem:[%s1281_s3 + $0x68] ss:$0 sps:$4 sm:$0xff] (!%p272_p3)   ;;  %p381_p11 = scmp.lt.s32.totalorder (!%p272_p3), %s1043_s19, 1 }
  0x10   : > { %897 = vmatpush3.bf16.msra.mxu0 (!%p272_p3), %v996_v3  ;;  %911 = vmatpush3.bf16.msra.mxu1 (!%p272_p3), %v997_v4  ;;  %v603_v20 = vsel (!%p272_p3), %vm444_vm1, %v1008_v19, 0  ;;  %v873_v32 = vld [vmem:[%s1282_s4] ss:$0 sm:$0xff] (!%p272_p3)  ;;  %vm656_vm3 = vcmask (!%p272_p3), 125952  }
  0x11   : > { %898 = vmatprep.subr.bf16.mxu0 (!%p272_p3), %v1065_v1  ;;  %912 = vmatprep.subr.bf16.mxu1 (!%p272_p3), %v1065_v1 }
  0x12   : > { %s1303_s20 = smov (!%p339_p6, %s1047_s20), 1  ;;  %s1305_s18 = smov (!%p343_p7, %s1039_s18), 1 }
  0x13   : > { %s1188_s29 = sshll.u32 %s1303_s20, 3  ;;  %s1307_s30 = smov (!%p354_p8, %s351_s30), 3 }
  0x14   : > { %899 = vmatpush3.bf16.msra.mxu0 %v998_v5  ;;  %913 = vmatpush3.bf16.msra.mxu1 %v999_v6  ;;  %s342_s10 = scalar_select %p341_p9, %s1043_s19, 3 }
  0x15   : > { %900 = vmatprep.subr.bf16.mxu0 %v1065_v1  ;;  %914 = vmatprep.subr.bf16.mxu1 %v1065_v1  ;;  %s828_s11 = sshll.u32 %s1307_s30, 1  ;;  %s1309_s12 = smov (!%p368_p10, %s365_s12), 3 }
  0x16   : > { %s359_s13 = sadd.s32 %s828_s11, %s1305_s18  ;;  %s825_s14 = sshll.u32 %s342_s10, 1 }
  0x17   : > { %s361_s15 = sadd.s32 %s1188_s29, %s359_s13  ;;  %s346_s16 = sadd.s32 %s825_s14, %s1305_s18 }
  0x18   : > { %901 = vmatpush3.bf16.msra.mxu0 %v1000_v7  ;;  %915 = vmatpush3.bf16.msra.mxu1 %v1001_v8  ;;  %s830_s17 = sshll.u32 %s361_s15, 2  ;;  %s348_s28 = sadd.s32 %s1188_s29, %s346_s16 }
  0x19   : > { %902 = vmatprep.subr.bf16.mxu0 %v1065_v1  ;;  %916 = vmatprep.subr.bf16.mxu1 %v1065_v1  ;;  %s363_s30 = scalar_lea.vmem %s1279_s1, %s830_s17  ;;  %s827_s8 = sshll.u32 %s348_s28, 2 }
  0x1a   : > { %v402_v14 = vld [vmem:[%s363_s30] sm:$0xf]  ;;  %s350_s13 = scalar_lea.vmem %s1278_s0, %s827_s8  ;;  %s831_s15 = sshll.u32 %s1309_s12, 1 }
  0x1b   : > { %v392_v15 = vld [vmem:[%s350_s13] sm:$0xf]  ;;  %s373_s28 = sadd.s32 %s831_s15, %s1305_s18  ;;  %s1311_s19 = smov (!%p381_p11, %s1043_s19), 1 }
  0x1c   : > { %903 = vmatpush3.bf16.msra.mxu0 %v446_v11  ;;  %917 = vmatpush3.bf16.msra.mxu1 %v519_v12  ;;  %s375_s6 = sadd.s32 %s1188_s29, %s373_s28  ;;  %s834_s13 = sshll.u32 %s1311_s19, 1 }
  0x1d   : > { %922 = vmatprep.subr.bf16.mxu0 %v1065_v1  ;;  %s833_s12 = sshll.u32 %s375_s6, 2  ;;  %s835_s27 = sshll.u32 %s1303_s20, 2 }
  0x1e   : > { %s377_s11 = scalar_lea.vmem %s1280_s2, %s833_s12  ;;  %s386_s14 = sadd.s32 %s834_s13, %s1305_s18 }
  0x1f   : > { %905 = vmatmul.mubr.msk.bf16.vlgmr.msra.gmra.mrb[0].mxu0 %vm440_vm2, %v402_v14  ;;  %919 = vmatmul.mubr.msk.bf16.vlgmr.msra.gmra.mrb[0].mxu1 %vm440_vm2, %v392_v15  ;;  %v561_v21 = vld [vmem:[%s377_s11] sm:$0xf]  ;;  %s388_s15 = sadd.s32 %s835_s27, %s386_s14 }
  0x20   : > { %923 = vmatpush3.bf16.msra.mxu0 %v1004_v13  ;;  %932 = vmatprep.mubr.msk.bf16.mxu0 %vm1066_vm0, %v1065_v1  ;;  %s836_s28 = sshll.u32 %s388_s15, 2 }
  0x21   : > { %924 = vmatprep.subr.bf16.mxu0 %v1065_v1  ;;  %s390_s30 = scalar_lea.vmem %s1283_s5, %s836_s28 }
  0x24   : > { %925 = vmatpush3.bf16.msra.mxu0 %v1005_v16 }
  0x25   : > { %926 = vmatprep.subr.bf16.mxu0 %v1065_v1 }
  0x28   : > { %927 = vmatpush3.bf16.msra.mxu0 %v1006_v17 }
  0x29   : > { %928 = vmatprep.subr.bf16.mxu0 %v1065_v1 }
  0x2c   : > { %929 = vmatpush3.bf16.msra.mxu0 %v1007_v18 }
  0x2d   : > { %930 = vmatprep.subr.bf16.mxu0 %v1065_v1 }
  0x30   : > { %931 = vmatpush3.bf16.msra.mxu0 %v603_v20 }
  0x33   : > { %933 = vmatmul.mubr.msk.bf16.vlgmr.msra.gmra.mrb[4].mxu0 %vm440_vm2, %v561_v21 }
  0xf2   : > { %v482_v22 = vpop.f32.mrb[0].mxu0  ;;  %v555_v24 = vpop.f32.mrb[0].mxu1 }
  0xf3   : > { %v906_v23 = vpop.f32.mrb[1].mxu0  ;;  %v556_v25 = vadd.f32 %v555_v24, %v482_v22  ;;  %v920_v27 = vpop.f32.mrb[1].mxu1 }
  0xf4   : > { %v485_v26 = vpop.f32.mrb[2].mxu0  ;;  %v558_v29 = vpop.f32.mrb[2].mxu1 }
  0xf5   : > { %v907_v28 = vpop.f32.mrb[3].mxu0  ;;  %v921_v30 = vpop.f32.mrb[3].mxu1 }
 0x106   : > { %v639_v31 = vpop.f32.mrb[4].mxu0 }
 0x107   : > { %v645_v33 = vadd.f32 %v639_v31, %v556_v25  ;;  %v934_v34 = vpop.f32.mrb[5].mxu0 }
 0x108   : > { %v642_v35 = vpop.f32.mrb[6].mxu0 }
 0x109   : > { %v653_v36 = vadd.f32 %v873_v32, %v645_v33  ;;  %v935_v37 = vpop.f32.mrb[7].mxu0 }
 0x10b   : > { %v654_v38 = vmax.f32 %v653_v36, 0.0 }
 0x10d   : > { %v655_v39 = vpack.c.bf16 %v654_v38, %v654_v38 }
 0x10f   : > { %657 = vst.msk [vmem:[%s390_s30] sm:$0xf] %vm656_vm3, %v655_v39 }
 0x110 PF: > { %s15_s24 = sadd.s32 1, %s1063_s24   ;;  %s1285_s8 = sld [smem:[#allocation2_spill]] }
 0x111   : > { %p12_p12 = scmp.ge.s32.totalorder %s15_s24, 10   ;;  %s1286_s18 = smov %s1051_s21 }
 0x112   : > { %s1287_s19 = smov %s1055_s22  ;;  %s1288_s20 = smov %s1059_s23 }
 0x113   : > { %s1289_s21 = smov %s1293_s25  ;;  %s1290_s22 = smov %s1297_s26 }
 0x114   :  { %14 = sbr.rel (!%p12_p12) target bundleno = 4 (0x4), region = 78 }
 0x116   : > { %s1291_s23 = smov %s1285_s8 }

// kernel: unet3d_forward.26
= control target key start
LH: loop header
LB: loop body
LE: loop exit
PB: predicated region body
PF: predicated region fallthrough
CT: control target
= control target key end

     0   :  { %s410_s12 = smov 0   ;;  %s433_s0 = inlined_call_operand.vmem [shape: bf16[64,16], index: 0, kind: input, shape index: {}]   ;;  %s434_s1 = inlined_call_operand.vmem [shape: bf16[16,64], index: 1, kind: input, shape index: {}]   ;;  %s435_s2 = inlined_call_operand.vmem [shape: f32[1,64], index: 2, kind: input, shape index: {}]   ;;  %s436_s3 = inlined_call_operand.vmem [shape: bf16[64,64], index: 3, kind: output, shape index: {}]  }
   0x1 LB: > { %s337_s13 = sadd.s32 4294967295, %s388_s12   ;;  %p341_p0 = scmp.ge.s32.totalorder %s388_s12, 1  ;;  %s388_s12 = sphi %s410_s12, %s13_s12  }
   0x2   : > { %p138_p1 = scmp.lt.s32.totalorder %s388_s12, 3 }
   0x4   : > { %p139_p2 = pnand %p341_p0, %p138_p1 }
   0x5   : > { %v379_v0 = vld [vmem:[%s434_s1] sm:$0xff] (!%p139_p2)   ;;  %s342_s16 = sshll.u32 (!%p139_p2), %s337_s13, 2  ;;  %vm204_vm0 = vcmask (!%p139_p2), 130048   ;;  %vm276_vm1 = vcmask (!%p139_p2), 519168  }
   0x6   : > { %142 = sbr.rel (%p139_p2) target bundleno = 238 (0xee), region = 32  ;;  %p163_p3 = scmp.lt.s32.totalorder (!%p139_p2), %s342_s16, 7  ;;  %365 = vmatprep.subr.bf16.mxu0 (!%p139_p2), %v379_v0  ;;  %v346_v3 = vld [vmem:[%s435_s2] ss:$0 sm:$0xff] (!%p139_p2) }
   0x7   : > { %366 = vmatpush3.bf16.msra.mxu0 (!%p139_p2), %v379_v0 }
   0xd   : > { %s438_s16 = smov (!%p163_p3, %s342_s16), 7 }
   0xe   : > { %s343_s17 = sshll.u32 %s438_s16, 2 }
   0xf   : > { %s166_s20 = scalar_lea.vmem %s433_s0, %s343_s17  ;;  %s172_s25 = scalar_lea.vmem %s436_s3, %s343_s17 }
  0x10   : > { %v380_v1 = vld [vmem:[%s166_s20] sm:$0xff]   ;;  %v381_v2 = vld [vmem:[%s166_s20 + $0x8] sm:$0xff]  }
  0x11   : > { %367 = vmatprep.mubr.msk.bf16.mxu0 %vm204_vm0, %v380_v1 }
  0x12   : > { %368 = vmatmul.mubr.msk.bf16.vlgmr.msra.gmra.mrb[0].mxu0 %vm204_vm0, %v381_v2 }
  0xe5   : > { %v369_v4 = vpop.f32.mrb[0].mxu0 }
  0xe6   : > { %v245_v5 = vpop.f32.mrb[1].mxu0  ;;  %v254_v8 = vadd.f32 %v369_v4, %v346_v3 }
  0xe7   : > { %v246_v6 = vadd.f32 %v346_v3, %v245_v5  ;;  %v370_v7 = vpop.f32.mrb[2].mxu0 }
  0xe8   : > { %v248_v9 = vpop.f32.mrb[3].mxu0  ;;  %v257_v11 = vadd.f32 %v370_v7, %v346_v3  ;;  %v360_v14 = vpack.c.bf16 %v254_v8, %v254_v8 }
  0xe9   : > { %v358_v10 = vpack.c.bf16 %v246_v6, %v246_v6  ;;  %v249_v12 = vadd.f32 %v346_v3, %v248_v9 }
  0xea   : > { %v361_v15 = vpack.c.bf16 %v257_v11, %v257_v11  ;;  %279 = vst.msk [vmem:[%s172_s25 + $0x8] sm:$0xf] %vm276_vm1, %v360_v14 }
  0xeb   : > { %277 = vst.msk [vmem:[%s172_s25] sm:$0xf] %vm276_vm1, %v358_v10  ;;  %v359_v13 = vpack.c.bf16 %v249_v12, %v249_v12 }
  0xec   : > { %280 = vst.msk [vmem:[%s172_s25 + $0xc] sm:$0xf] %vm276_vm1, %v361_v15 }
  0xed   : > { %278 = vst.msk [vmem:[%s172_s25 + $0x4] sm:$0xf] %vm276_vm1, %v359_v13 }
  0xee PF: > { %s13_s12 = sadd.s32 1, %s388_s12  }
  0xef   : > { %p10_p4 = scmp.ge.s32.totalorder %s13_s12, 4  }
  0xf1   :  { %12 = sbr.rel (!%p10_p4) target bundleno = 1 (0x1), region = 62 }

// kernel: unet3d_forward.25
= control target key start
LH: loop header
LB: loop body
LE: loop exit
PB: predicated region body
PF: predicated region fallthrough
CT: control target
= control target key end

     0   :  { %s1226_s18 = smov 0   ;;  %s1228_s19 = smov 0   ;;  %s1454_s0 = inlined_call_operand.vmem [shape: bf16[2,4,16,144], index: 0, kind: input, shape index: {}, may-alias: {0,1,2}]   ;;  %s1455_s1 = inlined_call_operand.vmem [shape: bf16[2,4,16,144], index: 1, kind: input, shape index: {}, may-alias: {0,1,2}]   ;;  %s1456_s2 = inlined_call_operand.vmem [shape: bf16[2,4,16,144], index: 2, kind: input, shape index: {}, may-alias: {0,1,2}]   ;;  %s1457_s3 = inlined_call_operand.vmem [shape: bf16[3,144,16], index: 3, kind: input, shape index: {}]   ;;  %s1458_s4 = inlined_call_operand.vmem [shape: f32[1,16], index: 4, kind: input, shape index: {}]   ;;  %s1459_s5 = inlined_call_operand.vmem [shape: bf16[2,2,16,16], index: 5, kind: output, shape index: {}]  }
   0x1   :  { %s1230_s20 = smov 0   ;;  %s1232_s21 = smov 0  }
   0x2   :  { %s1234_s22 = smov 0   ;;  %s1236_s23 = smov 0  }
   0x3   :  { %s1238_s24 = smov 0  }
   0x4 LB: > { %s27_s25 = sadd.s32 1, %s1181_s21  ;;  %s30_s26 = sadd.s32 1, %s1185_s22  ;;  %s1193_s24 = sphi %s1238_s24, %s15_s24   ;;  %s1189_s23 = sphi %s1236_s23, %s1465_s23   ;;  %s1185_s22 = sphi %s1234_s22, %s1464_s22   ;;  %s1181_s21 = sphi %s1232_s21, %s1463_s21   ;;  %s1177_s20 = sphi %s1230_s20, %s1462_s20   ;;  %s1173_s19 = sphi %s1228_s19, %s1461_s19   ;;  %s1169_s18 = sphi %s1226_s18, %s1460_s18  }
   0x5   : > { %p28_p0 = scmp.ge.s32.totalorder %s27_s25, 2  ;;  %p958_p1 = scmp.ge.s32.totalorder %s1193_s24, 1 }
   0x6   : > { %p274_p2 = scmp.lt.s32.totalorder %s1193_s24, 9  ;;  %s34_s27 = sadd.s32 1, %s1189_s23 }
   0x7   : > { %s1467_s25 = smov (%p28_p0, %s27_s25), 0  ;;  %s1469_s26 = smov (!%p28_p0, %s30_s26), %s1185_s22 }
   0x8   : > { %p275_p3 = pnand %p958_p1, %p274_p2  ;;  %p32_p4 = scmp.ge.s32.totalorder %s1469_s26, 2 }
   0x9   : > { %v1106_v0 = vld [vmem:[%s1457_s3 + $0x48] sm:$0xff] (!%p275_p3)   ;;  %v1195_v1 = vmov (!%p275_p3), 0   ;;  %v1107_v2 = vld [vmem:[%s1457_s3] sm:$0xff] (!%p275_p3)   ;;  %p345_p6 = scmp.lt.s32.totalorder (!%p275_p3), %s1177_s20, 1  ;;  %v1108_v3 = vld [vmem:[%s1457_s3 + $0x50] sm:$0xff] (!%p275_p3)   ;;  %p349_p7 = scmp.lt.s32.totalorder (!%p275_p3), %s1169_s18, 1 }
   0xa   : > { %s1471_s26 = smov (%p32_p4, %s1469_s26), 0  ;;  %s1473_s27 = smov (!%p32_p4, %s34_s27), %s1189_s23 }
   0xb   : > { %p36_p5 = scmp.ge.s32.totalorder %s1473_s27, 2  ;;  %278 = sbr.rel (%p275_p3) target bundleno = 304 (0x130), region = 40  ;;  %504 = vmatprep.subr.bf16.mxu0 (!%p275_p3), %v1195_v1  ;;  %607 = vmatprep.subr.bf16.mxu1 (!%p275_p3), %v1195_v1  ;;  %v1109_v4 = vld [vmem:[%s1457_s3 + $0x8] sm:$0xff] (!%p275_p3)   ;;  %v1110_v5 = vld [vmem:[%s1457_s3 + $0x58] sm:$0xff] (!%p275_p3)   ;;  %v1111_v6 = vld [vmem:[%s1457_s3 + $0x10] sm:$0xff] (!%p275_p3)   ;;  %vm500_vm0 = vcmask (!%p275_p3), 130048  }
   0xc   : > { %505 = vmatpush1.bf16.msra.mxu0 (!%p275_p3), %v1106_v0  ;;  %608 = vmatpush1.bf16.msra.mxu1 (!%p275_p3), %v1107_v2  ;;  %s358_s15 = sadd.s32 (!%p275_p3), 1, %s1173_s19  ;;  %s373_s17 = sadd.s32 (!%p275_p3), 2, %s1173_s19  ;;  %v1112_v7 = vld [vmem:[%s1457_s3 + $0x60] sm:$0xff] (!%p275_p3)   ;;  %v1113_v8 = vld [vmem:[%s1457_s3 + $0x18] sm:$0xff] (!%p275_p3)   ;;  %v1114_v9 = vld [vmem:[%s1457_s3 + $0x68] sm:$0xff] (!%p275_p3)   ;;  %vm781_vm1 = vcmask (!%p275_p3), 125952  }
   0xd   : > { %s1475_s27 = smov (%p36_p5, %s1473_s27), 0  ;;  %506 = vmatprep.subr.bf16.mxu0 (!%p275_p3), %v1195_v1  ;;  %609 = vmatprep.subr.bf16.mxu1 (!%p275_p3), %v1195_v1  ;;  %p361_p8 = scmp.lt.s32.totalorder (!%p275_p3), %s358_s15, 3  ;;  %v1115_v10 = vld [vmem:[%s1457_s3 + $0x20] sm:$0xff] (!%p275_p3)   ;;  %v1116_v11 = vld [vmem:[%s1457_s3 + $0x70] sm:$0xff] (!%p275_p3)   ;;  %v1117_v13 = vld [vmem:[%s1457_s3 + $0x28] sm:$0xff] (!%p275_p3)  }
   0xe   : > { %p376_p9 = scmp.lt.s32.totalorder (!%p275_p3), %s373_s17, 3  ;;  %p390_p10 = scmp.lt.s32.totalorder (!%p275_p3), %s1173_s19, 1  ;;  %v1118_v15 = vld [vmem:[%s1457_s3 + $0x78] sm:$0xff] (!%p275_p3)   ;;  %v1119_v16 = vld [vmem:[%s1457_s3 + $0x30] sm:$0xff] (!%p275_p3)   ;;  %v1120_v17 = vld [vmem:[%s1457_s3 + $0x80] sm:$0xff] (!%p275_p3)  }
   0xf   : > { %p347_p11 = scmp.lt.s32.totalorder (!%p275_p3), %s1173_s19, 3  ;;  %v1121_v18 = vld [vmem:[%s1457_s3 + $0x38] sm:$0xff] (!%p275_p3)   ;;  %v1122_v19 = vld [vmem:[%s1457_s3 + $0x88] sm:$0xff] (!%p275_p3)   ;;  %v1123_v20 = vld [vmem:[%s1457_s3 + $0x40] sm:$0xff] (!%p275_p3)  }
  0x10   : > { %507 = vmatpush1.bf16.msra.mxu0 (!%p275_p3), %v1108_v3  ;;  %610 = vmatpush1.bf16.msra.mxu1 (!%p275_p3), %v1109_v4  ;;  %v1128_v26 = vld [vmem:[%s1457_s3 + $0x90] sm:$0xff] (!%p275_p3)   ;;  %v1129_v28 = vld [vmem:[%s1457_s3 + $0x98] sm:$0xff] (!%p275_p3)   ;;  %v1130_v29 = vld [vmem:[%s1457_s3 + $0xa0] sm:$0xff] (!%p275_p3)  }
  0x11   : > { %508 = vmatprep.subr.bf16.mxu0 (!%p275_p3), %v1195_v1  ;;  %611 = vmatprep.subr.bf16.mxu1 (!%p275_p3), %v1195_v1  ;;  %v1131_v30 = vld [vmem:[%s1457_s3 + $0xa8] sm:$0xff] (!%p275_p3)   ;;  %v1132_v31 = vld [vmem:[%s1457_s3 + $0xb0] sm:$0xff] (!%p275_p3)   ;;  %v1133_v32 = vld [vmem:[%s1457_s3 + $0xb8] sm:$0xff] (!%p275_p3)  }
  0x12   : > { %s1477_s18 = smov (!%p349_p7, %s1169_s18), 1  ;;  %s1479_s20 = smov (!%p345_p6, %s1177_s20), 1  ;;  %v1134_v33 = vld [vmem:[%s1457_s3 + $0xc0] sm:$0xff]   ;;  %v1135_v34 = vld [vmem:[%s1457_s3 + $0xc8] sm:$0xff]   ;;  %v1136_v35 = vld [vmem:[%s1457_s3 + $0xd0] sm:$0xff]  }
  0x13   : > { %s1308_s16 = sshll.u32 %s1477_s18, 1  ;;  %s1481_s15 = smov (!%p361_p8, %s358_s15), 3  ;;  %v1046_v47 = vld [vmem:[%s1458_s4] ss:$0 sm:$0xff] }
  0x14   : > { %509 = vmatpush1.bf16.msra.mxu0 %v1110_v5  ;;  %612 = vmatpush1.bf16.msra.mxu1 %v1111_v6  ;;  %s1319_s7 = sshll.u32 %s1479_s20, 4  ;;  %s964_s8 = sshll.u32 %s1481_s15, 2 }
  0x15   : > { %510 = vmatprep.subr.bf16.mxu0 %v1195_v1  ;;  %613 = vmatprep.subr.bf16.mxu1 %v1195_v1  ;;  %s367_s9 = sadd.s32 %s964_s8, %s1308_s16  ;;  %s1483_s17 = smov (!%p376_p9, %s373_s17), 3 }
  0x16   : > { %s369_s12 = sadd.s32 %s1319_s7, %s367_s9  ;;  %s972_s9 = sshll.u32 %s1479_s20, 2 }
  0x17   : > { %s966_s28 = sshll.u32 %s369_s12, 2  ;;  %s968_s13 = sshll.u32 %s1483_s17, 2 }
  0x18   : > { %511 = vmatpush1.bf16.msra.mxu0 %v1112_v7  ;;  %614 = vmatpush1.bf16.msra.mxu1 %v1113_v8  ;;  %s371_s8 = scalar_lea.vmem %s1455_s1, %s966_s28  ;;  %s382_s20 = sadd.s32 %s968_s13, %s1308_s16 }
  0x19   : > { %512 = vmatprep.subr.bf16.mxu0 %v1195_v1  ;;  %615 = vmatprep.subr.bf16.mxu1 %v1195_v1  ;;  %s391_s10 = scalar_select %p390_p10, %s1173_s19, 1  ;;  %v420_v12 = vld [vmem:[%s371_s8] sm:$0xff] }
  0x1a   : > { %v993_v14 = vcombine.high %v420_v12, %v420_v12  ;;  %s384_s8 = sadd.s32 %s1319_s7, %s382_s20  ;;  %s1485_s19 = smov (!%p347_p11, %s1173_s19), 3  ;;  %v992_v24 = vcombine.low %v420_v12, %v420_v12 }
  0x1b   : > { %s971_s14 = sshll.u32 %s391_s10, 1  ;;  %s960_s11 = sshll.u32 %s1485_s19, 2 }
  0x1c   : > { %513 = vmatpush1.bf16.msra.mxu0 %v1114_v9  ;;  %616 = vmatpush1.bf16.msra.mxu1 %v1115_v10  ;;  %s395_s28 = sadd.s32 %s971_s14, %s1477_s18  ;;  %s353_s14 = sadd.s32 %s960_s11, %s1308_s16 }
  0x1d   : > { %514 = vmatprep.subr.bf16.mxu0 %v1195_v1  ;;  %617 = vmatprep.subr.bf16.mxu1 %v1195_v1  ;;  %s1353_s30 = sadd.s32 %s972_s9, %s395_s28  ;;  %s970_s9 = sshll.u32 %s384_s8, 2 }
  0x1e   : > { %1003 = vmatprep.mubr.msk.bf16.mxu0 %vm500_vm0, %v993_v14  ;;  %s355_s20 = sadd.s32 %s1319_s7, %s353_s14  ;;  %s386_s29 = scalar_lea.vmem %s1456_s2, %s970_s9 }
  0x1f   : > { %s962_s17 = sshll.u32 %s355_s20, 2  ;;  %v647_v23 = vld [vmem:[%s386_s29] sm:$0xff]  ;;  %s973_s13 = sshll.u32 %s1353_s30, 2 }
  0x20   : > { %515 = vmatpush1.bf16.msra.mxu0 %v1116_v11  ;;  %618 = vmatpush1.bf16.msra.mxu1 %v1117_v13  ;;  %s357_s10 = scalar_lea.vmem %s1454_s0, %s962_s17  ;;  %v1035_v27 = vcombine.high %v647_v23, %v647_v23  ;;  %v1034_v36 = vcombine.low %v647_v23, %v647_v23  ;;  %s399_s28 = scalar_lea.vmem %s1459_s5, %s973_s13 }
  0x21   : > { %516 = vmatprep.subr.bf16.mxu0 %v1195_v1  ;;  %619 = vmatprep.subr.bf16.mxu1 %v1195_v1  ;;  %v401_v21 = vld [vmem:[%s357_s10] sm:$0xff] }
  0x22   : > { %v1005_v22 = vcombine.high %v401_v21, %v401_v21  ;;  %v1004_v25 = vcombine.low %v401_v21, %v401_v21 }
  0x24   : > { %517 = vmatpush1.bf16.msra.mxu0 %v1118_v15  ;;  %620 = vmatpush1.bf16.msra.mxu1 %v1119_v16 }
  0x25   : > { %518 = vmatprep.subr.bf16.mxu0 %v1195_v1  ;;  %621 = vmatprep.subr.bf16.mxu1 %v1195_v1 }
  0x26   : > { %1015 = vmatprep.mubr.msk.bf16.mxu1 %vm500_vm0, %v1005_v22 }
  0x28   : > { %519 = vmatpush1.bf16.msra.mxu0 %v1120_v17  ;;  %622 = vmatpush1.bf16.msra.mxu1 %v1121_v18 }
  0x29   : > { %520 = vmatprep.subr.bf16.mxu0 %v1195_v1  ;;  %623 = vmatprep.subr.bf16.mxu1 %v1195_v1 }
  0x2c   : > { %521 = vmatpush1.bf16.msra.mxu0 %v1122_v19  ;;  %624 = vmatpush1.bf16.msra.mxu1 %v1123_v20 }
  0x2d   : > { %730 = vmatprep.subr.bf16.mxu0 %v1195_v1 }
  0x2f   : > { %537 = vmatmul.mubr.bf16.vlgmr.msra.gmra.mrb[0].mxu0 %v992_v24  ;;  %640 = vmatmul.mubr.bf16.vlgmr.msra.gmra.mrb[0].mxu1 %v1004_v25 }
  0x30   : > { %731 = vmatpush1.bf16.msra.mxu0 %v1128_v26  ;;  %1045 = vmatprep.mubr.msk.bf16.mxu0 %vm500_vm0, %v1035_v27 }
  0x31   : > { %732 = vmatprep.subr.bf16.mxu0 %v1195_v1 }
  0x34   : > { %733 = vmatpush1.bf16.msra.mxu0 %v1129_v28 }
  0x35   : > { %734 = vmatprep.subr.bf16.mxu0 %v1195_v1 }
  0x38   : > { %735 = vmatpush1.bf16.msra.mxu0 %v1130_v29 }
  0x39   : > { %736 = vmatprep.subr.bf16.mxu0 %v1195_v1 }
  0x3c   : > { %737 = vmatpush1.bf16.msra.mxu0 %v1131_v30 }
  0x3d   : > { %738 = vmatprep.subr.bf16.mxu0 %v1195_v1 }
  0x40   : > { %739 = vmatpush1.bf16.msra.mxu0 %v1132_v31 }
  0x41   : > { %740 = vmatprep.subr.bf16.mxu0 %v1195_v1 }
  0x44   : > { %741 = vmatpush1.bf16.msra.mxu0 %v1133_v32 }
  0x45   : > { %742 = vmatprep.subr.bf16.mxu0 %v1195_v1 }
  0x48   : > { %743 = vmatpush1.bf16.msra.mxu0 %v1134_v33 }
  0x49   : > { %744 = vmatprep.subr.bf16.mxu0 %v1195_v1 }
  0x4c   : > { %745 = vmatpush1.bf16.msra.mxu0 %v1135_v34 }
  0x4d   : > { %746 = vmatprep.subr.bf16.mxu0 %v1195_v1 }
  0x50   : > { %747 = vmatpush1.bf16.msra.mxu0 %v1136_v35 }
  0x53   : > { %763 = vmatmul.mubr.bf16.vlgmr.msra.gmra.mrb[4].mxu0 %v1034_v36 }
 0x102   : > { %v538_v37 = vpop.f32.mrb[0].mxu0  ;;  %v641_v39 = vpop.f32.mrb[0].mxu1 }
 0x103   : > { %v540_v38 = vpop.f32.mrb[1].mxu0  ;;  %v642_v40 = vadd.f32 %v641_v39, %v538_v37  ;;  %v643_v42 = vpop.f32.mrb[1].mxu1 }
 0x104   : > { %v541_v41 = vpop.f32.mrb[2].mxu0  ;;  %v644_v44 = vpop.f32.mrb[2].mxu1 }
 0x105   : > { %v542_v43 = vpop.f32.mrb[3].mxu0  ;;  %v645_v45 = vpop.f32.mrb[3].mxu1 }
 0x126   : > { %v764_v46 = vpop.f32.mrb[4].mxu0 }
 0x127   : > { %v770_v48 = vadd.f32 %v764_v46, %v642_v40  ;;  %v766_v49 = vpop.f32.mrb[5].mxu0 }
 0x128   : > { %v767_v50 = vpop.f32.mrb[6].mxu0 }
 0x129   : > { %v778_v51 = vadd.f32 %v1046_v47, %v770_v48  ;;  %v768_v52 = vpop.f32.mrb[7].mxu0 }
 0x12b   : > { %v779_v53 = vmax.f32 %v778_v51, 0.0 }
 0x12d   : > { %v780_v54 = vpack.c.bf16 %v779_v53, %v779_v53 }
 0x12f   : > { %782 = vst.msk [vmem:[%s399_s28] sm:$0xf] %vm781_vm1, %v780_v54 }
 0x130 PF: > { %s15_s24 = sadd.s32 1, %s1193_s24   ;;  %s1460_s18 = smov %s1181_s21 }
 0x131   : > { %p12_p12 = scmp.ge.s32.totalorder %s15_s24, 10   ;;  %s1461_s19 = smov %s1185_s22 }
 0x132   : > { %s1462_s20 = smov %s1189_s23  ;;  %s1463_s21 = smov %s1467_s25 }
 0x133   : > { %s1464_s22 = smov %s1471_s26  ;;  %s1465_s23 = smov %s1475_s27 }
 0x134   :  { %14 = sbr.rel (!%p12_p12) target bundleno = 4 (0x4), region = 78 }

// kernel: unet3d_forward.29
= control target key start
LH: loop header
LB: loop body
LE: loop exit
PB: predicated region body
PF: predicated region fallthrough
CT: control target
= control target key end

     0   :  { %s941_s12 = smov 0   ;;  %s1105_s0 = inlined_call_operand.vmem [shape: bf16[512,8], index: 0, kind: input, shape index: {}]   ;;  %s1106_s1 = inlined_call_operand.vmem [shape: bf16[8,32], index: 1, kind: input, shape index: {}]   ;;  %s1107_s2 = inlined_call_operand.vmem [shape: f32[1,32], index: 2, kind: input, shape index: {}]   ;;  %s1108_s3 = inlined_call_operand.vmem [shape: bf16[512,32], index: 3, kind: output, shape index: {}]  }
   0x1 LB: > { %s726_s13 = sadd.s32 4294967295, %s919_s12   ;;  %p730_p0 = scmp.ge.s32.totalorder %s919_s12, 1  ;;  %s919_s12 = sphi %s941_s12, %s13_s12  }
   0x2   : > { %p138_p1 = scmp.lt.s32.totalorder %s919_s12, 3 }
   0x4   : > { %p139_p2 = pnand %p730_p0, %p138_p1 }
   0x5   : > { %v207_v0 = vld [vmem:[%s1106_s1] sm:$0xf] (!%p139_p2)  ;;  %vm344_vm0 = vcmask (!%p139_p2), 1043456   ;;  %s731_s16 = sshll.u32 (!%p139_p2), %s726_s13, 5  ;;  %vm295_vm1 = vcmask (!%p139_p2), 64512   ;;  %vm637_vm2 = vcmask (!%p139_p2), 257024  }
   0x6   : > { %142 = sbr.rel (%p139_p2) target bundleno = 263 (0x107), region = 32  ;;  %887 = vmatprep.subr.msk.bf16.mxu0 (!%p139_p2), %vm344_vm0, %v207_v0  ;;  %888 = vmatprep.subr.msk.bf16.mxu1 (!%p139_p2), %vm344_vm0, %v207_v0  ;;  %v346_v1 = vsel (!%p139_p2), %vm344_vm0, %v207_v0, 0  ;;  %p163_p3 = scmp.lt.s32.totalorder (!%p139_p2), %s731_s16, 63  ;;  %v997_v18 = vld [vmem:[%s1107_s2] ss:$0 sm:$0xff] (!%p139_p2) }
   0x7   : > { %852 = vmatpush3.bf16.msra.mxu0 (!%p139_p2), %v346_v1  ;;  %886 = vmatpush3.bf16.msra.mxu1 (!%p139_p2), %v346_v1 }
   0xd   : > { %s1110_s16 = smov (!%p163_p3, %s731_s16), 63 }
   0xe   : > { %s732_s17 = sshll.u32 %s1110_s16, 2 }
   0xf   : > { %s960_s20 = scalar_lea.vmem %s1105_s0, %s732_s17  ;;  %s1005_s25 = scalar_lea.vmem %s1108_s3, %s732_s17 }
  0x10   : > { %v897_v2 = vld [vmem:[%s960_s20] sm:$0xff]   ;;  %v899_v4 = vld [vmem:[%s960_s20 + $0x8] sm:$0xff]   ;;  %v901_v6 = vld [vmem:[%s960_s20 + $0x10] sm:$0xff]  }
  0x11   : > { %v898_v3 = vld [vmem:[%s960_s20 + $0x40] sm:$0xff]   ;;  %853 = vmatprep.mubr.msk.bf16.mxu0 %vm295_vm1, %v897_v2  ;;  %v900_v5 = vld [vmem:[%s960_s20 + $0x48] sm:$0xff]   ;;  %v902_v7 = vld [vmem:[%s960_s20 + $0x50] sm:$0xff]  }
  0x12   : > { %869 = vmatprep.mubr.msk.bf16.mxu1 %vm295_vm1, %v898_v3  ;;  %854 = vmatmul.mubr.msk.bf16.vlgmr.msra.gmra.mrb[0].mxu0 %vm295_vm1, %v899_v4  ;;  %v903_v8 = vld [vmem:[%s960_s20 + $0x18] sm:$0xff]   ;;  %v905_v10 = vld [vmem:[%s960_s20 + $0x20] sm:$0xff]   ;;  %v907_v12 = vld [vmem:[%s960_s20 + $0x28] sm:$0xff]  }
  0x13   : > { %870 = vmatmul.mubr.msk.bf16.vlgmr.msra.gmra.mrb[0].mxu1 %vm295_vm1, %v900_v5  ;;  %857 = vmatprep.mubr.msk.bf16.mxu0 %vm295_vm1, %v901_v6  ;;  %v904_v9 = vld [vmem:[%s960_s20 + $0x58] sm:$0xff]   ;;  %v906_v11 = vld [vmem:[%s960_s20 + $0x60] sm:$0xff]   ;;  %v908_v13 = vld [vmem:[%s960_s20 + $0x68] sm:$0xff]  }
  0x14   : > { %873 = vmatprep.mubr.msk.bf16.mxu1 %vm295_vm1, %v902_v7  ;;  %v909_v14 = vld [vmem:[%s960_s20 + $0x30] sm:$0xff]   ;;  %v911_v16 = vld [vmem:[%s960_s20 + $0x38] sm:$0xff]  }
  0x15   : > { %v910_v15 = vld [vmem:[%s960_s20 + $0x70] sm:$0xff]   ;;  %v912_v17 = vld [vmem:[%s960_s20 + $0x78] sm:$0xff]  }
  0x1a   : > { %858 = vmatmul.mubr.msk.bf16.gmra.mrb[4].mxu0 %vm295_vm1, %v903_v8 }
  0x1b   : > { %874 = vmatmul.mubr.msk.bf16.gmra.mrb[4].mxu1 %vm295_vm1, %v904_v9  ;;  %861 = vmatprep.mubr.msk.bf16.mxu0 %vm295_vm1, %v905_v10 }
  0x1c   : > { %877 = vmatprep.mubr.msk.bf16.mxu1 %vm295_vm1, %v906_v11 }
  0x22   : > { %862 = vmatmul.mubr.msk.bf16.gmra.mrb[8].mxu0 %vm295_vm1, %v907_v12 }
  0x23   : > { %878 = vmatmul.mubr.msk.bf16.gmra.mrb[8].mxu1 %vm295_vm1, %v908_v13  ;;  %865 = vmatprep.mubr.msk.bf16.mxu0 %vm295_vm1, %v909_v14 }
  0x24   : > { %881 = vmatprep.mubr.msk.bf16.mxu1 %vm295_vm1, %v910_v15 }
  0x2a   : > { %866 = vmatmul.mubr.msk.bf16.gmra.mrb[12].mxu0 %vm295_vm1, %v911_v16 }
  0x2b   : > { %882 = vmatmul.mubr.msk.bf16.gmra.mrb[12].mxu1 %vm295_vm1, %v912_v17 }
  0xe5   : > { %v855_v19 = vpop.f32.mrb[0].mxu0 }
  0xe6   : > { %v391_v20 = vadd.f32 %v855_v19, %v997_v18  ;;  %v871_v21 = vpop.f32.mrb[0].mxu1  ;;  %v382_v22 = vpop.f32.mrb[1].mxu0 }
  0xe7   : > { %v455_v23 = vadd.f32 %v871_v21, %v997_v18  ;;  %v383_v24 = vadd.f32 %v997_v18, %v382_v22  ;;  %v446_v25 = vpop.f32.mrb[1].mxu1  ;;  %v856_v26 = vpop.f32.mrb[2].mxu0 }
  0xe8   : > { %v804_v27 = vpack.c.bf16 %v391_v20, %v391_v20  ;;  %v447_v28 = vadd.f32 %v997_v18, %v446_v25  ;;  %v394_v29 = vadd.f32 %v856_v26, %v997_v18  ;;  %v872_v30 = vpop.f32.mrb[2].mxu1  ;;  %v385_v31 = vpop.f32.mrb[3].mxu0 }
  0xe9   : > { %v820_v32 = vpack.c.bf16 %v455_v23, %v455_v23  ;;  %v802_v33 = vpack.c.bf16 %v383_v24, %v383_v24  ;;  %v458_v34 = vadd.f32 %v872_v30, %v997_v18  ;;  %v386_v35 = vadd.f32 %v997_v18, %v385_v31  ;;  %v449_v36 = vpop.f32.mrb[3].mxu1 }
  0xea   : > { %640 = vst.msk [vmem:[%s1005_s25 + $0x8] sm:$0xf] %vm637_vm2, %v804_v27  ;;  %v818_v37 = vpack.c.bf16 %v447_v28, %v447_v28  ;;  %v805_v38 = vpack.c.bf16 %v394_v29, %v394_v29  ;;  %v450_v39 = vadd.f32 %v997_v18, %v449_v36 }
  0xeb   : > { %656 = vst.msk [vmem:[%s1005_s25 + $0x48] sm:$0xf] %vm637_vm2, %v820_v32  ;;  %638 = vst.msk [vmem:[%s1005_s25] sm:$0xf] %vm637_vm2, %v802_v33  ;;  %v821_v40 = vpack.c.bf16 %v458_v34, %v458_v34  ;;  %v803_v41 = vpack.c.bf16 %v386_v35, %v386_v35 }
  0xec   : > { %654 = vst.msk [vmem:[%s1005_s25 + $0x40] sm:$0xf] %vm637_vm2, %v818_v37  ;;  %641 = vst.msk [vmem:[%s1005_s25 + $0xc] sm:$0xf] %vm637_vm2, %v805_v38  ;;  %v819_v42 = vpack.c.bf16 %v450_v39, %v450_v39 }
  0xed   : > { %657 = vst.msk [vmem:[%s1005_s25 + $0x4c] sm:$0xf] %vm637_vm2, %v821_v40  ;;  %639 = vst.msk [vmem:[%s1005_s25 + $0x4] sm:$0xf] %vm637_vm2, %v803_v41  ;;  %v859_v43 = vpop.f32.mrb[4].mxu0 }
  0xee   : > { %655 = vst.msk [vmem:[%s1005_s25 + $0x44] sm:$0xf] %vm637_vm2, %v819_v42  ;;  %v407_v44 = vadd.f32 %v859_v43, %v997_v18  ;;  %v875_v45 = vpop.f32.mrb[4].mxu1  ;;  %v398_v46 = vpop.f32.mrb[5].mxu0 }
  0xef   : > { %v471_v47 = vadd.f32 %v875_v45, %v997_v18  ;;  %v399_v48 = vadd.f32 %v997_v18, %v398_v46  ;;  %v462_v49 = vpop.f32.mrb[5].mxu1  ;;  %v860_v50 = vpop.f32.mrb[6].mxu0 }
  0xf0   : > { %v808_v51 = vpack.c.bf16 %v407_v44, %v407_v44  ;;  %v463_v52 = vadd.f32 %v997_v18, %v462_v49  ;;  %v410_v53 = vadd.f32 %v860_v50, %v997_v18  ;;  %v876_v54 = vpop.f32.mrb[6].mxu1  ;;  %v401_v55 = vpop.f32.mrb[7].mxu0 }
  0xf1   : > { %v824_v56 = vpack.c.bf16 %v471_v47, %v471_v47  ;;  %v806_v57 = vpack.c.bf16 %v399_v48, %v399_v48  ;;  %v474_v58 = vadd.f32 %v876_v54, %v997_v18  ;;  %v402_v59 = vadd.f32 %v997_v18, %v401_v55  ;;  %v465_v60 = vpop.f32.mrb[7].mxu1 }
  0xf2   : > { %644 = vst.msk [vmem:[%s1005_s25 + $0x18] sm:$0xf] %vm637_vm2, %v808_v51  ;;  %v822_v61 = vpack.c.bf16 %v463_v52, %v463_v52  ;;  %v809_v62 = vpack.c.bf16 %v410_v53, %v410_v53  ;;  %v466_v63 = vadd.f32 %v997_v18, %v465_v60 }
  0xf3   : > { %660 = vst.msk [vmem:[%s1005_s25 + $0x58] sm:$0xf] %vm637_vm2, %v824_v56  ;;  %642 = vst.msk [vmem:[%s1005_s25 + $0x10] sm:$0xf] %vm637_vm2, %v806_v57  ;;  %v825_v0 = vpack.c.bf16 %v474_v58, %v474_v58  ;;  %v807_v1 = vpack.c.bf16 %v402_v59, %v402_v59 }
  0xf4   : > { %658 = vst.msk [vmem:[%s1005_s25 + $0x50] sm:$0xf] %vm637_vm2, %v822_v61  ;;  %645 = vst.msk [vmem:[%s1005_s25 + $0x1c] sm:$0xf] %vm637_vm2, %v809_v62  ;;  %v823_v2 = vpack.c.bf16 %v466_v63, %v466_v63 }
  0xf5   : > { %661 = vst.msk [vmem:[%s1005_s25 + $0x5c] sm:$0xf] %vm637_vm2, %v825_v0  ;;  %643 = vst.msk [vmem:[%s1005_s25 + $0x14] sm:$0xf] %vm637_vm2, %v807_v1  ;;  %v863_v3 = vpop.f32.mrb[8].mxu0 }
  0xf6   : > { %659 = vst.msk [vmem:[%s1005_s25 + $0x54] sm:$0xf] %vm637_vm2, %v823_v2  ;;  %v423_v4 = vadd.f32 %v863_v3, %v997_v18  ;;  %v879_v5 = vpop.f32.mrb[8].mxu1  ;;  %v414_v6 = vpop.f32.mrb[9].mxu0 }
  0xf7   : > { %v487_v7 = vadd.f32 %v879_v5, %v997_v18  ;;  %v415_v8 = vadd.f32 %v997_v18, %v414_v6  ;;  %v478_v9 = vpop.f32.mrb[9].mxu1  ;;  %v864_v10 = vpop.f32.mrb[10].mxu0 }
  0xf8   : > { %v812_v11 = vpack.c.bf16 %v423_v4, %v423_v4  ;;  %v479_v12 = vadd.f32 %v997_v18, %v478_v9  ;;  %v426_v13 = vadd.f32 %v864_v10, %v997_v18  ;;  %v880_v14 = vpop.f32.mrb[10].mxu1  ;;  %v417_v15 = vpop.f32.mrb[11].mxu0 }
  0xf9   : > { %v828_v16 = vpack.c.bf16 %v487_v7, %v487_v7  ;;  %v810_v17 = vpack.c.bf16 %v415_v8, %v415_v8  ;;  %v490_v19 = vadd.f32 %v880_v14, %v997_v18  ;;  %v418_v20 = vadd.f32 %v997_v18, %v417_v15  ;;  %v481_v21 = vpop.f32.mrb[11].mxu1 }
  0xfa   : > { %648 = vst.msk [vmem:[%s1005_s25 + $0x28] sm:$0xf] %vm637_vm2, %v812_v11  ;;  %v826_v22 = vpack.c.bf16 %v479_v12, %v479_v12  ;;  %v813_v23 = vpack.c.bf16 %v426_v13, %v426_v13  ;;  %v482_v24 = vadd.f32 %v997_v18, %v481_v21 }
  0xfb   : > { %664 = vst.msk [vmem:[%s1005_s25 + $0x68] sm:$0xf] %vm637_vm2, %v828_v16  ;;  %646 = vst.msk [vmem:[%s1005_s25 + $0x20] sm:$0xf] %vm637_vm2, %v810_v17  ;;  %v829_v25 = vpack.c.bf16 %v490_v19, %v490_v19  ;;  %v811_v26 = vpack.c.bf16 %v418_v20, %v418_v20 }
  0xfc   : > { %662 = vst.msk [vmem:[%s1005_s25 + $0x60] sm:$0xf] %vm637_vm2, %v826_v22  ;;  %649 = vst.msk [vmem:[%s1005_s25 + $0x2c] sm:$0xf] %vm637_vm2, %v813_v23  ;;  %v827_v27 = vpack.c.bf16 %v482_v24, %v482_v24 }
  0xfd   : > { %665 = vst.msk [vmem:[%s1005_s25 + $0x6c] sm:$0xf] %vm637_vm2, %v829_v25  ;;  %647 = vst.msk [vmem:[%s1005_s25 + $0x24] sm:$0xf] %vm637_vm2, %v811_v26  ;;  %v867_v28 = vpop.f32.mrb[12].mxu0 }
  0xfe   : > { %663 = vst.msk [vmem:[%s1005_s25 + $0x64] sm:$0xf] %vm637_vm2, %v827_v27  ;;  %v439_v29 = vadd.f32 %v867_v28, %v997_v18  ;;  %v883_v30 = vpop.f32.mrb[12].mxu1  ;;  %v430_v31 = vpop.f32.mrb[13].mxu0 }
  0xff   : > { %v503_v32 = vadd.f32 %v883_v30, %v997_v18  ;;  %v431_v33 = vadd.f32 %v997_v18, %v430_v31  ;;  %v494_v34 = vpop.f32.mrb[13].mxu1  ;;  %v868_v35 = vpop.f32.mrb[14].mxu0 }
 0x100   : > { %v816_v36 = vpack.c.bf16 %v439_v29, %v439_v29  ;;  %v495_v37 = vadd.f32 %v997_v18, %v494_v34  ;;  %v442_v38 = vadd.f32 %v868_v35, %v997_v18  ;;  %v884_v39 = vpop.f32.mrb[14].mxu1  ;;  %v433_v40 = vpop.f32.mrb[15].mxu0 }
 0x101   : > { %v832_v41 = vpack.c.bf16 %v503_v32, %v503_v32  ;;  %v814_v42 = vpack.c.bf16 %v431_v33, %v431_v33  ;;  %v506_v43 = vadd.f32 %v884_v39, %v997_v18  ;;  %v434_v44 = vadd.f32 %v997_v18, %v433_v40  ;;  %v497_v45 = vpop.f32.mrb[15].mxu1 }
 0x102   : > { %652 = vst.msk [vmem:[%s1005_s25 + $0x38] sm:$0xf] %vm637_vm2, %v816_v36  ;;  %v830_v46 = vpack.c.bf16 %v495_v37, %v495_v37  ;;  %v817_v47 = vpack.c.bf16 %v442_v38, %v442_v38  ;;  %v498_v48 = vadd.f32 %v997_v18, %v497_v45 }
 0x103   : > { %668 = vst.msk [vmem:[%s1005_s25 + $0x78] sm:$0xf] %vm637_vm2, %v832_v41  ;;  %650 = vst.msk [vmem:[%s1005_s25 + $0x30] sm:$0xf] %vm637_vm2, %v814_v42  ;;  %v833_v49 = vpack.c.bf16 %v506_v43, %v506_v43  ;;  %v815_v50 = vpack.c.bf16 %v434_v44, %v434_v44 }
 0x104   : > { %666 = vst.msk [vmem:[%s1005_s25 + $0x70] sm:$0xf] %vm637_vm2, %v830_v46  ;;  %653 = vst.msk [vmem:[%s1005_s25 + $0x3c] sm:$0xf] %vm637_vm2, %v817_v47  ;;  %v831_v51 = vpack.c.bf16 %v498_v48, %v498_v48 }
 0x105   : > { %669 = vst.msk [vmem:[%s1005_s25 + $0x7c] sm:$0xf] %vm637_vm2, %v833_v49  ;;  %651 = vst.msk [vmem:[%s1005_s25 + $0x34] sm:$0xf] %vm637_vm2, %v815_v50 }
 0x106   : > { %667 = vst.msk [vmem:[%s1005_s25 + $0x74] sm:$0xf] %vm637_vm2, %v831_v51 }
 0x107 PF: > { %s13_s12 = sadd.s32 1, %s919_s12  }
 0x108   : > { %p10_p4 = scmp.ge.s32.totalorder %s13_s12, 4  }
 0x10a   :  { %12 = sbr.rel (!%p10_p4) target bundleno = 1 (0x1), region = 62 }

// kernel: unet3d_forward.27
= control target key start
LH: loop header
LB: loop body
LE: loop exit
PB: predicated region body
PF: predicated region fallthrough
CT: control target
= control target key end

     0   :  { %s1405_s18 = smov 0   ;;  %s1407_s19 = smov 0   ;;  %s1657_s0 = inlined_call_operand.vmem [shape: bf16[2,6,64,144], index: 0, kind: input, shape index: {}, may-alias: {0,1,2}]   ;;  %s1658_s1 = inlined_call_operand.vmem [shape: bf16[2,6,64,144], index: 1, kind: input, shape index: {}, may-alias: {0,1,2}]   ;;  %s1659_s2 = inlined_call_operand.vmem [shape: bf16[2,6,64,144], index: 2, kind: input, shape index: {}, may-alias: {0,1,2}]   ;;  %s1660_s3 = inlined_call_operand.vmem [shape: bf16[3,144,8], index: 3, kind: input, shape index: {}]   ;;  %s1661_s4 = inlined_call_operand.vmem [shape: f32[1,8], index: 4, kind: input, shape index: {}]   ;;  %s1662_s5 = inlined_call_operand.vmem [shape: bf16[2,4,64,8], index: 5, kind: output, shape index: {}]  }
   0x1   :  { %s1409_s20 = smov 0   ;;  %s1411_s21 = smov 0  }
   0x2   :  { %s1413_s22 = smov 0   ;;  %s1415_s23 = smov 0  }
   0x3   :  { %s1417_s24 = smov 0  }
   0x4 LB: > { %s27_s25 = sadd.s32 1, %s1360_s21  ;;  %s30_s26 = sadd.s32 1, %s1364_s22  ;;  %s1372_s24 = sphi %s1417_s24, %s15_s24   ;;  %s1368_s23 = sphi %s1415_s23, %s1668_s23   ;;  %s1364_s22 = sphi %s1413_s22, %s1667_s22   ;;  %s1360_s21 = sphi %s1411_s21, %s1666_s21   ;;  %s1356_s20 = sphi %s1409_s20, %s1665_s20   ;;  %s1352_s19 = sphi %s1407_s19, %s1664_s19   ;;  %s1348_s18 = sphi %s1405_s18, %s1663_s18  }
   0x5   : > { %p28_p0 = scmp.ge.s32.totalorder %s27_s25, 2  ;;  %p1088_p1 = scmp.ge.s32.totalorder %s1372_s24, 1 }
   0x6   : > { %p280_p2 = scmp.lt.s32.totalorder %s1372_s24, 17  ;;  %s34_s27 = sadd.s32 1, %s1368_s23 }
   0x7   : > { %s1670_s25 = smov (%p28_p0, %s27_s25), 0  ;;  %s1672_s26 = smov (!%p28_p0, %s30_s26), %s1364_s22 }
   0x8   : > { %p281_p3 = pnand %p1088_p1, %p280_p2  ;;  %p32_p4 = scmp.ge.s32.totalorder %s1672_s26, 4 }
   0x9   : > { %v1273_v0 = vld [vmem:[%s1660_s3 + $0x48] sm:$0xff] (!%p281_p3)   ;;  %v1374_v1 = vmov (!%p281_p3), 0   ;;  %v1274_v2 = vld [vmem:[%s1660_s3] sm:$0xff] (!%p281_p3)   ;;  %s1089_s7 = sshll.u32 (!%p281_p3), %s1348_s18, 2  ;;  %v1275_v3 = vld [vmem:[%s1660_s3 + $0x50] sm:$0xff] (!%p281_p3)   ;;  %p356_p6 = scmp.lt.s32.totalorder (!%p281_p3), %s1356_s20, 1 }
   0xa   : > { %s1674_s26 = smov (%p32_p4, %s1672_s26), 0  ;;  %s1676_s27 = smov (!%p32_p4, %s34_s27), %s1368_s23 }
   0xb   : > { %p36_p5 = scmp.ge.s32.totalorder %s1676_s27, 2  ;;  %284 = sbr.rel (%p281_p3) target bundleno = 306 (0x132), region = 40  ;;  %543 = vmatprep.subr.bf16.mxu0 (!%p281_p3), %v1374_v1  ;;  %670 = vmatprep.subr.bf16.mxu1 (!%p281_p3), %v1374_v1  ;;  %v1276_v4 = vld [vmem:[%s1660_s3 + $0x8] sm:$0xff] (!%p281_p3)   ;;  %v1277_v5 = vld [vmem:[%s1660_s3 + $0x58] sm:$0xff] (!%p281_p3)   ;;  %v1278_v6 = vld [vmem:[%s1660_s3 + $0x10] sm:$0xff] (!%p281_p3)   ;;  %vm536_vm0 = vcmask (!%p281_p3), 130048  }
   0xc   : > { %544 = vmatpush1.bf16.msra.mxu0 (!%p281_p3), %v1273_v0  ;;  %671 = vmatpush1.bf16.msra.mxu1 (!%p281_p3), %v1274_v2  ;;  %p360_p7 = scmp.lt.s32.totalorder (!%p281_p3), %s1089_s7, 7  ;;  %v1279_v7 = vld [vmem:[%s1660_s3 + $0x60] sm:$0xff] (!%p281_p3)   ;;  %s370_s18 = sadd.s32 (!%p281_p3), 1, %s1352_s19  ;;  %v1280_v8 = vld [vmem:[%s1660_s3 + $0x18] sm:$0xff] (!%p281_p3)   ;;  %v1281_v9 = vld [vmem:[%s1660_s3 + $0x68] sm:$0xff] (!%p281_p3)   ;;  %vm904_vm1 = vcmask (!%p281_p3), 60416  }
   0xd   : > { %s1678_s27 = smov (%p36_p5, %s1676_s27), 0  ;;  %545 = vmatprep.subr.bf16.mxu0 (!%p281_p3), %v1374_v1  ;;  %672 = vmatprep.subr.bf16.mxu1 (!%p281_p3), %v1374_v1  ;;  %p374_p8 = scmp.lt.s32.totalorder (!%p281_p3), %s370_s18, 5  ;;  %v1282_v10 = vld [vmem:[%s1660_s3 + $0x20] sm:$0xff] (!%p281_p3)   ;;  %v1283_v11 = vld [vmem:[%s1660_s3 + $0x70] sm:$0xff] (!%p281_p3)   ;;  %v1284_v12 = vld [vmem:[%s1660_s3 + $0x28] sm:$0xff] (!%p281_p3)  }
   0xe   : > { %s387_s30 = sadd.s32 (!%p281_p3), 2, %s1352_s19  ;;  %p358_p10 = scmp.lt.s32.totalorder (!%p281_p3), %s1352_s19, 5  ;;  %v1285_v14 = vld [vmem:[%s1660_s3 + $0x78] sm:$0xff] (!%p281_p3)   ;;  %v1286_v15 = vld [vmem:[%s1660_s3 + $0x30] sm:$0xff] (!%p281_p3)   ;;  %v1287_v16 = vld [vmem:[%s1660_s3 + $0x80] sm:$0xff] (!%p281_p3)  }
   0xf   : > { %p391_p9 = scmp.lt.s32.totalorder (!%p281_p3), %s387_s30, 5  ;;  %v1288_v17 = vld [vmem:[%s1660_s3 + $0x38] sm:$0xff] (!%p281_p3)   ;;  %v1289_v19 = vld [vmem:[%s1660_s3 + $0x88] sm:$0xff] (!%p281_p3)   ;;  %v1290_v20 = vld [vmem:[%s1660_s3 + $0x40] sm:$0xff] (!%p281_p3)   ;;  %p407_p11 = scmp.lt.s32.totalorder (!%p281_p3), %s1352_s19, 3 }
  0x10   : > { %546 = vmatpush1.bf16.msra.mxu0 (!%p281_p3), %v1275_v3  ;;  %673 = vmatpush1.bf16.msra.mxu1 (!%p281_p3), %v1276_v4  ;;  %v1297_v23 = vld [vmem:[%s1660_s3 + $0x90] sm:$0xff] (!%p281_p3)   ;;  %v1298_v26 = vld [vmem:[%s1660_s3 + $0x98] sm:$0xff] (!%p281_p3)   ;;  %v1299_v28 = vld [vmem:[%s1660_s3 + $0xa0] sm:$0xff] (!%p281_p3)  }
  0x11   : > { %547 = vmatprep.subr.bf16.mxu0 (!%p281_p3), %v1374_v1  ;;  %674 = vmatprep.subr.bf16.mxu1 (!%p281_p3), %v1374_v1  ;;  %v1300_v32 = vld [vmem:[%s1660_s3 + $0xa8] sm:$0xff] (!%p281_p3)   ;;  %v1301_v33 = vld [vmem:[%s1660_s3 + $0xb0] sm:$0xff] (!%p281_p3)   ;;  %v1302_v34 = vld [vmem:[%s1660_s3 + $0xb8] sm:$0xff] (!%p281_p3)  }
  0x12   : > { %s1680_s20 = smov (!%p356_p6, %s1356_s20), 1  ;;  %s1682_s7 = smov (!%p360_p7, %s1089_s7), 7  ;;  %v1309_v35 = vld [vmem:[%s1660_s3 + $0xc0] sm:$0xff]   ;;  %v1310_v36 = vld [vmem:[%s1660_s3 + $0xc8] sm:$0xff]   ;;  %v1311_v37 = vld [vmem:[%s1660_s3 + $0xd0] sm:$0xff]  }
  0x13   : > { %s1489_s28 = smul.u32 96, %s1680_s20  ;;  %s1492_s29 = sshll.u32 %s1682_s7, 1  ;;  %v1186_v61 = vld [vmem:[%s1661_s4] ss:$0 sm:$0xff] }
  0x14   : > { %548 = vmatpush1.bf16.msra.mxu0 %v1277_v5  ;;  %675 = vmatpush1.bf16.msra.mxu1 %v1278_v6  ;;  %s1684_s18 = smov (!%p374_p8, %s370_s18), 5  ;;  %s1686_s30 = smov (!%p391_p9, %s387_s30), 5 }
  0x15   : > { %549 = vmatprep.subr.bf16.mxu0 %v1374_v1  ;;  %676 = vmatprep.subr.bf16.mxu1 %v1374_v1  ;;  %s1095_s9 = sshll.u32 %s1684_s18, 4  ;;  %s1099_s13 = sshll.u32 %s1686_s30, 4 }
  0x16   : > { %s380_s12 = sadd.s32 %s1095_s9, %s1492_s29  ;;  %s397_s17 = sadd.s32 %s1099_s13, %s1492_s29 }
  0x17   : > { %s382_s15 = sadd.s32 %s1489_s28, %s380_s12 }
  0x18   : > { %550 = vmatpush1.bf16.msra.mxu0 %v1279_v7  ;;  %677 = vmatpush1.bf16.msra.mxu1 %v1280_v8  ;;  %s1096_s16 = sshll.u32 %s382_s15, 2 }
  0x19   : > { %551 = vmatprep.subr.bf16.mxu0 %v1374_v1  ;;  %678 = vmatprep.subr.bf16.mxu1 %v1374_v1  ;;  %s1514_s6 = scalar_lea.vmem %s1658_s1, %s1096_s16 }
  0x1a   : > { %v1293_v13 = vld [vmem:[%s1514_s6 + $0x4] ss:$8 sps:$4 sm:$0xff]   ;;  %s359_s12 = scalar_select %p358_p10, %s1352_s19, 5  ;;  %v1291_v21 = vld [vmem:[%s1514_s6] ss:$8 sps:$4 sm:$0xff]  }
  0x1b   : > { %1136 = vmatprep.mubr.msk.bf16.mxu0 %vm536_vm0, %v1293_v13  ;;  %v1303_v24 = vld [vmem:[%s1514_s6 + $0x14] ss:$8 sps:$4 sm:$0xff]   ;;  %v1307_v27 = vld [vmem:[%s1514_s6 + $0x10] ss:$8 sps:$4 sm:$0xff]   ;;  %s1688_s19 = smov (!%p407_p11, %s1352_s19), 3 }
  0x1c   : > { %552 = vmatpush1.bf16.msra.mxu0 %v1281_v9  ;;  %679 = vmatpush1.bf16.msra.mxu1 %v1282_v10  ;;  %s1091_s16 = sshll.u32 %s359_s12, 4  ;;  %s399_s12 = sadd.s32 %s1489_s28, %s397_s17 }
  0x1d   : > { %553 = vmatprep.subr.bf16.mxu0 %v1374_v1  ;;  %680 = vmatprep.subr.bf16.mxu1 %v1374_v1  ;;  %s364_s18 = sadd.s32 %s1091_s16, %s1492_s29  ;;  %s1100_s8 = sshll.u32 %s399_s12, 2 }
  0x1e   : > { %s366_s10 = sadd.s32 %s1489_s28, %s364_s18  ;;  %s1564_s14 = scalar_lea.vmem %s1659_s2, %s1100_s8 }
  0x1f   : > { %s1092_s30 = sshll.u32 %s366_s10, 2  ;;  %v1314_v30 = vld [vmem:[%s1564_s14 + $0x4] ss:$8 sps:$4 sm:$0xff]   ;;  %v1317_v31 = vld [vmem:[%s1564_s14 + $0x14] ss:$8 sps:$4 sm:$0xff]   ;;  %s1103_s8 = sshll.u32 %s1680_s20, 5 }
  0x20   : > { %554 = vmatpush1.bf16.msra.mxu0 %v1283_v11  ;;  %681 = vmatpush1.bf16.msra.mxu1 %v1284_v12  ;;  %s1541_s15 = scalar_lea.vmem %s1657_s0, %s1092_s30  ;;  %v1312_v38 = vld [vmem:[%s1564_s14] ss:$8 sps:$4 sm:$0xff]   ;;  %v1315_v39 = vld [vmem:[%s1564_s14 + $0x10] ss:$8 sps:$4 sm:$0xff]   ;;  %s1102_s14 = sshll.u32 %s1688_s19, 3 }
  0x21   : > { %555 = vmatprep.subr.bf16.mxu0 %v1374_v1  ;;  %682 = vmatprep.subr.bf16.mxu1 %v1374_v1  ;;  %v1296_v18 = vld [vmem:[%s1541_s15 + $0x4] ss:$8 sps:$4 sm:$0xff]   ;;  %v1294_v22 = vld [vmem:[%s1541_s15] ss:$8 sps:$4 sm:$0xff]   ;;  %v1305_v25 = vld [vmem:[%s1541_s15 + $0x14] ss:$8 sps:$4 sm:$0xff]   ;;  %s412_s18 = sadd.s32 %s1102_s14, %s1682_s7 }
  0x22   : > { %1151 = vmatprep.mubr.msk.bf16.mxu1 %vm536_vm0, %v1296_v18  ;;  %v1308_v29 = vld [vmem:[%s1541_s15 + $0x10] ss:$8 sps:$4 sm:$0xff]   ;;  %s414_s28 = sadd.s32 %s1103_s8, %s412_s18 }
  0x23   : > { %s1104_s15 = sshll.u32 %s414_s28, 2 }
  0x24   : > { %556 = vmatpush1.bf16.msra.mxu0 %v1285_v14  ;;  %683 = vmatpush1.bf16.msra.mxu1 %v1286_v15  ;;  %s416_s7 = scalar_lea.vmem %s1662_s5, %s1104_s15 }
  0x25   : > { %557 = vmatprep.subr.bf16.mxu0 %v1374_v1  ;;  %684 = vmatprep.subr.bf16.mxu1 %v1374_v1 }
  0x28   : > { %558 = vmatpush1.bf16.msra.mxu0 %v1287_v16  ;;  %685 = vmatpush1.bf16.msra.mxu1 %v1288_v17 }
  0x29   : > { %559 = vmatprep.subr.bf16.mxu0 %v1374_v1  ;;  %686 = vmatprep.subr.bf16.mxu1 %v1374_v1 }
  0x2c   : > { %560 = vmatpush1.bf16.msra.mxu0 %v1289_v19  ;;  %687 = vmatpush1.bf16.msra.mxu1 %v1290_v20 }
  0x2d   : > { %820 = vmatprep.subr.bf16.mxu0 %v1374_v1  ;;  %1197 = vmatprep.subr.bf16.mxu1 %v1374_v1 }
  0x2f   : > { %576 = vmatmul.mubr.bf16.vlgmr.msra.gmra.mrb[0].mxu0 %v1291_v21  ;;  %703 = vmatmul.mubr.bf16.vlgmr.msra.gmra.mrb[0].mxu1 %v1294_v22 }
  0x30   : > { %821 = vmatpush1.bf16.msra.mxu0 %v1297_v23  ;;  %1206 = vmatpush1.bf16.msra.mxu1 %v1297_v23 }
  0x31   : > { %822 = vmatprep.subr.bf16.mxu0 %v1374_v1  ;;  %1198 = vmatprep.subr.bf16.mxu1 %v1374_v1 }
  0x32   : > { %1137 = vmatprep.mubr.msk.bf16.mxu0 %vm536_vm0, %v1303_v24  ;;  %1152 = vmatprep.mubr.msk.bf16.mxu1 %vm536_vm0, %v1305_v25 }
  0x34   : > { %823 = vmatpush1.bf16.msra.mxu0 %v1298_v26  ;;  %1207 = vmatpush1.bf16.msra.mxu1 %v1298_v26 }
  0x35   : > { %824 = vmatprep.subr.bf16.mxu0 %v1374_v1  ;;  %1199 = vmatprep.subr.bf16.mxu1 %v1374_v1 }
  0x37   : > { %584 = vmatmul.mubr.bf16.gmra.mrb[4].mxu0 %v1307_v27  ;;  %711 = vmatmul.mubr.bf16.gmra.mrb[4].mxu1 %v1308_v29 }
  0x38   : > { %825 = vmatpush1.bf16.msra.mxu0 %v1299_v28  ;;  %1208 = vmatpush1.bf16.msra.mxu1 %v1299_v28 }
  0x39   : > { %826 = vmatprep.subr.bf16.mxu0 %v1374_v1  ;;  %1200 = vmatprep.subr.bf16.mxu1 %v1374_v1 }
  0x3a   : > { %1184 = vmatprep.mubr.msk.bf16.mxu0 %vm536_vm0, %v1314_v30  ;;  %1185 = vmatprep.mubr.msk.bf16.mxu1 %vm536_vm0, %v1317_v31 }
  0x3c   : > { %827 = vmatpush1.bf16.msra.mxu0 %v1300_v32  ;;  %1209 = vmatpush1.bf16.msra.mxu1 %v1300_v32 }
  0x3d   : > { %828 = vmatprep.subr.bf16.mxu0 %v1374_v1  ;;  %1201 = vmatprep.subr.bf16.mxu1 %v1374_v1 }
  0x40   : > { %829 = vmatpush1.bf16.msra.mxu0 %v1301_v33  ;;  %1210 = vmatpush1.bf16.msra.mxu1 %v1301_v33 }
  0x41   : > { %830 = vmatprep.subr.bf16.mxu0 %v1374_v1  ;;  %1202 = vmatprep.subr.bf16.mxu1 %v1374_v1 }
  0x44   : > { %831 = vmatpush1.bf16.msra.mxu0 %v1302_v34  ;;  %1211 = vmatpush1.bf16.msra.mxu1 %v1302_v34 }
  0x45   : > { %832 = vmatprep.subr.bf16.mxu0 %v1374_v1  ;;  %1203 = vmatprep.subr.bf16.mxu1 %v1374_v1 }
  0x48   : > { %833 = vmatpush1.bf16.msra.mxu0 %v1309_v35  ;;  %1212 = vmatpush1.bf16.msra.mxu1 %v1309_v35 }
  0x49   : > { %834 = vmatprep.subr.bf16.mxu0 %v1374_v1  ;;  %1204 = vmatprep.subr.bf16.mxu1 %v1374_v1 }
  0x4c   : > { %835 = vmatpush1.bf16.msra.mxu0 %v1310_v36  ;;  %1213 = vmatpush1.bf16.msra.mxu1 %v1310_v36 }
  0x4d   : > { %836 = vmatprep.subr.bf16.mxu0 %v1374_v1  ;;  %1205 = vmatprep.subr.bf16.mxu1 %v1374_v1 }
  0x50   : > { %837 = vmatpush1.bf16.msra.mxu0 %v1311_v37  ;;  %1214 = vmatpush1.bf16.msra.mxu1 %v1311_v37 }
  0x53   : > { %853 = vmatmul.mubr.bf16.vlgmr.msra.gmra.mrb[8].mxu0 %v1312_v38  ;;  %861 = vmatmul.mubr.bf16.vlgmr.msra.gmra.mrb[8].mxu1 %v1315_v39 }
 0x102   : > { %v577_v40 = vpop.f32.mrb[0].mxu0  ;;  %v704_v41 = vpop.f32.mrb[0].mxu1 }
 0x103   : > { %v579_v42 = vpop.f32.mrb[1].mxu0  ;;  %v705_v43 = vadd.f32 %v704_v41, %v577_v40  ;;  %v706_v44 = vpop.f32.mrb[1].mxu1 }
 0x104   : > { %v580_v45 = vpop.f32.mrb[2].mxu0  ;;  %v707_v46 = vpop.f32.mrb[2].mxu1 }
 0x105   : > { %v582_v47 = vpop.f32.mrb[3].mxu0  ;;  %v708_v48 = vadd.f32 %v707_v46, %v580_v45  ;;  %v709_v49 = vpop.f32.mrb[3].mxu1 }
 0x10a   : > { %v585_v50 = vpop.f32.mrb[4].mxu0  ;;  %v712_v51 = vpop.f32.mrb[4].mxu1 }
 0x10b   : > { %v587_v52 = vpop.f32.mrb[5].mxu0  ;;  %v713_v53 = vadd.f32 %v712_v51, %v585_v50  ;;  %v714_v54 = vpop.f32.mrb[5].mxu1 }
 0x10c   : > { %v588_v55 = vpop.f32.mrb[6].mxu0  ;;  %v715_v56 = vpop.f32.mrb[6].mxu1 }
 0x10d   : > { %v590_v57 = vpop.f32.mrb[7].mxu0  ;;  %v716_v58 = vadd.f32 %v715_v56, %v588_v55  ;;  %v717_v59 = vpop.f32.mrb[7].mxu1 }
 0x126   : > { %v854_v60 = vpop.f32.mrb[8].mxu0  ;;  %v862_v63 = vpop.f32.mrb[8].mxu1 }
 0x127   : > { %v869_v62 = vadd.f32 %v854_v60, %v705_v43  ;;  %v856_v0 = vpop.f32.mrb[9].mxu0  ;;  %v871_v1 = vadd.f32 %v862_v63, %v713_v53  ;;  %v864_v2 = vpop.f32.mrb[9].mxu1 }
 0x128   : > { %v857_v3 = vpop.f32.mrb[10].mxu0  ;;  %v865_v6 = vpop.f32.mrb[10].mxu1 }
 0x129   : > { %v880_v4 = vadd.f32 %v1186_v61, %v869_v62  ;;  %v870_v5 = vadd.f32 %v857_v3, %v708_v48  ;;  %v859_v7 = vpop.f32.mrb[11].mxu0  ;;  %v882_v8 = vadd.f32 %v1186_v61, %v871_v1  ;;  %v872_v9 = vadd.f32 %v865_v6, %v716_v58  ;;  %v867_v10 = vpop.f32.mrb[11].mxu1 }
 0x12b   : > { %v884_v11 = vmax.f32 %v880_v4, 0.0  ;;  %v881_v12 = vadd.f32 %v1186_v61, %v870_v5  ;;  %v886_v13 = vmax.f32 %v882_v8, 0.0  ;;  %v883_v14 = vadd.f32 %v1186_v61, %v872_v9 }
 0x12d   : > { %v1193_v15 = vpack.c.bf16 %v884_v11, %v884_v11  ;;  %v885_v16 = vmax.f32 %v881_v12, 0.0  ;;  %v1195_v17 = vpack.c.bf16 %v886_v13, %v886_v13  ;;  %v887_v18 = vmax.f32 %v883_v14, 0.0 }
 0x12f   : > { %905 = vst.msk [vmem:[%s416_s7] sm:$0xf] %vm904_vm1, %v1193_v15  ;;  %v1194_v19 = vpack.c.bf16 %v885_v16, %v885_v16  ;;  %907 = vst.msk [vmem:[%s416_s7 + $0x8] sm:$0xf] %vm904_vm1, %v1195_v17  ;;  %v1196_v20 = vpack.c.bf16 %v887_v18, %v887_v18 }
 0x131   : > { %906 = vst.msk [vmem:[%s416_s7 + $0x4] sm:$0xf] %vm904_vm1, %v1194_v19  ;;  %908 = vst.msk [vmem:[%s416_s7 + $0xc] sm:$0xf] %vm904_vm1, %v1196_v20 }
 0x132 PF: > { %s15_s24 = sadd.s32 1, %s1372_s24   ;;  %s1663_s18 = smov %s1360_s21 }
 0x133   : > { %p12_p12 = scmp.ge.s32.totalorder %s15_s24, 18   ;;  %s1664_s19 = smov %s1364_s22 }
 0x134   : > { %s1665_s20 = smov %s1368_s23  ;;  %s1666_s21 = smov %s1670_s25 }
 0x135   : > { %s1667_s22 = smov %s1674_s26  ;;  %s1668_s23 = smov %s1678_s27 }
 0x136   :  { %14 = sbr.rel (!%p12_p12) target bundleno = 4 (0x4), region = 78 }

// kernel: unet3d_forward.30
= control target key start
LH: loop header
LB: loop body
LE: loop exit
PB: predicated region body
PF: predicated region fallthrough
CT: control target
= control target key end

     0   :  { %s1843_s18 = smov 0   ;;  %s1845_s19 = smov 0   ;;  %s2127_s0 = inlined_call_operand.vmem [shape: bf16[2,10,256,72], index: 0, kind: input, shape index: {}, may-alias: {0,1,2}]   ;;  %s2128_s1 = inlined_call_operand.vmem [shape: bf16[2,10,256,72], index: 1, kind: input, shape index: {}, may-alias: {0,1,2}]   ;;  %s2129_s2 = inlined_call_operand.vmem [shape: bf16[2,10,256,72], index: 2, kind: input, shape index: {}, may-alias: {0,1,2}]   ;;  %s2130_s3 = inlined_call_operand.vmem [shape: bf16[3,72,4], index: 3, kind: input, shape index: {}]   ;;  %s2131_s4 = inlined_call_operand.vmem [shape: f32[1,4], index: 4, kind: input, shape index: {}]   ;;  %s2132_s5 = inlined_call_operand.vmem [shape: bf16[2,8,256,4], index: 5, kind: output, shape index: {}]  }
   0x1   :  { %s1847_s20 = smov 0   ;;  %s1849_s21 = smov 0  }
   0x2   :  { %s1851_s22 = smov 0   ;;  %s1853_s23 = smov 0  }
   0x3   :  { %s1855_s24 = smov 0  }
   0x4 LB: > { %s27_s25 = sadd.s32 1, %s1799_s21  ;;  %s30_s26 = sadd.s32 1, %s1803_s22  ;;  %s1811_s24 = sphi %s1855_s24, %s15_s24   ;;  %s1807_s23 = sphi %s1853_s23, %s2138_s23   ;;  %s1803_s22 = sphi %s1851_s22, %s2137_s22   ;;  %s1799_s21 = sphi %s1849_s21, %s2136_s21   ;;  %s1795_s20 = sphi %s1847_s20, %s2135_s20   ;;  %s1791_s19 = sphi %s1845_s19, %s2134_s19   ;;  %s1787_s18 = sphi %s1843_s18, %s2133_s18  }
   0x5   : > { %p28_p0 = scmp.ge.s32.totalorder %s27_s25, 2  ;;  %p1368_p1 = scmp.ge.s32.totalorder %s1811_s24, 1 }
   0x6   : > { %p277_p2 = scmp.lt.s32.totalorder %s1811_s24, 33  ;;  %s34_s27 = sadd.s32 1, %s1807_s23 }
   0x7   : > { %s2140_s25 = smov (%p28_p0, %s27_s25), 0  ;;  %s2142_s26 = smov (!%p28_p0, %s30_s26), %s1803_s22 }
   0x8   : > { %p278_p3 = pnand %p1368_p1, %p277_p2  ;;  %p32_p4 = scmp.ge.s32.totalorder %s2142_s26, 8 }
   0x9   : > { %v1718_v0 = vld [vmem:[%s2130_s3 + $0x24] sm:$0xff] (!%p278_p3)   ;;  %s1369_s7 = sshll.u32 (!%p278_p3), %s1787_s18, 4  ;;  %v1720_v2 = vld [vmem:[%s2130_s3 + $0x2c] sm:$0xff] (!%p278_p3)   ;;  %p350_p6 = scmp.lt.s32.totalorder (!%p278_p3), %s1795_s20, 1  ;;  %v1722_v4 = vld [vmem:[%s2130_s3 + $0x34] sm:$0xff] (!%p278_p3)   ;;  %vm553_vm0 = vcmask (!%p278_p3), 1043456  }
   0xa   : > { %s2144_s26 = smov (%p32_p4, %s2142_s26), 0  ;;  %s2146_s27 = smov (!%p32_p4, %s34_s27), %s1807_s23 }
   0xb   : > { %p36_p5 = scmp.ge.s32.totalorder %s2146_s27, 2  ;;  %281 = sbr.rel (%p278_p3) target bundleno = 297 (0x129), region = 40  ;;  %v1719_v1 = vld [vmem:[%s2130_s3] sm:$0xff] (!%p278_p3)   ;;  %1537 = vmatprep.subr.bf16.mxu1 (!%p278_p3), %v1718_v0  ;;  %v1721_v3 = vld [vmem:[%s2130_s3 + $0x8] sm:$0xff] (!%p278_p3)   ;;  %v1723_v5 = vld [vmem:[%s2130_s3 + $0x10] sm:$0xff] (!%p278_p3)   ;;  %vm528_vm1 = vcmask (!%p278_p3), 588800  }
   0xc   : > { %1563 = vmatprep.subr.bf16.mxu0 (!%p278_p3), %v1719_v1  ;;  %1538 = vmatpush3.bf16.msra.mxu1 (!%p278_p3), %v1718_v0  ;;  %p354_p7 = scmp.lt.s32.totalorder (!%p278_p3), %s1369_s7, 31  ;;  %s363_s16 = sadd.s32 (!%p278_p3), 1, %s1791_s19  ;;  %v1724_v6 = vld [vmem:[%s2130_s3 + $0x3c] sm:$0xff] (!%p278_p3)   ;;  %v1726_v8 = vld [vmem:[%s2130_s3 + $0x44] ss:$0 sps:$4 sm:$0xff] (!%p278_p3)   ;;  %v1732_v12 = vld [vmem:[%s2130_s3 + $0x48] sm:$0xff] (!%p278_p3)  }
   0xd   : > { %s2148_s27 = smov (%p36_p5, %s2146_s27), 0  ;;  %1564 = vmatpush3.bf16.msra.mxu0 (!%p278_p3), %v1719_v1  ;;  %1539 = vmatprep.subr.bf16.mxu1 (!%p278_p3), %v1720_v2  ;;  %v1725_v7 = vld [vmem:[%s2130_s3 + $0x18] sm:$0xff] (!%p278_p3)   ;;  %p367_p8 = scmp.lt.s32.totalorder (!%p278_p3), %s363_s16, 9  ;;  %v1727_v9 = vld [vmem:[%s2130_s3 + $0x20] ss:$0 sps:$4 sm:$0xff] (!%p278_p3)   ;;  %v555_v10 = vsel (!%p278_p3), %vm553_vm0, %v1726_v8, 0 }
   0xe   : > { %1565 = vmatprep.subr.bf16.mxu0 (!%p278_p3), %v1721_v3  ;;  %p352_p9 = scmp.lt.s32.totalorder (!%p278_p3), %s1791_s19, 9  ;;  %v746_v11 = vsel (!%p278_p3), %vm553_vm0, %v1727_v9, 0  ;;  %v1735_v15 = vld [vmem:[%s2130_s3 + $0x50] sm:$0xff] (!%p278_p3)   ;;  %v1738_v20 = vld [vmem:[%s2130_s3 + $0x58] sm:$0xff] (!%p278_p3)   ;;  %v1743_v23 = vld [vmem:[%s2130_s3 + $0x60] sm:$0xff] (!%p278_p3)   ;;  %p398_p11 = scmp.lt.s32.totalorder (!%p278_p3), %s1791_s19, 7 }
   0xf   : > { %v1748_v26 = vld [vmem:[%s2130_s3 + $0x68] ss:$0 sps:$4 sm:$0xff] (!%p278_p3)   ;;  %vm1181_vm2 = vcmask (!%p278_p3), 27648  }
  0x10   : > { %1540 = vmatpush3.bf16.msra.mxu1 (!%p278_p3), %v1720_v2  ;;  %v963_v31 = vsel (!%p278_p3), %vm553_vm0, %v1748_v26, 0 }
  0x11   : > { %1566 = vmatpush3.bf16.msra.mxu0 (!%p278_p3), %v1721_v3  ;;  %1541 = vmatprep.subr.bf16.mxu1 (!%p278_p3), %v1722_v4 }
  0x12   : > { %s2150_s20 = smov (!%p350_p6, %s1795_s20), 1  ;;  %s2152_s7 = smov (!%p354_p7, %s1369_s7), 31  ;;  %1567 = vmatprep.subr.bf16.mxu0 %v1723_v5 }
  0x13   : > { %s1921_s28 = smul.u32 320, %s2150_s20  ;;  %s2154_s16 = smov (!%p367_p8, %s363_s16), 9 }
  0x14   : > { %1542 = vmatpush3.bf16.msra.mxu1 %v1722_v4  ;;  %s353_s11 = scalar_select %p352_p9, %s1791_s19, 9 }
  0x15   : > { %1568 = vmatpush3.bf16.msra.mxu0 %v1723_v5  ;;  %1543 = vmatprep.subr.bf16.mxu1 %v1724_v6  ;;  %s1373_s12 = sshll.u32 %s2154_s16, 5 }
  0x16   : > { %1569 = vmatprep.subr.bf16.mxu0 %v1725_v7  ;;  %s372_s13 = sadd.s32 %s1373_s12, %s2152_s7  ;;  %s1370_s14 = sshll.u32 %s353_s11, 5 }
  0x17   : > { %s374_s15 = sadd.s32 %s1921_s28, %s372_s13  ;;  %s357_s17 = sadd.s32 %s1370_s14, %s2152_s7 }
  0x18   : > { %1544 = vmatpush3.bf16.msra.mxu1 %v1724_v6  ;;  %s1374_s18 = sshll.u32 %s374_s15, 2  ;;  %s359_s29 = sadd.s32 %s1921_s28, %s357_s17 }
  0x19   : > { %1570 = vmatpush3.bf16.msra.mxu0 %v1725_v7  ;;  %1657 = vmatprep.subr.msk.bf16.mxu1 %vm553_vm0, %v1726_v8  ;;  %s1945_s16 = scalar_lea.vmem %s2128_s1, %s1374_s18  ;;  %s1371_s8 = sshll.u32 %s359_s29, 2 }
  0x1a   : > { %1658 = vmatprep.subr.msk.bf16.mxu0 %vm553_vm0, %v1727_v9  ;;  %v1728_v13 = vld [vmem:[%s1945_s16] sm:$0xff]   ;;  %s1954_s13 = scalar_lea.vmem %s2127_s0, %s1371_s8  ;;  %s379_s14 = sadd.s32 2, %s1791_s19  ;;  %v1730_v16 = vld [vmem:[%s1945_s16 + $0x8] sm:$0xff]   ;;  %v1733_v18 = vld [vmem:[%s1945_s16 + $0x10] sm:$0xff]  }
  0x1b   : > { %v1729_v14 = vld [vmem:[%s1954_s13] sm:$0xff]   ;;  %p383_p10 = scmp.lt.s32.totalorder %s379_s14, 9  ;;  %1547 = vmatprep.mubr.msk.bf16.mxu1 %vm528_vm1, %v1728_v13  ;;  %v1731_v17 = vld [vmem:[%s1954_s13 + $0x8] sm:$0xff]   ;;  %v1734_v19 = vld [vmem:[%s1954_s13 + $0x10] sm:$0xff]   ;;  %s2158_s19 = smov (!%p398_p11, %s1791_s19), 7 }
  0x1c   : > { %1546 = vmatpush3.bf16.msra.mxu1 %v555_v10  ;;  %1573 = vmatprep.mubr.msk.bf16.mxu0 %vm528_vm1, %v1729_v14  ;;  %v1736_v21 = vld [vmem:[%s1945_s16 + $0x18] sm:$0xff]   ;;  %v1739_v24 = vld [vmem:[%s1945_s16 + $0x20] sm:$0xff]   ;;  %v1741_v27 = vld [vmem:[%s1945_s16 + $0x28] sm:$0xff]  }
  0x1d   : > { %1572 = vmatpush3.bf16.msra.mxu0 %v746_v11  ;;  %s2156_s14 = smov (!%p383_p10, %s379_s14), 9  ;;  %1615 = vmatprep.subr.bf16.mxu1 %v1732_v12  ;;  %v1737_v22 = vld [vmem:[%s1954_s13 + $0x18] sm:$0xff]   ;;  %v1740_v25 = vld [vmem:[%s1954_s13 + $0x20] sm:$0xff]   ;;  %v1742_v28 = vld [vmem:[%s1954_s13 + $0x28] sm:$0xff]  }
  0x1e   : > { %1589 = vmatprep.subr.bf16.mxu0 %v1732_v12  ;;  %s1376_s18 = sshll.u32 %s2156_s14, 5  ;;  %v1744_v29 = vld [vmem:[%s1945_s16 + $0x30] sm:$0xff]   ;;  %v1746_v32 = vld [vmem:[%s1945_s16 + $0x38] sm:$0xff]   ;;  %s1379_s16 = sshll.u32 %s2158_s19, 5  ;;  %v2045_v10 = vld [vmem:[%s2131_s4] ss:$0 sm:$0xff] }
  0x1f   : > { %1548 = vmatmul.mubr.msk.bf16.vlgmr.msra.gmra.mrb[0].mxu1 %vm528_vm1, %v1730_v16  ;;  %s388_s6 = sadd.s32 %s1376_s18, %s2152_s7  ;;  %v1745_v30 = vld [vmem:[%s1954_s13 + $0x30] sm:$0xff]   ;;  %v1747_v33 = vld [vmem:[%s1954_s13 + $0x38] sm:$0xff]   ;;  %s403_s13 = sadd.s32 %s1379_s16, %s2152_s7 }
  0x20   : > { %1574 = vmatmul.mubr.msk.bf16.vlgmr.msra.gmra.mrb[0].mxu0 %vm528_vm1, %v1731_v17  ;;  %1620 = vmatpush3.bf16.msra.mxu1 %v1732_v12  ;;  %s390_s10 = sadd.s32 %s1921_s28, %s388_s6  ;;  %s1380_s18 = sshll.u32 %s2150_s20, 8 }
  0x21   : > { %1590 = vmatpush3.bf16.msra.mxu0 %v1732_v12  ;;  %1551 = vmatprep.mubr.msk.bf16.mxu1 %vm528_vm1, %v1733_v18  ;;  %s1377_s11 = sshll.u32 %s390_s10, 2  ;;  %s405_s29 = sadd.s32 %s1380_s18, %s403_s13 }
  0x22   : > { %1577 = vmatprep.mubr.msk.bf16.mxu0 %vm528_vm1, %v1734_v19  ;;  %1591 = vmatprep.subr.bf16.mxu0 %v1735_v15  ;;  %s1994_s17 = scalar_lea.vmem %s2129_s2, %s1377_s11  ;;  %s1381_s19 = sshll.u32 %s405_s29, 2 }
  0x23   : > { %1616 = vmatprep.subr.bf16.mxu1 %v1735_v15  ;;  %v1750_v34 = vld [vmem:[%s1994_s17 + $0x20] sm:$0xff]   ;;  %v1752_v36 = vld [vmem:[%s1994_s17 + $0x28] sm:$0xff]   ;;  %v1754_v38 = vld [vmem:[%s1994_s17 + $0x30] sm:$0xff]   ;;  %s2055_s8 = scalar_lea.vmem %s2132_s5, %s1381_s19 }
  0x24   : > { %1621 = vmatpush3.bf16.msra.mxu1 %v1735_v15  ;;  %v1749_v35 = vld [vmem:[%s1994_s17] sm:$0xff]   ;;  %v1751_v37 = vld [vmem:[%s1994_s17 + $0x8] sm:$0xff]   ;;  %v1753_v39 = vld [vmem:[%s1994_s17 + $0x10] sm:$0xff]  }
  0x25   : > { %1592 = vmatpush3.bf16.msra.mxu0 %v1735_v15  ;;  %1617 = vmatprep.subr.bf16.mxu1 %v1738_v20  ;;  %v1756_v40 = vld [vmem:[%s1994_s17 + $0x38] sm:$0xff]  }
  0x26   : > { %1593 = vmatprep.subr.bf16.mxu0 %v1738_v20  ;;  %v1755_v41 = vld [vmem:[%s1994_s17 + $0x18] sm:$0xff]  }
  0x27   : > { %1552 = vmatmul.mubr.msk.bf16.gmra.mrb[4].mxu1 %vm528_vm1, %v1736_v21 }
  0x28   : > { %1578 = vmatmul.mubr.msk.bf16.gmra.mrb[4].mxu0 %vm528_vm1, %v1737_v22  ;;  %1622 = vmatpush3.bf16.msra.mxu1 %v1738_v20 }
  0x29   : > { %1594 = vmatpush3.bf16.msra.mxu0 %v1738_v20  ;;  %1555 = vmatprep.mubr.msk.bf16.mxu1 %vm528_vm1, %v1739_v24 }
  0x2a   : > { %1581 = vmatprep.mubr.msk.bf16.mxu0 %vm528_vm1, %v1740_v25  ;;  %1595 = vmatprep.subr.bf16.mxu0 %v1743_v23 }
  0x2b   : > { %1618 = vmatprep.subr.bf16.mxu1 %v1743_v23 }
  0x2c   : > { %1623 = vmatpush3.bf16.msra.mxu1 %v1743_v23 }
  0x2d   : > { %1596 = vmatpush3.bf16.msra.mxu0 %v1743_v23  ;;  %1660 = vmatprep.subr.msk.bf16.mxu1 %vm553_vm0, %v1748_v26 }
  0x2e   : > { %1659 = vmatprep.subr.msk.bf16.mxu0 %vm553_vm0, %v1748_v26 }
  0x2f   : > { %1556 = vmatmul.mubr.msk.bf16.gmra.mrb[8].mxu1 %vm528_vm1, %v1741_v27 }
  0x30   : > { %1582 = vmatmul.mubr.msk.bf16.gmra.mrb[8].mxu0 %vm528_vm1, %v1742_v28  ;;  %1559 = vmatprep.mubr.msk.bf16.mxu1 %vm528_vm1, %v1744_v29 }
  0x31   : > { %1585 = vmatprep.mubr.msk.bf16.mxu0 %vm528_vm1, %v1745_v30  ;;  %1598 = vmatpush3.bf16.msra.mxu0 %v963_v31 }
  0x32   : > { %1624 = vmatpush3.bf16.msra.mxu1 %v963_v31 }
  0x37   : > { %1560 = vmatmul.mubr.msk.bf16.gmra.mrb[12].mxu1 %vm528_vm1, %v1746_v32 }
  0x38   : > { %1586 = vmatmul.mubr.msk.bf16.gmra.mrb[12].mxu0 %vm528_vm1, %v1747_v33  ;;  %1607 = vmatprep.mubr.msk.bf16.mxu1 %vm528_vm1, %v1750_v34 }
  0x39   : > { %1599 = vmatprep.mubr.msk.bf16.mxu0 %vm528_vm1, %v1749_v35 }
  0x3f   : > { %1608 = vmatmul.mubr.msk.bf16.vlgmr.msra.gmra.mrb[16].mxu1 %vm528_vm1, %v1752_v36 }
  0x40   : > { %1600 = vmatmul.mubr.msk.bf16.vlgmr.msra.gmra.mrb[0].mxu0 %vm528_vm1, %v1751_v37  ;;  %1611 = vmatprep.mubr.msk.bf16.mxu1 %vm528_vm1, %v1754_v38 }
  0x41   : > { %1603 = vmatprep.mubr.msk.bf16.mxu0 %vm528_vm1, %v1753_v39 }
  0x47   : > { %1612 = vmatmul.mubr.msk.bf16.gmra.mrb[20].mxu1 %vm528_vm1, %v1756_v40 }
  0x48   : > { %1604 = vmatmul.mubr.msk.bf16.gmra.mrb[4].mxu0 %vm528_vm1, %v1755_v41 }
  0xf2   : > { %v1549_v42 = vpop.f32.mrb[0].mxu1 }
  0xf3   : > { %v591_v43 = vpop.f32.mrb[1].mxu1 }
  0xf4   : > { %v1550_v44 = vpop.f32.mrb[2].mxu1 }
  0xf5   : > { %v594_v45 = vpop.f32.mrb[3].mxu1 }
  0xfa   : > { %v2026_v46 = vpop.f32.mrb[4].mxu1 }
  0xfb   : > { %v2028_v47 = vpop.f32.mrb[5].mxu1 }
  0xfc   : > { %v2030_v48 = vpop.f32.mrb[6].mxu1 }
  0xfd   : > { %v2032_v49 = vpop.f32.mrb[7].mxu1 }
 0x102   : > { %v1557_v50 = vpop.f32.mrb[8].mxu1 }
 0x103   : > { %v1583_v51 = vpop.f32.mrb[8].mxu0  ;;  %v623_v52 = vpop.f32.mrb[9].mxu1 }
 0x104   : > { %v823_v53 = vadd.f32 %v1583_v51, %v1557_v50  ;;  %v814_v54 = vpop.f32.mrb[9].mxu0  ;;  %v1558_v55 = vpop.f32.mrb[10].mxu1 }
 0x105   : > { %v815_v56 = vadd.f32 %v814_v54, %v623_v52  ;;  %v1584_v57 = vpop.f32.mrb[10].mxu0  ;;  %v626_v58 = vpop.f32.mrb[11].mxu1 }
 0x106   : > { %v826_v59 = vadd.f32 %v1584_v57, %v1558_v55  ;;  %v817_v60 = vpop.f32.mrb[11].mxu0 }
 0x107   : > { %v818_v61 = vadd.f32 %v817_v60, %v626_v58 }
 0x10a   : > { %v1561_v62 = vpop.f32.mrb[12].mxu1 }
 0x10b   : > { %v1587_v63 = vpop.f32.mrb[12].mxu0  ;;  %v639_v0 = vpop.f32.mrb[13].mxu1 }
 0x10c   : > { %v839_v1 = vadd.f32 %v1587_v63, %v1561_v62  ;;  %v830_v2 = vpop.f32.mrb[13].mxu0  ;;  %v1562_v3 = vpop.f32.mrb[14].mxu1 }
 0x10d   : > { %v831_v4 = vadd.f32 %v830_v2, %v639_v0  ;;  %v1588_v5 = vpop.f32.mrb[14].mxu0  ;;  %v642_v6 = vpop.f32.mrb[15].mxu1 }
 0x10e   : > { %v2036_v7 = vadd.f32 %v1588_v5, %v1562_v3  ;;  %v833_v8 = vpop.f32.mrb[15].mxu0 }
 0x10f   : > { %v2038_v9 = vadd.f32 %v833_v8, %v642_v6 }
 0x112   : > { %v1609_v11 = vpop.f32.mrb[16].mxu1 }
 0x113   : > { %v1601_v12 = vpop.f32.mrb[0].mxu0  ;;  %v1072_v13 = vadd.f32 %v1609_v11, %v823_v53  ;;  %v1031_v14 = vpop.f32.mrb[17].mxu1 }
 0x114   : > { %v1625_v15 = vadd.f32 %v1601_v12, %v1549_v42  ;;  %v999_v16 = vpop.f32.mrb[1].mxu0  ;;  %v1070_v17 = vadd.f32 %v1031_v14, %v815_v56  ;;  %v1610_v18 = vpop.f32.mrb[18].mxu1 }
 0x115   : > { %v1095_v19 = vadd.f32 %v2045_v10, %v1072_v13  ;;  %v1626_v20 = vadd.f32 %v999_v16, %v591_v43  ;;  %v1602_v21 = vpop.f32.mrb[2].mxu0  ;;  %v1073_v22 = vadd.f32 %v1610_v18, %v826_v59  ;;  %v1034_v23 = vpop.f32.mrb[19].mxu1 }
 0x116   : > { %v1087_v24 = vadd.f32 %v1625_v15, %v2045_v10  ;;  %v1093_v25 = vadd.f32 %v2045_v10, %v1070_v17  ;;  %v1627_v26 = vadd.f32 %v1602_v21, %v1550_v44  ;;  %v1002_v27 = vpop.f32.mrb[3].mxu0  ;;  %v1071_v28 = vadd.f32 %v1034_v23, %v818_v61 }
 0x117   : > { %v1111_v29 = vmax.f32 %v1095_v19, 0.0  ;;  %v1085_v30 = vadd.f32 %v1626_v20, %v2045_v10  ;;  %v1096_v31 = vadd.f32 %v2045_v10, %v1073_v22  ;;  %v1628_v32 = vadd.f32 %v1002_v27, %v594_v45 }
 0x118   : > { %v1103_v33 = vmax.f32 %v1087_v24, 0.0  ;;  %v1109_v34 = vmax.f32 %v1093_v25, 0.0  ;;  %v1088_v35 = vadd.f32 %v1627_v26, %v2045_v10  ;;  %v1094_v36 = vadd.f32 %v2045_v10, %v1071_v28 }
 0x119   : > { %v1492_v37 = vpack.c.bf16 %v1111_v29, %v1111_v29  ;;  %v1101_v38 = vmax.f32 %v1085_v30, 0.0  ;;  %v1112_v39 = vmax.f32 %v1096_v31, 0.0  ;;  %v1086_v40 = vadd.f32 %v1628_v32, %v2045_v10 }
 0x11a   : > { %v1484_v41 = vpack.c.bf16 %v1103_v33, %v1103_v33  ;;  %v1490_v42 = vpack.c.bf16 %v1109_v34, %v1109_v34  ;;  %v1104_v43 = vmax.f32 %v1088_v35, 0.0  ;;  %v1110_v44 = vmax.f32 %v1094_v36, 0.0  ;;  %v1613_v45 = vpop.f32.mrb[20].mxu1 }
 0x11b   : > { %1192 = vst.msk [vmem:[%s2055_s8 + $0x28] sm:$0xf] %vm1181_vm2, %v1492_v37  ;;  %v1482_v50 = vpack.c.bf16 %v1101_v38, %v1101_v38  ;;  %v1493_v51 = vpack.c.bf16 %v1112_v39, %v1112_v39  ;;  %v1102_v52 = vmax.f32 %v1086_v40, 0.0  ;;  %v1605_v53 = vpop.f32.mrb[4].mxu0  ;;  %v1076_v54 = vadd.f32 %v1613_v45, %v839_v1  ;;  %v1047_v55 = vpop.f32.mrb[21].mxu1 }
 0x11c   : > { %1184 = vst.msk [vmem:[%s2055_s8 + $0x8] sm:$0xf] %vm1181_vm2, %v1484_v41  ;;  %1190 = vst.msk [vmem:[%s2055_s8 + $0x20] sm:$0xf] %vm1181_vm2, %v1490_v42  ;;  %v1485_v56 = vpack.c.bf16 %v1104_v43, %v1104_v43  ;;  %v1491_v57 = vpack.c.bf16 %v1110_v44, %v1110_v44  ;;  %v1629_v58 = vadd.f32 %v1605_v53, %v2026_v46  ;;  %v1015_v59 = vpop.f32.mrb[5].mxu0  ;;  %v1614_v61 = vpop.f32.mrb[22].mxu1 }
 0x11d   : > { %v1074_v60 = vadd.f32 %v1047_v55, %v831_v4  ;;  %1182 = vst.msk [vmem:[%s2055_s8] sm:$0xf] %vm1181_vm2, %v1482_v50  ;;  %1193 = vst.msk [vmem:[%s2055_s8 + $0x2c] sm:$0xf] %vm1181_vm2, %v1493_v51  ;;  %v1483_v62 = vpack.c.bf16 %v1102_v52, %v1102_v52  ;;  %v1099_v63 = vadd.f32 %v2045_v10, %v1076_v54  ;;  %v1606_v1 = vpop.f32.mrb[6].mxu0  ;;  %v1050_v3 = vpop.f32.mrb[23].mxu1 }
 0x11e   : > { %v1630_v0 = vadd.f32 %v1015_v59, %v2028_v47  ;;  %v1077_v2 = vadd.f32 %v1614_v61, %v2036_v7  ;;  %1185 = vst.msk [vmem:[%s2055_s8 + $0xc] sm:$0xf] %vm1181_vm2, %v1485_v56  ;;  %1191 = vst.msk [vmem:[%s2055_s8 + $0x24] sm:$0xf] %vm1181_vm2, %v1491_v57  ;;  %v1091_v46 = vadd.f32 %v1629_v58, %v2045_v10  ;;  %v1018_v6 = vpop.f32.mrb[7].mxu0 }
 0x11f   : > { %v1097_v4 = vadd.f32 %v2045_v10, %v1074_v60  ;;  %v1631_v5 = vadd.f32 %v1606_v1, %v2030_v48  ;;  %v1075_v8 = vadd.f32 %v1050_v3, %v2038_v9  ;;  %1183 = vst.msk [vmem:[%s2055_s8 + $0x4] sm:$0xf] %vm1181_vm2, %v1483_v62  ;;  %v1115_v47 = vmax.f32 %v1099_v63, 0.0 }
 0x120   : > { %v1089_v7 = vadd.f32 %v1630_v0, %v2045_v10  ;;  %v1100_v11 = vadd.f32 %v2045_v10, %v1077_v2  ;;  %v1632_v12 = vadd.f32 %v1018_v6, %v2032_v49  ;;  %v1107_v13 = vmax.f32 %v1091_v46, 0.0 }
 0x121   : > { %v1113_v14 = vmax.f32 %v1097_v4, 0.0  ;;  %v1092_v15 = vadd.f32 %v1631_v5, %v2045_v10  ;;  %v1098_v48 = vadd.f32 %v2045_v10, %v1075_v8  ;;  %v1496_v16 = vpack.c.bf16 %v1115_v47, %v1115_v47 }
 0x122   : > { %v1105_v9 = vmax.f32 %v1089_v7, 0.0  ;;  %v1116_v17 = vmax.f32 %v1100_v11, 0.0  ;;  %v1090_v18 = vadd.f32 %v1632_v12, %v2045_v10  ;;  %v1488_v19 = vpack.c.bf16 %v1107_v13, %v1107_v13 }
 0x123   : > { %v1494_v20 = vpack.c.bf16 %v1113_v14, %v1113_v14  ;;  %v1108_v49 = vmax.f32 %v1092_v15, 0.0  ;;  %v1114_v21 = vmax.f32 %v1098_v48, 0.0  ;;  %1196 = vst.msk [vmem:[%s2055_s8 + $0x38] sm:$0xf] %vm1181_vm2, %v1496_v16 }
 0x124   : > { %v1486_v22 = vpack.c.bf16 %v1105_v9, %v1105_v9  ;;  %v1497_v23 = vpack.c.bf16 %v1116_v17, %v1116_v17  ;;  %v1106_v24 = vmax.f32 %v1090_v18, 0.0  ;;  %1188 = vst.msk [vmem:[%s2055_s8 + $0x18] sm:$0xf] %vm1181_vm2, %v1488_v19 }
 0x125   : > { %1194 = vst.msk [vmem:[%s2055_s8 + $0x30] sm:$0xf] %vm1181_vm2, %v1494_v20  ;;  %v1489_v25 = vpack.c.bf16 %v1108_v49, %v1108_v49  ;;  %v1495_v26 = vpack.c.bf16 %v1114_v21, %v1114_v21 }
 0x126   : > { %1186 = vst.msk [vmem:[%s2055_s8 + $0x10] sm:$0xf] %vm1181_vm2, %v1486_v22  ;;  %1197 = vst.msk [vmem:[%s2055_s8 + $0x3c] sm:$0xf] %vm1181_vm2, %v1497_v23  ;;  %v1487_v10 = vpack.c.bf16 %v1106_v24, %v1106_v24 }
 0x127   : > { %1189 = vst.msk [vmem:[%s2055_s8 + $0x1c] sm:$0xf] %vm1181_vm2, %v1489_v25  ;;  %1195 = vst.msk [vmem:[%s2055_s8 + $0x34] sm:$0xf] %vm1181_vm2, %v1495_v26 }
 0x128   : > { %1187 = vst.msk [vmem:[%s2055_s8 + $0x14] sm:$0xf] %vm1181_vm2, %v1487_v10 }
 0x129 PF: > { %s15_s24 = sadd.s32 1, %s1811_s24   ;;  %s2133_s18 = smov %s1799_s21 }
 0x12a   : > { %p12_p12 = scmp.ge.s32.totalorder %s15_s24, 34   ;;  %s2134_s19 = smov %s1803_s22 }
 0x12b   : > { %s2135_s20 = smov %s1807_s23  ;;  %s2136_s21 = smov %s2140_s25 }
 0x12c   : > { %s2137_s22 = smov %s2144_s26  ;;  %s2138_s23 = smov %s2148_s27 }
 0x12d   :  { %14 = sbr.rel (!%p12_p12) target bundleno = 4 (0x4), region = 78 }

// kernel: unet3d_forward.32
= control target key start
LH: loop header
LB: loop body
LE: loop exit
PB: predicated region body
PF: predicated region fallthrough
CT: control target
= control target key end

     0   :  { %s2002_s14 = smov 0   ;;  %s2544_s0 = inlined_call_operand.vmem [shape: bf16[4096,4], index: 0, kind: input, shape index: {}]   ;;  %s2545_s1 = inlined_call_operand.vmem [shape: bf16[4,1], index: 1, kind: input, shape index: {}]   ;;  %s2546_s2 = inlined_call_operand.<no memory space> [shape: f32[1,1], index: 2, kind: input, shape index: {}]   ;;  %s2547_s3 = inlined_call_operand.vmem [shape: f32[4096,1], index: 3, kind: output, shape index: {}]  }
   0x1   :  { %v8_v0 = vstv %s2546_s2 }
   0x2   :  { %9 = vst [vmem:[#allocation2] sm:$0x1] %v8_v0 }
   0x3 LB: > { %s1560_s15 = sadd.s32 4294967295, %s1977_s14   ;;  %p1564_p0 = scmp.ge.s32.totalorder %s1977_s14, 1  ;;  %s1977_s14 = sphi %s2002_s14, %s15_s14  }
   0x4   : > { %p140_p1 = scmp.lt.s32.totalorder %s1977_s14, 5 }
   0x6   : > { %p141_p2 = pnand %p1564_p0, %p140_p1 }
   0x7   : > { %v305_v1 = vld [vmem:[%s2545_s1] sm:$0x3] (!%p141_p2)  ;;  %vm826_vm0 = vcmask (!%p141_p2), 1041408   ;;  %s1565_s2 = sshll.u32 (!%p141_p2), %s1560_s15, 7  ;;  %vm633_vm1 = vcmask (!%p141_p2), 31744   ;;  %vm1375_vm2 = vcmask (!%p141_p2), 7168  }
   0x8   : > { %144 = sbr.rel (%p141_p2) target bundleno = 359 (0x167), region = 32  ;;  %1897 = vmatprep.subr.msk.bf16.mxu0 (!%p141_p2), %vm826_vm0, %v305_v1  ;;  %1898 = vmatprep.subr.msk.bf16.mxu1 (!%p141_p2), %vm826_vm0, %v305_v1  ;;  %v828_v2 = vsel (!%p141_p2), %vm826_vm0, %v305_v1, 0  ;;  %p165_p3 = scmp.lt.s32.totalorder (!%p141_p2), %s1565_s2, 511 }
   0x9   : > { %1766 = vmatpush3.bf16.msra.mxu0 (!%p141_p2), %v828_v2  ;;  %1896 = vmatpush3.bf16.msra.mxu1 (!%p141_p2), %v828_v2 }
   0xf   : > { %s2549_s2 = smov (!%p165_p3, %s1565_s2), 511 }
  0x10   : > { %s1566_s18 = sshll.u32 %s2549_s2, 2  ;;  %s1568_s22 = sshll.u32 %s2549_s2, 3 }
  0x11   : > { %s2019_s21 = scalar_lea.vmem %s2544_s0, %s1566_s18  ;;  %s2155_s25 = scalar_lea.vmem %s2547_s3, %s1568_s22 }
  0x12   : > { %v1907_v3 = vld [vmem:[%s2019_s21] sm:$0xff]   ;;  %v1909_v5 = vld [vmem:[%s2019_s21 + $0x8] sm:$0xff]   ;;  %v1911_v7 = vld [vmem:[%s2019_s21 + $0x10] sm:$0xff]  }
  0x13   : > { %v1908_v4 = vld [vmem:[%s2019_s21 + $0x100] sm:$0xff]   ;;  %1767 = vmatprep.mubr.msk.bf16.mxu0 %vm633_vm1, %v1907_v3  ;;  %v1910_v6 = vld [vmem:[%s2019_s21 + $0x108] sm:$0xff]   ;;  %v1912_v8 = vld [vmem:[%s2019_s21 + $0x110] sm:$0xff]  }
  0x14   : > { %1831 = vmatprep.mubr.msk.bf16.mxu1 %vm633_vm1, %v1908_v4  ;;  %1768 = vmatmul.mubr.msk.bf16.vlgmr.msra.gmra.mrb[0].mxu0 %vm633_vm1, %v1909_v5  ;;  %v1913_v9 = vld [vmem:[%s2019_s21 + $0x18] sm:$0xff]   ;;  %v1915_v11 = vld [vmem:[%s2019_s21 + $0x20] sm:$0xff]   ;;  %v1917_v13 = vld [vmem:[%s2019_s21 + $0x28] sm:$0xff]  }
  0x15   : > { %1832 = vmatmul.mubr.msk.bf16.vlgmr.msra.gmra.mrb[0].mxu1 %vm633_vm1, %v1910_v6  ;;  %1771 = vmatprep.mubr.msk.bf16.mxu0 %vm633_vm1, %v1911_v7  ;;  %v1914_v10 = vld [vmem:[%s2019_s21 + $0x118] sm:$0xff]   ;;  %v1916_v12 = vld [vmem:[%s2019_s21 + $0x120] sm:$0xff]   ;;  %v1918_v14 = vld [vmem:[%s2019_s21 + $0x128] sm:$0xff]  }
  0x16   : > { %1835 = vmatprep.mubr.msk.bf16.mxu1 %vm633_vm1, %v1912_v8  ;;  %v1919_v15 = vld [vmem:[%s2019_s21 + $0x30] sm:$0xff]   ;;  %v1921_v17 = vld [vmem:[%s2019_s21 + $0x38] sm:$0xff]   ;;  %v1923_v19 = vld [vmem:[%s2019_s21 + $0x40] sm:$0xff]  }
  0x17   : > { %v1920_v16 = vld [vmem:[%s2019_s21 + $0x130] sm:$0xff]   ;;  %v1922_v18 = vld [vmem:[%s2019_s21 + $0x138] sm:$0xff]   ;;  %v1924_v20 = vld [vmem:[%s2019_s21 + $0x140] sm:$0xff]  }
  0x18   : > { %v1925_v21 = vld [vmem:[%s2019_s21 + $0x48] sm:$0xff]   ;;  %v1927_v23 = vld [vmem:[%s2019_s21 + $0x50] sm:$0xff]   ;;  %v1929_v25 = vld [vmem:[%s2019_s21 + $0x58] sm:$0xff]  }
  0x19   : > { %v1926_v22 = vld [vmem:[%s2019_s21 + $0x148] sm:$0xff]   ;;  %v1928_v24 = vld [vmem:[%s2019_s21 + $0x150] sm:$0xff]   ;;  %v1930_v26 = vld [vmem:[%s2019_s21 + $0x158] sm:$0xff]  }
  0x1a   : > { %v1931_v27 = vld [vmem:[%s2019_s21 + $0x60] sm:$0xff]   ;;  %v1933_v29 = vld [vmem:[%s2019_s21 + $0x68] sm:$0xff]   ;;  %v1935_v31 = vld [vmem:[%s2019_s21 + $0x70] sm:$0xff]  }
  0x1b   : > { %v1932_v28 = vld [vmem:[%s2019_s21 + $0x160] sm:$0xff]   ;;  %v1934_v30 = vld [vmem:[%s2019_s21 + $0x168] sm:$0xff]   ;;  %v1936_v32 = vld [vmem:[%s2019_s21 + $0x170] sm:$0xff]  }
  0x1c   : > { %1772 = vmatmul.mubr.msk.bf16.gmra.mrb[4].mxu0 %vm633_vm1, %v1913_v9  ;;  %v1937_v33 = vld [vmem:[%s2019_s21 + $0x78] sm:$0xff]   ;;  %v1939_v35 = vld [vmem:[%s2019_s21 + $0x80] sm:$0xff]   ;;  %v1941_v37 = vld [vmem:[%s2019_s21 + $0x88] sm:$0xff]  }
  0x1d   : > { %1836 = vmatmul.mubr.msk.bf16.gmra.mrb[4].mxu1 %vm633_vm1, %v1914_v10  ;;  %1775 = vmatprep.mubr.msk.bf16.mxu0 %vm633_vm1, %v1915_v11  ;;  %v1938_v34 = vld [vmem:[%s2019_s21 + $0x178] sm:$0xff]   ;;  %v1940_v36 = vld [vmem:[%s2019_s21 + $0x180] sm:$0xff]   ;;  %v1942_v38 = vld [vmem:[%s2019_s21 + $0x188] sm:$0xff]  }
  0x1e   : > { %1839 = vmatprep.mubr.msk.bf16.mxu1 %vm633_vm1, %v1916_v12  ;;  %v1943_v39 = vld [vmem:[%s2019_s21 + $0x90] sm:$0xff]   ;;  %v1945_v41 = vld [vmem:[%s2019_s21 + $0x98] sm:$0xff]   ;;  %v1947_v43 = vld [vmem:[%s2019_s21 + $0xa0] sm:$0xff]  }
  0x1f   : > { %v1944_v40 = vld [vmem:[%s2019_s21 + $0x190] sm:$0xff]   ;;  %v1946_v42 = vld [vmem:[%s2019_s21 + $0x198] sm:$0xff]   ;;  %v1948_v44 = vld [vmem:[%s2019_s21 + $0x1a0] sm:$0xff]  }
  0x20   : > { %v1949_v45 = vld [vmem:[%s2019_s21 + $0xa8] sm:$0xff]   ;;  %v1951_v47 = vld [vmem:[%s2019_s21 + $0xb0] sm:$0xff]   ;;  %v1953_v49 = vld [vmem:[%s2019_s21 + $0xb8] sm:$0xff]  }
  0x21   : > { %v1950_v46 = vld [vmem:[%s2019_s21 + $0x1a8] sm:$0xff]   ;;  %v1952_v48 = vld [vmem:[%s2019_s21 + $0x1b0] sm:$0xff]   ;;  %v1954_v50 = vld [vmem:[%s2019_s21 + $0x1b8] sm:$0xff]  }
  0x22   : > { %v1955_v51 = vld [vmem:[%s2019_s21 + $0xc0] sm:$0xff]   ;;  %v1957_v53 = vld [vmem:[%s2019_s21 + $0xc8] sm:$0xff]   ;;  %v1959_v55 = vld [vmem:[%s2019_s21 + $0xd0] sm:$0xff]  }
  0x23   : > { %v1956_v52 = vld [vmem:[%s2019_s21 + $0x1c0] sm:$0xff]   ;;  %v1958_v54 = vld [vmem:[%s2019_s21 + $0x1c8] sm:$0xff]   ;;  %v1960_v56 = vld [vmem:[%s2019_s21 + $0x1d0] sm:$0xff]  }
  0x24   : > { %1776 = vmatmul.mubr.msk.bf16.gmra.mrb[8].mxu0 %vm633_vm1, %v1917_v13  ;;  %v1961_v57 = vld [vmem:[%s2019_s21 + $0xd8] sm:$0xff]   ;;  %v1963_v59 = vld [vmem:[%s2019_s21 + $0xe0] sm:$0xff]   ;;  %v1965_v61 = vld [vmem:[%s2019_s21 + $0xe8] sm:$0xff]  }
  0x25   : > { %1840 = vmatmul.mubr.msk.bf16.gmra.mrb[8].mxu1 %vm633_vm1, %v1918_v14  ;;  %1779 = vmatprep.mubr.msk.bf16.mxu0 %vm633_vm1, %v1919_v15  ;;  %v1962_v58 = vld [vmem:[%s2019_s21 + $0x1d8] sm:$0xff]   ;;  %v1964_v60 = vld [vmem:[%s2019_s21 + $0x1e0] sm:$0xff]   ;;  %v1966_v62 = vld [vmem:[%s2019_s21 + $0x1e8] sm:$0xff]  }
  0x26   : > { %1843 = vmatprep.mubr.msk.bf16.mxu1 %vm633_vm1, %v1920_v16  ;;  %v1967_v63 = vld [vmem:[%s2019_s21 + $0xf0] sm:$0xff]   ;;  %v1969_v1 = vld [vmem:[%s2019_s21 + $0xf8] sm:$0xff]   ;;  %v2150_v3 = vld [vmem:[#allocation2] ss:$0 sm:$0xff] }
  0x27   : > { %v1968_v0 = vld [vmem:[%s2019_s21 + $0x1f0] sm:$0xff]   ;;  %v1970_v2 = vld [vmem:[%s2019_s21 + $0x1f8] sm:$0xff]  }
  0x2c   : > { %1780 = vmatmul.mubr.msk.bf16.gmra.mrb[12].mxu0 %vm633_vm1, %v1921_v17 }
  0x2d   : > { %1844 = vmatmul.mubr.msk.bf16.gmra.mrb[12].mxu1 %vm633_vm1, %v1922_v18  ;;  %1783 = vmatprep.mubr.msk.bf16.mxu0 %vm633_vm1, %v1923_v19 }
  0x2e   : > { %1847 = vmatprep.mubr.msk.bf16.mxu1 %vm633_vm1, %v1924_v20 }
  0x34   : > { %1784 = vmatmul.mubr.msk.bf16.gmra.mrb[16].mxu0 %vm633_vm1, %v1925_v21 }
  0x35   : > { %1848 = vmatmul.mubr.msk.bf16.gmra.mrb[16].mxu1 %vm633_vm1, %v1926_v22  ;;  %1787 = vmatprep.mubr.msk.bf16.mxu0 %vm633_vm1, %v1927_v23 }
  0x36   : > { %1851 = vmatprep.mubr.msk.bf16.mxu1 %vm633_vm1, %v1928_v24 }
  0x3c   : > { %1788 = vmatmul.mubr.msk.bf16.gmra.mrb[20].mxu0 %vm633_vm1, %v1929_v25 }
  0x3d   : > { %1852 = vmatmul.mubr.msk.bf16.gmra.mrb[20].mxu1 %vm633_vm1, %v1930_v26  ;;  %1791 = vmatprep.mubr.msk.bf16.mxu0 %vm633_vm1, %v1931_v27 }
  0x3e   : > { %1855 = vmatprep.mubr.msk.bf16.mxu1 %vm633_vm1, %v1932_v28 }
  0x44   : > { %1792 = vmatmul.mubr.msk.bf16.gmra.mrb[24].mxu0 %vm633_vm1, %v1933_v29 }
  0x45   : > { %1856 = vmatmul.mubr.msk.bf16.gmra.mrb[24].mxu1 %vm633_vm1, %v1934_v30  ;;  %1795 = vmatprep.mubr.msk.bf16.mxu0 %vm633_vm1, %v1935_v31 }
  0x46   : > { %1859 = vmatprep.mubr.msk.bf16.mxu1 %vm633_vm1, %v1936_v32 }
  0x4c   : > { %1796 = vmatmul.mubr.msk.bf16.gmra.mrb[28].mxu0 %vm633_vm1, %v1937_v33 }
  0x4d   : > { %1860 = vmatmul.mubr.msk.bf16.gmra.mrb[28].mxu1 %vm633_vm1, %v1938_v34  ;;  %1799 = vmatprep.mubr.msk.bf16.mxu0 %vm633_vm1, %v1939_v35 }
  0x4e   : > { %1863 = vmatprep.mubr.msk.bf16.mxu1 %vm633_vm1, %v1940_v36 }
  0x54   : > { %1800 = vmatmul.mubr.msk.bf16.gmra.mrb[32].mxu0 %vm633_vm1, %v1941_v37 }
  0x55   : > { %1864 = vmatmul.mubr.msk.bf16.gmra.mrb[32].mxu1 %vm633_vm1, %v1942_v38  ;;  %1803 = vmatprep.mubr.msk.bf16.mxu0 %vm633_vm1, %v1943_v39 }
  0x56   : > { %1867 = vmatprep.mubr.msk.bf16.mxu1 %vm633_vm1, %v1944_v40 }
  0x5c   : > { %1804 = vmatmul.mubr.msk.bf16.gmra.mrb[36].mxu0 %vm633_vm1, %v1945_v41 }
  0x5d   : > { %1868 = vmatmul.mubr.msk.bf16.gmra.mrb[36].mxu1 %vm633_vm1, %v1946_v42  ;;  %1807 = vmatprep.mubr.msk.bf16.mxu0 %vm633_vm1, %v1947_v43 }
  0x5e   : > { %1871 = vmatprep.mubr.msk.bf16.mxu1 %vm633_vm1, %v1948_v44 }
  0x64   : > { %1808 = vmatmul.mubr.msk.bf16.gmra.mrb[40].mxu0 %vm633_vm1, %v1949_v45 }
  0x65   : > { %1872 = vmatmul.mubr.msk.bf16.gmra.mrb[40].mxu1 %vm633_vm1, %v1950_v46  ;;  %1811 = vmatprep.mubr.msk.bf16.mxu0 %vm633_vm1, %v1951_v47 }
  0x66   : > { %1875 = vmatprep.mubr.msk.bf16.mxu1 %vm633_vm1, %v1952_v48 }
  0x6c   : > { %1812 = vmatmul.mubr.msk.bf16.gmra.mrb[44].mxu0 %vm633_vm1, %v1953_v49 }
  0x6d   : > { %1876 = vmatmul.mubr.msk.bf16.gmra.mrb[44].mxu1 %vm633_vm1, %v1954_v50  ;;  %1815 = vmatprep.mubr.msk.bf16.mxu0 %vm633_vm1, %v1955_v51 }
  0x6e   : > { %1879 = vmatprep.mubr.msk.bf16.mxu1 %vm633_vm1, %v1956_v52 }
  0x74   : > { %1816 = vmatmul.mubr.msk.bf16.gmra.mrb[48].mxu0 %vm633_vm1, %v1957_v53 }
  0x75   : > { %1880 = vmatmul.mubr.msk.bf16.gmra.mrb[48].mxu1 %vm633_vm1, %v1958_v54  ;;  %1819 = vmatprep.mubr.msk.bf16.mxu0 %vm633_vm1, %v1959_v55 }
  0x76   : > { %1883 = vmatprep.mubr.msk.bf16.mxu1 %vm633_vm1, %v1960_v56 }
  0x7c   : > { %1820 = vmatmul.mubr.msk.bf16.gmra.mrb[52].mxu0 %vm633_vm1, %v1961_v57 }
  0x7d   : > { %1884 = vmatmul.mubr.msk.bf16.gmra.mrb[52].mxu1 %vm633_vm1, %v1962_v58  ;;  %1823 = vmatprep.mubr.msk.bf16.mxu0 %vm633_vm1, %v1963_v59 }
  0x7e   : > { %1887 = vmatprep.mubr.msk.bf16.mxu1 %vm633_vm1, %v1964_v60 }
  0x84   : > { %1824 = vmatmul.mubr.msk.bf16.gmra.mrb[56].mxu0 %vm633_vm1, %v1965_v61 }
  0x85   : > { %1888 = vmatmul.mubr.msk.bf16.gmra.mrb[56].mxu1 %vm633_vm1, %v1966_v62  ;;  %1827 = vmatprep.mubr.msk.bf16.mxu0 %vm633_vm1, %v1967_v63 }
  0x86   : > { %1891 = vmatprep.mubr.msk.bf16.mxu1 %vm633_vm1, %v1968_v0 }
  0x8c   : > { %1828 = vmatmul.mubr.msk.bf16.gmra.mrb[60].mxu0 %vm633_vm1, %v1969_v1 }
  0x8d   : > { %1892 = vmatmul.mubr.msk.bf16.gmra.mrb[60].mxu1 %vm633_vm1, %v1970_v2 }
  0xe7   : > { %v1769_v4 = vpop.f32.mrb[0].mxu0 }
  0xe8   : > { %v873_v5 = vadd.f32 %v1769_v4, %v2150_v3  ;;  %v1833_v6 = vpop.f32.mrb[0].mxu1  ;;  %v864_v7 = vpop.f32.mrb[1].mxu0 }
  0xe9   : > { %v1129_v8 = vadd.f32 %v1833_v6, %v2150_v3  ;;  %v865_v9 = vadd.f32 %v2150_v3, %v864_v7  ;;  %v1120_v10 = vpop.f32.mrb[1].mxu1  ;;  %v1770_v11 = vpop.f32.mrb[2].mxu0 }
  0xea   : > { %1378 = vst.msk [vmem:[%s2155_s25 + $0x10] sm:$0xff] %vm1375_vm2, %v873_v5  ;;  %v1121_v12 = vadd.f32 %v2150_v3, %v1120_v10  ;;  %v876_v13 = vadd.f32 %v1770_v11, %v2150_v3  ;;  %v1834_v14 = vpop.f32.mrb[2].mxu1  ;;  %v867_v15 = vpop.f32.mrb[3].mxu0 }
  0xeb   : > { %1442 = vst.msk [vmem:[%s2155_s25 + $0x210] sm:$0xff] %vm1375_vm2, %v1129_v8  ;;  %1376 = vst.msk [vmem:[%s2155_s25] sm:$0xff] %vm1375_vm2, %v865_v9  ;;  %v1132_v16 = vadd.f32 %v1834_v14, %v2150_v3  ;;  %v868_v17 = vadd.f32 %v2150_v3, %v867_v15  ;;  %v1123_v18 = vpop.f32.mrb[3].mxu1 }
  0xec   : > { %1440 = vst.msk [vmem:[%s2155_s25 + $0x200] sm:$0xff] %vm1375_vm2, %v1121_v12  ;;  %1379 = vst.msk [vmem:[%s2155_s25 + $0x18] sm:$0xff] %vm1375_vm2, %v876_v13  ;;  %v1124_v19 = vadd.f32 %v2150_v3, %v1123_v18 }
  0xed   : > { %1443 = vst.msk [vmem:[%s2155_s25 + $0x218] sm:$0xff] %vm1375_vm2, %v1132_v16  ;;  %1377 = vst.msk [vmem:[%s2155_s25 + $0x8] sm:$0xff] %vm1375_vm2, %v868_v17 }
  0xee   : > { %1441 = vst.msk [vmem:[%s2155_s25 + $0x208] sm:$0xff] %vm1375_vm2, %v1124_v19 }
  0xef   : > { %v1773_v20 = vpop.f32.mrb[4].mxu0 }
  0xf0   : > { %v889_v21 = vadd.f32 %v1773_v20, %v2150_v3  ;;  %v1837_v22 = vpop.f32.mrb[4].mxu1  ;;  %v880_v23 = vpop.f32.mrb[5].mxu0 }
  0xf1   : > { %v1145_v24 = vadd.f32 %v1837_v22, %v2150_v3  ;;  %v881_v25 = vadd.f32 %v2150_v3, %v880_v23  ;;  %v1136_v26 = vpop.f32.mrb[5].mxu1  ;;  %v1774_v27 = vpop.f32.mrb[6].mxu0 }
  0xf2   : > { %1382 = vst.msk [vmem:[%s2155_s25 + $0x30] sm:$0xff] %vm1375_vm2, %v889_v21  ;;  %v1137_v28 = vadd.f32 %v2150_v3, %v1136_v26  ;;  %v892_v29 = vadd.f32 %v1774_v27, %v2150_v3  ;;  %v1838_v30 = vpop.f32.mrb[6].mxu1  ;;  %v883_v31 = vpop.f32.mrb[7].mxu0 }
  0xf3   : > { %1446 = vst.msk [vmem:[%s2155_s25 + $0x230] sm:$0xff] %vm1375_vm2, %v1145_v24  ;;  %1380 = vst.msk [vmem:[%s2155_s25 + $0x20] sm:$0xff] %vm1375_vm2, %v881_v25  ;;  %v1148_v32 = vadd.f32 %v1838_v30, %v2150_v3  ;;  %v884_v33 = vadd.f32 %v2150_v3, %v883_v31  ;;  %v1139_v34 = vpop.f32.mrb[7].mxu1 }
  0xf4   : > { %1444 = vst.msk [vmem:[%s2155_s25 + $0x220] sm:$0xff] %vm1375_vm2, %v1137_v28  ;;  %1383 = vst.msk [vmem:[%s2155_s25 + $0x38] sm:$0xff] %vm1375_vm2, %v892_v29  ;;  %v1140_v35 = vadd.f32 %v2150_v3, %v1139_v34 }
  0xf5   : > { %1447 = vst.msk [vmem:[%s2155_s25 + $0x238] sm:$0xff] %vm1375_vm2, %v1148_v32  ;;  %1381 = vst.msk [vmem:[%s2155_s25 + $0x28] sm:$0xff] %vm1375_vm2, %v884_v33 }
  0xf6   : > { %1445 = vst.msk [vmem:[%s2155_s25 + $0x228] sm:$0xff] %vm1375_vm2, %v1140_v35 }
  0xf7   : > { %v1777_v36 = vpop.f32.mrb[8].mxu0 }
  0xf8   : > { %v905_v37 = vadd.f32 %v1777_v36, %v2150_v3  ;;  %v1841_v38 = vpop.f32.mrb[8].mxu1  ;;  %v896_v39 = vpop.f32.mrb[9].mxu0 }
  0xf9   : > { %v1161_v40 = vadd.f32 %v1841_v38, %v2150_v3  ;;  %v897_v41 = vadd.f32 %v2150_v3, %v896_v39  ;;  %v1152_v42 = vpop.f32.mrb[9].mxu1  ;;  %v1778_v43 = vpop.f32.mrb[10].mxu0 }
  0xfa   : > { %1386 = vst.msk [vmem:[%s2155_s25 + $0x50] sm:$0xff] %vm1375_vm2, %v905_v37  ;;  %v1153_v44 = vadd.f32 %v2150_v3, %v1152_v42  ;;  %v908_v45 = vadd.f32 %v1778_v43, %v2150_v3  ;;  %v1842_v46 = vpop.f32.mrb[10].mxu1  ;;  %v899_v47 = vpop.f32.mrb[11].mxu0 }
  0xfb   : > { %1450 = vst.msk [vmem:[%s2155_s25 + $0x250] sm:$0xff] %vm1375_vm2, %v1161_v40  ;;  %1384 = vst.msk [vmem:[%s2155_s25 + $0x40] sm:$0xff] %vm1375_vm2, %v897_v41  ;;  %v1164_v48 = vadd.f32 %v1842_v46, %v2150_v3  ;;  %v900_v49 = vadd.f32 %v2150_v3, %v899_v47  ;;  %v1155_v50 = vpop.f32.mrb[11].mxu1 }
  0xfc   : > { %1448 = vst.msk [vmem:[%s2155_s25 + $0x240] sm:$0xff] %vm1375_vm2, %v1153_v44  ;;  %1387 = vst.msk [vmem:[%s2155_s25 + $0x58] sm:$0xff] %vm1375_vm2, %v908_v45  ;;  %v1156_v51 = vadd.f32 %v2150_v3, %v1155_v50 }
  0xfd   : > { %1451 = vst.msk [vmem:[%s2155_s25 + $0x258] sm:$0xff] %vm1375_vm2, %v1164_v48  ;;  %1385 = vst.msk [vmem:[%s2155_s25 + $0x48] sm:$0xff] %vm1375_vm2, %v900_v49 }
  0xfe   : > { %1449 = vst.msk [vmem:[%s2155_s25 + $0x248] sm:$0xff] %vm1375_vm2, %v1156_v51 }
  0xff   : > { %v1781_v52 = vpop.f32.mrb[12].mxu0 }
 0x100   : > { %v921_v53 = vadd.f32 %v1781_v52, %v2150_v3  ;;  %v1845_v54 = vpop.f32.mrb[12].mxu1  ;;  %v912_v55 = vpop.f32.mrb[13].mxu0 }
 0x101   : > { %v1177_v56 = vadd.f32 %v1845_v54, %v2150_v3  ;;  %v913_v57 = vadd.f32 %v2150_v3, %v912_v55  ;;  %v1168_v58 = vpop.f32.mrb[13].mxu1  ;;  %v1782_v59 = vpop.f32.mrb[14].mxu0 }
 0x102   : > { %1390 = vst.msk [vmem:[%s2155_s25 + $0x70] sm:$0xff] %vm1375_vm2, %v921_v53  ;;  %v1169_v60 = vadd.f32 %v2150_v3, %v1168_v58  ;;  %v924_v61 = vadd.f32 %v1782_v59, %v2150_v3  ;;  %v1846_v62 = vpop.f32.mrb[14].mxu1  ;;  %v915_v63 = vpop.f32.mrb[15].mxu0 }
 0x103   : > { %1454 = vst.msk [vmem:[%s2155_s25 + $0x270] sm:$0xff] %vm1375_vm2, %v1177_v56  ;;  %1388 = vst.msk [vmem:[%s2155_s25 + $0x60] sm:$0xff] %vm1375_vm2, %v913_v57  ;;  %v1180_v0 = vadd.f32 %v1846_v62, %v2150_v3  ;;  %v916_v1 = vadd.f32 %v2150_v3, %v915_v63  ;;  %v1171_v2 = vpop.f32.mrb[15].mxu1 }
 0x104   : > { %1452 = vst.msk [vmem:[%s2155_s25 + $0x260] sm:$0xff] %vm1375_vm2, %v1169_v60  ;;  %1391 = vst.msk [vmem:[%s2155_s25 + $0x78] sm:$0xff] %vm1375_vm2, %v924_v61  ;;  %v1172_v4 = vadd.f32 %v2150_v3, %v1171_v2 }
 0x105   : > { %1455 = vst.msk [vmem:[%s2155_s25 + $0x278] sm:$0xff] %vm1375_vm2, %v1180_v0  ;;  %1389 = vst.msk [vmem:[%s2155_s25 + $0x68] sm:$0xff] %vm1375_vm2, %v916_v1 }
 0x106   : > { %1453 = vst.msk [vmem:[%s2155_s25 + $0x268] sm:$0xff] %vm1375_vm2, %v1172_v4 }
 0x107   : > { %v1785_v5 = vpop.f32.mrb[16].mxu0 }
 0x108   : > { %v937_v6 = vadd.f32 %v1785_v5, %v2150_v3  ;;  %v1849_v7 = vpop.f32.mrb[16].mxu1  ;;  %v928_v8 = vpop.f32.mrb[17].mxu0 }
 0x109   : > { %v1193_v9 = vadd.f32 %v1849_v7, %v2150_v3  ;;  %v929_v10 = vadd.f32 %v2150_v3, %v928_v8  ;;  %v1184_v11 = vpop.f32.mrb[17].mxu1  ;;  %v1786_v12 = vpop.f32.mrb[18].mxu0 }
 0x10a   : > { %1394 = vst.msk [vmem:[%s2155_s25 + $0x90] sm:$0xff] %vm1375_vm2, %v937_v6  ;;  %v1185_v13 = vadd.f32 %v2150_v3, %v1184_v11  ;;  %v940_v14 = vadd.f32 %v1786_v12, %v2150_v3  ;;  %v1850_v15 = vpop.f32.mrb[18].mxu1  ;;  %v931_v16 = vpop.f32.mrb[19].mxu0 }
 0x10b   : > { %1458 = vst.msk [vmem:[%s2155_s25 + $0x290] sm:$0xff] %vm1375_vm2, %v1193_v9  ;;  %1392 = vst.msk [vmem:[%s2155_s25 + $0x80] sm:$0xff] %vm1375_vm2, %v929_v10  ;;  %v1196_v17 = vadd.f32 %v1850_v15, %v2150_v3  ;;  %v932_v18 = vadd.f32 %v2150_v3, %v931_v16  ;;  %v1187_v19 = vpop.f32.mrb[19].mxu1 }
 0x10c   : > { %1456 = vst.msk [vmem:[%s2155_s25 + $0x280] sm:$0xff] %vm1375_vm2, %v1185_v13  ;;  %1395 = vst.msk [vmem:[%s2155_s25 + $0x98] sm:$0xff] %vm1375_vm2, %v940_v14  ;;  %v1188_v20 = vadd.f32 %v2150_v3, %v1187_v19 }
 0x10d   : > { %1459 = vst.msk [vmem:[%s2155_s25 + $0x298] sm:$0xff] %vm1375_vm2, %v1196_v17  ;;  %1393 = vst.msk [vmem:[%s2155_s25 + $0x88] sm:$0xff] %vm1375_vm2, %v932_v18 }
 0x10e   : > { %1457 = vst.msk [vmem:[%s2155_s25 + $0x288] sm:$0xff] %vm1375_vm2, %v1188_v20 }
 0x10f   : > { %v1789_v21 = vpop.f32.mrb[20].mxu0 }
 0x110   : > { %v953_v22 = vadd.f32 %v1789_v21, %v2150_v3  ;;  %v1853_v23 = vpop.f32.mrb[20].mxu1  ;;  %v944_v24 = vpop.f32.mrb[21].mxu0 }
 0x111   : > { %v1209_v25 = vadd.f32 %v1853_v23, %v2150_v3  ;;  %v945_v26 = vadd.f32 %v2150_v3, %v944_v24  ;;  %v1200_v27 = vpop.f32.mrb[21].mxu1  ;;  %v1790_v28 = vpop.f32.mrb[22].mxu0 }
 0x112   : > { %1398 = vst.msk [vmem:[%s2155_s25 + $0xb0] sm:$0xff] %vm1375_vm2, %v953_v22  ;;  %v1201_v29 = vadd.f32 %v2150_v3, %v1200_v27  ;;  %v956_v30 = vadd.f32 %v1790_v28, %v2150_v3  ;;  %v1854_v31 = vpop.f32.mrb[22].mxu1  ;;  %v947_v32 = vpop.f32.mrb[23].mxu0 }
 0x113   : > { %1462 = vst.msk [vmem:[%s2155_s25 + $0x2b0] sm:$0xff] %vm1375_vm2, %v1209_v25  ;;  %1396 = vst.msk [vmem:[%s2155_s25 + $0xa0] sm:$0xff] %vm1375_vm2, %v945_v26  ;;  %v1212_v33 = vadd.f32 %v1854_v31, %v2150_v3  ;;  %v948_v34 = vadd.f32 %v2150_v3, %v947_v32  ;;  %v1203_v35 = vpop.f32.mrb[23].mxu1 }
 0x114   : > { %1460 = vst.msk [vmem:[%s2155_s25 + $0x2a0] sm:$0xff] %vm1375_vm2, %v1201_v29  ;;  %1399 = vst.msk [vmem:[%s2155_s25 + $0xb8] sm:$0xff] %vm1375_vm2, %v956_v30  ;;  %v1204_v36 = vadd.f32 %v2150_v3, %v1203_v35 }
 0x115   : > { %1463 = vst.msk [vmem:[%s2155_s25 + $0x2b8] sm:$0xff] %vm1375_vm2, %v1212_v33  ;;  %1397 = vst.msk [vmem:[%s2155_s25 + $0xa8] sm:$0xff] %vm1375_vm2, %v948_v34 }
 0x116   : > { %1461 = vst.msk [vmem:[%s2155_s25 + $0x2a8] sm:$0xff] %vm1375_vm2, %v1204_v36 }
 0x117   : > { %v1793_v37 = vpop.f32.mrb[24].mxu0 }
 0x118   : > { %v969_v38 = vadd.f32 %v1793_v37, %v2150_v3  ;;  %v1857_v39 = vpop.f32.mrb[24].mxu1  ;;  %v960_v40 = vpop.f32.mrb[25].mxu0 }
 0x119   : > { %v1225_v41 = vadd.f32 %v1857_v39, %v2150_v3  ;;  %v961_v42 = vadd.f32 %v2150_v3, %v960_v40  ;;  %v1216_v43 = vpop.f32.mrb[25].mxu1  ;;  %v1794_v44 = vpop.f32.mrb[26].mxu0 }
 0x11a   : > { %1402 = vst.msk [vmem:[%s2155_s25 + $0xd0] sm:$0xff] %vm1375_vm2, %v969_v38  ;;  %v1217_v45 = vadd.f32 %v2150_v3, %v1216_v43  ;;  %v972_v46 = vadd.f32 %v1794_v44, %v2150_v3  ;;  %v1858_v47 = vpop.f32.mrb[26].mxu1  ;;  %v963_v48 = vpop.f32.mrb[27].mxu0 }
 0x11b   : > { %1466 = vst.msk [vmem:[%s2155_s25 + $0x2d0] sm:$0xff] %vm1375_vm2, %v1225_v41  ;;  %1400 = vst.msk [vmem:[%s2155_s25 + $0xc0] sm:$0xff] %vm1375_vm2, %v961_v42  ;;  %v1228_v49 = vadd.f32 %v1858_v47, %v2150_v3  ;;  %v964_v50 = vadd.f32 %v2150_v3, %v963_v48  ;;  %v1219_v51 = vpop.f32.mrb[27].mxu1 }
 0x11c   : > { %1464 = vst.msk [vmem:[%s2155_s25 + $0x2c0] sm:$0xff] %vm1375_vm2, %v1217_v45  ;;  %1403 = vst.msk [vmem:[%s2155_s25 + $0xd8] sm:$0xff] %vm1375_vm2, %v972_v46  ;;  %v1220_v52 = vadd.f32 %v2150_v3, %v1219_v51 }
 0x11d   : > { %1467 = vst.msk [vmem:[%s2155_s25 + $0x2d8] sm:$0xff] %vm1375_vm2, %v1228_v49  ;;  %1401 = vst.msk [vmem:[%s2155_s25 + $0xc8] sm:$0xff] %vm1375_vm2, %v964_v50 }
 0x11e   : > { %1465 = vst.msk [vmem:[%s2155_s25 + $0x2c8] sm:$0xff] %vm1375_vm2, %v1220_v52 }
 0x11f   : > { %v1797_v53 = vpop.f32.mrb[28].mxu0 }
 0x120   : > { %v985_v54 = vadd.f32 %v1797_v53, %v2150_v3  ;;  %v1861_v55 = vpop.f32.mrb[28].mxu1  ;;  %v976_v56 = vpop.f32.mrb[29].mxu0 }
 0x121   : > { %v1241_v57 = vadd.f32 %v1861_v55, %v2150_v3  ;;  %v977_v58 = vadd.f32 %v2150_v3, %v976_v56  ;;  %v1232_v59 = vpop.f32.mrb[29].mxu1  ;;  %v1798_v60 = vpop.f32.mrb[30].mxu0 }
 0x122   : > { %1406 = vst.msk [vmem:[%s2155_s25 + $0xf0] sm:$0xff] %vm1375_vm2, %v985_v54  ;;  %v1233_v61 = vadd.f32 %v2150_v3, %v1232_v59  ;;  %v988_v62 = vadd.f32 %v1798_v60, %v2150_v3  ;;  %v1862_v63 = vpop.f32.mrb[30].mxu1  ;;  %v979_v0 = vpop.f32.mrb[31].mxu0 }
 0x123   : > { %1470 = vst.msk [vmem:[%s2155_s25 + $0x2f0] sm:$0xff] %vm1375_vm2, %v1241_v57  ;;  %1404 = vst.msk [vmem:[%s2155_s25 + $0xe0] sm:$0xff] %vm1375_vm2, %v977_v58  ;;  %v1244_v1 = vadd.f32 %v1862_v63, %v2150_v3  ;;  %v980_v2 = vadd.f32 %v2150_v3, %v979_v0  ;;  %v1235_v4 = vpop.f32.mrb[31].mxu1 }
 0x124   : > { %1468 = vst.msk [vmem:[%s2155_s25 + $0x2e0] sm:$0xff] %vm1375_vm2, %v1233_v61  ;;  %1407 = vst.msk [vmem:[%s2155_s25 + $0xf8] sm:$0xff] %vm1375_vm2, %v988_v62  ;;  %v1236_v5 = vadd.f32 %v2150_v3, %v1235_v4 }
 0x125   : > { %1471 = vst.msk [vmem:[%s2155_s25 + $0x2f8] sm:$0xff] %vm1375_vm2, %v1244_v1  ;;  %1405 = vst.msk [vmem:[%s2155_s25 + $0xe8] sm:$0xff] %vm1375_vm2, %v980_v2 }
 0x126   : > { %1469 = vst.msk [vmem:[%s2155_s25 + $0x2e8] sm:$0xff] %vm1375_vm2, %v1236_v5 }
 0x127   : > { %v1801_v6 = vpop.f32.mrb[32].mxu0 }
 0x128   : > { %v1001_v7 = vadd.f32 %v1801_v6, %v2150_v3  ;;  %v1865_v8 = vpop.f32.mrb[32].mxu1  ;;  %v992_v9 = vpop.f32.mrb[33].mxu0 }
 0x129   : > { %v1257_v10 = vadd.f32 %v1865_v8, %v2150_v3  ;;  %v993_v11 = vadd.f32 %v2150_v3, %v992_v9  ;;  %v1248_v12 = vpop.f32.mrb[33].mxu1  ;;  %v1802_v13 = vpop.f32.mrb[34].mxu0 }
 0x12a   : > { %1410 = vst.msk [vmem:[%s2155_s25 + $0x110] sm:$0xff] %vm1375_vm2, %v1001_v7  ;;  %v1249_v14 = vadd.f32 %v2150_v3, %v1248_v12  ;;  %v1004_v15 = vadd.f32 %v1802_v13, %v2150_v3  ;;  %v1866_v16 = vpop.f32.mrb[34].mxu1  ;;  %v995_v17 = vpop.f32.mrb[35].mxu0 }
 0x12b   : > { %1474 = vst.msk [vmem:[%s2155_s25 + $0x310] sm:$0xff] %vm1375_vm2, %v1257_v10  ;;  %1408 = vst.msk [vmem:[%s2155_s25 + $0x100] sm:$0xff] %vm1375_vm2, %v993_v11  ;;  %v1260_v18 = vadd.f32 %v1866_v16, %v2150_v3  ;;  %v996_v19 = vadd.f32 %v2150_v3, %v995_v17  ;;  %v1251_v20 = vpop.f32.mrb[35].mxu1 }
 0x12c   : > { %1472 = vst.msk [vmem:[%s2155_s25 + $0x300] sm:$0xff] %vm1375_vm2, %v1249_v14  ;;  %1411 = vst.msk [vmem:[%s2155_s25 + $0x118] sm:$0xff] %vm1375_vm2, %v1004_v15  ;;  %v1252_v21 = vadd.f32 %v2150_v3, %v1251_v20 }
 0x12d   : > { %1475 = vst.msk [vmem:[%s2155_s25 + $0x318] sm:$0xff] %vm1375_vm2, %v1260_v18  ;;  %1409 = vst.msk [vmem:[%s2155_s25 + $0x108] sm:$0xff] %vm1375_vm2, %v996_v19 }
 0x12e   : > { %1473 = vst.msk [vmem:[%s2155_s25 + $0x308] sm:$0xff] %vm1375_vm2, %v1252_v21 }
 0x12f   : > { %v1805_v22 = vpop.f32.mrb[36].mxu0 }
 0x130   : > { %v1017_v23 = vadd.f32 %v1805_v22, %v2150_v3  ;;  %v1869_v24 = vpop.f32.mrb[36].mxu1  ;;  %v1008_v25 = vpop.f32.mrb[37].mxu0 }
 0x131   : > { %v1273_v26 = vadd.f32 %v1869_v24, %v2150_v3  ;;  %v1009_v27 = vadd.f32 %v2150_v3, %v1008_v25  ;;  %v1264_v28 = vpop.f32.mrb[37].mxu1  ;;  %v1806_v29 = vpop.f32.mrb[38].mxu0 }
 0x132   : > { %1414 = vst.msk [vmem:[%s2155_s25 + $0x130] sm:$0xff] %vm1375_vm2, %v1017_v23  ;;  %v1265_v30 = vadd.f32 %v2150_v3, %v1264_v28  ;;  %v1020_v31 = vadd.f32 %v1806_v29, %v2150_v3  ;;  %v1870_v32 = vpop.f32.mrb[38].mxu1  ;;  %v1011_v33 = vpop.f32.mrb[39].mxu0 }
 0x133   : > { %1478 = vst.msk [vmem:[%s2155_s25 + $0x330] sm:$0xff] %vm1375_vm2, %v1273_v26  ;;  %1412 = vst.msk [vmem:[%s2155_s25 + $0x120] sm:$0xff] %vm1375_vm2, %v1009_v27  ;;  %v1276_v34 = vadd.f32 %v1870_v32, %v2150_v3  ;;  %v1012_v35 = vadd.f32 %v2150_v3, %v1011_v33  ;;  %v1267_v36 = vpop.f32.mrb[39].mxu1 }
 0x134   : > { %1476 = vst.msk [vmem:[%s2155_s25 + $0x320] sm:$0xff] %vm1375_vm2, %v1265_v30  ;;  %1415 = vst.msk [vmem:[%s2155_s25 + $0x138] sm:$0xff] %vm1375_vm2, %v1020_v31  ;;  %v1268_v37 = vadd.f32 %v2150_v3, %v1267_v36 }
 0x135   : > { %1479 = vst.msk [vmem:[%s2155_s25 + $0x338] sm:$0xff] %vm1375_vm2, %v1276_v34  ;;  %1413 = vst.msk [vmem:[%s2155_s25 + $0x128] sm:$0xff] %vm1375_vm2, %v1012_v35 }
 0x136   : > { %1477 = vst.msk [vmem:[%s2155_s25 + $0x328] sm:$0xff] %vm1375_vm2, %v1268_v37 }
 0x137   : > { %v1809_v38 = vpop.f32.mrb[40].mxu0 }
 0x138   : > { %v1033_v39 = vadd.f32 %v1809_v38, %v2150_v3  ;;  %v1873_v40 = vpop.f32.mrb[40].mxu1  ;;  %v1024_v41 = vpop.f32.mrb[41].mxu0 }
 0x139   : > { %v1289_v42 = vadd.f32 %v1873_v40, %v2150_v3  ;;  %v1025_v43 = vadd.f32 %v2150_v3, %v1024_v41  ;;  %v1280_v44 = vpop.f32.mrb[41].mxu1  ;;  %v1810_v45 = vpop.f32.mrb[42].mxu0 }
 0x13a   : > { %1418 = vst.msk [vmem:[%s2155_s25 + $0x150] sm:$0xff] %vm1375_vm2, %v1033_v39  ;;  %v1281_v46 = vadd.f32 %v2150_v3, %v1280_v44  ;;  %v1036_v47 = vadd.f32 %v1810_v45, %v2150_v3  ;;  %v1874_v48 = vpop.f32.mrb[42].mxu1  ;;  %v1027_v49 = vpop.f32.mrb[43].mxu0 }
 0x13b   : > { %1482 = vst.msk [vmem:[%s2155_s25 + $0x350] sm:$0xff] %vm1375_vm2, %v1289_v42  ;;  %1416 = vst.msk [vmem:[%s2155_s25 + $0x140] sm:$0xff] %vm1375_vm2, %v1025_v43  ;;  %v1292_v50 = vadd.f32 %v1874_v48, %v2150_v3  ;;  %v1028_v51 = vadd.f32 %v2150_v3, %v1027_v49  ;;  %v1283_v52 = vpop.f32.mrb[43].mxu1 }
 0x13c   : > { %1480 = vst.msk [vmem:[%s2155_s25 + $0x340] sm:$0xff] %vm1375_vm2, %v1281_v46  ;;  %1419 = vst.msk [vmem:[%s2155_s25 + $0x158] sm:$0xff] %vm1375_vm2, %v1036_v47  ;;  %v1284_v53 = vadd.f32 %v2150_v3, %v1283_v52 }
 0x13d   : > { %1483 = vst.msk [vmem:[%s2155_s25 + $0x358] sm:$0xff] %vm1375_vm2, %v1292_v50  ;;  %1417 = vst.msk [vmem:[%s2155_s25 + $0x148] sm:$0xff] %vm1375_vm2, %v1028_v51 }
 0x13e   : > { %1481 = vst.msk [vmem:[%s2155_s25 + $0x348] sm:$0xff] %vm1375_vm2, %v1284_v53 }
 0x13f   : > { %v1813_v54 = vpop.f32.mrb[44].mxu0 }
 0x140   : > { %v1049_v55 = vadd.f32 %v1813_v54, %v2150_v3  ;;  %v1877_v56 = vpop.f32.mrb[44].mxu1  ;;  %v1040_v57 = vpop.f32.mrb[45].mxu0 }
 0x141   : > { %v1305_v58 = vadd.f32 %v1877_v56, %v2150_v3  ;;  %v1041_v59 = vadd.f32 %v2150_v3, %v1040_v57  ;;  %v1296_v60 = vpop.f32.mrb[45].mxu1  ;;  %v1814_v61 = vpop.f32.mrb[46].mxu0 }
 0x142   : > { %1422 = vst.msk [vmem:[%s2155_s25 + $0x170] sm:$0xff] %vm1375_vm2, %v1049_v55  ;;  %v1297_v62 = vadd.f32 %v2150_v3, %v1296_v60  ;;  %v1052_v63 = vadd.f32 %v1814_v61, %v2150_v3  ;;  %v1878_v0 = vpop.f32.mrb[46].mxu1  ;;  %v1043_v1 = vpop.f32.mrb[47].mxu0 }
 0x143   : > { %1486 = vst.msk [vmem:[%s2155_s25 + $0x370] sm:$0xff] %vm1375_vm2, %v1305_v58  ;;  %1420 = vst.msk [vmem:[%s2155_s25 + $0x160] sm:$0xff] %vm1375_vm2, %v1041_v59  ;;  %v1308_v2 = vadd.f32 %v1878_v0, %v2150_v3  ;;  %v1044_v4 = vadd.f32 %v2150_v3, %v1043_v1  ;;  %v1299_v5 = vpop.f32.mrb[47].mxu1 }
 0x144   : > { %1484 = vst.msk [vmem:[%s2155_s25 + $0x360] sm:$0xff] %vm1375_vm2, %v1297_v62  ;;  %1423 = vst.msk [vmem:[%s2155_s25 + $0x178] sm:$0xff] %vm1375_vm2, %v1052_v63  ;;  %v1300_v6 = vadd.f32 %v2150_v3, %v1299_v5 }
 0x145   : > { %1487 = vst.msk [vmem:[%s2155_s25 + $0x378] sm:$0xff] %vm1375_vm2, %v1308_v2  ;;  %1421 = vst.msk [vmem:[%s2155_s25 + $0x168] sm:$0xff] %vm1375_vm2, %v1044_v4 }
 0x146   : > { %1485 = vst.msk [vmem:[%s2155_s25 + $0x368] sm:$0xff] %vm1375_vm2, %v1300_v6 }
 0x147   : > { %v1817_v7 = vpop.f32.mrb[48].mxu0 }
 0x148   : > { %v1065_v8 = vadd.f32 %v1817_v7, %v2150_v3  ;;  %v1881_v9 = vpop.f32.mrb[48].mxu1  ;;  %v1056_v10 = vpop.f32.mrb[49].mxu0 }
 0x149   : > { %v1321_v11 = vadd.f32 %v1881_v9, %v2150_v3  ;;  %v1057_v12 = vadd.f32 %v2150_v3, %v1056_v10  ;;  %v1312_v13 = vpop.f32.mrb[49].mxu1  ;;  %v1818_v14 = vpop.f32.mrb[50].mxu0 }
 0x14a   : > { %1426 = vst.msk [vmem:[%s2155_s25 + $0x190] sm:$0xff] %vm1375_vm2, %v1065_v8  ;;  %v1313_v15 = vadd.f32 %v2150_v3, %v1312_v13  ;;  %v1068_v16 = vadd.f32 %v1818_v14, %v2150_v3  ;;  %v1882_v17 = vpop.f32.mrb[50].mxu1  ;;  %v1059_v18 = vpop.f32.mrb[51].mxu0 }
 0x14b   : > { %1490 = vst.msk [vmem:[%s2155_s25 + $0x390] sm:$0xff] %vm1375_vm2, %v1321_v11  ;;  %1424 = vst.msk [vmem:[%s2155_s25 + $0x180] sm:$0xff] %vm1375_vm2, %v1057_v12  ;;  %v1324_v19 = vadd.f32 %v1882_v17, %v2150_v3  ;;  %v1060_v20 = vadd.f32 %v2150_v3, %v1059_v18  ;;  %v1315_v21 = vpop.f32.mrb[51].mxu1 }
 0x14c   : > { %1488 = vst.msk [vmem:[%s2155_s25 + $0x380] sm:$0xff] %vm1375_vm2, %v1313_v15  ;;  %1427 = vst.msk [vmem:[%s2155_s25 + $0x198] sm:$0xff] %vm1375_vm2, %v1068_v16  ;;  %v1316_v22 = vadd.f32 %v2150_v3, %v1315_v21 }
 0x14d   : > { %1491 = vst.msk [vmem:[%s2155_s25 + $0x398] sm:$0xff] %vm1375_vm2, %v1324_v19  ;;  %1425 = vst.msk [vmem:[%s2155_s25 + $0x188] sm:$0xff] %vm1375_vm2, %v1060_v20 }
 0x14e   : > { %1489 = vst.msk [vmem:[%s2155_s25 + $0x388] sm:$0xff] %vm1375_vm2, %v1316_v22 }
 0x14f   : > { %v1821_v23 = vpop.f32.mrb[52].mxu0 }
 0x150   : > { %v1081_v24 = vadd.f32 %v1821_v23, %v2150_v3  ;;  %v1885_v25 = vpop.f32.mrb[52].mxu1  ;;  %v1072_v26 = vpop.f32.mrb[53].mxu0 }
 0x151   : > { %v1337_v27 = vadd.f32 %v1885_v25, %v2150_v3  ;;  %v1073_v28 = vadd.f32 %v2150_v3, %v1072_v26  ;;  %v1328_v29 = vpop.f32.mrb[53].mxu1  ;;  %v1822_v30 = vpop.f32.mrb[54].mxu0 }
 0x152   : > { %1430 = vst.msk [vmem:[%s2155_s25 + $0x1b0] sm:$0xff] %vm1375_vm2, %v1081_v24  ;;  %v1329_v31 = vadd.f32 %v2150_v3, %v1328_v29  ;;  %v1084_v32 = vadd.f32 %v1822_v30, %v2150_v3  ;;  %v1886_v33 = vpop.f32.mrb[54].mxu1  ;;  %v1075_v34 = vpop.f32.mrb[55].mxu0 }
 0x153   : > { %1494 = vst.msk [vmem:[%s2155_s25 + $0x3b0] sm:$0xff] %vm1375_vm2, %v1337_v27  ;;  %1428 = vst.msk [vmem:[%s2155_s25 + $0x1a0] sm:$0xff] %vm1375_vm2, %v1073_v28  ;;  %v1340_v35 = vadd.f32 %v1886_v33, %v2150_v3  ;;  %v1076_v36 = vadd.f32 %v2150_v3, %v1075_v34  ;;  %v1331_v37 = vpop.f32.mrb[55].mxu1 }
 0x154   : > { %1492 = vst.msk [vmem:[%s2155_s25 + $0x3a0] sm:$0xff] %vm1375_vm2, %v1329_v31  ;;  %1431 = vst.msk [vmem:[%s2155_s25 + $0x1b8] sm:$0xff] %vm1375_vm2, %v1084_v32  ;;  %v1332_v38 = vadd.f32 %v2150_v3, %v1331_v37 }
 0x155   : > { %1495 = vst.msk [vmem:[%s2155_s25 + $0x3b8] sm:$0xff] %vm1375_vm2, %v1340_v35  ;;  %1429 = vst.msk [vmem:[%s2155_s25 + $0x1a8] sm:$0xff] %vm1375_vm2, %v1076_v36 }
 0x156   : > { %1493 = vst.msk [vmem:[%s2155_s25 + $0x3a8] sm:$0xff] %vm1375_vm2, %v1332_v38 }
 0x157   : > { %v1825_v39 = vpop.f32.mrb[56].mxu0 }
 0x158   : > { %v1097_v40 = vadd.f32 %v1825_v39, %v2150_v3  ;;  %v1889_v41 = vpop.f32.mrb[56].mxu1  ;;  %v1088_v42 = vpop.f32.mrb[57].mxu0 }
 0x159   : > { %v1353_v43 = vadd.f32 %v1889_v41, %v2150_v3  ;;  %v1089_v44 = vadd.f32 %v2150_v3, %v1088_v42  ;;  %v1344_v45 = vpop.f32.mrb[57].mxu1  ;;  %v1826_v46 = vpop.f32.mrb[58].mxu0 }
 0x15a   : > { %1434 = vst.msk [vmem:[%s2155_s25 + $0x1d0] sm:$0xff] %vm1375_vm2, %v1097_v40  ;;  %v1345_v47 = vadd.f32 %v2150_v3, %v1344_v45  ;;  %v1100_v48 = vadd.f32 %v1826_v46, %v2150_v3  ;;  %v1890_v49 = vpop.f32.mrb[58].mxu1  ;;  %v1091_v50 = vpop.f32.mrb[59].mxu0 }
 0x15b   : > { %1498 = vst.msk [vmem:[%s2155_s25 + $0x3d0] sm:$0xff] %vm1375_vm2, %v1353_v43  ;;  %1432 = vst.msk [vmem:[%s2155_s25 + $0x1c0] sm:$0xff] %vm1375_vm2, %v1089_v44  ;;  %v1356_v51 = vadd.f32 %v1890_v49, %v2150_v3  ;;  %v1092_v52 = vadd.f32 %v2150_v3, %v1091_v50  ;;  %v1347_v53 = vpop.f32.mrb[59].mxu1 }
 0x15c   : > { %1496 = vst.msk [vmem:[%s2155_s25 + $0x3c0] sm:$0xff] %vm1375_vm2, %v1345_v47  ;;  %1435 = vst.msk [vmem:[%s2155_s25 + $0x1d8] sm:$0xff] %vm1375_vm2, %v1100_v48  ;;  %v1348_v54 = vadd.f32 %v2150_v3, %v1347_v53 }
 0x15d   : > { %1499 = vst.msk [vmem:[%s2155_s25 + $0x3d8] sm:$0xff] %vm1375_vm2, %v1356_v51  ;;  %1433 = vst.msk [vmem:[%s2155_s25 + $0x1c8] sm:$0xff] %vm1375_vm2, %v1092_v52 }
 0x15e   : > { %1497 = vst.msk [vmem:[%s2155_s25 + $0x3c8] sm:$0xff] %vm1375_vm2, %v1348_v54 }
 0x15f   : > { %v1829_v55 = vpop.f32.mrb[60].mxu0 }
 0x160   : > { %v1113_v56 = vadd.f32 %v1829_v55, %v2150_v3  ;;  %v1893_v57 = vpop.f32.mrb[60].mxu1  ;;  %v1104_v58 = vpop.f32.mrb[61].mxu0 }
 0x161   : > { %v1369_v59 = vadd.f32 %v1893_v57, %v2150_v3  ;;  %v1105_v60 = vadd.f32 %v2150_v3, %v1104_v58  ;;  %v1360_v61 = vpop.f32.mrb[61].mxu1  ;;  %v1830_v62 = vpop.f32.mrb[62].mxu0 }
 0x162   : > { %1438 = vst.msk [vmem:[%s2155_s25 + $0x1f0] sm:$0xff] %vm1375_vm2, %v1113_v56  ;;  %v1361_v63 = vadd.f32 %v2150_v3, %v1360_v61  ;;  %v1116_v0 = vadd.f32 %v1830_v62, %v2150_v3  ;;  %v1894_v1 = vpop.f32.mrb[62].mxu1  ;;  %v1107_v2 = vpop.f32.mrb[63].mxu0 }
 0x163   : > { %1502 = vst.msk [vmem:[%s2155_s25 + $0x3f0] sm:$0xff] %vm1375_vm2, %v1369_v59  ;;  %1436 = vst.msk [vmem:[%s2155_s25 + $0x1e0] sm:$0xff] %vm1375_vm2, %v1105_v60  ;;  %v1372_v4 = vadd.f32 %v1894_v1, %v2150_v3  ;;  %v1108_v5 = vadd.f32 %v2150_v3, %v1107_v2  ;;  %v1363_v6 = vpop.f32.mrb[63].mxu1 }
 0x164   : > { %1500 = vst.msk [vmem:[%s2155_s25 + $0x3e0] sm:$0xff] %vm1375_vm2, %v1361_v63  ;;  %1439 = vst.msk [vmem:[%s2155_s25 + $0x1f8] sm:$0xff] %vm1375_vm2, %v1116_v0  ;;  %v1364_v7 = vadd.f32 %v2150_v3, %v1363_v6 }
 0x165   : > { %1503 = vst.msk [vmem:[%s2155_s25 + $0x3f8] sm:$0xff] %vm1375_vm2, %v1372_v4  ;;  %1437 = vst.msk [vmem:[%s2155_s25 + $0x1e8] sm:$0xff] %vm1375_vm2, %v1108_v5 }
 0x166   : > { %1501 = vst.msk [vmem:[%s2155_s25 + $0x3e8] sm:$0xff] %vm1375_vm2, %v1364_v7 }
 0x167 PF: > { %s15_s14 = sadd.s32 1, %s1977_s14  }
 0x168   : > { %p12_p4 = scmp.ge.s32.totalorder %s15_s14, 6  }
 0x16a   :  { %14 = sbr.rel (!%p12_p4) target bundleno = 3 (0x3), region = 62 }

// kernel: unet3d_forward.33
= control target key start
LH: loop header
LB: loop body
LE: loop exit
PB: predicated region body
PF: predicated region fallthrough
CT: control target
= control target key end

     0   :  { %s326_s9 = smov 0   ;;  %s340_s0 = inlined_call_operand.vmem [shape: f32[6,8], index: 0, kind: input, shape index: {}]   ;;  %s341_s1 = inlined_call_operand.vmem [shape: f32[2,8,256], index: 1, kind: input, shape index: {}]   ;;  %s342_s2 = inlined_call_operand.vmem [shape: f32[2,6,256], index: 2, kind: output, shape index: {}]  }
   0x1 LB: > { %s279_s10 = sadd.s32 4294967295, %s308_s9   ;;  %p283_p0 = scmp.ge.s32.totalorder %s308_s9, 1  ;;  %s308_s9 = sphi %s326_s9, %s12_s9  }
   0x2   : > { %p112_p1 = scmp.lt.s32.totalorder %s308_s9, 3 }
   0x4   : > { %p113_p2 = pnand %p283_p0, %p112_p1 }
   0x5   : > { %p134_p3 = scmp.lt.s32.totalorder (!%p113_p2), %s279_s10, 1  ;;  %v310_v0 = vmov (!%p113_p2), 0.0   ;;  %v144_v3 = vld [vmem:[%s340_s0] sm:$0x3f] (!%p113_p2)  ;;  %vm147_vm0 = vcmask (!%p113_p2), 64512  }
   0x6   : > { %116 = sbr.rel (%p113_p2) target bundleno = 233 (0xe9), region = 28  ;;  %215 = vmatprep.mubr.f32.mxu0 (!%p113_p2), %v310_v0 }
   0xd   : > { %s344_s10 = smov (!%p134_p3, %s279_s10), 1 }
   0xe   : > { %s291_s11 = sshll.u32 %s344_s10, 4 }
   0xf   : > { %s138_s14 = scalar_lea.vmem %s341_s1, %s291_s11  ;;  %s143_s19 = scalar_lea.vmem %s342_s2, %s291_s11 }
  0x10   : > { %v146_v1 = vld [vmem:[%s138_s14 + $0x8] sm:$0xff]  ;;  %v145_v2 = vld [vmem:[%s138_s14] sm:$0xff] }
  0x11   : > { %151 = vmatprep.subr.mxu0 %v146_v1 }
  0x12   : > { %152 = vmatpush1.msra.mxu0 %v145_v2 }
  0x13   : > { %288 = vmatmul.mubr.msk.f32.vlgmr.msra.gmra.mrb[0].mxu0 %vm147_vm0, %v144_v3 }
  0xe6   : > { %v217_v4 = vpop.f32.mrb[0].mxu0 }
  0xe7   : > { %222 = vst [vmem:[%s143_s19] sm:$0x3f] %v217_v4  ;;  %v219_v5 = vpop.f32.mrb[1].mxu0 }
  0xe8   : > { %223 = vst [vmem:[%s143_s19 + $0x8] sm:$0x3f] %v219_v5 }
  0xe9 PF: > { %s12_s9 = sadd.s32 1, %s308_s9  }
  0xea   : > { %p9_p4 = scmp.ge.s32.totalorder %s12_s9, 4  }
  0xec   :  { %11 = sbr.rel (!%p9_p4) target bundleno = 1 (0x1), region = 58 }

// kernel: unet3d_forward.34
= control target key start
LH: loop header
LB: loop body
LE: loop exit
PB: predicated region body
PF: predicated region fallthrough
CT: control target
= control target key end

     0   :  { %s373_s9 = smov 0   ;;  %s402_s0 = inlined_call_operand.vmem [shape: f32[20,16], index: 0, kind: input, shape index: {}]   ;;  %s403_s1 = inlined_call_operand.vmem [shape: f32[12,16,16], index: 1, kind: input, shape index: {}]   ;;  %s404_s2 = inlined_call_operand.vmem [shape: f32[12,20,16], index: 2, kind: output, shape index: {}]  }
   0x1 LB: > { %s298_s10 = sadd.s32 4294967295, %s353_s9   ;;  %p302_p0 = scmp.ge.s32.totalorder %s353_s9, 1  ;;  %s353_s9 = sphi %s373_s9, %s12_s9  }
   0x2   : > { %p112_p1 = scmp.lt.s32.totalorder %s353_s9, 13 }
   0x4   : > { %p113_p2 = pnand %p302_p0, %p112_p1 }
   0x5   : > { %p134_p3 = scmp.lt.s32.totalorder (!%p113_p2), %s298_s10, 11  ;;  %v355_v0 = vmov (!%p113_p2), 0.0|0.0   ;;  %vm356_vm0 = vmmov (!%p113_p2), 0   ;;  %v357_v1 = vmov (!%p113_p2), 0.0   ;;  %v145_v5 = vld [vmem:[%s402_s0 + $0x8] sm:$0xff] (!%p113_p2)  ;;  %vm149_vm1 = vcmask (!%p113_p2), 130048  }
   0x6   : > { %116 = sbr.rel (%p113_p2) target bundleno = 239 (0xef), region = 28  ;;  %333 = vmatprep.subr.bf16.mxu1 (!%p113_p2), %v355_v0  ;;  %330 = vmatprep.subr.bf16.mxu0 (!%p113_p2), %v355_v0  ;;  %v144_v6 = vld [vmem:[%s402_s0] sm:$0xff] (!%p113_p2)  ;;  %v146_v7 = vld [vmem:[%s402_s0 + $0x10] sm:$0xf] (!%p113_p2)  ;;  %vm241_vm2 = vcmask (!%p113_p2), 125952  }
   0x7   : > { %324 = vmatprep.mubr.msk.f32.mxu1 (!%p113_p2), %vm356_vm0, %v357_v1  ;;  %321 = vmatprep.mubr.msk.f32.mxu0 (!%p113_p2), %vm356_vm0, %v357_v1 }
   0xd   : > { %s406_s10 = smov (!%p134_p3, %s298_s10), 11 }
   0xe   : > { %s311_s11 = sshll.u32 %s406_s10, 4  ;;  %s335_s21 = smul.u32 24, %s406_s10 }
   0xf   : > { %s138_s14 = scalar_lea.vmem %s403_s1, %s311_s11 }
  0x10   : > { %v147_v2 = vld [vmem:[%s138_s14] sm:$0xff]  ;;  %v148_v3 = vld [vmem:[%s138_s14 + $0x8] sm:$0xff]  ;;  %s143_s24 = scalar_lea.vmem %s404_s2, %s335_s21 }
  0x11   : > { %v331_v4 = vpack.c.bf16 %v148_v3, %v147_v2 }
  0x13   : > { %334 = vmatpush3.bf16.msra.mxu1 %v331_v4  ;;  %332 = vmatpush3.bf16.msra.mxu0 %v331_v4 }
  0x16   : > { %325 = vmatmul.mubr.msk.f32.vlgmr.msra.gmra.mrb[0].mxu1 %vm149_vm1, %v145_v5  ;;  %322 = vmatmul.mubr.msk.f32.vlgmr.msra.gmra.mrb[0].mxu0 %vm149_vm1, %v144_v6 }
  0x17   : > { %327 = vmatprep.mubr.msk.f32.mxu1 %vm356_vm0, %v357_v1 }
  0x1a   : > { %328 = vmatmul.mubr.msk.f32.gmra.mrb[2].mxu1 %vm149_vm1, %v146_v7 }
  0xe9   : > { %v230_v8 = vpop.f32.mrb[0].mxu1  ;;  %v225_v9 = vpop.f32.mrb[0].mxu0 }
  0xea   : > { %240 = vst.msk [vmem:[%s143_s24 + $0x8] sm:$0xff] %vm149_vm1, %v230_v8  ;;  %v326_v10 = vpop.f32.mrb[1].mxu1  ;;  %239 = vst.msk [vmem:[%s143_s24] sm:$0xff] %vm149_vm1, %v225_v9  ;;  %v323_v11 = vpop.f32.mrb[1].mxu0 }
  0xed   : > { %v235_v12 = vpop.f32.mrb[2].mxu1 }
  0xee   : > { %242 = vst.msk [vmem:[%s143_s24 + $0x10] sm:$0xf] %vm241_vm2, %v235_v12  ;;  %v329_v13 = vpop.f32.mrb[3].mxu1 }
  0xef PF: > { %s12_s9 = sadd.s32 1, %s353_s9  }
  0xf0   : > { %p9_p4 = scmp.ge.s32.totalorder %s12_s9, 14  }
  0xf2   :  { %11 = sbr.rel (!%p9_p4) target bundleno = 1 (0x1), region = 58 }

// kernel: unet3d_forward.35
= control target key start
LH: loop header
LB: loop body
LE: loop exit
PB: predicated region body
PF: predicated region fallthrough
CT: control target
= control target key end

     0   :  { %8 = vsyncpa [#allocation3], 0  ;;  %s917_s0 = inlined_call_operand.vmem [shape: f32[240,16], index: 0, kind: input, shape index: {}]   ;;  %s918_s1 = inlined_call_operand.vmem [shape: f32[16,20], index: 1, kind: input, shape index: {}]   ;;  %s919_s2 = inlined_call_operand.vmem [shape: f32[1,20], index: 2, kind: input, shape index: {}]   ;;  %s920_s3 = inlined_call_operand.hbm [shape: f32[240,20], index: 3, kind: output, shape index: {}]  }
   0x1   :  { %10 = vsyncpa [#allocation3 + $0x1], 0  ;;  %s705_s12 = smov 0   ;;  %s707_s13 = smov 0  }
   0x2   :  { %s709_s14 = smov 0   ;;  %s711_s15 = smov 0  }
   0x3 LB: > { %s726_s16 = sadd.s32 4294967295, %s677_s15   ;;  %s474_s17 = sadd.s32 4294967294, %s677_s15   ;;  %s677_s15 = sphi %s711_s15, %s926_s15   ;;  %s673_s14 = sphi %s709_s14, %s925_s14   ;;  %s669_s13 = sphi %s707_s13, %s924_s13   ;;  %s665_s12 = sphi %s705_s12, %s923_s12  }
   0x4   : > { %s730_s18 = sadd.s32 1, %s677_s15   ;;  %s91_s19 = sadd.s32 1, %s673_s14 }
   0x5   : > { %s88_s20 = ssub.s32 %s677_s15, %s730_s18  ;;  %p101_p0 = scmp.ne.s32.totalorder %s673_s14, %s669_s13 }
   0x6   : > { %p89_p1 = scmp.eq.s32.totalorder %s88_s20, 0  ;;  %p102_p2 = scmp.eq.s32.totalorder %s726_s16, 1 }
   0x7   : > { %p107_p3 = scmp.ne.s32.totalorder %s669_s13, %s665_s12  ;;  %p108_p4 = scmp.eq.s32.totalorder %s474_s17, 1 }
   0x8   : > { %s741_s21 = scalar_select %p89_p1, %s673_s14, %s91_s19  }
   0x9   : > { %p743_p5 = por %p102_p2, %p101_p0  ;;  %p747_p6 = por %p108_p4, %p107_p3 }
   0xa   : > { %p477_p7 = scmp.ge.s32.totalorder %s677_s15, 1  ;;  %p141_p8 = scmp.lt.s32.totalorder %s677_s15, 3 }
   0xc   : > { %p142_p9 = pnand %p477_p7, %p141_p8 }
   0xd   : > { %v187_v0 = vld [vmem:[%s918_s1] sm:$0xff] (!%p142_p9)  ;;  %v188_v1 = vld [vmem:[%s918_s1 + $0x8] sm:$0xff] (!%p142_p9)  ;;  %s165_s28 = smul.u32 (!%p142_p9), 15, %s726_s16  ;;  %v679_v2 = vmov (!%p142_p9), 0.0|0.0   ;;  %vm680_vm0 = vmmov (!%p142_p9), 0   ;;  %v681_v4 = vmov (!%p142_p9), 0.0  }
   0xe   : > { %145 = sbr.rel (%p142_p9) target bundleno = 282 (0x11a), region = 32  ;;  %565 = vmatprep.subr.bf16.mxu0 (!%p142_p9), %v679_v2  ;;  %v566_v3 = vpack.c.bf16 (!%p142_p9), %v188_v1, %v187_v0  ;;  %568 = vmatprep.subr.bf16.mxu1 (!%p142_p9), %v679_v2  ;;  %vm196_vm1 = vcmask (!%p142_p9), 130048   ;;  %s162_s6 = sand.u32 (!%p142_p9), 1, %s669_s13   ;;  %v816_v20 = vld [vmem:[%s919_s2] ss:$0 sm:$0xff] (!%p142_p9)  ;;  %vm382_vm2 = vcmask (!%p142_p9), 162816  }
   0xf   : > { %520 = vmatprep.mubr.msk.f32.mxu0 (!%p142_p9), %vm680_vm0, %v681_v4  ;;  %p166_p10 = scmp.lt.s32.totalorder (!%p142_p9), %s165_s28, 29  ;;  %544 = vmatprep.mubr.msk.f32.mxu1 (!%p142_p9), %vm680_vm0, %v681_v4  ;;  %s570_s7 = smul.u32 (!%p142_p9), 120, %s162_s6 }
  0x10   : > { %567 = vmatpush3.bf16.msra.mxu0 (!%p142_p9), %v566_v3  ;;  %569 = vmatpush3.bf16.msra.mxu1 (!%p142_p9), %v566_v3  ;;  %s498_s11 = smul.u32 (!%p142_p9), 1920, %s726_s16  ;;  %s876_s16 = scalar_lea.sflag (!%p142_p9), [#allocation3], %s162_s6 }
  0x11   : > { %s820_s10 = scalar_lea.vmem (!%p142_p9), [#allocation2], %s570_s7  ;;  %s682_s26 = smov (!%p142_p9), [#allocation2]  }
  0x12   : > { %s412_s17 = sshll.u32 (!%p142_p9), %s820_s10, 4  ;;  %s867_s24 = scalar_lea.hbm (!%p142_p9), %s920_s3, %s498_s11  ;;  %s869_s17 = int_to_ptr.vmem [resolvable:$true] %s412_s17 }
  0x13   : > { %s615_s25 = scalar_lea.vmem (!%p142_p9), %s869_s17, 1920  ;;  %s619_s27 = sshll.u32 (!%p142_p9), %s682_s26, 4  ;;  %s620_s27 = int_to_ptr.vmem [resolvable:$false] %s619_s27 }
  0x14   : > { %p616_p11 = scmp.ne.s32.totalorder (!%p142_p9), %s869_s17, %s615_s25  ;;  %p622_p0 = scmp.lt.s32.totalorder (!%p142_p9), %s869_s17, %s620_s27 }
  0x15   : > { %s928_s28 = smov (!%p166_p10, %s165_s28), 29 }
  0x16   : > { %s478_s29 = sshll.u32 %s928_s28, 3  ;;  %p617_p12 = pnand %p616_p11, %p743_p5 }
  0x17   : > { %s765_s5 = scalar_lea.vmem %s917_s0, %s478_s29  ;;  %s621_s28 = scalar_lea.vmem %s620_s27, 3840 }
  0x18   : > { %v172_v5 = vld [vmem:[%s765_s5] sm:$0xff]  ;;  %v173_v7 = vld [vmem:[%s765_s5 + $0x8] sm:$0xff]  ;;  %v174_v9 = vld [vmem:[%s765_s5 + $0x10] sm:$0xff]  ;;  %p618_p13 = pneg %p617_p12  ;;  %p623_p1 = scmp.lt.s32.totalorder %s621_s28, %s615_s25 }
  0x19   : > { %v180_v6 = vld [vmem:[%s765_s5 + $0x40] sm:$0xff]  ;;  %521 = vmatmul.mubr.msk.f32.vlgmr.msra.gmra.mrb[0].mxu0 %vm196_vm1, %v172_v5  ;;  %v181_v8 = vld [vmem:[%s765_s5 + $0x48] sm:$0xff]  ;;  %v182_v10 = vld [vmem:[%s765_s5 + $0x50] sm:$0xff] }
  0x1a   : > { %545 = vmatmul.mubr.msk.f32.vlgmr.msra.gmra.mrb[0].mxu1 %vm196_vm1, %v180_v6  ;;  %523 = vmatprep.mubr.msk.f32.mxu0 %vm680_vm0, %v681_v4  ;;  %v175_v11 = vld [vmem:[%s765_s5 + $0x18] sm:$0xff]  ;;  %v176_v13 = vld [vmem:[%s765_s5 + $0x20] sm:$0xff]  ;;  %v177_v15 = vld [vmem:[%s765_s5 + $0x28] sm:$0xff]  ;;  %p624_p2 = por %p623_p1, %p622_p0 }
  0x1b   : > { %547 = vmatprep.mubr.msk.f32.mxu1 %vm680_vm0, %v681_v4  ;;  %v183_v12 = vld [vmem:[%s765_s5 + $0x58] sm:$0xff]  ;;  %v184_v14 = vld [vmem:[%s765_s5 + $0x60] sm:$0xff]  ;;  %v185_v16 = vld [vmem:[%s765_s5 + $0x68] sm:$0xff] }
  0x1c   : > { %v178_v17 = vld [vmem:[%s765_s5 + $0x30] sm:$0xff]  ;;  %v179_v19 = vld [vmem:[%s765_s5 + $0x38] sm:$0xff]  ;;  %p625_p3 = pnand %p624_p2, %p618_p13 }
  0x1d   : > { %524 = vmatmul.mubr.msk.f32.gmra.mrb[2].mxu0 %vm196_vm1, %v173_v7  ;;  %v186_v18 = vld [vmem:[%s765_s5 + $0x70] sm:$0xff] }
  0x1e   : > { %548 = vmatmul.mubr.msk.f32.gmra.mrb[2].mxu1 %vm196_vm1, %v181_v8  ;;  %526 = vmatprep.mubr.msk.f32.mxu0 %vm680_vm0, %v681_v4 }
  0x1f   : > { %550 = vmatprep.mubr.msk.f32.mxu1 %vm680_vm0, %v681_v4 }
  0x21   : > { %527 = vmatmul.mubr.msk.f32.gmra.mrb[4].mxu0 %vm196_vm1, %v174_v9 }
  0x22   : > { %551 = vmatmul.mubr.msk.f32.gmra.mrb[4].mxu1 %vm196_vm1, %v182_v10  ;;  %529 = vmatprep.mubr.msk.f32.mxu0 %vm680_vm0, %v681_v4 }
  0x23   : > { %553 = vmatprep.mubr.msk.f32.mxu1 %vm680_vm0, %v681_v4 }
  0x25   : > { %530 = vmatmul.mubr.msk.f32.gmra.mrb[6].mxu0 %vm196_vm1, %v175_v11 }
  0x26   : > { %554 = vmatmul.mubr.msk.f32.gmra.mrb[6].mxu1 %vm196_vm1, %v183_v12  ;;  %532 = vmatprep.mubr.msk.f32.mxu0 %vm680_vm0, %v681_v4 }
  0x27   : > { %556 = vmatprep.mubr.msk.f32.mxu1 %vm680_vm0, %v681_v4 }
  0x29   : > { %533 = vmatmul.mubr.msk.f32.gmra.mrb[8].mxu0 %vm196_vm1, %v176_v13 }
  0x2a   : > { %557 = vmatmul.mubr.msk.f32.gmra.mrb[8].mxu1 %vm196_vm1, %v184_v14  ;;  %535 = vmatprep.mubr.msk.f32.mxu0 %vm680_vm0, %v681_v4 }
  0x2b   : > { %559 = vmatprep.mubr.msk.f32.mxu1 %vm680_vm0, %v681_v4 }
  0x2d   : > { %536 = vmatmul.mubr.msk.f32.gmra.mrb[10].mxu0 %vm196_vm1, %v177_v15 }
  0x2e   : > { %560 = vmatmul.mubr.msk.f32.gmra.mrb[10].mxu1 %vm196_vm1, %v185_v16  ;;  %538 = vmatprep.mubr.msk.f32.mxu0 %vm680_vm0, %v681_v4 }
  0x2f   : > { %562 = vmatprep.mubr.msk.f32.mxu1 %vm680_vm0, %v681_v4 }
  0x31   : > { %539 = vmatmul.mubr.msk.f32.gmra.mrb[12].mxu0 %vm196_vm1, %v178_v17 }
  0x32   : > { %563 = vmatmul.mubr.msk.f32.gmra.mrb[12].mxu1 %vm196_vm1, %v186_v18  ;;  %541 = vmatprep.mubr.msk.f32.mxu0 %vm680_vm0, %v681_v4 }
  0x35   : > { %542 = vmatmul.mubr.msk.f32.gmra.mrb[14].mxu0 %vm196_vm1, %v179_v19 }
  0xec   : > { %v308_v21 = vpop.f32.mrb[0].mxu0 }
  0xed   : > { %v348_v22 = vpop.f32.mrb[0].mxu1  ;;  %v309_v23 = vadd.f32 %v816_v20, %v308_v21  ;;  %v522_v24 = vpop.f32.mrb[1].mxu0 }
  0xee   : > { %v349_v25 = vadd.f32 %v816_v20, %v348_v22  ;;  %v546_v26 = vpop.f32.mrb[1].mxu1 }
  0xef   : > { %383 = vst.msk [vmem:[%s820_s10] sm:$0xff] %vm382_vm2, %v309_v23 }
  0xf0   : > { %391 = vst.msk [vmem:[%s820_s10 + $0x40] sm:$0xff] %vm382_vm2, %v349_v25  ;;  %v313_v27 = vpop.f32.mrb[2].mxu0 }
  0xf1   : > { %v353_v28 = vpop.f32.mrb[2].mxu1  ;;  %v314_v29 = vadd.f32 %v816_v20, %v313_v27  ;;  %v525_v30 = vpop.f32.mrb[3].mxu0 }
  0xf2   : > { %v354_v31 = vadd.f32 %v816_v20, %v353_v28  ;;  %v549_v32 = vpop.f32.mrb[3].mxu1 }
  0xf3   : > { %384 = vst.msk [vmem:[%s820_s10 + $0x8] sm:$0xff] %vm382_vm2, %v314_v29 }
  0xf4   : > { %392 = vst.msk [vmem:[%s820_s10 + $0x48] sm:$0xff] %vm382_vm2, %v354_v31  ;;  %v318_v33 = vpop.f32.mrb[4].mxu0 }
  0xf5   : > { %v358_v34 = vpop.f32.mrb[4].mxu1  ;;  %v319_v35 = vadd.f32 %v816_v20, %v318_v33  ;;  %v528_v36 = vpop.f32.mrb[5].mxu0 }
  0xf6   : > { %v359_v37 = vadd.f32 %v816_v20, %v358_v34  ;;  %v552_v38 = vpop.f32.mrb[5].mxu1 }
  0xf7   : > { %385 = vst.msk [vmem:[%s820_s10 + $0x10] sm:$0xff] %vm382_vm2, %v319_v35 }
  0xf8   : > { %393 = vst.msk [vmem:[%s820_s10 + $0x50] sm:$0xff] %vm382_vm2, %v359_v37  ;;  %v323_v39 = vpop.f32.mrb[6].mxu0 }
  0xf9   : > { %v363_v40 = vpop.f32.mrb[6].mxu1  ;;  %v324_v41 = vadd.f32 %v816_v20, %v323_v39  ;;  %v531_v42 = vpop.f32.mrb[7].mxu0 }
  0xfa   : > { %v364_v43 = vadd.f32 %v816_v20, %v363_v40  ;;  %v555_v44 = vpop.f32.mrb[7].mxu1 }
  0xfb   : > { %386 = vst.msk [vmem:[%s820_s10 + $0x18] sm:$0xff] %vm382_vm2, %v324_v41 }
  0xfc   : > { %394 = vst.msk [vmem:[%s820_s10 + $0x58] sm:$0xff] %vm382_vm2, %v364_v43  ;;  %v328_v45 = vpop.f32.mrb[8].mxu0 }
  0xfd   : > { %v368_v46 = vpop.f32.mrb[8].mxu1  ;;  %v329_v47 = vadd.f32 %v816_v20, %v328_v45  ;;  %v534_v48 = vpop.f32.mrb[9].mxu0 }
  0xfe   : > { %v369_v49 = vadd.f32 %v816_v20, %v368_v46  ;;  %v558_v50 = vpop.f32.mrb[9].mxu1 }
  0xff   : > { %387 = vst.msk [vmem:[%s820_s10 + $0x20] sm:$0xff] %vm382_vm2, %v329_v47 }
 0x100   : > { %395 = vst.msk [vmem:[%s820_s10 + $0x60] sm:$0xff] %vm382_vm2, %v369_v49  ;;  %v333_v51 = vpop.f32.mrb[10].mxu0 }
 0x101   : > { %v373_v52 = vpop.f32.mrb[10].mxu1  ;;  %v334_v53 = vadd.f32 %v816_v20, %v333_v51  ;;  %v537_v54 = vpop.f32.mrb[11].mxu0 }
 0x102   : > { %v374_v55 = vadd.f32 %v816_v20, %v373_v52  ;;  %v561_v56 = vpop.f32.mrb[11].mxu1 }
 0x103   : > { %388 = vst.msk [vmem:[%s820_s10 + $0x28] sm:$0xff] %vm382_vm2, %v334_v53 }
 0x104   : > { %396 = vst.msk [vmem:[%s820_s10 + $0x68] sm:$0xff] %vm382_vm2, %v374_v55  ;;  %v338_v57 = vpop.f32.mrb[12].mxu0 }
 0x105   : > { %v378_v58 = vpop.f32.mrb[12].mxu1  ;;  %v339_v59 = vadd.f32 %v816_v20, %v338_v57  ;;  %v540_v60 = vpop.f32.mrb[13].mxu0 }
 0x106   : > { %v379_v61 = vadd.f32 %v816_v20, %v378_v58  ;;  %v564_v62 = vpop.f32.mrb[13].mxu1 }
 0x107   : > { %389 = vst.msk [vmem:[%s820_s10 + $0x30] sm:$0xff] %vm382_vm2, %v339_v59 }
 0x108   : > { %397 = vst.msk [vmem:[%s820_s10 + $0x70] sm:$0xff] %vm382_vm2, %v379_v61  ;;  %v343_v63 = vpop.f32.mrb[14].mxu0 }
 0x109   : > { %v344_v0 = vadd.f32 %v816_v20, %v343_v63  ;;  %v543_v1 = vpop.f32.mrb[15].mxu0 }
 0x10b   : > { %390 = vst.msk [vmem:[%s820_s10 + $0x38] sm:$0xff] %vm382_vm2, %v344_v0 }
 0x10c   : > { %628 = shalt.err (!%p625_p3)
}
 0x10d   : > { %s629_s29 = scalar_lea.hbm %s867_s24, 1920  ;;  %s633_s5 = scalar_lea.hbm %s920_s3, 3840 }
 0x10e   : > { %p630_p4 = scmp.ne.s32.totalorder %s867_s24, %s629_s29  ;;  %p634_p9 = scmp.lt.u32.totalorder %s867_s24, %s920_s3 }
 0x10f   : > { %p635_p10 = scmp.lt.u32.totalorder %s633_s5, %s629_s29  ;;  %p637_p12 = scmp.lt.u32.totalorder %s629_s29, %s867_s24 }
 0x110   : > { %p631_p7 = pnand %p630_p4, %p743_p5 }
 0x111   : > { %p636_p11 = por %p635_p10, %p634_p9 }
 0x112   : > { %p632_p8 = pneg %p631_p7 }
 0x113   : > { %p638_p13 = por %p637_p12, %p636_p11 }
 0x115   : > { %p639_p0 = pnand %p638_p13, %p632_p8 }
 0x117   : > { %642 = shalt.err (!%p639_p0)
}
 0x118   : > { %s683_s8 = smov 128   ;;  %s684_s9 = smov 8  }
 0x119   : > { %571 = dma.vmem_to_hbm [thread:$0]  (%p743_p5), %s869_s17, 1920, %s867_s24, %s876_s16, %s683_s8, %s683_s8, %s684_s9  }
 0x11a PF: > { %p577_p1 = scmp.ge.s32.totalorder %s677_s15, 2  ;;  %s427_s10 = sand.u32 1, %s665_s12  }
 0x11b   : > { %s428_s11 = scalar_lea.sflag [#allocation3], %s427_s10 }
 0x11c   : > { %p574_p2 = pnand %p577_p1, %p747_p6 }
 0x11e   : > { %660 = dma.done.wait (!%p574_p2), %s428_s11, 1920  }
 0x11f   : > { %662 = vsyncadd (!%p574_p2), %s428_s11, 4294965376  ;;  %p13_p3 = scmp.ge.s32.totalorder %s730_s18, 4   ;;  %s923_s12 = smov %s669_s13 }
 0x120   : > { %s924_s13 = smov %s673_s14  ;;  %s925_s14 = smov %s741_s21 }
 0x121   : > { %s926_s15 = smov %s730_s18  ;;  %15 = sbr.rel (!%p13_p3) target bundleno = 3 (0x3), region = 67 }
 0x128   :  { %433 = vsyncpa [#allocation3], 1 }
 0x129   :  { %435 = vsyncpa [#allocation3 + $0x1], 1 }

</bundles_post_ra>
